<compile_context>
chip_gen: v6e
topology: v6e:2x2x1
jax: 0.10.0
libtpu: 0.0.40
codegen_flags: <defaults>
</compile_context>

<pallas_src>
import functools
import math

import jax
import jax.numpy as jnp
from jax.experimental import pallas as pl
from jax.experimental.pallas import tpu as pltpu


# ----------------------------------------------------------------------------
# Fused TransformerBlock kernel: one (batch, query-tile) cell per grid step
# ----------------------------------------------------------------------------
def _transformer_kernel(xyz_all_ref, xyz_q_ref, feat_all_ref, feat_q_ref,
                        kvw_ref, kvb_ref, qw_ref, qb_ref,
                        d1w_ref, d1b_ref, d2w_ref, d2b_ref,
                        g1w_ref, g1b_ref, g2w_ref, g2b_ref,
                        fc2w_ref, fc2b_ref,
                        o_ref, attn_ref, *, k):
    f32, bf16 = jnp.float32, jnp.bfloat16

    xyz_all = xyz_all_ref[0]      # [N, 3]   all points (neighbour source)
    xyz_q = xyz_q_ref[0]          # [TQ, 3]  query tile
    feats_all = feat_all_ref[0]   # [N, dp]
    feats_q = feat_q_ref[0]       # [TQ, dp]
    N = xyz_all.shape[0]
    tq = xyz_q.shape[0]
    dm = g1w_ref.shape[0]

    # ---- gather source: fused (fc1 o [w_ks | w_vs]) projection of all points
    kv_src = (jnp.dot(feats_all.astype(bf16), kvw_ref[...],
                      preferred_element_type=f32)
              + kvb_ref[...]).astype(bf16)                               # [N, 2dm]
    # queries for this tile only: fused (fc1 o w_qs)
    q = jnp.dot(feats_q.astype(bf16), qw_ref[...],
                preferred_element_type=f32) + qb_ref[...]                # [TQ, dm]

    # ---- pairwise squared distances for this query tile (f32, MXU) ----
    gram = jax.lax.dot_general(xyz_q, xyz_all, (((1,), (1,)), ((), ())),
                               preferred_element_type=f32)               # [TQ, N]
    sq_q = jnp.sum(xyz_q * xyz_q, axis=1, keepdims=True)                 # [TQ, 1]
    sq_n = jax.lax.dot_general(jnp.ones((1, 3), f32), xyz_all * xyz_all,
                               (((1,), (1,)), ((), ())),
                               preferred_element_type=f32)               # [1, N]
    d = jnp.maximum(sq_q + sq_n - 2.0 * gram, 0.0)                       # [TQ, N]

    # ---- kNN: packed (distance | column) int32 key -> one reduce / neighbour
    np2 = 1 << max(int(N) - 1, 1).bit_length()        # next pow2 >= N
    idx_mask = np2 - 1
    col = jax.lax.broadcasted_iota(jnp.int32, (tq, N), 1)
    # d >= 0, so its int32 bit pattern is order-preserving; low bits hold col
    # (ties and near-ties break toward the lowest column index).
    keys = (pltpu.bitcast(d, jnp.int32) & ~idx_mask) | col

    kv_rows, delta_rows = [], []
    for _ in range(k):
        m = jnp.min(keys, axis=1, keepdims=True)       # fused min + argmin
        idx = m & idx_mask                             # [TQ, 1]
        sel = col == idx                               # exactly one hot / row
        oh = sel.astype(f32)
        # neighbour k|v gathered with one bf16 MXU pass (streamed, not stacked)
        kv_rows.append(jnp.dot(oh.astype(bf16), kv_src,
                               preferred_element_type=f32))              # [TQ, 2dm]
        # neighbour coordinates gathered in f32 (bf16 cancels in the delta)
        delta_rows.append(xyz_q - jnp.dot(oh, xyz_all,
                                          preferred_element_type=f32))   # [TQ, 3]
        keys = jnp.where(sel, 0x7FFFFFFF, keys)
    kv_g = jnp.stack(kv_rows, axis=0)                  # [k, TQ, 2dm]
    delta = jnp.stack(delta_rows, axis=0)              # [k, TQ, 3]
    k_j = kv_g[:, :, :dm]
    v_j = kv_g[:, :, dm:]

    # ---- positional MLP fc_delta on the stacked [k*TQ, 3] deltas ----
    h = jnp.maximum(
        jnp.dot(delta.reshape(k * tq, 3).astype(bf16), d1w_ref[...],
                preferred_element_type=f32) + d1b_ref[...], 0.0)
    pos = (jnp.dot(h.astype(bf16), d2w_ref[...],
                   preferred_element_type=f32)
           + d2b_ref[...]).reshape(k, tq, dm)                            # [k, TQ, dm]

    # ---- attention MLP fc_gamma; q @ g1w hoisted out of the neighbour stack
    qg = jnp.dot(q.astype(bf16), g1w_ref[...],
                 preferred_element_type=f32) + g1b_ref[...]              # [TQ, dm]
    pre = (pos - k_j).reshape(k * tq, dm).astype(bf16)
    h2 = jnp.maximum(
        jnp.dot(pre, g1w_ref[...],
                preferred_element_type=f32).reshape(k, tq, dm) + qg[None], 0.0)
    g = jnp.dot(h2.reshape(k * tq, dm).astype(bf16), g2w_ref[...],
                preferred_element_type=f32) + g2b_ref[...]               # [k*TQ, dm]

    # ---- softmax over the neighbour axis (dim=-2 in the torch layout) ----
    logits = (g * (1.0 / math.sqrt(dm))).reshape(k, tq, dm)
    mmax = jnp.max(logits, axis=0, keepdims=True)
    e = jnp.exp(logits - mmax)
    attn = e / jnp.sum(e, axis=0, keepdims=True)                         # [k, TQ, dm]

    res = jnp.sum(attn * (v_j + pos), axis=0)                            # [TQ, dm]
    out = jnp.dot(res.astype(bf16), fc2w_ref[...],
                  preferred_element_type=f32) + fc2b_ref[...] + feats_q
    o_ref[0] = out
    attn_ref[0] = attn


def transformer_block(xyz, feats, params, k, *, tq=None):
    """Forward pass of TransformerBlock.  Returns (res, attn) like the torch module."""
    B, N, dp = feats.shape
    dm = params['wq'].shape[1]
    if tq is None:
        tq = min(N, 128)           # per-generation tuning knob (VMEM budget)
    assert N % tq == 0, "query-tile size must divide N"
    nqt = N // tq

    bf = lambda a: a.astype(jnp.bfloat16)
    r2 = lambda v: v.reshape(1, -1)

    # Fold fc1 into the bias-free q/k/v projections:  (x@fc1_w+fc1_b)@W
    # == x@(fc1_w@W) + fc1_b@W.  k|v fused so the gather source is contiguous.
    wkv = jnp.concatenate([params['wk'], params['wv']], axis=1)          # [dm, 2dm]
    kv_w, kv_b = params['fc1_w'] @ wkv, params['fc1_b'] @ wkv
    q_w, q_b = params['fc1_w'] @ params['wq'], params['fc1_b'] @ params['wq']

    args = (xyz, xyz, feats, feats,
            bf(kv_w), r2(kv_b), bf(q_w), r2(q_b),
            bf(params['d1_w']), r2(params['d1_b']),
            bf(params['d2_w']), r2(params['d2_b']),
            bf(params['g1_w']), r2(params['g1_b']),
            bf(params['g2_w']), r2(params['g2_b']),
            bf(params['fc2_w']), r2(params['fc2_b']))

    in_specs = [
        pl.BlockSpec((1, N, 3), lambda b, q: (b, 0, 0)),     # all points
        pl.BlockSpec((1, tq, 3), lambda b, q: (b, q, 0)),    # query tile
        pl.BlockSpec((1, N, dp), lambda b, q: (b, 0, 0)),    # all features
        pl.BlockSpec((1, tq, dp), lambda b, q: (b, q, 0)),   # tile features
    ] + [pl.BlockSpec(a.shape, lambda b, q, nd=a.ndim: (0,) * nd)
         for a in args[4:]]

    out_shapes = (jax.ShapeDtypeStruct((B, N, dp), jnp.float32),
                  jax.ShapeDtypeStruct((B, k, N, dm), jnp.float32))
    out_specs = (pl.BlockSpec((1, tq, dp), lambda b, q: (b, q, 0)),
                 pl.BlockSpec((1, k, tq, dm), lambda b, q: (b, 0, q, 0)))

    res, attn_knm = pl.pallas_call(
        functools.partial(_transformer_kernel, k=k),
        grid=(B, nqt),
        out_shape=out_shapes,
        in_specs=in_specs,
        out_specs=out_specs,
        compiler_params=pltpu.CompilerParams(
            dimension_semantics=("parallel", "parallel"),
            vmem_limit_bytes=48 * 1024 * 1024),
    )(*args)

    # kernel keeps attn in [B, k, N, dm]; present it in the torch layout [B, N, k, dm]
    attn = jnp.transpose(attn_knm, (0, 2, 1, 3))
    return res, attn


# ----------------------------------------------------------------------------
# Deterministic parameter init (PyTorch nn.Linear-style uniform bounds)
# ----------------------------------------------------------------------------
def _linear_init(key, fan_in, fan_out, bias=True):
    k1, k2 = jax.random.split(key)
    bound = 1.0 / math.sqrt(fan_in)
    w = jax.random.uniform(k1, (fan_in, fan_out), jnp.float32, -bound, bound)
    if bias:
        b = jax.random.uniform(k2, (fan_out,), jnp.float32, -bound, bound)
        return w, b
    return w


def init_params(key, d_points, d_model):
    ks = jax.random.split(key, 9)
    fc1_w, fc1_b = _linear_init(ks[0], d_points, d_model)
    fc2_w, fc2_b = _linear_init(ks[1], d_model, d_points)
    d1_w, d1_b = _linear_init(ks[2], 3, d_model)
    d2_w, d2_b = _linear_init(ks[3], d_model, d_model)
    g1_w, g1_b = _linear_init(ks[4], d_model, d_model)
    g2_w, g2_b = _linear_init(ks[5], d_model, d_model)
    wq = _linear_init(ks[6], d_model, d_model, bias=False)
    wk = _linear_init(ks[7], d_model, d_model, bias=False)
    wv = _linear_init(ks[8], d_model, d_model, bias=False)
    return dict(fc1_w=fc1_w, fc1_b=fc1_b, fc2_w=fc2_w, fc2_b=fc2_b,
                d1_w=d1_w, d1_b=d1_b, d2_w=d2_w, d2_b=d2_b,
                g1_w=g1_w, g1_b=g1_b, g2_w=g2_w, g2_b=g2_b,
                wq=wq, wk=wk, wv=wv)


if __name__ == "__main__":
    key = jax.random.PRNGKey(0)
    B, N, d_points, d_model, k = 2, 64, 16, 32, 8

    k1, k2, k3 = jax.random.split(key, 3)
    xyz = jax.random.normal(k1, (B, N, 3), jnp.float32)
    feats = jax.random.normal(k2, (B, N, d_points), jnp.float32)
    params = init_params(k3, d_points, d_model)

    res, attn = transformer_block(xyz, feats, params, k)
    jax.block_until_ready((res, attn))

    assert res.shape == (B, N, d_points)
    assert attn.shape == (B, N, k, d_model)
    assert bool(jnp.all(jnp.isfinite(res)))
    assert bool(jnp.all(jnp.isfinite(attn)))
    # softmax over the neighbour dimension sums to ~1
    s = jnp.sum(attn, axis=2)
    assert float(jnp.max(jnp.abs(s - 1.0))) < 1e-3
    print("KERNEL_OK")
</pallas_src>

<mosaic_0001>
module attributes {stable_mosaic.version = 11 : i64} {
  func.func @_transformer_kernel(%arg0: i32, %arg1: i32, %arg2: memref<1x64x3xf32, #tpu.memory_space<vmem>>, %arg3: memref<1x64x3xf32, #tpu.memory_space<vmem>>, %arg4: memref<1x64x16xf32, #tpu.memory_space<vmem>>, %arg5: memref<1x64x16xf32, #tpu.memory_space<vmem>>, %arg6: memref<16x64xbf16, #tpu.memory_space<vmem>>, %arg7: memref<1x64xf32, #tpu.memory_space<vmem>>, %arg8: memref<16x32xbf16, #tpu.memory_space<vmem>>, %arg9: memref<1x32xf32, #tpu.memory_space<vmem>>, %arg10: memref<3x32xbf16, #tpu.memory_space<vmem>>, %arg11: memref<1x32xf32, #tpu.memory_space<vmem>>, %arg12: memref<32x32xbf16, #tpu.memory_space<vmem>>, %arg13: memref<1x32xf32, #tpu.memory_space<vmem>>, %arg14: memref<32x32xbf16, #tpu.memory_space<vmem>>, %arg15: memref<1x32xf32, #tpu.memory_space<vmem>>, %arg16: memref<32x32xbf16, #tpu.memory_space<vmem>>, %arg17: memref<1x32xf32, #tpu.memory_space<vmem>>, %arg18: memref<32x16xbf16, #tpu.memory_space<vmem>>, %arg19: memref<1x16xf32, #tpu.memory_space<vmem>>, %arg20: memref<1x64x16xf32, #tpu.memory_space<vmem>>, %arg21: memref<1x8x64x32xf32, #tpu.memory_space<vmem>>) attributes {dimension_semantics = [#tpu.dimension_semantics<parallel>, #tpu.dimension_semantics<parallel>], iteration_bounds = array<i64: 2, 1>, scalar_prefetch = 0 : i64, scratch_operands = 0 : i64, tpu.core_type = #tpu.core_type<tc>, window_params = [{transform_indices = @transform_0, window_bounds = array<i64: 1, 64, 3>}, {transform_indices = @transform_1, window_bounds = array<i64: 1, 64, 3>}, {transform_indices = @transform_2, window_bounds = array<i64: 1, 64, 16>}, {transform_indices = @transform_3, window_bounds = array<i64: 1, 64, 16>}, {pipeline_mode = #tpu.pipeline_mode<synchronous>, transform_indices = @transform_4, window_bounds = array<i64: 16, 64>}, {pipeline_mode = #tpu.pipeline_mode<synchronous>, transform_indices = @transform_5, window_bounds = array<i64: 1, 64>}, {pipeline_mode = #tpu.pipeline_mode<synchronous>, transform_indices = @transform_6, window_bounds = array<i64: 16, 32>}, {pipeline_mode = #tpu.pipeline_mode<synchronous>, transform_indices = @transform_7, window_bounds = array<i64: 1, 32>}, {pipeline_mode = #tpu.pipeline_mode<synchronous>, transform_indices = @transform_8, window_bounds = array<i64: 3, 32>}, {pipeline_mode = #tpu.pipeline_mode<synchronous>, transform_indices = @transform_9, window_bounds = array<i64: 1, 32>}, {pipeline_mode = #tpu.pipeline_mode<synchronous>, transform_indices = @transform_10, window_bounds = array<i64: 32, 32>}, {pipeline_mode = #tpu.pipeline_mode<synchronous>, transform_indices = @transform_11, window_bounds = array<i64: 1, 32>}, {pipeline_mode = #tpu.pipeline_mode<synchronous>, transform_indices = @transform_12, window_bounds = array<i64: 32, 32>}, {pipeline_mode = #tpu.pipeline_mode<synchronous>, transform_indices = @transform_13, window_bounds = array<i64: 1, 32>}, {pipeline_mode = #tpu.pipeline_mode<synchronous>, transform_indices = @transform_14, window_bounds = array<i64: 32, 32>}, {pipeline_mode = #tpu.pipeline_mode<synchronous>, transform_indices = @transform_15, window_bounds = array<i64: 1, 32>}, {pipeline_mode = #tpu.pipeline_mode<synchronous>, transform_indices = @transform_16, window_bounds = array<i64: 32, 16>}, {pipeline_mode = #tpu.pipeline_mode<synchronous>, transform_indices = @transform_17, window_bounds = array<i64: 1, 16>}, {transform_indices = @transform_18, window_bounds = array<i64: 1, 64, 16>}, {transform_indices = @transform_19, window_bounds = array<i64: 1, 8, 64, 32>}]} {
    %c0 = arith.constant 0 : index
    %c0_0 = arith.constant 0 : index
    %c0_1 = arith.constant 0 : index
    %0 = vector.load %arg2[%c0, %c0_0, %c0_1] : memref<1x64x3xf32, #tpu.memory_space<vmem>>, vector<1x64x3xf32>
    %1 = vector.shape_cast %0 : vector<1x64x3xf32> to vector<64x3xf32>
    %c0_2 = arith.constant 0 : index
    %c0_3 = arith.constant 0 : index
    %c0_4 = arith.constant 0 : index
    %2 = vector.load %arg3[%c0_2, %c0_3, %c0_4] : memref<1x64x3xf32, #tpu.memory_space<vmem>>, vector<1x64x3xf32>
    %3 = vector.shape_cast %2 : vector<1x64x3xf32> to vector<64x3xf32>
    %c0_5 = arith.constant 0 : index
    %c0_6 = arith.constant 0 : index
    %c0_7 = arith.constant 0 : index
    %4 = vector.load %arg4[%c0_5, %c0_6, %c0_7] : memref<1x64x16xf32, #tpu.memory_space<vmem>>, vector<1x64x16xf32>
    %5 = vector.shape_cast %4 : vector<1x64x16xf32> to vector<64x16xf32>
    %c0_8 = arith.constant 0 : index
    %c0_9 = arith.constant 0 : index
    %c0_10 = arith.constant 0 : index
    %6 = vector.load %arg5[%c0_8, %c0_9, %c0_10] : memref<1x64x16xf32, #tpu.memory_space<vmem>>, vector<1x64x16xf32>
    %7 = vector.shape_cast %6 : vector<1x64x16xf32> to vector<64x16xf32>
    %8 = arith.truncf %5 : vector<64x16xf32> to vector<64x16xbf16>
    %c0_11 = arith.constant 0 : index
    %c0_12 = arith.constant 0 : index
    %9 = vector.load %arg6[%c0_11, %c0_12] : memref<16x64xbf16, #tpu.memory_space<vmem>>, vector<16x64xbf16>
    %cst = arith.constant dense<0.000000e+00> : vector<64x64xf32>
    %10 = tpu.matmul %8, %9, %cst {dimension_numbers = #tpu.dot_dimension_numbers<[1], [0], [0], [1], [0, 0, 1, 1], [], []>} : vector<64x16xbf16>, vector<16x64xbf16>, vector<64x64xf32> -> vector<64x64xf32>
    %c0_13 = arith.constant 0 : index
    %c0_14 = arith.constant 0 : index
    %11 = vector.load %arg7[%c0_13, %c0_14] : memref<1x64xf32, #tpu.memory_space<vmem>>, vector<1x64xf32>
    %12 = vector.broadcast %11 : vector<1x64xf32> to vector<64x64xf32>
    %13 = arith.addf %10, %12 : vector<64x64xf32>
    %14 = arith.truncf %13 : vector<64x64xf32> to vector<64x64xbf16>
    %15 = arith.truncf %7 : vector<64x16xf32> to vector<64x16xbf16>
    %c0_15 = arith.constant 0 : index
    %c0_16 = arith.constant 0 : index
    %16 = vector.load %arg8[%c0_15, %c0_16] : memref<16x32xbf16, #tpu.memory_space<vmem>>, vector<16x32xbf16>
    %cst_17 = arith.constant dense<0.000000e+00> : vector<64x32xf32>
    %17 = tpu.matmul %15, %16, %cst_17 {dimension_numbers = #tpu.dot_dimension_numbers<[1], [0], [0], [1], [0, 0, 1, 1], [], []>} : vector<64x16xbf16>, vector<16x32xbf16>, vector<64x32xf32> -> vector<64x32xf32>
    %c0_18 = arith.constant 0 : index
    %c0_19 = arith.constant 0 : index
    %18 = vector.load %arg9[%c0_18, %c0_19] : memref<1x32xf32, #tpu.memory_space<vmem>>, vector<1x32xf32>
    %19 = vector.broadcast %18 : vector<1x32xf32> to vector<64x32xf32>
    %20 = arith.addf %17, %19 : vector<64x32xf32>
    %cst_20 = arith.constant dense<0.000000e+00> : vector<64x64xf32>
    %21 = tpu.matmul %3, %1, %cst_20 {dimension_numbers = #tpu.dot_dimension_numbers<[1], [1], [0], [0], [0, 0, 1, 0], [], []>} : vector<64x3xf32>, vector<64x3xf32>, vector<64x64xf32> -> vector<64x64xf32>
    %22 = arith.mulf %3, %3 : vector<64x3xf32>
    %cst_21 = arith.constant dense<0.000000e+00> : vector<64xf32>
    %23 = vector.multi_reduction <add>, %22, %cst_21 [1] : vector<64x3xf32> to vector<64xf32>
    %24 = vector.shape_cast %23 : vector<64xf32> to vector<64x1xf32>
    %cst_22 = arith.constant 1.000000e+00 : f32
    %25 = vector.broadcast %cst_22 : f32 to vector<1x3xf32>
    %26 = arith.mulf %1, %1 : vector<64x3xf32>
    %cst_23 = arith.constant dense<0.000000e+00> : vector<1x64xf32>
    %27 = tpu.matmul %25, %26, %cst_23 {dimension_numbers = #tpu.dot_dimension_numbers<[1], [1], [0], [0], [0, 0, 1, 0], [], []>} : vector<1x3xf32>, vector<64x3xf32>, vector<1x64xf32> -> vector<1x64xf32>
    %28 = vector.broadcast %24 : vector<64x1xf32> to vector<64x64xf32>
    %29 = vector.broadcast %27 : vector<1x64xf32> to vector<64x64xf32>
    %30 = arith.addf %28, %29 : vector<64x64xf32>
    %cst_24 = arith.constant 2.000000e+00 : f32
    %31 = vector.broadcast %cst_24 : f32 to vector<64x64xf32>
    %32 = arith.mulf %31, %21 : vector<64x64xf32>
    %33 = arith.subf %30, %32 : vector<64x64xf32>
    %cst_25 = arith.constant 0.000000e+00 : f32
    %34 = vector.broadcast %cst_25 : f32 to vector<64x64xf32>
    %35 = arith.maximumf %33, %34 : vector<64x64xf32>
    %36 = tpu.iota {dimensions = array<i32: 1>} : vector<64x64xi32>
    %37 = tpu.bitcast %35 : vector<64x64xf32> -> vector<64x64xi32>
    %c-64_i32 = arith.constant -64 : i32
    %38 = vector.broadcast %c-64_i32 : i32 to vector<64x64xi32>
    %39 = arith.andi %37, %38 : vector<64x64xi32>
    %40 = arith.ori %39, %36 : vector<64x64xi32>
    %cst_26 = arith.constant dense<2147483647> : vector<64xi32>
    %41 = vector.multi_reduction <minsi>, %40, %cst_26 [1] : vector<64x64xi32> to vector<64xi32>
    %42 = vector.shape_cast %41 : vector<64xi32> to vector<64x1xi32>
    %c63_i32 = arith.constant 63 : i32
    %43 = vector.broadcast %c63_i32 : i32 to vector<64x1xi32>
    %44 = arith.andi %42, %43 : vector<64x1xi32>
    %45 = vector.broadcast %44 : vector<64x1xi32> to vector<64x64xi32>
    %46 = arith.cmpi eq, %36, %45 : vector<64x64xi32>
    %47 = arith.extui %46 : vector<64x64xi1> to vector<64x64xi32>
    %48 = arith.sitofp %47 : vector<64x64xi32> to vector<64x64xf32>
    %49 = arith.truncf %48 : vector<64x64xf32> to vector<64x64xbf16>
    %cst_27 = arith.constant dense<0.000000e+00> : vector<64x64xf32>
    %50 = tpu.matmul %49, %14, %cst_27 {dimension_numbers = #tpu.dot_dimension_numbers<[1], [0], [0], [1], [0, 0, 1, 1], [], []>} : vector<64x64xbf16>, vector<64x64xbf16>, vector<64x64xf32> -> vector<64x64xf32>
    %cst_28 = arith.constant dense<0.000000e+00> : vector<64x3xf32>
    %51 = tpu.matmul %48, %1, %cst_28 {dimension_numbers = #tpu.dot_dimension_numbers<[1], [0], [0], [1], [0, 0, 1, 1], [], []>} : vector<64x64xf32>, vector<64x3xf32>, vector<64x3xf32> -> vector<64x3xf32>
    %52 = arith.subf %3, %51 : vector<64x3xf32>
    %c2147483647_i32 = arith.constant 2147483647 : i32
    %53 = vector.broadcast %c2147483647_i32 : i32 to vector<64x64xi32>
    %54 = arith.select %46, %53, %40 : vector<64x64xi1>, vector<64x64xi32>
    %cst_29 = arith.constant dense<2147483647> : vector<64xi32>
    %55 = vector.multi_reduction <minsi>, %54, %cst_29 [1] : vector<64x64xi32> to vector<64xi32>
    %56 = vector.shape_cast %55 : vector<64xi32> to vector<64x1xi32>
    %c63_i32_30 = arith.constant 63 : i32
    %57 = vector.broadcast %c63_i32_30 : i32 to vector<64x1xi32>
    %58 = arith.andi %56, %57 : vector<64x1xi32>
    %59 = vector.broadcast %58 : vector<64x1xi32> to vector<64x64xi32>
    %60 = arith.cmpi eq, %36, %59 : vector<64x64xi32>
    %61 = arith.extui %60 : vector<64x64xi1> to vector<64x64xi32>
    %62 = arith.sitofp %61 : vector<64x64xi32> to vector<64x64xf32>
    %63 = arith.truncf %62 : vector<64x64xf32> to vector<64x64xbf16>
    %cst_31 = arith.constant dense<0.000000e+00> : vector<64x64xf32>
    %64 = tpu.matmul %63, %14, %cst_31 {dimension_numbers = #tpu.dot_dimension_numbers<[1], [0], [0], [1], [0, 0, 1, 1], [], []>} : vector<64x64xbf16>, vector<64x64xbf16>, vector<64x64xf32> -> vector<64x64xf32>
    %cst_32 = arith.constant dense<0.000000e+00> : vector<64x3xf32>
    %65 = tpu.matmul %62, %1, %cst_32 {dimension_numbers = #tpu.dot_dimension_numbers<[1], [0], [0], [1], [0, 0, 1, 1], [], []>} : vector<64x64xf32>, vector<64x3xf32>, vector<64x3xf32> -> vector<64x3xf32>
    %66 = arith.subf %3, %65 : vector<64x3xf32>
    %c2147483647_i32_33 = arith.constant 2147483647 : i32
    %67 = vector.broadcast %c2147483647_i32_33 : i32 to vector<64x64xi32>
    %68 = arith.select %60, %67, %54 : vector<64x64xi1>, vector<64x64xi32>
    %cst_34 = arith.constant dense<2147483647> : vector<64xi32>
    %69 = vector.multi_reduction <minsi>, %68, %cst_34 [1] : vector<64x64xi32> to vector<64xi32>
    %70 = vector.shape_cast %69 : vector<64xi32> to vector<64x1xi32>
    %c63_i32_35 = arith.constant 63 : i32
    %71 = vector.broadcast %c63_i32_35 : i32 to vector<64x1xi32>
    %72 = arith.andi %70, %71 : vector<64x1xi32>
    %73 = vector.broadcast %72 : vector<64x1xi32> to vector<64x64xi32>
    %74 = arith.cmpi eq, %36, %73 : vector<64x64xi32>
    %75 = arith.extui %74 : vector<64x64xi1> to vector<64x64xi32>
    %76 = arith.sitofp %75 : vector<64x64xi32> to vector<64x64xf32>
    %77 = arith.truncf %76 : vector<64x64xf32> to vector<64x64xbf16>
    %cst_36 = arith.constant dense<0.000000e+00> : vector<64x64xf32>
    %78 = tpu.matmul %77, %14, %cst_36 {dimension_numbers = #tpu.dot_dimension_numbers<[1], [0], [0], [1], [0, 0, 1, 1], [], []>} : vector<64x64xbf16>, vector<64x64xbf16>, vector<64x64xf32> -> vector<64x64xf32>
    %cst_37 = arith.constant dense<0.000000e+00> : vector<64x3xf32>
    %79 = tpu.matmul %76, %1, %cst_37 {dimension_numbers = #tpu.dot_dimension_numbers<[1], [0], [0], [1], [0, 0, 1, 1], [], []>} : vector<64x64xf32>, vector<64x3xf32>, vector<64x3xf32> -> vector<64x3xf32>
    %80 = arith.subf %3, %79 : vector<64x3xf32>
    %c2147483647_i32_38 = arith.constant 2147483647 : i32
    %81 = vector.broadcast %c2147483647_i32_38 : i32 to vector<64x64xi32>
    %82 = arith.select %74, %81, %68 : vector<64x64xi1>, vector<64x64xi32>
    %cst_39 = arith.constant dense<2147483647> : vector<64xi32>
    %83 = vector.multi_reduction <minsi>, %82, %cst_39 [1] : vector<64x64xi32> to vector<64xi32>
    %84 = vector.shape_cast %83 : vector<64xi32> to vector<64x1xi32>
    %c63_i32_40 = arith.constant 63 : i32
    %85 = vector.broadcast %c63_i32_40 : i32 to vector<64x1xi32>
    %86 = arith.andi %84, %85 : vector<64x1xi32>
    %87 = vector.broadcast %86 : vector<64x1xi32> to vector<64x64xi32>
    %88 = arith.cmpi eq, %36, %87 : vector<64x64xi32>
    %89 = arith.extui %88 : vector<64x64xi1> to vector<64x64xi32>
    %90 = arith.sitofp %89 : vector<64x64xi32> to vector<64x64xf32>
    %91 = arith.truncf %90 : vector<64x64xf32> to vector<64x64xbf16>
    %cst_41 = arith.constant dense<0.000000e+00> : vector<64x64xf32>
    %92 = tpu.matmul %91, %14, %cst_41 {dimension_numbers = #tpu.dot_dimension_numbers<[1], [0], [0], [1], [0, 0, 1, 1], [], []>} : vector<64x64xbf16>, vector<64x64xbf16>, vector<64x64xf32> -> vector<64x64xf32>
    %cst_42 = arith.constant dense<0.000000e+00> : vector<64x3xf32>
    %93 = tpu.matmul %90, %1, %cst_42 {dimension_numbers = #tpu.dot_dimension_numbers<[1], [0], [0], [1], [0, 0, 1, 1], [], []>} : vector<64x64xf32>, vector<64x3xf32>, vector<64x3xf32> -> vector<64x3xf32>
    %94 = arith.subf %3, %93 : vector<64x3xf32>
    %c2147483647_i32_43 = arith.constant 2147483647 : i32
    %95 = vector.broadcast %c2147483647_i32_43 : i32 to vector<64x64xi32>
    %96 = arith.select %88, %95, %82 : vector<64x64xi1>, vector<64x64xi32>
    %cst_44 = arith.constant dense<2147483647> : vector<64xi32>
    %97 = vector.multi_reduction <minsi>, %96, %cst_44 [1] : vector<64x64xi32> to vector<64xi32>
    %98 = vector.shape_cast %97 : vector<64xi32> to vector<64x1xi32>
    %c63_i32_45 = arith.constant 63 : i32
    %99 = vector.broadcast %c63_i32_45 : i32 to vector<64x1xi32>
    %100 = arith.andi %98, %99 : vector<64x1xi32>
    %101 = vector.broadcast %100 : vector<64x1xi32> to vector<64x64xi32>
    %102 = arith.cmpi eq, %36, %101 : vector<64x64xi32>
    %103 = arith.extui %102 : vector<64x64xi1> to vector<64x64xi32>
    %104 = arith.sitofp %103 : vector<64x64xi32> to vector<64x64xf32>
    %105 = arith.truncf %104 : vector<64x64xf32> to vector<64x64xbf16>
    %cst_46 = arith.constant dense<0.000000e+00> : vector<64x64xf32>
    %106 = tpu.matmul %105, %14, %cst_46 {dimension_numbers = #tpu.dot_dimension_numbers<[1], [0], [0], [1], [0, 0, 1, 1], [], []>} : vector<64x64xbf16>, vector<64x64xbf16>, vector<64x64xf32> -> vector<64x64xf32>
    %cst_47 = arith.constant dense<0.000000e+00> : vector<64x3xf32>
    %107 = tpu.matmul %104, %1, %cst_47 {dimension_numbers = #tpu.dot_dimension_numbers<[1], [0], [0], [1], [0, 0, 1, 1], [], []>} : vector<64x64xf32>, vector<64x3xf32>, vector<64x3xf32> -> vector<64x3xf32>
    %108 = arith.subf %3, %107 : vector<64x3xf32>
    %c2147483647_i32_48 = arith.constant 2147483647 : i32
    %109 = vector.broadcast %c2147483647_i32_48 : i32 to vector<64x64xi32>
    %110 = arith.select %102, %109, %96 : vector<64x64xi1>, vector<64x64xi32>
    %cst_49 = arith.constant dense<2147483647> : vector<64xi32>
    %111 = vector.multi_reduction <minsi>, %110, %cst_49 [1] : vector<64x64xi32> to vector<64xi32>
    %112 = vector.shape_cast %111 : vector<64xi32> to vector<64x1xi32>
    %c63_i32_50 = arith.constant 63 : i32
    %113 = vector.broadcast %c63_i32_50 : i32 to vector<64x1xi32>
    %114 = arith.andi %112, %113 : vector<64x1xi32>
    %115 = vector.broadcast %114 : vector<64x1xi32> to vector<64x64xi32>
    %116 = arith.cmpi eq, %36, %115 : vector<64x64xi32>
    %117 = arith.extui %116 : vector<64x64xi1> to vector<64x64xi32>
    %118 = arith.sitofp %117 : vector<64x64xi32> to vector<64x64xf32>
    %119 = arith.truncf %118 : vector<64x64xf32> to vector<64x64xbf16>
    %cst_51 = arith.constant dense<0.000000e+00> : vector<64x64xf32>
    %120 = tpu.matmul %119, %14, %cst_51 {dimension_numbers = #tpu.dot_dimension_numbers<[1], [0], [0], [1], [0, 0, 1, 1], [], []>} : vector<64x64xbf16>, vector<64x64xbf16>, vector<64x64xf32> -> vector<64x64xf32>
    %cst_52 = arith.constant dense<0.000000e+00> : vector<64x3xf32>
    %121 = tpu.matmul %118, %1, %cst_52 {dimension_numbers = #tpu.dot_dimension_numbers<[1], [0], [0], [1], [0, 0, 1, 1], [], []>} : vector<64x64xf32>, vector<64x3xf32>, vector<64x3xf32> -> vector<64x3xf32>
    %122 = arith.subf %3, %121 : vector<64x3xf32>
    %c2147483647_i32_53 = arith.constant 2147483647 : i32
    %123 = vector.broadcast %c2147483647_i32_53 : i32 to vector<64x64xi32>
    %124 = arith.select %116, %123, %110 : vector<64x64xi1>, vector<64x64xi32>
    %cst_54 = arith.constant dense<2147483647> : vector<64xi32>
    %125 = vector.multi_reduction <minsi>, %124, %cst_54 [1] : vector<64x64xi32> to vector<64xi32>
    %126 = vector.shape_cast %125 : vector<64xi32> to vector<64x1xi32>
    %c63_i32_55 = arith.constant 63 : i32
    %127 = vector.broadcast %c63_i32_55 : i32 to vector<64x1xi32>
    %128 = arith.andi %126, %127 : vector<64x1xi32>
    %129 = vector.broadcast %128 : vector<64x1xi32> to vector<64x64xi32>
    %130 = arith.cmpi eq, %36, %129 : vector<64x64xi32>
    %131 = arith.extui %130 : vector<64x64xi1> to vector<64x64xi32>
    %132 = arith.sitofp %131 : vector<64x64xi32> to vector<64x64xf32>
    %133 = arith.truncf %132 : vector<64x64xf32> to vector<64x64xbf16>
    %cst_56 = arith.constant dense<0.000000e+00> : vector<64x64xf32>
    %134 = tpu.matmul %133, %14, %cst_56 {dimension_numbers = #tpu.dot_dimension_numbers<[1], [0], [0], [1], [0, 0, 1, 1], [], []>} : vector<64x64xbf16>, vector<64x64xbf16>, vector<64x64xf32> -> vector<64x64xf32>
    %cst_57 = arith.constant dense<0.000000e+00> : vector<64x3xf32>
    %135 = tpu.matmul %132, %1, %cst_57 {dimension_numbers = #tpu.dot_dimension_numbers<[1], [0], [0], [1], [0, 0, 1, 1], [], []>} : vector<64x64xf32>, vector<64x3xf32>, vector<64x3xf32> -> vector<64x3xf32>
    %136 = arith.subf %3, %135 : vector<64x3xf32>
    %c2147483647_i32_58 = arith.constant 2147483647 : i32
    %137 = vector.broadcast %c2147483647_i32_58 : i32 to vector<64x64xi32>
    %138 = arith.select %130, %137, %124 : vector<64x64xi1>, vector<64x64xi32>
    %cst_59 = arith.constant dense<2147483647> : vector<64xi32>
    %139 = vector.multi_reduction <minsi>, %138, %cst_59 [1] : vector<64x64xi32> to vector<64xi32>
    %140 = vector.shape_cast %139 : vector<64xi32> to vector<64x1xi32>
    %c63_i32_60 = arith.constant 63 : i32
    %141 = vector.broadcast %c63_i32_60 : i32 to vector<64x1xi32>
    %142 = arith.andi %140, %141 : vector<64x1xi32>
    %143 = vector.broadcast %142 : vector<64x1xi32> to vector<64x64xi32>
    %144 = arith.cmpi eq, %36, %143 : vector<64x64xi32>
    %145 = arith.extui %144 : vector<64x64xi1> to vector<64x64xi32>
    %146 = arith.sitofp %145 : vector<64x64xi32> to vector<64x64xf32>
    %147 = arith.truncf %146 : vector<64x64xf32> to vector<64x64xbf16>
    %cst_61 = arith.constant dense<0.000000e+00> : vector<64x64xf32>
    %148 = tpu.matmul %147, %14, %cst_61 {dimension_numbers = #tpu.dot_dimension_numbers<[1], [0], [0], [1], [0, 0, 1, 1], [], []>} : vector<64x64xbf16>, vector<64x64xbf16>, vector<64x64xf32> -> vector<64x64xf32>
    %cst_62 = arith.constant dense<0.000000e+00> : vector<64x3xf32>
    %149 = tpu.matmul %146, %1, %cst_62 {dimension_numbers = #tpu.dot_dimension_numbers<[1], [0], [0], [1], [0, 0, 1, 1], [], []>} : vector<64x64xf32>, vector<64x3xf32>, vector<64x3xf32> -> vector<64x3xf32>
    %150 = arith.subf %3, %149 : vector<64x3xf32>
    %151 = vector.shape_cast %50 : vector<64x64xf32> to vector<1x64x64xf32>
    %152 = vector.shape_cast %64 : vector<64x64xf32> to vector<1x64x64xf32>
    %153 = vector.shape_cast %78 : vector<64x64xf32> to vector<1x64x64xf32>
    %154 = vector.shape_cast %92 : vector<64x64xf32> to vector<1x64x64xf32>
    %155 = vector.shape_cast %106 : vector<64x64xf32> to vector<1x64x64xf32>
    %156 = vector.shape_cast %120 : vector<64x64xf32> to vector<1x64x64xf32>
    %157 = vector.shape_cast %134 : vector<64x64xf32> to vector<1x64x64xf32>
    %158 = vector.shape_cast %148 : vector<64x64xf32> to vector<1x64x64xf32>
    %159 = tpu.concatenate %151, %152, %153, %154, %155, %156, %157, %158 in 0 : vector<1x64x64xf32>, vector<1x64x64xf32>, vector<1x64x64xf32>, vector<1x64x64xf32>, vector<1x64x64xf32>, vector<1x64x64xf32>, vector<1x64x64xf32>, vector<1x64x64xf32> -> vector<8x64x64xf32>
    %160 = vector.shape_cast %52 : vector<64x3xf32> to vector<1x64x3xf32>
    %161 = vector.shape_cast %66 : vector<64x3xf32> to vector<1x64x3xf32>
    %162 = vector.shape_cast %80 : vector<64x3xf32> to vector<1x64x3xf32>
    %163 = vector.shape_cast %94 : vector<64x3xf32> to vector<1x64x3xf32>
    %164 = vector.shape_cast %108 : vector<64x3xf32> to vector<1x64x3xf32>
    %165 = vector.shape_cast %122 : vector<64x3xf32> to vector<1x64x3xf32>
    %166 = vector.shape_cast %136 : vector<64x3xf32> to vector<1x64x3xf32>
    %167 = vector.shape_cast %150 : vector<64x3xf32> to vector<1x64x3xf32>
    %168 = tpu.concatenate %160, %161, %162, %163, %164, %165, %166, %167 in 0 : vector<1x64x3xf32>, vector<1x64x3xf32>, vector<1x64x3xf32>, vector<1x64x3xf32>, vector<1x64x3xf32>, vector<1x64x3xf32>, vector<1x64x3xf32>, vector<1x64x3xf32> -> vector<8x64x3xf32>
    %169 = vector.extract_strided_slice %159 {offsets = [0, 0, 0], sizes = [8, 64, 32], strides = [1, 1, 1]} : vector<8x64x64xf32> to vector<8x64x32xf32>
    %170 = vector.extract_strided_slice %159 {offsets = [0, 0, 32], sizes = [8, 64, 32], strides = [1, 1, 1]} : vector<8x64x64xf32> to vector<8x64x32xf32>
    %171 = vector.shape_cast %168 : vector<8x64x3xf32> to vector<512x3xf32>
    %172 = arith.truncf %171 : vector<512x3xf32> to vector<512x3xbf16>
    %c0_63 = arith.constant 0 : index
    %c0_64 = arith.constant 0 : index
    %173 = vector.load %arg10[%c0_63, %c0_64] : memref<3x32xbf16, #tpu.memory_space<vmem>>, vector<3x32xbf16>
    %cst_65 = arith.constant dense<0.000000e+00> : vector<512x32xf32>
    %174 = tpu.matmul %172, %173, %cst_65 {dimension_numbers = #tpu.dot_dimension_numbers<[1], [0], [0], [1], [0, 0, 1, 1], [], []>} : vector<512x3xbf16>, vector<3x32xbf16>, vector<512x32xf32> -> vector<512x32xf32>
    %c0_66 = arith.constant 0 : index
    %c0_67 = arith.constant 0 : index
    %175 = vector.load %arg11[%c0_66, %c0_67] : memref<1x32xf32, #tpu.memory_space<vmem>>, vector<1x32xf32>
    %176 = vector.broadcast %175 : vector<1x32xf32> to vector<512x32xf32>
    %177 = arith.addf %174, %176 : vector<512x32xf32>
    %cst_68 = arith.constant 0.000000e+00 : f32
    %178 = vector.broadcast %cst_68 : f32 to vector<512x32xf32>
    %179 = arith.maximumf %177, %178 : vector<512x32xf32>
    %180 = arith.truncf %179 : vector<512x32xf32> to vector<512x32xbf16>
    %c0_69 = arith.constant 0 : index
    %c0_70 = arith.constant 0 : index
    %181 = vector.load %arg12[%c0_69, %c0_70] : memref<32x32xbf16, #tpu.memory_space<vmem>>, vector<32x32xbf16>
    %cst_71 = arith.constant dense<0.000000e+00> : vector<512x32xf32>
    %182 = tpu.matmul %180, %181, %cst_71 {dimension_numbers = #tpu.dot_dimension_numbers<[1], [0], [0], [1], [0, 0, 1, 1], [], []>} : vector<512x32xbf16>, vector<32x32xbf16>, vector<512x32xf32> -> vector<512x32xf32>
    %c0_72 = arith.constant 0 : index
    %c0_73 = arith.constant 0 : index
    %183 = vector.load %arg13[%c0_72, %c0_73] : memref<1x32xf32, #tpu.memory_space<vmem>>, vector<1x32xf32>
    %184 = vector.broadcast %183 : vector<1x32xf32> to vector<512x32xf32>
    %185 = arith.addf %182, %184 : vector<512x32xf32>
    %186 = vector.shape_cast %185 : vector<512x32xf32> to vector<8x64x32xf32>
    %187 = arith.truncf %20 : vector<64x32xf32> to vector<64x32xbf16>
    %c0_74 = arith.constant 0 : index
    %c0_75 = arith.constant 0 : index
    %188 = vector.load %arg14[%c0_74, %c0_75] : memref<32x32xbf16, #tpu.memory_space<vmem>>, vector<32x32xbf16>
    %cst_76 = arith.constant dense<0.000000e+00> : vector<64x32xf32>
    %189 = tpu.matmul %187, %188, %cst_76 {dimension_numbers = #tpu.dot_dimension_numbers<[1], [0], [0], [1], [0, 0, 1, 1], [], []>} : vector<64x32xbf16>, vector<32x32xbf16>, vector<64x32xf32> -> vector<64x32xf32>
    %c0_77 = arith.constant 0 : index
    %c0_78 = arith.constant 0 : index
    %190 = vector.load %arg15[%c0_77, %c0_78] : memref<1x32xf32, #tpu.memory_space<vmem>>, vector<1x32xf32>
    %191 = vector.broadcast %190 : vector<1x32xf32> to vector<64x32xf32>
    %192 = arith.addf %189, %191 : vector<64x32xf32>
    %193 = arith.subf %186, %169 : vector<8x64x32xf32>
    %194 = vector.shape_cast %193 : vector<8x64x32xf32> to vector<512x32xf32>
    %195 = arith.truncf %194 : vector<512x32xf32> to vector<512x32xbf16>
    %c0_79 = arith.constant 0 : index
    %c0_80 = arith.constant 0 : index
    %196 = vector.load %arg14[%c0_79, %c0_80] : memref<32x32xbf16, #tpu.memory_space<vmem>>, vector<32x32xbf16>
    %cst_81 = arith.constant dense<0.000000e+00> : vector<512x32xf32>
    %197 = tpu.matmul %195, %196, %cst_81 {dimension_numbers = #tpu.dot_dimension_numbers<[1], [0], [0], [1], [0, 0, 1, 1], [], []>} : vector<512x32xbf16>, vector<32x32xbf16>, vector<512x32xf32> -> vector<512x32xf32>
    %198 = vector.shape_cast %197 : vector<512x32xf32> to vector<8x64x32xf32>
    %199 = vector.shape_cast %192 : vector<64x32xf32> to vector<1x64x32xf32>
    %200 = vector.broadcast %199 : vector<1x64x32xf32> to vector<8x64x32xf32>
    %201 = arith.addf %198, %200 : vector<8x64x32xf32>
    %cst_82 = arith.constant 0.000000e+00 : f32
    %202 = vector.broadcast %cst_82 : f32 to vector<8x64x32xf32>
    %203 = arith.maximumf %201, %202 : vector<8x64x32xf32>
    %204 = vector.shape_cast %203 : vector<8x64x32xf32> to vector<512x32xf32>
    %205 = arith.truncf %204 : vector<512x32xf32> to vector<512x32xbf16>
    %c0_83 = arith.constant 0 : index
    %c0_84 = arith.constant 0 : index
    %206 = vector.load %arg16[%c0_83, %c0_84] : memref<32x32xbf16, #tpu.memory_space<vmem>>, vector<32x32xbf16>
    %cst_85 = arith.constant dense<0.000000e+00> : vector<512x32xf32>
    %207 = tpu.matmul %205, %206, %cst_85 {dimension_numbers = #tpu.dot_dimension_numbers<[1], [0], [0], [1], [0, 0, 1, 1], [], []>} : vector<512x32xbf16>, vector<32x32xbf16>, vector<512x32xf32> -> vector<512x32xf32>
    %c0_86 = arith.constant 0 : index
    %c0_87 = arith.constant 0 : index
    %208 = vector.load %arg17[%c0_86, %c0_87] : memref<1x32xf32, #tpu.memory_space<vmem>>, vector<1x32xf32>
    %209 = vector.broadcast %208 : vector<1x32xf32> to vector<512x32xf32>
    %210 = arith.addf %207, %209 : vector<512x32xf32>
    %cst_88 = arith.constant 0.176776692 : f32
    %211 = vector.broadcast %cst_88 : f32 to vector<512x32xf32>
    %212 = arith.mulf %210, %211 : vector<512x32xf32>
    %213 = vector.shape_cast %212 : vector<512x32xf32> to vector<8x64x32xf32>
    %cst_89 = arith.constant dense<0xFF800000> : vector<64x32xf32>
    %214 = vector.multi_reduction <maximumf>, %213, %cst_89 [0] : vector<8x64x32xf32> to vector<64x32xf32>
    %215 = vector.shape_cast %214 : vector<64x32xf32> to vector<1x64x32xf32>
    %216 = vector.broadcast %215 : vector<1x64x32xf32> to vector<8x64x32xf32>
    %217 = arith.subf %213, %216 : vector<8x64x32xf32>
    %218 = math.exp %217 : vector<8x64x32xf32>
    %cst_90 = arith.constant dense<0.000000e+00> : vector<64x32xf32>
    %219 = vector.multi_reduction <add>, %218, %cst_90 [0] : vector<8x64x32xf32> to vector<64x32xf32>
    %220 = vector.shape_cast %219 : vector<64x32xf32> to vector<1x64x32xf32>
    %221 = vector.broadcast %220 : vector<1x64x32xf32> to vector<8x64x32xf32>
    %222 = arith.divf %218, %221 : vector<8x64x32xf32>
    %223 = arith.addf %170, %186 : vector<8x64x32xf32>
    %224 = arith.mulf %222, %223 : vector<8x64x32xf32>
    %cst_91 = arith.constant dense<0.000000e+00> : vector<64x32xf32>
    %225 = vector.multi_reduction <add>, %224, %cst_91 [0] : vector<8x64x32xf32> to vector<64x32xf32>
    %226 = arith.truncf %225 : vector<64x32xf32> to vector<64x32xbf16>
    %c0_92 = arith.constant 0 : index
    %c0_93 = arith.constant 0 : index
    %227 = vector.load %arg18[%c0_92, %c0_93] : memref<32x16xbf16, #tpu.memory_space<vmem>>, vector<32x16xbf16>
    %cst_94 = arith.constant dense<0.000000e+00> : vector<64x16xf32>
    %228 = tpu.matmul %226, %227, %cst_94 {dimension_numbers = #tpu.dot_dimension_numbers<[1], [0], [0], [1], [0, 0, 1, 1], [], []>} : vector<64x32xbf16>, vector<32x16xbf16>, vector<64x16xf32> -> vector<64x16xf32>
    %c0_95 = arith.constant 0 : index
    %c0_96 = arith.constant 0 : index
    %229 = vector.load %arg19[%c0_95, %c0_96] : memref<1x16xf32, #tpu.memory_space<vmem>>, vector<1x16xf32>
    %230 = vector.broadcast %229 : vector<1x16xf32> to vector<64x16xf32>
    %231 = arith.addf %228, %230 : vector<64x16xf32>
    %232 = arith.addf %231, %7 : vector<64x16xf32>
    %c0_97 = arith.constant 0 : index
    %c0_98 = arith.constant 0 : index
    %c0_99 = arith.constant 0 : index
    %233 = vector.load %arg20[%c0_97, %c0_98, %c0_99] : memref<1x64x16xf32, #tpu.memory_space<vmem>>, vector<1x64x16xf32>
    %234 = vector.shape_cast %233 : vector<1x64x16xf32> to vector<64x16xf32>
    %235 = vector.shape_cast %232 : vector<64x16xf32> to vector<1x64x16xf32>
    tpu.vector_store %arg20[%c0_97, %c0_98, %c0_99], %235 {strides = array<i32>} : memref<1x64x16xf32, #tpu.memory_space<vmem>>, vector<1x64x16xf32>,
    %c0_100 = arith.constant 0 : index
    %c0_101 = arith.constant 0 : index
    %c0_102 = arith.constant 0 : index
    %c0_103 = arith.constant 0 : index
    %236 = vector.load %arg21[%c0_100, %c0_101, %c0_102, %c0_103] : memref<1x8x64x32xf32, #tpu.memory_space<vmem>>, vector<1x8x64x32xf32>
    %237 = vector.shape_cast %236 : vector<1x8x64x32xf32> to vector<8x64x32xf32>
    %238 = vector.shape_cast %222 : vector<8x64x32xf32> to vector<1x8x64x32xf32>
    tpu.vector_store %arg21[%c0_100, %c0_101, %c0_102, %c0_103], %238 {strides = array<i32>} : memref<1x8x64x32xf32, #tpu.memory_space<vmem>>, vector<1x8x64x32xf32>,
    return
  }
  func.func @transform_0(%arg0: i32, %arg1: i32) -> (i32, i32, i32) {
    %c0_i32 = arith.constant 0 : i32
    %c0_i32_0 = arith.constant 0 : i32
    %c0_i32_1 = arith.constant 0 : i32
    return %arg0, %c0_i32, %c0_i32_0 : i32, i32, i32
  }
  func.func @transform_1(%arg0: i32, %arg1: i32) -> (i32, i32, i32) {
    %c0_i32 = arith.constant 0 : i32
    %c0_i32_0 = arith.constant 0 : i32
    return %arg0, %arg1, %c0_i32 : i32, i32, i32
  }
  func.func @transform_2(%arg0: i32, %arg1: i32) -> (i32, i32, i32) {
    %c0_i32 = arith.constant 0 : i32
    %c0_i32_0 = arith.constant 0 : i32
    %c0_i32_1 = arith.constant 0 : i32
    return %arg0, %c0_i32, %c0_i32_0 : i32, i32, i32
  }
  func.func @transform_3(%arg0: i32, %arg1: i32) -> (i32, i32, i32) {
    %c0_i32 = arith.constant 0 : i32
    %c0_i32_0 = arith.constant 0 : i32
    return %arg0, %arg1, %c0_i32 : i32, i32, i32
  }
  func.func @transform_4(%arg0: i32, %arg1: i32) -> (i32, i32) {
    %c0_i32 = arith.constant 0 : i32
    %c0_i32_0 = arith.constant 0 : i32
    %c0_i32_1 = arith.constant 0 : i32
    return %c0_i32, %c0_i32_0 : i32, i32
  }
  func.func @transform_5(%arg0: i32, %arg1: i32) -> (i32, i32) {
    %c0_i32 = arith.constant 0 : i32
    %c0_i32_0 = arith.constant 0 : i32
    %c0_i32_1 = arith.constant 0 : i32
    return %c0_i32, %c0_i32_0 : i32, i32
  }
  func.func @transform_6(%arg0: i32, %arg1: i32) -> (i32, i32) {
    %c0_i32 = arith.constant 0 : i32
    %c0_i32_0 = arith.constant 0 : i32
    %c0_i32_1 = arith.constant 0 : i32
    return %c0_i32, %c0_i32_0 : i32, i32
  }
  func.func @transform_7(%arg0: i32, %arg1: i32) -> (i32, i32) {
    %c0_i32 = arith.constant 0 : i32
    %c0_i32_0 = arith.constant 0 : i32
    %c0_i32_1 = arith.constant 0 : i32
    return %c0_i32, %c0_i32_0 : i32, i32
  }
  func.func @transform_8(%arg0: i32, %arg1: i32) -> (i32, i32) {
    %c0_i32 = arith.constant 0 : i32
    %c0_i32_0 = arith.constant 0 : i32
    %c0_i32_1 = arith.constant 0 : i32
    return %c0_i32, %c0_i32_0 : i32, i32
  }
  func.func @transform_9(%arg0: i32, %arg1: i32) -> (i32, i32) {
    %c0_i32 = arith.constant 0 : i32
    %c0_i32_0 = arith.constant 0 : i32
    %c0_i32_1 = arith.constant 0 : i32
    return %c0_i32, %c0_i32_0 : i32, i32
  }
  func.func @transform_10(%arg0: i32, %arg1: i32) -> (i32, i32) {
    %c0_i32 = arith.constant 0 : i32
    %c0_i32_0 = arith.constant 0 : i32
    %c0_i32_1 = arith.constant 0 : i32
    return %c0_i32, %c0_i32_0 : i32, i32
  }
  func.func @transform_11(%arg0: i32, %arg1: i32) -> (i32, i32) {
    %c0_i32 = arith.constant 0 : i32
    %c0_i32_0 = arith.constant 0 : i32
    %c0_i32_1 = arith.constant 0 : i32
    return %c0_i32, %c0_i32_0 : i32, i32
  }
  func.func @transform_12(%arg0: i32, %arg1: i32) -> (i32, i32) {
    %c0_i32 = arith.constant 0 : i32
    %c0_i32_0 = arith.constant 0 : i32
    %c0_i32_1 = arith.constant 0 : i32
    return %c0_i32, %c0_i32_0 : i32, i32
  }
  func.func @transform_13(%arg0: i32, %arg1: i32) -> (i32, i32) {
    %c0_i32 = arith.constant 0 : i32
    %c0_i32_0 = arith.constant 0 : i32
    %c0_i32_1 = arith.constant 0 : i32
    return %c0_i32, %c0_i32_0 : i32, i32
  }
  func.func @transform_14(%arg0: i32, %arg1: i32) -> (i32, i32) {
    %c0_i32 = arith.constant 0 : i32
    %c0_i32_0 = arith.constant 0 : i32
    %c0_i32_1 = arith.constant 0 : i32
    return %c0_i32, %c0_i32_0 : i32, i32
  }
  func.func @transform_15(%arg0: i32, %arg1: i32) -> (i32, i32) {
    %c0_i32 = arith.constant 0 : i32
    %c0_i32_0 = arith.constant 0 : i32
    %c0_i32_1 = arith.constant 0 : i32
    return %c0_i32, %c0_i32_0 : i32, i32
  }
  func.func @transform_16(%arg0: i32, %arg1: i32) -> (i32, i32) {
    %c0_i32 = arith.constant 0 : i32
    %c0_i32_0 = arith.constant 0 : i32
    %c0_i32_1 = arith.constant 0 : i32
    return %c0_i32, %c0_i32_0 : i32, i32
  }
  func.func @transform_17(%arg0: i32, %arg1: i32) -> (i32, i32) {
    %c0_i32 = arith.constant 0 : i32
    %c0_i32_0 = arith.constant 0 : i32
    %c0_i32_1 = arith.constant 0 : i32
    return %c0_i32, %c0_i32_0 : i32, i32
  }
  func.func @transform_18(%arg0: i32, %arg1: i32) -> (i32, i32, i32) {
    %c0_i32 = arith.constant 0 : i32
    %c0_i32_0 = arith.constant 0 : i32
    return %arg0, %arg1, %c0_i32 : i32, i32, i32
  }
  func.func @transform_19(%arg0: i32, %arg1: i32) -> (i32, i32, i32, i32) {
    %c0_i32 = arith.constant 0 : i32
    %c0_i32_0 = arith.constant 0 : i32
    %c0_i32_1 = arith.constant 0 : i32
    return %arg0, %c0_i32, %arg1, %c0_i32_0 : i32, i32, i32, i32
  }
}

</mosaic_0001>

<bundles_post_ra>
// kernel: tpu_custom_call.1
= control target key start
LH: loop header
LB: loop body
LE: loop exit
PB: predicated region body
PF: predicated region fallthrough
CT: control target
= control target key end

     0   :  { %s9930_s30 = smov 0   ;;  %s9932_s20 = smov 0   ;;  %s13925_s0 = inlined_call_operand.vmem [shape: f32[2,64,3], index: 0, kind: input, shape index: {}]   ;;  %s13926_s1 = inlined_call_operand.vmem [shape: f32[2,64,3], index: 1, kind: input, shape index: {}]   ;;  %s13927_s2 = inlined_call_operand.vmem [shape: f32[2,64,16], index: 2, kind: input, shape index: {}]   ;;  %s13928_s3 = inlined_call_operand.vmem [shape: f32[2,64,16], index: 3, kind: input, shape index: {}]   ;;  %s13929_s4 = inlined_call_operand.vmem [shape: bf16[16,64], index: 4, kind: input, shape index: {}]   ;;  %s13930_s5 = inlined_call_operand.vmem [shape: f32[1,64], index: 5, kind: input, shape index: {}]   ;;  %s13931_s6 = inlined_call_operand.vmem [shape: bf16[16,32], index: 6, kind: input, shape index: {}]   ;;  %s13932_s7 = inlined_call_operand.vmem [shape: f32[1,32], index: 7, kind: input, shape index: {}]   ;;  %s13933_s8 = inlined_call_operand.vmem [shape: bf16[3,32], index: 8, kind: input, shape index: {}]   ;;  %s13934_s9 = inlined_call_operand.vmem [shape: f32[1,32], index: 9, kind: input, shape index: {}]   ;;  %s13935_s10 = inlined_call_operand.vmem [shape: bf16[32,32], index: 10, kind: input, shape index: {}]   ;;  %s13936_s11 = inlined_call_operand.vmem [shape: f32[1,32], index: 11, kind: input, shape index: {}]   ;;  %s13937_s12 = inlined_call_operand.vmem [shape: bf16[32,32], index: 12, kind: input, shape index: {}]   ;;  %s13938_s13 = inlined_call_operand.vmem [shape: f32[1,32], index: 13, kind: input, shape index: {}]   ;;  %s13939_s14 = inlined_call_operand.vmem [shape: bf16[32,32], index: 14, kind: input, shape index: {}]   ;;  %s13940_s15 = inlined_call_operand.vmem [shape: f32[1,32], index: 15, kind: input, shape index: {}]   ;;  %s13941_s16 = inlined_call_operand.vmem [shape: bf16[32,16], index: 16, kind: input, shape index: {}]   ;;  %s13942_s17 = inlined_call_operand.vmem [shape: f32[1,16], index: 17, kind: input, shape index: {}]   ;;  %s13943_s18 = inlined_call_operand.vmem [shape: f32[2,64,16], index: 18, kind: output, shape index: {0}]   ;;  %s13944_s19 = inlined_call_operand.vmem [shape: f32[2,8,64,32], index: 19, kind: output, shape index: {1}]  }
   0x1   :  { %14002 = sst [smem:[#allocation70_spill]] %s13925_s0  ;;  %s9928_s0 = smov 0  }
   0x2   :  { %14003 = sst [smem:[#allocation71_spill]] %s13926_s1 }
   0x3   :  { %14004 = sst [smem:[#allocation72_spill]] %s13927_s2 }
   0x4   :  { %14005 = sst [smem:[#allocation73_spill]] %s13928_s3 }
   0x5 LB: > { %s42_s21 = sadd.s32 1, %s9816_s30  ;;  %p8127_p0 = scmp.ge.s32.totalorder %s9820_s20, 1  ;;  %s9820_s20 = sphi %s9932_s20, %s30_s20   ;;  %s9816_s30 = sphi %s9930_s30, %s14269_s30   ;;  %s9812_s0 = sphi %s9928_s0, %s14268_s0  }
   0x6   : > { %p44_p1 = scmp.ge.s32.totalorder %s42_s21, 2  ;;  %p600_p2 = scmp.lt.s32.totalorder %s9820_s20, 3 }
   0x8   : > { %s14271_s21 = smov (%p44_p1, %s42_s21), 0  ;;  %p601_p3 = pnand %p8127_p0, %p600_p2 }
   0xa   : > { %604 = sbr.rel (%p601_p3) target bundleno = 3992 (0xf98), region = 92 }
   0xf   : > { %v9611_v0 = vld [vmem:[%s13929_s4] sm:$0xff]   ;;  %p692_p4 = scmp.lt.s32.totalorder %s9812_s0, 1  ;;  %s14006_s26 = sld [smem:[#allocation70_spill]]  ;;  %v9822_v2 = vmov 0.0   ;;  %vm972_vm0 = vcmask 23552   ;;  %vm794_vm1 = vcmask 130048  }
  0x10   : > { %v9612_v1 = vld [vmem:[%s13931_s6] sm:$0xff]   ;;  %8868 = vmatprep.subr.bf16.mxu0 %v9611_v0  ;;  %s14007_s1 = sld [smem:[#allocation72_spill]]  ;;  %vm9823_vm2 = vmmov 0   ;;  %vm1325_vm3 = vcmask 523264   ;;  %s9826_s23 = smov 32  }
  0x11   : > { %s14273_s0 = smov (!%p692_p4, %s9812_s0), 1  ;;  %8878 = vmatprep.subr.bf16.mxu1 %v9612_v1  ;;  %8869 = vmatpush3.bf16.msra.mxu0 %v9611_v0  ;;  %s14008_s25 = sld [smem:[#allocation73_spill]] }
  0x12   : > { %8879 = vmatpush3.bf16.msra.mxu1 %v9612_v1  ;;  %s9955_s24 = sshll.u32 %s14273_s0, 6  ;;  %s14009_s29 = sld [smem:[#allocation71_spill]] }
  0x13   : > { %8916 = vmatprep.subr.mxu1 %v9822_v2 }
  0x15   : > { %s9961_s27 = scalar_lea.vmem %s14006_s26, %s9955_s24  ;;  %s13890_s26 = scalar_lea.vmem %s13943_s18, %s9955_s24 }
  0x16   : > { %s9968_s22 = scalar_lea.vmem %s14007_s1, %s9955_s24  ;;  %v9977_v3 = vld [vmem:[%s9961_s27 + $0x38] sm:$0xff]  ;;  %v10000_v18 = vld [vmem:[%s9961_s27 + $0x30] sm:$0xff]  ;;  %v10026_v33 = vld [vmem:[%s9961_s27 + $0x28] sm:$0xff] }
  0x17   : > { %s9974_s3 = scalar_lea.vmem %s14008_s25, %s9955_s24  ;;  %v759_v4 = vld [vmem:[%s9968_s22] sm:$0xff]  ;;  %v760_v5 = vld [vmem:[%s9968_s22 + $0x8] sm:$0xff]  ;;  %8888 = vmatprep.subr.msk.mxu0 %vm972_vm0, %v9977_v3  ;;  %v761_v10 = vld [vmem:[%s9968_s22 + $0x10] sm:$0xff]  ;;  %v1165_v15 = vmul.f32 %v9977_v3, %v9977_v3  ;;  %v1164_v28 = vmul.f32 %v10000_v18, %v10000_v18  ;;  %v1163_v41 = vmul.f32 %v10026_v33, %v10026_v33 }
  0x18   : > { %v767_v6 = vld [vmem:[%s9974_s3] sm:$0xff]  ;;  %v768_v7 = vld [vmem:[%s9974_s3 + $0x8] sm:$0xff]  ;;  %v775_v8 = vpack.c.bf16 %v760_v5, %v759_v4  ;;  %v762_v11 = vld [vmem:[%s9968_s22 + $0x18] sm:$0xff]  ;;  %s9992_s1 = scalar_lea.vmem %s14009_s29, %s9955_s24  ;;  %v9824_v5 = vmov 1.0   ;;  %s9827_s29 = smov 96  }
  0x19   : > { %v876_v9 = vpack.c.bf16 %v768_v7, %v767_v6  ;;  %v769_v12 = vld [vmem:[%s9974_s3 + $0x10] sm:$0xff]  ;;  %v776_v13 = vpack.c.bf16 %v762_v11, %v761_v10  ;;  %v770_v14 = vld [vmem:[%s9974_s3 + $0x18] sm:$0xff]  ;;  %v763_v16 = vld [vmem:[%s9968_s22 + $0x20] sm:$0xff] }
  0x1a   : > { %v764_v17 = vld [vmem:[%s9968_s22 + $0x28] sm:$0xff]  ;;  %8870 = vmatprep.mubr.msk.bf16.mxu0 %vm794_vm1, %v775_v8  ;;  %v877_v19 = vpack.c.bf16 %v770_v14, %v769_v12  ;;  %v771_v21 = vld [vmem:[%s9974_s3 + $0x20] sm:$0xff]  ;;  %v765_v22 = vld [vmem:[%s9968_s22 + $0x30] sm:$0xff] }
  0x1b   : > { %8880 = vmatprep.mubr.msk.bf16.mxu1 %vm794_vm1, %v876_v9  ;;  %v777_v20 = vpack.c.bf16 %v764_v17, %v763_v16  ;;  %8871 = vmatmul.mubr.msk.bf16.vlgmr.msra.gmra.mxu0 %vm794_vm1, %v776_v13  ;;  %v772_v23 = vld [vmem:[%s9974_s3 + $0x28] sm:$0xff]  ;;  %v766_v24 = vld [vmem:[%s9968_s22 + $0x38] sm:$0xff]  ;;  %v751_v26 = vld [vmem:[%s9992_s1] sm:$0xff] }
  0x1c   : > { %8881 = vmatmul.mubr.msk.bf16.vlgmr.msra.gmra.mxu1 %vm794_vm1, %v877_v19  ;;  %8889 = vmatpush3.xpose.msk.msra.mxu0 %vm972_vm0, %v9977_v3  ;;  %v878_v25 = vpack.c.bf16 %v772_v23, %v771_v21  ;;  %v10014_v27 = vld [vmem:[%s9992_s1 + $0x10] sm:$0xff]  ;;  %v774_v30 = vld [vmem:[%s9974_s3 + $0x38] sm:$0xff]  ;;  %v1126_v32 = vmul.f32 %v751_v26, %v751_v26  ;;  %v778_v34 = vpack.c.bf16 %v766_v24, %v765_v22  ;;  %v10039_v39 = vld [vmem:[%s9992_s1 + $0x8] sm:$0xff] }
  0x1d   : > { %8917 = vmatpush3.xpose.msk.msra.mxu1 %vm972_vm0, %v1165_v15  ;;  %8890 = vmatprep.subr.msk.mxu0 %vm972_vm0, %v10000_v18  ;;  %v773_v29 = vld [vmem:[%s9974_s3 + $0x30] sm:$0xff]  ;;  %v1128_v31 = vmul.f32 %v10014_v27, %v10014_v27  ;;  %v10032_v35 = vld [vmem:[%s9992_s1 + $0x18] sm:$0xff]  ;;  %v1127_v42 = vmul.f32 %v10039_v39, %v10039_v39  ;;  %v10051_v43 = vld [vmem:[%s9961_s27 + $0x20] sm:$0xff] }
  0x1e   : > { %8918 = vmatprep.subr.mxu1 %v9822_v2  ;;  %8874 = vmatprep.mubr.msk.bf16.mxu0 %vm794_vm1, %v777_v20  ;;  %v1134_v37 = vsel %vm972_vm0, %v1126_v32, 0.0  ;;  %v879_v38 = vpack.c.bf16 %v774_v30, %v773_v29  ;;  %v1129_v40 = vmul.f32 %v10032_v35, %v10032_v35  ;;  %v10056_v44 = vld [vmem:[%s9992_s1 + $0x28] sm:$0xff]  ;;  %v755_v45 = vld [vmem:[%s9992_s1 + $0x20] sm:$0xff]  ;;  %v1162_v48 = vmul.f32 %v10051_v43, %v10051_v43  ;;  %v10072_v51 = vld [vmem:[%s9961_s27 + $0x18] sm:$0xff] }
  0x1f   : > { %8884 = vmatprep.mubr.msk.bf16.mxu1 %vm794_vm1, %v878_v25  ;;  %v1140_v36 = vsel %vm972_vm0, %v1128_v31, 0.0  ;;  %1135 = vadd.xlane.f32.xlu0 %v1134_v37  ;;  %v1131_v47 = vmul.f32 %v10056_v44, %v10056_v44  ;;  %v1137_v49 = vsel %vm972_vm0, %v1127_v42, 0.0  ;;  %v1130_v50 = vmul.f32 %v755_v45, %v755_v45  ;;  %v758_v52 = vld [vmem:[%s9992_s1 + $0x38] sm:$0xff]  ;;  %v757_v53 = vld [vmem:[%s9992_s1 + $0x30] sm:$0xff]  ;;  %v10102_v63 = vld [vmem:[%s9961_s27 + $0x8] sm:$0xff] }
  0x20   : > { %8891 = vmatpush3.xpose.msk.msra.mxu0 %vm972_vm0, %v10000_v18  ;;  %1141 = vadd.xlane.f32.xlu1 %v1140_v36  ;;  %v1143_v46 = vsel %vm972_vm0, %v1129_v40, 0.0  ;;  %v1133_v55 = vmul.f32 %v758_v52, %v758_v52  ;;  %v1161_v56 = vmul.f32 %v10072_v51, %v10072_v51  ;;  %v1132_v58 = vmul.f32 %v757_v53, %v757_v53  ;;  %v10089_v59 = vld [vmem:[%s9961_s27 + $0x10] sm:$0xff]  ;;  %v10113_v1 = vld [vmem:[%s9961_s27] sm:$0xff]  ;;  %v9615_v17 = vld [vmem:[%s13935_s10 + $0x8] sm:$0xff]  }
  0x21   : > { %8919 = vmatpush3.xpose.msk.msra.mxu1 %vm972_vm0, %v1164_v28  ;;  %8892 = vmatprep.subr.msk.mxu0 %vm972_vm0, %v10026_v33  ;;  %v1149_v54 = vsel %vm972_vm0, %v1131_v47, 0.0  ;;  %v1146_v57 = vsel %vm972_vm0, %v1130_v50, 0.0  ;;  %v1160_v61 = vmul.f32 %v10089_v59, %v10089_v59  ;;  %v1159_v0 = vmul.f32 %v10102_v63, %v10102_v63  ;;  %v8146_v9 = vld [vmem:[%s13932_s7] ss:$0 sm:$0xff] }
  0x22   : > { %8920 = vmatprep.subr.mxu1 %v9822_v2  ;;  %v1155_v60 = vsel %vm972_vm0, %v1133_v55, 0.0  ;;  %v1152_v62 = vsel %vm972_vm0, %v1132_v58, 0.0  ;;  %v1158_v4 = vmul.f32 %v10113_v1, %v10113_v1  ;;  %v8140_v21 = vld [vmem:[%s13930_s5] ss:$0 sm:$0xff] }
  0x23   : > { %8875 = vmatmul.mubr.msk.bf16.gmra.mxu0 %vm794_vm1, %v778_v34  ;;  %1138 = vadd.xlane.f32.xlu0 %v1137_v49 }
  0x24   : > { %8893 = vmatpush3.xpose.msk.msra.mxu0 %vm972_vm0, %v10026_v33  ;;  %8885 = vmatmul.mubr.msk.bf16.gmra.mxu1 %vm794_vm1, %v879_v38 }
  0x25   : > { %8921 = vmatpush3.xpose.msk.msra.mxu1 %vm972_vm0, %v1163_v41  ;;  %8894 = vmatprep.subr.msk.mxu0 %vm972_vm0, %v10051_v43  ;;  %v1263_v41 = vlaneseq }
  0x26   : > { %8922 = vmatprep.subr.mxu1 %v9822_v2  ;;  %8904 = vmatprep.mubr.msk.f32.mxu0 %vm972_vm0, %v751_v26 }
  0x27   : > { %8932 = vmatprep.mubr.msk.f32.mxu1 %vm9823_vm2, %v9822_v2  ;;  %1144 = vadd.xlane.f32.xlu1 %v1143_v46  ;;  %v1264_v47 = vshrl.u32 %v1263_v41, 7 }
  0x28   : > { %8895 = vmatpush3.xpose.msk.msra.mxu0 %vm972_vm0, %v10051_v43  ;;  %1147 = vadd.xlane.f32.xlu0 %v1146_v57 }
  0x29   : > { %8923 = vmatpush3.xpose.msk.msra.mxu1 %vm972_vm0, %v1162_v48  ;;  %8896 = vmatprep.subr.msk.mxu0 %vm972_vm0, %v10072_v51  ;;  %v1265_v49 = vsub.s32 0, %v1264_v47 }
  0x2a   : > { %8924 = vmatprep.subr.mxu1 %v9822_v2 }
  0x2b   : > { %1150 = vadd.xlane.f32.xlu1 %v1149_v54 }
  0x2c   : > { %8897 = vmatpush3.xpose.msk.msra.mxu0 %vm972_vm0, %v10072_v51  ;;  %1153 = vadd.xlane.f32.xlu0 %v1152_v62 }
  0x2d   : > { %8925 = vmatpush3.xpose.msk.msra.mxu1 %vm972_vm0, %v1161_v56  ;;  %8898 = vmatprep.subr.msk.mxu0 %vm972_vm0, %v10089_v59 }
  0x2e   : > { %8926 = vmatprep.subr.mxu1 %v9822_v2 }
  0x2f   : > { %1156 = vadd.xlane.f32.xlu1 %v1155_v60 }
  0x30   : > { %8899 = vmatpush3.xpose.msk.msra.mxu0 %vm972_vm0, %v10089_v59 }
  0x31   : > { %8927 = vmatpush3.xpose.msk.msra.mxu1 %vm972_vm0, %v1160_v61  ;;  %8900 = vmatprep.subr.msk.mxu0 %vm972_vm0, %v10102_v63 }
  0x32   : > { %8928 = vmatprep.subr.mxu1 %v9822_v2 }
  0x34   : > { %8901 = vmatpush3.xpose.msk.msra.mxu0 %vm972_vm0, %v10102_v63 }
  0x35   : > { %8929 = vmatpush3.xpose.msk.msra.mxu1 %vm972_vm0, %v1159_v0  ;;  %8902 = vmatprep.subr.msk.mxu0 %vm972_vm0, %v10113_v1 }
  0x36   : > { %8930 = vmatprep.subr.mxu1 %v9822_v2 }
  0x38   : > { %8903 = vmatpush3.xpose.msk.msra.mxu0 %vm972_vm0, %v10113_v1 }
  0x39   : > { %8931 = vmatpush3.xpose.msk.msra.mxu1 %vm972_vm0, %v1158_v4 }
  0x3a   : > { %8951 = vmatprep.subr.mxu1 %v9977_v3 }
  0x3b   : > { %8905 = vmatmul.mubr.msk.f32.vlgmr.msra.gmra.mxu0 %vm972_vm0, %v10039_v39 }
  0x3c   : > { %8933 = vmatmul.mubr.msk.f32.vlgmr.msra.gmra.mxu1 %vm972_vm0, %v9824_v5  ;;  %8907 = vmatprep.mubr.msk.f32.mxu0 %vm972_vm0, %v10014_v27 }
  0x3d   : > { %8952 = vmatpush3.msra.mxu1 %v9977_v3 }
  0x3e   : > { %8953 = vmatprep.subr.mxu1 %v10000_v18 }
  0x3f   : > { %8908 = vmatmul.mubr.msk.f32.gmra.mxu0 %vm972_vm0, %v10032_v35  ;;  %8954 = vmatpush3.msra.mxu1 %v10000_v18 }
  0x40   : > { %8910 = vmatprep.mubr.msk.f32.mxu0 %vm972_vm0, %v755_v45  ;;  %8955 = vmatprep.subr.mxu1 %v10026_v33 }
  0x41   : > { %8956 = vmatpush3.msra.mxu1 %v10026_v33 }
  0x42   : > { %8957 = vmatprep.subr.mxu1 %v10051_v43 }
  0x43   : > { %8911 = vmatmul.mubr.msk.f32.gmra.mxu0 %vm972_vm0, %v10056_v44  ;;  %8958 = vmatpush3.msra.mxu1 %v10051_v43 }
  0x44   : > { %8913 = vmatprep.mubr.msk.f32.mxu0 %vm972_vm0, %v757_v53  ;;  %8959 = vmatprep.subr.mxu1 %v10072_v51 }
  0x45   : > { %8960 = vmatpush3.msra.mxu1 %v10072_v51 }
  0x46   : > { %8961 = vmatprep.subr.mxu1 %v10089_v59 }
  0x47   : > { %8914 = vmatmul.mubr.msk.f32.gmra.mxu0 %vm972_vm0, %v758_v52  ;;  %8962 = vmatpush3.msra.mxu1 %v10089_v59 }
  0x48   : > { %8963 = vmatprep.subr.mxu1 %v10102_v63 }
  0x49   : > { %8964 = vmatpush3.msra.mxu1 %v10102_v63 }
  0x4a   : > { %8965 = vmatprep.subr.mxu1 %v10113_v1 }
  0x4b   : > { %8966 = vmatpush3.msra.mxu1 %v10113_v1 }
  0x4c   : > { %8995 = vmatprep.subr.mxu1 %v9977_v3 }
  0xa8   : > { %v1136_v46 = vpop.xlane.xlu0 %1135 }
  0xa9   : > { %v1142_v44 = vpop.xlane.xlu1 %1141 }
  0xac   : > { %v1139_v52 = vpop.xlane.xlu0 %1138 }
  0xb0   : > { %v1145_v48 = vpop.xlane.xlu1 %1144 }
  0xb1   : > { %v1148_v0 = vpop.xlane.xlu0 %1147 }
  0xb4   : > { %v1151_v57 = vpop.xlane.xlu1 %1150 }
  0xdb   : > { %v8872_v6 = vpop.f32.mrf.mxu0 }
  0xdc   : > { %v8882_v7 = vpop.f32.mrf.mxu1  ;;  %v850_v38 = vadd.f32 %v8872_v6, %v8140_v21 }
  0xdd   : > { %v841_v8 = vpop.f32.mrf.mxu0  ;;  %v10161_v13 = vadd.f32 %v8882_v7, %v8146_v9 }
  0xde   : > { %v10159_v10 = vpop.f32.mrf.mxu1  ;;  %v842_v42 = vadd.f32 %v8140_v21, %v841_v8 }
  0xdf   : > { %v8873_v11 = vpop.f32.mrf.mxu0 }
  0xe0   : > { %v8883_v12 = vpop.f32.mrf.mxu1  ;;  %v853_v36 = vadd.f32 %v8873_v11, %v8140_v21 }
  0xe1   : > { %v10163_v14 = vadd.f32 %v8883_v12, %v8146_v9  ;;  %v844_v15 = vpop.f32.mrf.mxu0 }
  0xe2   : > { %v10165_v16 = vpop.f32.mrf.mxu1  ;;  %v10187_v39 = vpack.c.bf16 %v853_v36, %v850_v38  ;;  %v845_v40 = vadd.f32 %v8140_v21, %v844_v15 }
  0xe3   : > { %v8876_v19 = vpop.f32.mrf.mxu0 }
  0xe4   : > { %v8886_v20 = vpop.f32.mrf.mxu1  ;;  %v866_v23 = vadd.f32 %v8876_v19, %v8140_v21  ;;  %v10191_v45 = vpack.c.bf16 %v845_v40, %v842_v42  ;;  %v10199_v19 = vand.u32 127, %v1263_v41  ;;  %v1154_v40 = vpop.xlane.xlu0 %1153 }
  0xe5   : > { %v857_v22 = vpop.f32.mrf.mxu0  ;;  %v10174_v26 = vadd.f32 %v8886_v20, %v8146_v9 }
  0xe6   : > { %v10172_v24 = vpop.f32.mrf.mxu1  ;;  %v858_v27 = vadd.f32 %v8140_v21, %v857_v22 }
  0xe7   : > { %v8877_v25 = vpop.f32.mrf.mxu0 }
  0xe8   : > { %v869_v28 = vadd.f32 %v8877_v25, %v8140_v21  ;;  %v8887_v29 = vpop.f32.mrf.mxu1 }
  0xe9   : > { %v860_v30 = vpop.f32.mrf.mxu0  ;;  %v10176_v31 = vadd.f32 %v8887_v29, %v8146_v9 }
  0xea   : > { %v10178_v32 = vpack.c.bf16 %v869_v28, %v866_v23  ;;  %v861_v34 = vadd.f32 %v8140_v21, %v860_v30  ;;  %v10196_v50 = vpop.f32.mrf.mxu1  ;;  %v1157_v23 = vpop.xlane.xlu1 %1156 }
  0xec   : > { %v10182_v37 = vpack.c.bf16 %v861_v34, %v858_v27  ;;  %8935 = vmatprep.subr.bf16.mxu0 %v10178_v32 }
  0xed   : > { %8936 = vmatpush3.bf16.msra.mxu0 %v10178_v32 }
  0xee   : > { %8937 = vmatprep.subr.bf16.mxu0 %v10182_v37 }
  0xf1   : > { %8938 = vmatpush3.bf16.msra.mxu0 %v10182_v37 }
  0xf2   : > { %8939 = vmatprep.subr.bf16.mxu0 %v10187_v39 }
  0xf5   : > { %8940 = vmatpush3.bf16.msra.mxu0 %v10187_v39 }
  0xf6   : > { %8941 = vmatprep.subr.bf16.mxu0 %v10191_v45 }
  0xf9   : > { %8942 = vmatpush3.bf16.msra.mxu0 %v10191_v45 }
  0xfa   : > { %8979 = vmatprep.subr.bf16.mxu0 %v10178_v32 }
  0xfb   : > { %v8906_v53 = vpop.f32.mrf.mxu0 }
  0xfc   : > { %v1259_v54 = vpop.f32.mrf.mxu1  ;;  %v1276_v6 = vmul.f32 2.0, %v8906_v53 }
  0xfd   : > { %v1266_v55 = vrot.slane %v1259_v54, %v1265_v49  ;;  %v1087_v56 = vpop.f32.mrf.mxu0 }
  0xfe   : > { %v1275_v58 = vmul.f32 2.0, %v1087_v56  ;;  %v8934_v60 = vpop.f32.mrf.mxu1 }
  0xff   : > { %v1267_v61 = vadd.f32 %v1266_v55, %v1136_v46  ;;  %v8909_v62 = vpop.f32.mrf.mxu0  ;;  %v1270_v4 = vadd.f32 %v1266_v55, %v1145_v48  ;;  %v1268_v9 = vadd.f32 %v1266_v55, %v1139_v52  ;;  %v1269_v12 = vadd.f32 %v1266_v55, %v1142_v44 }
 0x100   : > { %v1278_v5 = vmul.f32 2.0, %v8909_v62  ;;  %v1272_v28 = vadd.f32 %v1266_v55, %v1151_v57  ;;  %v1271_v36 = vadd.f32 %v1266_v55, %v1148_v0  ;;  %v1274_v41 = vadd.f32 %v1266_v55, %v1157_v23 }
 0x101   : > { %v1283_v7 = vsub.f32 %v1267_v61, %v1275_v58  ;;  %v1097_v8 = vpop.f32.mrf.mxu0  ;;  %v1284_v22 = vsub.f32 %v1268_v9, %v1276_v6  ;;  %v1273_v58 = vadd.f32 %v1266_v55, %v1154_v40 }
 0x102   : > { %v1286_v11 = vsub.f32 %v1270_v4, %v1278_v5  ;;  %v1277_v15 = vmul.f32 2.0, %v1097_v8 }
 0x103   : > { %v1291_v20 = vmax.f32 %v1283_v7, 0.0  ;;  %v8912_v21 = vpop.f32.mrf.mxu0  ;;  %v1292_v38 = vmax.f32 %v1284_v22, 0.0 }
 0x104   : > { %v1294_v25 = vmax.f32 %v1286_v11, 0.0  ;;  %v1285_v27 = vsub.f32 %v1269_v12, %v1277_v15  ;;  %v1280_v29 = vmul.f32 2.0, %v8912_v21 }
 0x105   : > { %v1309_v30 = vand.u32 4294967232, %v1291_v20  ;;  %v1107_v34 = vpop.f32.mrf.mxu0  ;;  %v1310_v49 = vand.u32 4294967232, %v1292_v38 }
 0x106   : > { %v1312_v42 = vand.u32 4294967232, %v1294_v25  ;;  %v1293_v46 = vmax.f32 %v1285_v27, 0.0  ;;  %v1288_v44 = vsub.f32 %v1272_v28, %v1280_v29  ;;  %v1279_v47 = vmul.f32 2.0, %v1107_v34 }
 0x107   : > { %v8915_v48 = vpop.f32.mrf.mxu0  ;;  %v10202_v52 = vor.u32 %v1309_v30, %v10199_v19  ;;  %v10205_v61 = vor.u32 %v1310_v49, %v10199_v19 }
 0x108   : > { %v1311_v53 = vand.u32 4294967232, %v1293_v46  ;;  %v1296_v54 = vmax.f32 %v1288_v44, 0.0  ;;  %v1287_v56 = vsub.f32 %v1271_v36, %v1279_v47  ;;  %v1282_v57 = vmul.f32 2.0, %v8915_v48 }
 0x109   : > { %v1117_v60 = vpop.f32.mrf.mxu0  ;;  %v1326_v62 = vsel %vm1325_vm3, %v10202_v52, 2147483647  ;;  %v10210_v0 = vor.u32 %v1312_v42, %v10199_v19  ;;  %v1341_v8 = vsel %vm1325_vm3, %v10205_v61, 2147483647 }
 0x10a   : > { %v1314_v4 = vand.u32 4294967232, %v1296_v54  ;;  %v1295_v5 = vmax.f32 %v1287_v56, 0.0  ;;  %v1290_v6 = vsub.f32 %v1274_v41, %v1282_v57  ;;  %v1281_v7 = vmul.f32 2.0, %v1117_v60 }
 0x10b   : > { %v1328_v9 = vshra.s32 %v1326_v62, 16  ;;  %v1371_v55 = vsel %vm1325_vm3, %v10210_v0, 2147483647  ;;  %v10217_v11 = vor.u32 %v1311_v53, %v10199_v19  ;;  %v1343_v21 = vshra.s32 %v1341_v8, 16 }
 0x10c   : > { %v1313_v12 = vand.u32 4294967232, %v1295_v5  ;;  %v1298_v15 = vmax.f32 %v1290_v6, 0.0  ;;  %v1289_v20 = vsub.f32 %v1273_v58, %v1281_v7  ;;  %v1373_v23 = vshra.s32 %v1371_v55, 16 }
 0x10d   : > { %v1330_v22 = vcvt.s32.f32 %v1328_v9  ;;  %v1356_v25 = vsel %vm1325_vm3, %v10217_v11, 2147483647  ;;  %v10222_v27 = vor.u32 %v1314_v4, %v10199_v19  ;;  %v1345_v30 = vcvt.s32.f32 %v1343_v21 }
 0x10e   : > { %v1316_v28 = vand.u32 4294967232, %v1298_v15  ;;  %v1297_v29 = vmax.f32 %v1289_v20, 0.0  ;;  %v1358_v34 = vshra.s32 %v1356_v25, 16  ;;  %v10227_v38 = vor.u32 %v1313_v12, %v10199_v19 }
 0x10f   : > { %1331 = vmin.xlane.f32.xlu0 %v1330_v22  ;;  %v1401_v36 = vsel %vm1325_vm3, %v10222_v27, 2147483647  ;;  %1346 = vmin.xlane.f32.xlu1 %v1345_v30  ;;  %v1375_v47 = vcvt.s32.f32 %v1373_v23  ;;  %v1327_v6 = vand.u32 65535, %v1326_v62  ;;  %v1342_v7 = vand.u32 65535, %v1341_v8 }
 0x110   : > { %v1315_v40 = vand.u32 4294967232, %v1297_v29  ;;  %v1360_v42 = vcvt.s32.f32 %v1358_v34  ;;  %v10230_v46 = vor.u32 %v1316_v28, %v10199_v19  ;;  %v1386_v44 = vsel %vm1325_vm3, %v10227_v38, 2147483647 }
 0x111   : > { %v1403_v41 = vshra.s32 %v1401_v36, 16  ;;  %v1388_v48 = vshra.s32 %v1386_v44, 16  ;;  %v1329_v12 = vcvt.s32.f32 %v1327_v6  ;;  %v1357_v15 = vand.u32 65535, %v1356_v25 }
 0x112   : > { %v10235_v49 = vor.u32 %v1315_v40, %v10199_v19  ;;  %v1431_v53 = vsel %vm1325_vm3, %v10230_v46, 2147483647  ;;  %v1344_v21 = vcvt.s32.f32 %v1342_v7  ;;  %v1372_v23 = vand.u32 65535, %v1371_v55 }
 0x113   : > { %1361 = vmin.xlane.f32.xlu0 %v1360_v42  ;;  %1376 = vmin.xlane.f32.xlu1 %v1375_v47  ;;  %v1390_v54 = vcvt.s32.f32 %v1388_v48  ;;  %v1405_v58 = vcvt.s32.f32 %v1403_v41  ;;  %v1433_v60 = vshra.s32 %v1431_v53, 16  ;;  %v1359_v40 = vcvt.s32.f32 %v1357_v15 }
 0x114   : > { %v1416_v56 = vsel %vm1325_vm3, %v10235_v49, 2147483647  ;;  %v1387_v41 = vand.u32 65535, %v1386_v44  ;;  %v1402_v62 = vand.u32 65535, %v1401_v36  ;;  %v1432_v7 = vand.u32 65535, %v1431_v53 }
 0x115   : > { %v1418_v57 = vshra.s32 %v1416_v56, 16  ;;  %v1435_v5 = vcvt.s32.f32 %v1433_v60  ;;  %v1417_v55 = vand.u32 65535, %v1416_v56 }
 0x116   : > { %v1404_v6 = vcvt.s32.f32 %v1402_v62 }
 0x117   : > { %1391 = vmin.xlane.f32.xlu0 %v1390_v54  ;;  %v1420_v4 = vcvt.s32.f32 %v1418_v57  ;;  %1406 = vmin.xlane.f32.xlu1 %v1405_v58  ;;  %v1374_v57 = vcvt.s32.f32 %v1372_v23 }
 0x11b   : > { %1421 = vmin.xlane.f32.xlu0 %v1420_v4  ;;  %1436 = vmin.xlane.f32.xlu1 %v1435_v5 }
 0x198   : > { %v1332_v9 = vpop.xlane.xlu0 %1331  ;;  %v1347_v20 = vpop.xlane.xlu1 %1346 }
 0x199   : > { %vm1333_vm4 = vcmp.eq.f32.partialorder %v1330_v22, %v1332_v9  ;;  %vm1348_vm5 = vcmp.eq.f32.partialorder %v1345_v30, %v1347_v20  ;;  %v1389_v22 = vcvt.s32.f32 %v1387_v41  ;;  %v1338_v56 = vcvt.f32.s32 %v1332_v9 }
 0x19a   : > { %v1334_v28 = vsel %vm1333_vm4, %v1329_v12, inf  ;;  %v1349_v29 = vsel %vm1348_vm5, %v1344_v21, inf }
 0x19b   : > { %1335 = vmin.xlane.f32.xlu0 %v1334_v28  ;;  %1350 = vmin.xlane.f32.xlu1 %v1349_v29  ;;  %v1353_v28 = vcvt.f32.s32 %v1347_v20 }
 0x19c   : > { %v1362_v34 = vpop.xlane.xlu0 %1361  ;;  %v1377_v48 = vpop.xlane.xlu1 %1376 }
 0x19d   : > { %vm1363_vm6 = vcmp.eq.f32.partialorder %v1360_v42, %v1362_v34  ;;  %vm1378_vm7 = vcmp.eq.f32.partialorder %v1375_v47, %v1377_v48  ;;  %v1419_v42 = vcvt.s32.f32 %v1417_v55  ;;  %v1434_v47 = vcvt.s32.f32 %v1432_v7 }
 0x19e   : > { %v1364_v8 = vsel %vm1363_vm6, %v1359_v40, inf  ;;  %v1379_v60 = vsel %vm1378_vm7, %v1374_v57, inf  ;;  %v1383_v53 = vcvt.f32.s32 %v1377_v48  ;;  %v1354_v57 = vshll.u32 %v1353_v28, 16 }
 0x19f   : > { %1365 = vmin.xlane.f32.xlu0 %v1364_v8  ;;  %1380 = vmin.xlane.f32.xlu1 %v1379_v60 }
 0x1a0   : > { %v1392_v25 = vpop.xlane.xlu0 %1391  ;;  %v1407_v30 = vpop.xlane.xlu1 %1406  ;;  %v1384_v7 = vshll.u32 %v1383_v53, 16 }
 0x1a1   : > { %vm1393_vm8 = vcmp.eq.f32.partialorder %v1390_v54, %v1392_v25  ;;  %vm1408_vm9 = vcmp.eq.f32.partialorder %v1405_v58, %v1407_v30  ;;  %v1339_v54 = vshll.u32 %v1338_v56, 16  ;;  %v1368_v58 = vcvt.f32.s32 %v1362_v34 }
 0x1a2   : > { %v1394_v12 = vsel %vm1393_vm8, %v1389_v22, inf  ;;  %v1409_v15 = vsel %vm1408_vm9, %v1404_v6, inf  ;;  %v1413_v62 = vcvt.f32.s32 %v1407_v30  ;;  %v1398_v8 = vcvt.f32.s32 %v1392_v25 }
 0x1a3   : > { %1395 = vmin.xlane.f32.xlu0 %v1394_v12  ;;  %1410 = vmin.xlane.f32.xlu1 %v1409_v15  ;;  %v1369_v12 = vshll.u32 %v1368_v58, 16 }
 0x1a4   : > { %v1422_v44 = vpop.xlane.xlu0 %1421  ;;  %v1437_v36 = vpop.xlane.xlu1 %1436 }
 0x1a5   : > { %vm1423_vm10 = vcmp.eq.f32.partialorder %v1420_v4, %v1422_v44  ;;  %vm1438_vm11 = vcmp.eq.f32.partialorder %v1435_v5, %v1437_v36  ;;  %v1443_v22 = vcvt.f32.s32 %v1437_v36  ;;  %v1428_v55 = vcvt.f32.s32 %v1422_v44 }
 0x1a6   : > { %v1424_v21 = vsel %vm1423_vm10, %v1419_v42, inf  ;;  %v1439_v23 = vsel %vm1438_vm11, %v1434_v47, inf  ;;  %v1414_v42 = vshll.u32 %v1413_v62, 16  ;;  %v1399_v47 = vshll.u32 %v1398_v8, 16 }
 0x1a7   : > { %1425 = vmin.xlane.f32.xlu0 %v1424_v21  ;;  %1440 = vmin.xlane.f32.xlu1 %v1439_v23  ;;  %v1444_v21 = vshll.u32 %v1443_v22, 16  ;;  %v1429_v23 = vshll.u32 %v1428_v55, 16 }
 0x224   : > { %v1336_v29 = vpop.xlane.xlu0 %1335  ;;  %v1351_v40 = vpop.xlane.xlu1 %1350 }
 0x225   : > { %v1337_v41 = vcvt.f32.s32 %v1336_v29  ;;  %v1352_v60 = vcvt.f32.s32 %v1351_v40 }
 0x227   : > { %v1340_v4 = vadd.s32 %v1339_v54, %v1337_v41  ;;  %v1355_v5 = vadd.s32 %v1354_v57, %v1352_v60 }
 0x228   : > { %v1366_v6 = vpop.xlane.xlu0 %1365  ;;  %v1381_v9 = vpop.xlane.xlu1 %1380 }
 0x229   : > { %v1446_v15 = vand.u32 63, %v1340_v4  ;;  %v1367_v20 = vcvt.f32.s32 %v1366_v6  ;;  %v1447_v48 = vand.u32 63, %v1355_v5  ;;  %v1382_v34 = vcvt.f32.s32 %v1381_v9 }
 0x22b   : > { %v1370_v56 = vadd.s32 %v1369_v12, %v1367_v20  ;;  %vm1454_vm12 = vcmp.eq.s32.totalorder %v10199_v19, %v1446_v15  ;;  %vm1455_vm13 = vcmp.eq.s32.totalorder %v10199_v19, %v1447_v48  ;;  %v1385_v25 = vadd.s32 %v1384_v7, %v1382_v34 }
 0x22c   : > { %v1396_v30 = vpop.xlane.xlu0 %1395  ;;  %v8177_v44 = vsel %vm1454_vm12, 1.0, %v9822_v2  ;;  %v10245_v36 = vsel %vm1454_vm12, 2147483647, %v10202_v52  ;;  %v1411_v29 = vpop.xlane.xlu1 %1410  ;;  %v8178_v53 = vsel %vm1455_vm13, 1.0, %v9822_v2  ;;  %v10250_v58 = vsel %vm1455_vm13, 2147483647, %v10205_v61 }
 0x22d   : > { %v1448_v28 = vand.u32 63, %v1370_v56  ;;  %v1397_v54 = vcvt.f32.s32 %v1396_v30  ;;  %8967 = vmatprep.mubr.msk.f32.mxu1 %vm1325_vm3, %v8177_v44  ;;  %v1449_v40 = vand.u32 63, %v1385_v25  ;;  %v1412_v41 = vcvt.f32.s32 %v1411_v29 }
 0x22e   : > { %v1478_v57 = vpack.c.bf16 %v8178_v53, %v8177_v44  ;;  %8968 = vmatmul.mubr.msk.f32.vlgmr.msra.gmra.mxu1 %vm1325_vm3, %v8178_v53  ;;  %v10255_v62 = vsel %vm1325_vm3, %v10250_v58, 2147483647  ;;  %v10265_v61 = vsel %vm1325_vm3, %v10245_v36, 2147483647 }
 0x22f   : > { %v1400_v52 = vadd.s32 %v1399_v47, %v1397_v54  ;;  %vm10258_vm14 = vcmp.eq.s32.totalorder %v10199_v19, %v1448_v28  ;;  %v1721_v60 = vshra.s32 %v10255_v62, 16  ;;  %8996 = vmatpush3.msra.mxu1 %v9977_v3  ;;  %v1415_v22 = vadd.s32 %v1414_v42, %v1412_v41 }
 0x230   : > { %8943 = vmatprep.mubr.msk.bf16.mxu0 %vm1325_vm3, %v1478_v57  ;;  %v1426_v55 = vpop.xlane.xlu0 %1425  ;;  %v8179_v4 = vsel %vm10258_vm14, 1.0, %v9822_v2  ;;  %vm10273_vm15 = vcmp.eq.s32.totalorder %v10199_v19, %v1449_v40  ;;  %v1706_v6 = vshra.s32 %v10265_v61, 16  ;;  %8997 = vmatprep.subr.mxu1 %v10000_v18  ;;  %v1441_v12 = vpop.xlane.xlu1 %1440  ;;  %v10304_v30 = vsel %vm10258_vm14, 2147483647, %v10217_v11 }
 0x231   : > { %v1450_v7 = vand.u32 63, %v1400_v52  ;;  %v1427_v15 = vcvt.f32.s32 %v1426_v55  ;;  %8970 = vmatprep.mubr.msk.f32.mxu1 %vm1325_vm3, %v8179_v4  ;;  %v10280_v9 = vcvt.s32.f32 %v1721_v60  ;;  %v8180_v20 = vsel %vm10273_vm15, 1.0, %v9822_v2  ;;  %8998 = vmatpush3.msra.mxu1 %v10000_v18 }
 0x232   : > { %v1451_v42 = vand.u32 63, %v1415_v22  ;;  %v1442_v47 = vcvt.f32.s32 %v1441_v12  ;;  %v1479_v48 = vpack.c.bf16 %v8180_v20, %v8179_v4  ;;  %8971 = vmatmul.mubr.msk.f32.gmra.mxu1 %vm1325_vm3, %v8180_v20  ;;  %v10287_v34 = vcvt.s32.f32 %v1706_v6  ;;  %8999 = vmatprep.subr.mxu1 %v10026_v33 }
 0x233   : > { %v1430_v56 = vadd.s32 %v1429_v23, %v1427_v15  ;;  %1724 = vmin.xlane.f32.xlu1 %v10280_v9  ;;  %vm10292_vm2 = vcmp.eq.s32.totalorder %v10199_v19, %v1450_v7  ;;  %v10299_v18 = vsel %vm10273_vm15, 2147483647, %v10210_v0  ;;  %9000 = vmatpush3.msra.mxu1 %v10026_v33 }
 0x234   : > { %v1445_v23 = vadd.s32 %v1444_v21, %v1442_v47  ;;  %1709 = vmin.xlane.f32.xlu0 %v10287_v34  ;;  %8944 = vmatmul.mubr.msk.bf16.vlgmr.msra.gmra.mxu0 %vm1325_vm3, %v1479_v48  ;;  %v8181_v44 = vsel %vm10292_vm2, 1.0, %v9822_v2  ;;  %v10314_v0 = vsel %vm1325_vm3, %v10299_v18, 2147483647  ;;  %vm1459_vm4 = vcmp.eq.s32.totalorder %v10199_v19, %v1451_v42 }
 0x235   : > { %v1452_v28 = vand.u32 63, %v1430_v56  ;;  %8980 = vmatpush3.bf16.msra.mxu0 %v10178_v32  ;;  %8973 = vmatprep.mubr.msk.f32.mxu1 %vm1325_vm3, %v8181_v44  ;;  %v1751_v33 = vshra.s32 %v10314_v0, 16  ;;  %v8182_v11 = vsel %vm1459_vm4, 1.0, %v9822_v2  ;;  %v10323_v21 = vsel %vm1325_vm3, %v10304_v30, 2147483647 }
 0x236   : > { %v1453_v29 = vand.u32 63, %v1445_v23  ;;  %8981 = vmatprep.subr.bf16.mxu0 %v10182_v37  ;;  %v1480_v54 = vpack.c.bf16 %v8182_v11, %v8181_v44  ;;  %8974 = vmatmul.mubr.msk.f32.gmra.mxu1 %vm1325_vm3, %v8182_v11  ;;  %v1736_v53 = vshra.s32 %v10323_v21, 16  ;;  %v10329_v40 = vsel %vm1459_vm4, 2147483647, %v10222_v27 }
 0x237   : > { %v10331_v41 = vcvt.s32.f32 %v1751_v33  ;;  %vm1460_vm5 = vcmp.eq.s32.totalorder %v10199_v19, %v1452_v28  ;;  %v10336_v57 = vsel %vm1325_vm3, %v10329_v40, 2147483647  ;;  %v10341_v52 = vsel %vm10292_vm2, 2147483647, %v10227_v38  ;;  %9001 = vmatprep.subr.mxu1 %v10051_v43 }
 0x238   : > { %v10344_v8 = vcvt.s32.f32 %v1736_v53  ;;  %8947 = vmatprep.mubr.msk.bf16.mxu0 %vm1325_vm3, %v1480_v54  ;;  %v8183_v27 = vsel %vm1460_vm5, 1.0, %v9822_v2  ;;  %v1781_v60 = vshra.s32 %v10336_v57, 16  ;;  %v10351_v22 = vsel %vm1325_vm3, %v10341_v52, 2147483647  ;;  %9002 = vmatpush3.msra.mxu1 %v10051_v43 }
 0x239   : > { %1754 = vmin.xlane.f32.xlu1 %v10331_v41  ;;  %8982 = vmatpush3.bf16.msra.mxu0 %v10182_v37  ;;  %v1766_v38 = vshra.s32 %v10351_v22, 16  ;;  %vm1461_vm6 = vcmp.eq.s32.totalorder %v10199_v19, %v1453_v29  ;;  %v10359_v55 = vsel %vm1460_vm5, 2147483647, %v10235_v49  ;;  %v1705_v47 = vand.u32 65535, %v10265_v61 }
 0x23a   : > { %1739 = vmin.xlane.f32.xlu0 %v10344_v8  ;;  %8983 = vmatprep.subr.bf16.mxu0 %v10187_v39  ;;  %v10363_v4 = vcvt.s32.f32 %v1781_v60  ;;  %v8184_v5 = vsel %vm1461_vm6, 1.0, %v9822_v2  ;;  %v10367_v43 = vsel %vm1461_vm6, 2147483647, %v10230_v46  ;;  %v10371_v6 = vsel %vm1325_vm3, %v10359_v55, 2147483647 }
 0x23b   : > { %8976 = vmatprep.mubr.msk.f32.mxu1 %vm1325_vm3, %v8183_v27  ;;  %v10374_v7 = vcvt.s32.f32 %v1766_v38  ;;  %v1481_v49 = vpack.c.bf16 %v8184_v5, %v8183_v27  ;;  %v10378_v12 = vsel %vm1325_vm3, %v10367_v43, 2147483647  ;;  %v1796_v15 = vshra.s32 %v10371_v6, 16  ;;  %9003 = vmatprep.subr.mxu1 %v10072_v51 }
 0x23c   : > { %8977 = vmatmul.mubr.msk.f32.gmra.mxu1 %vm1325_vm3, %v8184_v5  ;;  %v1811_v46 = vshra.s32 %v10378_v12, 16  ;;  %v1707_v25 = vcvt.s32.f32 %v1705_v47  ;;  %v1780_v61 = vand.u32 65535, %v10336_v57  ;;  %v1795_v57 = vand.u32 65535, %v10371_v6 }
 0x23d   : > { %1784 = vmin.xlane.f32.xlu1 %v10363_v4  ;;  %8948 = vmatmul.mubr.msk.bf16.gmra.mxu0 %vm1325_vm3, %v1481_v49  ;;  %v1798_v42 = vcvt.s32.f32 %v1796_v15 }
 0x23e   : > { %1769 = vmin.xlane.f32.xlu0 %v10374_v7  ;;  %8984 = vmatpush3.bf16.msra.mxu0 %v10187_v39  ;;  %v1813_v20 = vcvt.s32.f32 %v1811_v46  ;;  %v1782_v29 = vcvt.s32.f32 %v1780_v61  ;;  %v1797_v38 = vcvt.s32.f32 %v1795_v57 }
 0x23f   : > { %8985 = vmatprep.subr.bf16.mxu0 %v10191_v45  ;;  %9004 = vmatpush3.msra.mxu1 %v10072_v51  ;;  %v1720_v51 = vand.u32 65535, %v10255_v62 }
 0x240   : > { %9005 = vmatprep.subr.mxu1 %v10089_v59 }
 0x241   : > { %1814 = vmin.xlane.f32.xlu1 %v1813_v20  ;;  %9006 = vmatpush3.msra.mxu1 %v10089_v59  ;;  %v1722_v48 = vcvt.s32.f32 %v1720_v51 }
 0x242   : > { %1799 = vmin.xlane.f32.xlu0 %v1798_v42  ;;  %8986 = vmatpush3.bf16.msra.mxu0 %v10191_v45 }
 0x243   : > { %9023 = vmatprep.subr.bf16.mxu0 %v10178_v32  ;;  %9007 = vmatprep.subr.mxu1 %v10102_v63 }
 0x244   : > { %9008 = vmatpush3.msra.mxu1 %v10102_v63  ;;  %v1750_v63 = vand.u32 65535, %v10314_v0 }
 0x245   : > { %9009 = vmatprep.subr.mxu1 %v10113_v1 }
 0x246   : > { %9010 = vmatpush3.msra.mxu1 %v10113_v1  ;;  %v1735_v1 = vand.u32 65535, %v10323_v21  ;;  %v1752_v62 = vcvt.s32.f32 %v1750_v63  ;;  %v1810_v21 = vand.u32 65535, %v10378_v12 }
 0x247   : > { %9039 = vmatprep.subr.mxu1 %v9977_v3 }
 0x248   : > { %v1737_v33 = vcvt.s32.f32 %v1735_v1  ;;  %v1812_v60 = vcvt.s32.f32 %v1810_v21 }
 0x2bc   : > { %v1725_v59 = vpop.xlane.xlu1 %1724 }
 0x2bd   : > { %v1710_v56 = vpop.xlane.xlu0 %1709  ;;  %vm1726_vm7 = vcmp.eq.f32.partialorder %v10280_v9, %v1725_v59  ;;  %v1765_v9 = vand.u32 65535, %v10351_v22 }
 0x2be   : > { %v1727_v23 = vsel %vm1726_vm7, %v1722_v48, inf  ;;  %vm1711_vm8 = vcmp.eq.f32.partialorder %v10287_v34, %v1710_v56  ;;  %v1716_v12 = vcvt.f32.s32 %v1710_v56 }
 0x2bf   : > { %1728 = vmin.xlane.f32.xlu1 %v1727_v23  ;;  %v1712_v44 = vsel %vm1711_vm8, %v1707_v25, inf  ;;  %v1767_v53 = vcvt.s32.f32 %v1765_v9 }
 0x2c0   : > { %1713 = vmin.xlane.f32.xlu0 %v1712_v44  ;;  %v1717_v47 = vshll.u32 %v1716_v12, 16 }
 0x2c2   : > { %v1755_v3 = vpop.xlane.xlu1 %1754 }
 0x2c3   : > { %v1740_v28 = vpop.xlane.xlu0 %1739  ;;  %vm1756_vm9 = vcmp.eq.f32.partialorder %v10331_v41, %v1755_v3  ;;  %v1761_v46 = vcvt.f32.s32 %v1755_v3 }
 0x2c4   : > { %v1757_v11 = vsel %vm1756_vm9, %v1752_v62, inf  ;;  %vm1741_vm10 = vcmp.eq.f32.partialorder %v10344_v8, %v1740_v28  ;;  %v1746_v48 = vcvt.f32.s32 %v1740_v28 }
 0x2c5   : > { %1758 = vmin.xlane.f32.xlu1 %v1757_v11  ;;  %v1742_v34 = vsel %vm1741_vm10, %v1737_v33, inf }
 0x2c6   : > { %1743 = vmin.xlane.f32.xlu0 %v1742_v34  ;;  %v1785_v0 = vpop.xlane.xlu1 %1784  ;;  %v1747_v62 = vshll.u32 %v1746_v48, 16 }
 0x2c7   : > { %v1770_v54 = vpop.xlane.xlu0 %1769  ;;  %vm1786_vm11 = vcmp.eq.f32.partialorder %v10363_v4, %v1785_v0  ;;  %v1731_v4 = vcvt.f32.s32 %v1725_v59  ;;  %v1791_v25 = vcvt.f32.s32 %v1785_v0 }
 0x2c8   : > { %v1787_v41 = vsel %vm1786_vm11, %v1782_v29, inf  ;;  %vm1771_vm12 = vcmp.eq.f32.partialorder %v10374_v7, %v1770_v54  ;;  %v1776_v61 = vcvt.f32.s32 %v1770_v54 }
 0x2c9   : > { %1788 = vmin.xlane.f32.xlu1 %v1787_v41  ;;  %v1772_v27 = vsel %vm1771_vm12, %v1767_v53, inf  ;;  %v1732_v6 = vshll.u32 %v1731_v4, 16 }
 0x2ca   : > { %1773 = vmin.xlane.f32.xlu0 %v1772_v27  ;;  %v1815_v8 = vpop.xlane.xlu1 %1814 }
 0x2cb   : > { %v1800_v22 = vpop.xlane.xlu0 %1799  ;;  %vm1816_vm13 = vcmp.eq.f32.partialorder %v1813_v20, %v1815_v8  ;;  %v1762_v20 = vshll.u32 %v1761_v46, 16  ;;  %v1821_v59 = vcvt.f32.s32 %v1815_v8 }
 0x2cc   : > { %v1817_v5 = vsel %vm1816_vm13, %v1812_v60, inf  ;;  %vm1801_vm14 = vcmp.eq.f32.partialorder %v1798_v42, %v1800_v22  ;;  %v1792_v42 = vshll.u32 %v1791_v25, 16  ;;  %v1806_v56 = vcvt.f32.s32 %v1800_v22 }
 0x2cd   : > { %1818 = vmin.xlane.f32.xlu1 %v1817_v5  ;;  %v1802_v49 = vsel %vm1801_vm14, %v1797_v38, inf  ;;  %v1777_v60 = vshll.u32 %v1776_v61, 16 }
 0x2ce   : > { %1803 = vmin.xlane.f32.xlu0 %v1802_v49  ;;  %v1822_v49 = vshll.u32 %v1821_v59, 16  ;;  %v1807_v46 = vshll.u32 %v1806_v56, 16 }
 0x348   : > { %v1729_v15 = vpop.xlane.xlu1 %1728 }
 0x349   : > { %v1730_v51 = vcvt.f32.s32 %v1729_v15  ;;  %v1714_v7 = vpop.xlane.xlu0 %1713 }
 0x34a   : > { %v1715_v23 = vcvt.f32.s32 %v1714_v7 }
 0x34b   : > { %v1733_v63 = vadd.s32 %v1732_v6, %v1730_v51  ;;  %v10439_v6 = vld [vmem:[%s9961_s27 + $0x38] sm:$0xff] }
 0x34c   : > { %v1718_v44 = vadd.s32 %v1717_v47, %v1715_v23  ;;  %v10446_v47 = vld [vmem:[%s9961_s27 + $0x30] sm:$0xff] }
 0x34d   : > { %v1825_v1 = vand.u32 63, %v1733_v63 }
 0x34e   : > { %v1824_v33 = vand.u32 63, %v1718_v44  ;;  %v1759_v9 = vpop.xlane.xlu1 %1758 }
 0x34f   : > { %vm1833_vm15 = vcmp.eq.s32.totalorder %v10199_v19, %v1825_v1  ;;  %v1760_v3 = vcvt.f32.s32 %v1759_v9  ;;  %v1744_v11 = vpop.xlane.xlu0 %1743 }
 0x350   : > { %v1745_v34 = vcvt.f32.s32 %v1744_v11  ;;  %vm1832_vm2 = vcmp.eq.s32.totalorder %v10199_v19, %v1824_v33  ;;  %v8198_v28 = vsel %vm1833_vm15, 1.0, %v9822_v2  ;;  %v10417_v0 = vsel %vm1833_vm15, 2147483647, %v10250_v58  ;;  %v10469_v33 = vld [vmem:[%s9961_s27 + $0x28] sm:$0xff] }
 0x351   : > { %v1763_v29 = vadd.s32 %v1762_v20, %v1760_v3  ;;  %v8197_v21 = vsel %vm1832_vm2, 1.0, %v9822_v2  ;;  %v10422_v54 = vsel %vm1325_vm3, %v10417_v0, 2147483647  ;;  %v10425_v53 = vsel %vm1832_vm2, 2147483647, %v10245_v36 }
 0x352   : > { %v1748_v57 = vadd.s32 %v1747_v62, %v1745_v34  ;;  %v1789_v41 = vpop.xlane.xlu1 %1788  ;;  %v1856_v27 = vpack.c.bf16 %v8198_v28, %v8197_v21  ;;  %9011 = vmatprep.mubr.msk.f32.mxu1 %vm1325_vm3, %v8197_v21  ;;  %v2099_v8 = vshra.s32 %v10422_v54, 16  ;;  %v10431_v58 = vsel %vm1325_vm3, %v10425_v53, 2147483647 }
 0x353   : > { %v1827_v22 = vand.u32 63, %v1763_v29  ;;  %v1790_v38 = vcvt.f32.s32 %v1789_v41  ;;  %v1774_v5 = vpop.xlane.xlu0 %1773  ;;  %9012 = vmatmul.mubr.msk.f32.vlgmr.msra.gmra.mxu1 %vm1325_vm3, %v8198_v28  ;;  %v2084_v36 = vshra.s32 %v10431_v58, 16  ;;  %v10487_v28 = vld [vmem:[%s9961_s27 + $0x20] sm:$0xff]  ;;  %v2098_v34 = vand.u32 65535, %v10422_v54 }
 0x354   : > { %v1826_v4 = vand.u32 63, %v1748_v57  ;;  %v1775_v12 = vcvt.f32.s32 %v1774_v5  ;;  %8987 = vmatprep.mubr.msk.bf16.mxu0 %vm1325_vm3, %v1856_v27  ;;  %v10436_v15 = vcvt.s32.f32 %v2099_v8  ;;  %9040 = vmatpush3.msra.mxu1 %v10439_v6 }
 0x355   : > { %v1793_v51 = vadd.s32 %v1792_v42, %v1790_v38  ;;  %v10442_v7 = vcvt.s32.f32 %v2084_v36  ;;  %vm1835_vm4 = vcmp.eq.s32.totalorder %v10199_v19, %v1827_v22  ;;  %9041 = vmatprep.subr.mxu1 %v10446_v47  ;;  %v10512_v22 = vld [vmem:[%s9961_s27 + $0x18] sm:$0xff] }
 0x356   : > { %v1778_v48 = vadd.s32 %v1777_v60, %v1775_v12  ;;  %v1819_v25 = vpop.xlane.xlu1 %1818  ;;  %vm10450_vm5 = vcmp.eq.s32.totalorder %v10199_v19, %v1826_v4  ;;  %2102 = vmin.xlane.f32.xlu1 %v10436_v15  ;;  %v8200_v63 = vsel %vm1835_vm4, 1.0, %v9822_v2  ;;  %v10457_v44 = vsel %vm1835_vm4, 2147483647, %v10299_v18  ;;  %9042 = vmatpush3.msra.mxu1 %v10446_v47 }
 0x357   : > { %v1829_v20 = vand.u32 63, %v1793_v51  ;;  %v1820_v1 = vcvt.f32.s32 %v1819_v25  ;;  %v1804_v62 = vpop.xlane.xlu0 %1803  ;;  %v8199_v42 = vsel %vm10450_vm5, 1.0, %v9822_v2  ;;  %2087 = vmin.xlane.f32.xlu0 %v10442_v7  ;;  %v10466_v61 = vsel %vm1325_vm3, %v10457_v44, 2147483647  ;;  %9043 = vmatprep.subr.mxu1 %v10469_v33 }
 0x358   : > { %v1828_v18 = vand.u32 63, %v1778_v48  ;;  %v1805_v9 = vcvt.f32.s32 %v1804_v62  ;;  %9014 = vmatprep.mubr.msk.f32.mxu1 %vm1325_vm3, %v8199_v42  ;;  %v1857_v59 = vpack.c.bf16 %v8200_v63, %v8199_v42  ;;  %v2129_v56 = vshra.s32 %v10466_v61, 16  ;;  %9044 = vmatpush3.msra.mxu1 %v10469_v33  ;;  %v10572_v42 = vld [vmem:[%s9961_s27 + $0x10] sm:$0xff] }
 0x359   : > { %v1823_v3 = vadd.s32 %v1822_v49, %v1820_v1  ;;  %9015 = vmatmul.mubr.msk.f32.gmra.mxu1 %vm1325_vm3, %v8200_v63  ;;  %v10479_v11 = vsel %vm10450_vm5, 2147483647, %v10304_v30  ;;  %vm10482_vm6 = vcmp.eq.s32.totalorder %v10199_v19, %v1829_v20  ;;  %9045 = vmatprep.subr.mxu1 %v10487_v28 }
 0x35a   : > { %v1808_v29 = vadd.s32 %v1807_v46, %v1805_v9  ;;  %8988 = vmatmul.mubr.msk.bf16.vlgmr.msra.gmra.mxu0 %vm1325_vm3, %v1857_v59  ;;  %vm10492_vm7 = vcmp.eq.s32.totalorder %v10199_v19, %v1828_v18  ;;  %v10496_v57 = vcvt.s32.f32 %v2129_v56  ;;  %v10500_v30 = vsel %vm1325_vm3, %v10479_v11, 2147483647  ;;  %9046 = vmatpush3.msra.mxu1 %v10487_v28  ;;  %v10583_v56 = vld [vmem:[%s9961_s27 + $0x8] sm:$0xff] }
 0x35b   : > { %v1831_v41 = vand.u32 63, %v1823_v3  ;;  %9024 = vmatpush3.bf16.msra.mxu0 %v10178_v32  ;;  %v8201_v27 = vsel %vm10492_vm7, 1.0, %v9822_v2  ;;  %v2114_v8 = vshra.s32 %v10500_v30, 16  ;;  %v8202_v60 = vsel %vm10482_vm6, 1.0, %v9822_v2  ;;  %9047 = vmatprep.subr.mxu1 %v10512_v22  ;;  %v10590_v3 = vld [vmem:[%s9961_s27] sm:$0xff] }
 0x35c   : > { %v1830_v38 = vand.u32 63, %v1808_v29  ;;  %9025 = vmatprep.subr.bf16.mxu0 %v10182_v37  ;;  %9017 = vmatprep.mubr.msk.f32.mxu1 %vm1325_vm3, %v8201_v27  ;;  %v1858_v5 = vpack.c.bf16 %v8202_v60, %v8201_v27  ;;  %v10520_v36 = vsel %vm10482_vm6, 2147483647, %v10329_v40  ;;  %v10525_v49 = vsel %vm10492_vm7, 2147483647, %v10341_v52 }
 0x35d   : > { %2132 = vmin.xlane.f32.xlu1 %v10496_v57  ;;  %v10528_v4 = vcvt.s32.f32 %v2114_v8  ;;  %9018 = vmatmul.mubr.msk.f32.gmra.mxu1 %vm1325_vm3, %v8202_v60  ;;  %v10533_v12 = vsel %vm1325_vm3, %v10520_v36, 2147483647  ;;  %v10537_v46 = vsel %vm1325_vm3, %v10525_v49, 2147483647  ;;  %vm1839_vm8 = vcmp.eq.s32.totalorder %v10199_v19, %v1831_v41 }
 0x35e   : > { %8991 = vmatprep.mubr.msk.bf16.mxu0 %vm1325_vm3, %v1858_v5  ;;  %vm1838_vm9 = vcmp.eq.s32.totalorder %v10199_v19, %v1830_v38  ;;  %v2159_v40 = vshra.s32 %v10533_v12, 16  ;;  %v2144_v52 = vshra.s32 %v10537_v46, 16  ;;  %v8204_v51 = vsel %vm1839_vm8, 1.0, %v9822_v2  ;;  %9048 = vmatpush3.msra.mxu1 %v10512_v22 }
 0x35f   : > { %2117 = vmin.xlane.f32.xlu0 %v10528_v4  ;;  %9026 = vmatpush3.bf16.msra.mxu0 %v10182_v37  ;;  %v8203_v48 = vsel %vm1838_vm9, 1.0, %v9822_v2  ;;  %v10550_v25 = vsel %vm1839_vm8, 2147483647, %v10367_v43  ;;  %v10553_v23 = vsel %vm1838_vm9, 2147483647, %v10359_v55  ;;  %v2083_v29 = vand.u32 65535, %v10431_v58 }
 0x360   : > { %9027 = vmatprep.subr.bf16.mxu0 %v10187_v39  ;;  %9020 = vmatprep.mubr.msk.f32.mxu1 %vm1325_vm3, %v8203_v48  ;;  %v10557_v63 = vcvt.s32.f32 %v2159_v40  ;;  %v10559_v20 = vcvt.s32.f32 %v2144_v52  ;;  %v1859_v1 = vpack.c.bf16 %v8204_v51, %v8203_v48  ;;  %v10563_v62 = vsel %vm1325_vm3, %v10550_v25, 2147483647 }
 0x361   : > { %9021 = vmatmul.mubr.msk.f32.gmra.mxu1 %vm1325_vm3, %v8204_v51  ;;  %v2189_v43 = vshra.s32 %v10563_v62, 16  ;;  %v10569_v55 = vsel %vm1325_vm3, %v10553_v23, 2147483647  ;;  %9049 = vmatprep.subr.mxu1 %v10572_v42  ;;  %v2100_v41 = vcvt.s32.f32 %v2098_v34  ;;  %v2085_v8 = vcvt.s32.f32 %v2083_v29 }
 0x362   : > { %2162 = vmin.xlane.f32.xlu1 %v10557_v63  ;;  %8992 = vmatmul.mubr.msk.bf16.gmra.mxu0 %vm1325_vm3, %v1859_v1  ;;  %v2174_v18 = vshra.s32 %v10569_v55, 16  ;;  %v2128_v5 = vand.u32 65535, %v10466_v61  ;;  %v2113_v40 = vand.u32 65535, %v10500_v30  ;;  %v2158_v58 = vand.u32 65535, %v10533_v12 }
 0x363   : > { %2147 = vmin.xlane.f32.xlu0 %v10559_v20  ;;  %9028 = vmatpush3.bf16.msra.mxu0 %v10187_v39  ;;  %v2191_v9 = vcvt.s32.f32 %v2189_v43  ;;  %v2143_v1 = vand.u32 65535, %v10537_v46  ;;  %v2188_v30 = vand.u32 65535, %v10563_v62  ;;  %v2173_v12 = vand.u32 65535, %v10569_v55 }
 0x364   : > { %9029 = vmatprep.subr.bf16.mxu0 %v10191_v45  ;;  %v2176_v59 = vcvt.s32.f32 %v2174_v18  ;;  %9050 = vmatpush3.msra.mxu1 %v10572_v42  ;;  %v2130_v54 = vcvt.s32.f32 %v2128_v5  ;;  %v2160_v43 = vcvt.s32.f32 %v2158_v58 }
 0x365   : > { %9051 = vmatprep.subr.mxu1 %v10583_v56  ;;  %v2190_v29 = vcvt.s32.f32 %v2188_v30  ;;  %v2175_v62 = vcvt.s32.f32 %v2173_v12 }
 0x366   : > { %2192 = vmin.xlane.f32.xlu1 %v2191_v9  ;;  %9052 = vmatpush3.msra.mxu1 %v10583_v56 }
 0x367   : > { %2177 = vmin.xlane.f32.xlu0 %v2176_v59  ;;  %9030 = vmatpush3.bf16.msra.mxu0 %v10191_v45 }
 0x368   : > { %9067 = vmatprep.subr.bf16.mxu0 %v10178_v32  ;;  %9053 = vmatprep.subr.mxu1 %v10590_v3 }
 0x369   : > { %9054 = vmatpush3.msra.mxu1 %v10590_v3 }
 0x36a   : > { %9083 = vmatprep.subr.mxu1 %v10439_v6 }
 0x3df   : > { %v2103_v21 = vpop.xlane.xlu1 %2102 }
 0x3e0   : > { %v2088_v27 = vpop.xlane.xlu0 %2087  ;;  %vm2104_vm10 = vcmp.eq.f32.partialorder %v10436_v15, %v2103_v21  ;;  %v2115_v15 = vcvt.s32.f32 %v2113_v40  ;;  %v2109_v55 = vcvt.f32.s32 %v2103_v21 }
 0x3e1   : > { %v2105_v60 = vsel %vm2104_vm10, %v2100_v41, inf  ;;  %vm2089_vm11 = vcmp.eq.f32.partialorder %v10442_v7, %v2088_v27 }
 0x3e2   : > { %2106 = vmin.xlane.f32.xlu1 %v2105_v60  ;;  %v2090_v38 = vsel %vm2089_vm11, %v2085_v8, inf  ;;  %v2094_v60 = vcvt.f32.s32 %v2088_v27 }
 0x3e3   : > { %2091 = vmin.xlane.f32.xlu0 %v2090_v38  ;;  %v2110_v38 = vshll.u32 %v2109_v55, 16 }
 0x3e6   : > { %v2133_v52 = vpop.xlane.xlu1 %2132 }
 0x3e7   : > { %vm2134_vm12 = vcmp.eq.f32.partialorder %v10496_v57, %v2133_v52  ;;  %v2145_v57 = vcvt.s32.f32 %v2143_v1 }
 0x3e8   : > { %v2118_v51 = vpop.xlane.xlu0 %2117  ;;  %v2135_v48 = vsel %vm2134_vm12, %v2130_v54, inf  ;;  %v2095_v54 = vshll.u32 %v2094_v60, 16 }
 0x3e9   : > { %2136 = vmin.xlane.f32.xlu1 %v2135_v48  ;;  %vm2119_vm13 = vcmp.eq.f32.partialorder %v10528_v4, %v2118_v51  ;;  %v2139_v48 = vcvt.f32.s32 %v2133_v52 }
 0x3ea   : > { %v2120_v7 = vsel %vm2119_vm13, %v2115_v15, inf  ;;  %v2124_v15 = vcvt.f32.s32 %v2118_v51 }
 0x3eb   : > { %2121 = vmin.xlane.f32.xlu0 %v2120_v7  ;;  %v10605_v61 = vpop.xlane.xlu1 %2162  ;;  %v2140_v30 = vshll.u32 %v2139_v48, 16 }
 0x3ec   : > { %v10608_v18 = vpop.xlane.xlu0 %2147  ;;  %vm2164_vm14 = vcmp.eq.f32.partialorder %v10557_v63, %v10605_v61 }
 0x3ed   : > { %v2165_v34 = vsel %vm2164_vm14, %v2160_v43, inf  ;;  %vm2149_vm15 = vcmp.eq.f32.partialorder %v10559_v20, %v10608_v18  ;;  %v2154_v52 = vcvt.f32.s32 %v10608_v18 }
 0x3ee   : > { %2166 = vmin.xlane.f32.xlu1 %v2165_v34  ;;  %v2150_v4 = vsel %vm2149_vm15, %v2145_v57, inf  ;;  %v2125_v57 = vshll.u32 %v2124_v15, 16 }
 0x3ef   : > { %2151 = vmin.xlane.f32.xlu0 %v2150_v4  ;;  %v10615_v46 = vpop.xlane.xlu1 %2192 }
 0x3f0   : > { %v10617_v41 = vpop.xlane.xlu0 %2177  ;;  %vm2194_vm2 = vcmp.eq.f32.partialorder %v2191_v9, %v10615_v46  ;;  %v2199_v55 = vcvt.f32.s32 %v10615_v46 }
 0x3f1   : > { %v2195_v8 = vsel %vm2194_vm2, %v2190_v29, inf  ;;  %vm2179_vm4 = vcmp.eq.f32.partialorder %v2176_v59, %v10617_v41  ;;  %v2169_v59 = vcvt.f32.s32 %v10605_v61  ;;  %v2184_v18 = vcvt.f32.s32 %v10617_v41 }
 0x3f2   : > { %2196 = vmin.xlane.f32.xlu1 %v2195_v8  ;;  %v2180_v63 = vsel %vm2179_vm4, %v2175_v62, inf }
 0x3f3   : > { %2181 = vmin.xlane.f32.xlu0 %v2180_v63  ;;  %v2170_v46 = vshll.u32 %v2169_v59, 16 }
 0x46b   : > { %v2107_v20 = vpop.xlane.xlu1 %2106 }
 0x46c   : > { %v2108_v5 = vcvt.f32.s32 %v2107_v20  ;;  %v2092_v40 = vpop.xlane.xlu0 %2091 }
 0x46d   : > { %v2093_v58 = vcvt.f32.s32 %v2092_v40 }
 0x46e   : > { %v2111_v1 = vadd.s32 %v2110_v38, %v2108_v5 }
 0x46f   : > { %v2096_v7 = vadd.s32 %v2095_v54, %v2093_v58  ;;  %v2155_v54 = vshll.u32 %v2154_v52, 16 }
 0x470   : > { %v2203_v9 = vand.u32 63, %v2111_v1 }
 0x471   : > { %v2202_v43 = vand.u32 63, %v2096_v7  ;;  %v2200_v7 = vshll.u32 %v2199_v55, 16 }
 0x472   : > { %vm2211_vm5 = vcmp.eq.s32.totalorder %v10199_v19, %v2203_v9  ;;  %v2137_v21 = vpop.xlane.xlu1 %2136 }
 0x473   : > { %v2138_v27 = vcvt.f32.s32 %v2137_v21  ;;  %vm2210_vm6 = vcmp.eq.s32.totalorder %v10199_v19, %v2202_v43  ;;  %v8218_v12 = vsel %vm2211_vm5, 1.0, %v9822_v2  ;;  %v10626_v34 = vsel %vm2211_vm5, 2147483647, %v10417_v0 }
 0x474   : > { %v2122_v51 = vpop.xlane.xlu0 %2121  ;;  %v8217_v4 = vsel %vm2210_vm6, 1.0, %v9822_v2  ;;  %v10632_v29 = vsel %vm1325_vm3, %v10626_v34, 2147483647  ;;  %v10635_v61 = vsel %vm2210_vm6, 2147483647, %v10425_v53 }
 0x475   : > { %v2141_v62 = vadd.s32 %v2140_v30, %v2138_v27  ;;  %v2123_v8 = vcvt.f32.s32 %v2122_v51  ;;  %v2234_v63 = vpack.c.bf16 %v8218_v12, %v8217_v4  ;;  %9055 = vmatprep.mubr.msk.f32.mxu1 %vm1325_vm3, %v8217_v4  ;;  %v2477_v0 = vshra.s32 %v10632_v29, 16 }
 0x476   : > { %9056 = vmatmul.mubr.msk.f32.vlgmr.msra.gmra.mxu1 %vm1325_vm3, %v8218_v12  ;;  %v10644_v60 = vsel %vm1325_vm3, %v10635_v61, 2147483647 }
 0x477   : > { %v2205_v20 = vand.u32 63, %v2141_v62  ;;  %v2126_v53 = vadd.s32 %v2125_v57, %v2123_v8  ;;  %v2167_v38 = vpop.xlane.xlu1 %2166  ;;  %9031 = vmatprep.mubr.msk.bf16.mxu0 %vm1325_vm3, %v2234_v63  ;;  %v10647_v5 = vcvt.s32.f32 %v2477_v0  ;;  %v2462_v40 = vshra.s32 %v10644_v60, 16  ;;  %9084 = vmatpush3.msra.mxu1 %v10439_v6 }
 0x478   : > { %v2168_v41 = vcvt.f32.s32 %v2167_v38  ;;  %v2152_v58 = vpop.xlane.xlu0 %2151  ;;  %9085 = vmatprep.subr.mxu1 %v10446_v47  ;;  %v2185_v57 = vshll.u32 %v2184_v18, 16 }
 0x479   : > { %v2204_v48 = vand.u32 63, %v2126_v53  ;;  %v2153_v15 = vcvt.f32.s32 %v2152_v58  ;;  %2480 = vmin.xlane.f32.xlu1 %v10647_v5  ;;  %v10653_v1 = vcvt.s32.f32 %v2462_v40  ;;  %vm2213_vm7 = vcmp.eq.s32.totalorder %v10199_v19, %v2205_v20  ;;  %9086 = vmatpush3.msra.mxu1 %v10446_v47 }
 0x47a   : > { %v2171_v9 = vadd.s32 %v2170_v46, %v2168_v41  ;;  %v8220_v43 = vsel %vm2213_vm7, 1.0, %v9822_v2  ;;  %v10659_v30 = vsel %vm2213_vm7, 2147483647, %v10457_v44  ;;  %9087 = vmatprep.subr.mxu1 %v10469_v33 }
 0x47b   : > { %v2156_v59 = vadd.s32 %v2155_v54, %v2153_v15  ;;  %v2197_v21 = vpop.xlane.xlu1 %2196  ;;  %vm2212_vm8 = vcmp.eq.s32.totalorder %v10199_v19, %v2204_v48  ;;  %2465 = vmin.xlane.f32.xlu0 %v10653_v1  ;;  %v10666_v27 = vsel %vm1325_vm3, %v10659_v30, 2147483647  ;;  %9088 = vmatpush3.msra.mxu1 %v10469_v33 }
 0x47c   : > { %v2207_v12 = vand.u32 63, %v2171_v9  ;;  %v2198_v52 = vcvt.f32.s32 %v2197_v21  ;;  %v2182_v51 = vpop.xlane.xlu0 %2181  ;;  %v8219_v44 = vsel %vm2212_vm8, 1.0, %v9822_v2  ;;  %v2507_v4 = vshra.s32 %v10666_v27, 16  ;;  %9089 = vmatprep.subr.mxu1 %v10487_v28 }
 0x47d   : > { %v2206_v62 = vand.u32 63, %v2156_v59  ;;  %v2183_v8 = vcvt.f32.s32 %v2182_v51  ;;  %9058 = vmatprep.mubr.msk.f32.mxu1 %vm1325_vm3, %v8219_v44  ;;  %v2235_v63 = vpack.c.bf16 %v8220_v43, %v8219_v44  ;;  %v10674_v0 = vsel %vm2212_vm8, 2147483647, %v10479_v11  ;;  %9090 = vmatpush3.msra.mxu1 %v10487_v28 }
 0x47e   : > { %v2201_v55 = vadd.s32 %v2200_v7, %v2198_v52  ;;  %9059 = vmatmul.mubr.msk.f32.gmra.mxu1 %vm1325_vm3, %v8220_v43  ;;  %v10678_v18 = vcvt.s32.f32 %v2507_v4  ;;  %v10682_v20 = vsel %vm1325_vm3, %v10674_v0, 2147483647  ;;  %vm2215_vm9 = vcmp.eq.s32.totalorder %v10199_v19, %v2207_v12  ;;  %9091 = vmatprep.subr.mxu1 %v10512_v22 }
 0x47f   : > { %v2186_v53 = vadd.s32 %v2185_v57, %v2183_v8  ;;  %9032 = vmatmul.mubr.msk.bf16.vlgmr.msra.gmra.mxu0 %vm1325_vm3, %v2235_v63  ;;  %vm2214_vm10 = vcmp.eq.s32.totalorder %v10199_v19, %v2206_v62  ;;  %v2492_v11 = vshra.s32 %v10682_v20, 16  ;;  %v8222_v38 = vsel %vm2215_vm9, 1.0, %v9822_v2  ;;  %9092 = vmatpush3.msra.mxu1 %v10512_v22 }
 0x480   : > { %v2209_v40 = vand.u32 63, %v2201_v55  ;;  %9068 = vmatpush3.bf16.msra.mxu0 %v10178_v32  ;;  %v8221_v46 = vsel %vm2214_vm10, 1.0, %v9822_v2  ;;  %2510 = vmin.xlane.f32.xlu1 %v10678_v18  ;;  %v10695_v54 = vsel %vm2215_vm9, 2147483647, %v10520_v36  ;;  %v10698_v41 = vsel %vm2214_vm10, 2147483647, %v10525_v49 }
 0x481   : > { %v2208_v58 = vand.u32 63, %v2186_v53  ;;  %9069 = vmatprep.subr.bf16.mxu0 %v10182_v37  ;;  %9061 = vmatprep.mubr.msk.f32.mxu1 %vm1325_vm3, %v8221_v46  ;;  %v10702_v48 = vcvt.s32.f32 %v2492_v11  ;;  %v2236_v15 = vpack.c.bf16 %v8222_v38, %v8221_v46  ;;  %v10706_v7 = vsel %vm1325_vm3, %v10695_v54, 2147483647 }
 0x482   : > { %9062 = vmatmul.mubr.msk.f32.gmra.mxu1 %vm1325_vm3, %v8222_v38  ;;  %v2537_v36 = vshra.s32 %v10706_v7, 16  ;;  %v10712_v49 = vsel %vm1325_vm3, %v10698_v41, 2147483647  ;;  %vm2217_vm11 = vcmp.eq.s32.totalorder %v10199_v19, %v2209_v40  ;;  %9093 = vmatprep.subr.mxu1 %v10572_v42  ;;  %v2476_v63 = vand.u32 65535, %v10632_v29 }
 0x483   : > { %2495 = vmin.xlane.f32.xlu0 %v10702_v48  ;;  %9035 = vmatprep.mubr.msk.bf16.mxu0 %vm1325_vm3, %v2236_v15  ;;  %vm2216_vm12 = vcmp.eq.s32.totalorder %v10199_v19, %v2208_v58  ;;  %v2522_v9 = vshra.s32 %v10712_v49, 16  ;;  %v8224_v43 = vsel %vm2217_vm11, 1.0, %v9822_v2  ;;  %v10722_v57 = vsel %vm2217_vm11, 2147483647, %v10550_v25 }
 0x484   : > { %9070 = vmatpush3.bf16.msra.mxu0 %v10182_v37  ;;  %v8223_v59 = vsel %vm2216_vm12, 1.0, %v9822_v2  ;;  %v2539_v21 = vcvt.s32.f32 %v2537_v36  ;;  %v10728_v12 = vsel %vm1325_vm3, %v10722_v57, 2147483647  ;;  %v10731_v52 = vsel %vm2216_vm12, 2147483647, %v10553_v23  ;;  %9094 = vmatpush3.msra.mxu1 %v10572_v42 }
 0x485   : > { %9071 = vmatprep.subr.bf16.mxu0 %v10187_v39  ;;  %9064 = vmatprep.mubr.msk.f32.mxu1 %vm1325_vm3, %v8223_v59  ;;  %v2524_v25 = vcvt.s32.f32 %v2522_v9  ;;  %v2237_v51 = vpack.c.bf16 %v8224_v43, %v8223_v59  ;;  %v2567_v44 = vshra.s32 %v10728_v12, 16  ;;  %v2550_v4 = vsel %vm1325_vm3, %v10731_v52, 2147483647 }
 0x486   : > { %2540 = vmin.xlane.f32.xlu1 %v2539_v21  ;;  %9065 = vmatmul.mubr.msk.f32.gmra.mxu1 %vm1325_vm3, %v8224_v43  ;;  %v2552_v62 = vshra.s32 %v2550_v4, 16  ;;  %v2461_v55 = vand.u32 65535, %v10644_v60  ;;  %v2478_v11 = vcvt.s32.f32 %v2476_v63  ;;  %v2506_v58 = vand.u32 65535, %v10666_v27 }
 0x487   : > { %2525 = vmin.xlane.f32.xlu0 %v2524_v25  ;;  %9036 = vmatmul.mubr.msk.bf16.gmra.mxu0 %vm1325_vm3, %v2237_v51  ;;  %v2569_v23 = vcvt.s32.f32 %v2567_v44  ;;  %v2491_v36 = vand.u32 65535, %v10682_v20  ;;  %v2536_v43 = vand.u32 65535, %v10706_v7  ;;  %v2521_v51 = vand.u32 65535, %v10712_v49 }
 0x488   : > { %9072 = vmatpush3.bf16.msra.mxu0 %v10187_v39  ;;  %v2554_v8 = vcvt.s32.f32 %v2552_v62  ;;  %9095 = vmatprep.subr.mxu1 %v10583_v56  ;;  %v2463_v46 = vcvt.s32.f32 %v2461_v55  ;;  %v2508_v29 = vcvt.s32.f32 %v2506_v58  ;;  %v2566_v20 = vand.u32 65535, %v10728_v12 }
 0x489   : > { %9073 = vmatprep.subr.bf16.mxu0 %v10191_v45  ;;  %9096 = vmatpush3.msra.mxu1 %v10583_v56  ;;  %v2493_v59 = vcvt.s32.f32 %v2491_v36  ;;  %v2538_v44 = vcvt.s32.f32 %v2536_v43  ;;  %v2551_v7 = vand.u32 65535, %v2550_v4 }
 0x48a   : > { %2570 = vmin.xlane.f32.xlu1 %v2569_v23  ;;  %9097 = vmatprep.subr.mxu1 %v10590_v3  ;;  %v2568_v55 = vcvt.s32.f32 %v2566_v20 }
 0x48b   : > { %2555 = vmin.xlane.f32.xlu0 %v2554_v8  ;;  %9098 = vmatpush3.msra.mxu1 %v10590_v3  ;;  %v2553_v12 = vcvt.s32.f32 %v2551_v7 }
 0x48c   : > { %9074 = vmatpush3.bf16.msra.mxu0 %v10191_v45  ;;  %9127 = vmatprep.subr.mxu1 %v10439_v6 }
 0x48d   : > { %9111 = vmatprep.subr.bf16.mxu0 %v10178_v32 }
 0x502   : > { %v2481_v53 = vpop.xlane.xlu1 %2480 }
 0x503   : > { %vm2482_vm13 = vcmp.eq.f32.partialorder %v10647_v5, %v2481_v53  ;;  %v2487_v4 = vcvt.f32.s32 %v2481_v53 }
 0x504   : > { %v2466_v38 = vpop.xlane.xlu0 %2465  ;;  %v2483_v40 = vsel %vm2482_vm13, %v2478_v11, inf }
 0x505   : > { %2484 = vmin.xlane.f32.xlu1 %v2483_v40  ;;  %vm2467_vm14 = vcmp.eq.f32.partialorder %v10653_v1, %v2466_v38  ;;  %v2488_v58 = vshll.u32 %v2487_v4, 16 }
 0x506   : > { %v2468_v15 = vsel %vm2467_vm14, %v2463_v46, inf  ;;  %v2472_v46 = vcvt.f32.s32 %v2466_v38 }
 0x507   : > { %2469 = vmin.xlane.f32.xlu0 %v2468_v15 }
 0x509   : > { %v2511_v9 = vpop.xlane.xlu1 %2510 }
 0x50a   : > { %vm2512_vm15 = vcmp.eq.f32.partialorder %v10678_v18, %v2511_v9  ;;  %v2523_v18 = vcvt.s32.f32 %v2521_v51 }
 0x50b   : > { %v2513_v60 = vsel %vm2512_vm15, %v2508_v29, inf  ;;  %v2473_v29 = vshll.u32 %v2472_v46, 16 }
 0x50c   : > { %v2496_v5 = vpop.xlane.xlu0 %2495  ;;  %2514 = vmin.xlane.f32.xlu1 %v2513_v60 }
 0x50d   : > { %vm2497_vm2 = vcmp.eq.f32.partialorder %v10702_v48, %v2496_v5  ;;  %v2502_v51 = vcvt.f32.s32 %v2496_v5 }
 0x50e   : > { %v2498_v1 = vsel %vm2497_vm2, %v2493_v59, inf  ;;  %v2517_v59 = vcvt.f32.s32 %v2511_v9 }
 0x50f   : > { %2499 = vmin.xlane.f32.xlu0 %v2498_v1  ;;  %v10760_v27 = vpop.xlane.xlu1 %2540  ;;  %v2503_v7 = vshll.u32 %v2502_v51, 16 }
 0x510   : > { %v10763_v62 = vpop.xlane.xlu0 %2525  ;;  %vm2542_vm4 = vcmp.eq.f32.partialorder %v2539_v21, %v10760_v27  ;;  %v2518_v20 = vshll.u32 %v2517_v59, 16 }
 0x511   : > { %v2543_v63 = vsel %vm2542_vm4, %v2538_v44, inf  ;;  %vm2527_vm5 = vcmp.eq.f32.partialorder %v2524_v25, %v10763_v62 }
 0x512   : > { %2544 = vmin.xlane.f32.xlu1 %v2543_v63  ;;  %v2528_v49 = vsel %vm2527_vm5, %v2523_v18, inf  ;;  %v2547_v63 = vcvt.f32.s32 %v10760_v27 }
 0x513   : > { %2529 = vmin.xlane.f32.xlu0 %v2528_v49  ;;  %v10767_v48 = vpop.xlane.xlu1 %2570 }
 0x514   : > { %v10769_v11 = vpop.xlane.xlu0 %2555  ;;  %vm2572_vm6 = vcmp.eq.f32.partialorder %v2569_v23, %v10767_v48  ;;  %v2577_v46 = vcvt.f32.s32 %v10767_v48 }
 0x515   : > { %v2573_v40 = vsel %vm2572_vm6, %v2568_v55, inf  ;;  %vm2557_vm7 = vcmp.eq.f32.partialorder %v2554_v8, %v10769_v11 }
 0x516   : > { %2574 = vmin.xlane.f32.xlu1 %v2573_v40  ;;  %v2558_v21 = vsel %vm2557_vm7, %v2553_v12, inf }
 0x517   : > { %2559 = vmin.xlane.f32.xlu0 %v2558_v21 }
 0x58e   : > { %v2485_v25 = vpop.xlane.xlu1 %2484 }
 0x58f   : > { %v2486_v15 = vcvt.f32.s32 %v2485_v25 }
 0x590   : > { %v2470_v36 = vpop.xlane.xlu0 %2469 }
 0x591   : > { %v2489_v60 = vadd.s32 %v2488_v58, %v2486_v15  ;;  %v2471_v43 = vcvt.f32.s32 %v2470_v36  ;;  %v2562_v15 = vcvt.f32.s32 %v10769_v11 }
 0x593   : > { %v2581_v1 = vand.u32 63, %v2489_v60  ;;  %v2474_v23 = vadd.s32 %v2473_v29, %v2471_v43  ;;  %v2548_v29 = vshll.u32 %v2547_v63, 16 }
 0x595   : > { %vm2589_vm8 = vcmp.eq.s32.totalorder %v10199_v19, %v2581_v1  ;;  %v2580_v44 = vand.u32 63, %v2474_v23  ;;  %v2515_v8 = vpop.xlane.xlu1 %2514  ;;  %v2578_v23 = vshll.u32 %v2577_v46, 16 }
 0x596   : > { %v2516_v18 = vcvt.f32.s32 %v2515_v8  ;;  %v8238_v53 = vsel %vm2589_vm8, 1.0, %v9822_v2  ;;  %v10776_v38 = vsel %vm2589_vm8, 2147483647, %v10626_v34  ;;  %v2532_v34 = vcvt.f32.s32 %v10763_v62 }
 0x597   : > { %vm2588_vm9 = vcmp.eq.s32.totalorder %v10199_v19, %v2580_v44  ;;  %v10782_v9 = vsel %vm1325_vm3, %v10776_v38, 2147483647 }
 0x598   : > { %v2519_v5 = vadd.s32 %v2518_v20, %v2516_v18  ;;  %v2500_v49 = vpop.xlane.xlu0 %2499  ;;  %v8237_v55 = vsel %vm2588_vm9, 1.0, %v9822_v2  ;;  %v2855_v12 = vshra.s32 %v10782_v9, 16  ;;  %v10787_v40 = vsel %vm2588_vm9, 2147483647, %v10635_v61 }
 0x599   : > { %v2501_v21 = vcvt.f32.s32 %v2500_v49  ;;  %v2612_v4 = vpack.c.bf16 %v8238_v53, %v8237_v55  ;;  %9099 = vmatprep.mubr.msk.f32.mxu1 %vm1325_vm3, %v8237_v55  ;;  %v10793_v27 = vsel %vm1325_vm3, %v10787_v40, 2147483647  ;;  %v2533_v59 = vshll.u32 %v2532_v34, 16 }
 0x59a   : > { %v2583_v25 = vand.u32 63, %v2519_v5  ;;  %9100 = vmatmul.mubr.msk.f32.vlgmr.msra.gmra.mxu1 %vm1325_vm3, %v8238_v53  ;;  %v10797_v58 = vcvt.s32.f32 %v2855_v12  ;;  %v2840_v61 = vshra.s32 %v10793_v27, 16  ;;  %v2563_v18 = vshll.u32 %v2562_v15, 16 }
 0x59b   : > { %v2504_v62 = vadd.s32 %v2503_v7, %v2501_v21  ;;  %v2545_v36 = vpop.xlane.xlu1 %2544  ;;  %9075 = vmatprep.mubr.msk.bf16.mxu0 %vm1325_vm3, %v2612_v4  ;;  %9128 = vmatpush3.msra.mxu1 %v10439_v6 }
 0x59c   : > { %v2546_v60 = vcvt.f32.s32 %v2545_v36  ;;  %v2530_v43 = vpop.xlane.xlu0 %2529  ;;  %2858 = vmin.xlane.f32.xlu1 %v10797_v58  ;;  %v10804_v48 = vcvt.s32.f32 %v2840_v61  ;;  %vm2591_vm10 = vcmp.eq.s32.totalorder %v10199_v19, %v2583_v25  ;;  %9129 = vmatprep.subr.mxu1 %v10446_v47 }
 0x59d   : > { %v2582_v51 = vand.u32 63, %v2504_v62  ;;  %v2531_v11 = vcvt.f32.s32 %v2530_v43  ;;  %v10809_v1 = vsel %vm2591_vm10, 2147483647, %v10659_v30  ;;  %9130 = vmatpush3.msra.mxu1 %v10446_v47  ;;  %v8240_v8 = vsel %vm2591_vm10, 1.0, %v9822_v2 }
 0x59e   : > { %v2549_v44 = vadd.s32 %v2548_v29, %v2546_v60  ;;  %2843 = vmin.xlane.f32.xlu0 %v10804_v48  ;;  %v10816_v20 = vsel %vm1325_vm3, %v10809_v1, 2147483647  ;;  %9131 = vmatprep.subr.mxu1 %v10469_v33 }
 0x59f   : > { %v2534_v53 = vadd.s32 %v2533_v59, %v2531_v11  ;;  %v2575_v7 = vpop.xlane.xlu1 %2574  ;;  %vm2590_vm11 = vcmp.eq.s32.totalorder %v10199_v19, %v2582_v51  ;;  %v2885_v30 = vshra.s32 %v10816_v20, 16  ;;  %9132 = vmatpush3.msra.mxu1 %v10469_v33 }
 0x5a0   : > { %v2585_v47 = vand.u32 63, %v2549_v44  ;;  %v2576_v63 = vcvt.f32.s32 %v2575_v7  ;;  %v2560_v5 = vpop.xlane.xlu0 %2559  ;;  %v8239_v49 = vsel %vm2590_vm11, 1.0, %v9822_v2  ;;  %v10824_v55 = vsel %vm2590_vm11, 2147483647, %v10674_v0  ;;  %9133 = vmatprep.subr.mxu1 %v10487_v28 }
 0x5a1   : > { %v2584_v12 = vand.u32 63, %v2534_v53  ;;  %v2561_v34 = vcvt.f32.s32 %v2560_v5  ;;  %9102 = vmatprep.mubr.msk.f32.mxu1 %vm1325_vm3, %v8239_v49  ;;  %v2613_v21 = vpack.c.bf16 %v8240_v8, %v8239_v49  ;;  %v10828_v4 = vcvt.s32.f32 %v2885_v30  ;;  %9134 = vmatpush3.msra.mxu1 %v10487_v28 }
 0x5a2   : > { %v2579_v33 = vadd.s32 %v2578_v23, %v2576_v63  ;;  %9103 = vmatmul.mubr.msk.f32.gmra.mxu1 %vm1325_vm3, %v8240_v8  ;;  %v10834_v46 = vsel %vm1325_vm3, %v10824_v55, 2147483647  ;;  %vm2593_vm12 = vcmp.eq.s32.totalorder %v10199_v19, %v2585_v47  ;;  %9135 = vmatprep.subr.mxu1 %v10512_v22  ;;  %v2854_v63 = vand.u32 65535, %v10782_v9 }
 0x5a3   : > { %v2564_v0 = vadd.s32 %v2563_v18, %v2561_v34  ;;  %9076 = vmatmul.mubr.msk.bf16.vlgmr.msra.gmra.mxu0 %vm1325_vm3, %v2613_v21  ;;  %vm2592_vm13 = vcmp.eq.s32.totalorder %v10199_v19, %v2584_v12  ;;  %2888 = vmin.xlane.f32.xlu1 %v10828_v4  ;;  %v2870_v28 = vshra.s32 %v10834_v46, 16  ;;  %v8242_v25 = vsel %vm2593_vm12, 1.0, %v9822_v2 }
 0x5a4   : > { %v2587_v61 = vand.u32 63, %v2579_v33  ;;  %9112 = vmatpush3.bf16.msra.mxu0 %v10178_v32  ;;  %v8241_v15 = vsel %vm2592_vm13, 1.0, %v9822_v2  ;;  %v10846_v62 = vsel %vm2593_vm12, 2147483647, %v10695_v54  ;;  %v10849_v36 = vsel %vm2592_vm13, 2147483647, %v10698_v41  ;;  %9136 = vmatpush3.msra.mxu1 %v10512_v22 }
 0x5a5   : > { %v2586_v29 = vand.u32 63, %v2564_v0  ;;  %9113 = vmatprep.subr.bf16.mxu0 %v10182_v37  ;;  %9105 = vmatprep.mubr.msk.f32.mxu1 %vm1325_vm3, %v8241_v15  ;;  %v10854_v60 = vcvt.s32.f32 %v2870_v28  ;;  %v2614_v43 = vpack.c.bf16 %v8242_v25, %v8241_v15  ;;  %v10858_v59 = vsel %vm1325_vm3, %v10846_v62, 2147483647 }
 0x5a6   : > { %9106 = vmatmul.mubr.msk.f32.gmra.mxu1 %vm1325_vm3, %v8242_v25  ;;  %v2915_v54 = vshra.s32 %v10858_v59, 16  ;;  %v10864_v41 = vsel %vm1325_vm3, %v10849_v36, 2147483647  ;;  %vm2595_vm14 = vcmp.eq.s32.totalorder %v10199_v19, %v2587_v61  ;;  %9137 = vmatprep.subr.mxu1 %v10572_v42  ;;  %v2839_v5 = vand.u32 65535, %v10793_v27 }
 0x5a7   : > { %2873 = vmin.xlane.f32.xlu0 %v10854_v60  ;;  %9079 = vmatprep.mubr.msk.bf16.mxu0 %vm1325_vm3, %v2614_v43  ;;  %vm2594_vm15 = vcmp.eq.s32.totalorder %v10199_v19, %v2586_v29  ;;  %v2900_v22 = vshra.s32 %v10864_v41, 16  ;;  %v8244_v51 = vsel %vm2595_vm14, 1.0, %v9822_v2  ;;  %v10874_v11 = vsel %vm2595_vm14, 2147483647, %v10722_v57 }
 0x5a8   : > { %9114 = vmatpush3.bf16.msra.mxu0 %v10182_v37  ;;  %v8243_v23 = vsel %vm2594_vm15, 1.0, %v9822_v2  ;;  %v2917_v44 = vcvt.s32.f32 %v2915_v54  ;;  %v10880_v8 = vsel %vm1325_vm3, %v10874_v11, 2147483647  ;;  %v10883_v18 = vsel %vm2594_vm15, 2147483647, %v10731_v52  ;;  %9138 = vmatpush3.msra.mxu1 %v10572_v42 }
 0x5a9   : > { %9115 = vmatprep.subr.bf16.mxu0 %v10187_v39  ;;  %9108 = vmatprep.mubr.msk.f32.mxu1 %vm1325_vm3, %v8243_v23  ;;  %v2902_v57 = vcvt.s32.f32 %v2900_v22  ;;  %v2615_v53 = vpack.c.bf16 %v8244_v51, %v8243_v23  ;;  %v2945_v7 = vshra.s32 %v10880_v8, 16  ;;  %v2928_v30 = vsel %vm1325_vm3, %v10883_v18, 2147483647 }
 0x5aa   : > { %2918 = vmin.xlane.f32.xlu1 %v2917_v44  ;;  %9109 = vmatmul.mubr.msk.f32.gmra.mxu1 %vm1325_vm3, %v8244_v51  ;;  %v2930_v47 = vshra.s32 %v2928_v30, 16  ;;  %v2856_v12 = vcvt.s32.f32 %v2854_v63  ;;  %v2841_v21 = vcvt.s32.f32 %v2839_v5  ;;  %v2869_v9 = vand.u32 65535, %v10834_v46 }
 0x5ab   : > { %2903 = vmin.xlane.f32.xlu0 %v2902_v57  ;;  %9080 = vmatmul.mubr.msk.bf16.gmra.mxu0 %vm1325_vm3, %v2615_v53  ;;  %v2947_v52 = vcvt.s32.f32 %v2945_v7  ;;  %v2899_v61 = vand.u32 65535, %v10864_v41  ;;  %v2944_v29 = vand.u32 65535, %v10880_v8  ;;  %v2929_v43 = vand.u32 65535, %v2928_v30 }
 0x5ac   : > { %9116 = vmatpush3.bf16.msra.mxu0 %v10187_v39  ;;  %v2932_v42 = vcvt.s32.f32 %v2930_v47  ;;  %9139 = vmatprep.subr.mxu1 %v10583_v56  ;;  %v2871_v25 = vcvt.s32.f32 %v2869_v9 }
 0x5ad   : > { %9117 = vmatprep.subr.bf16.mxu0 %v10191_v45  ;;  %9140 = vmatpush3.msra.mxu1 %v10583_v56  ;;  %v2946_v41 = vcvt.s32.f32 %v2944_v29  ;;  %v2931_v51 = vcvt.s32.f32 %v2929_v43 }
 0x5ae   : > { %2948 = vmin.xlane.f32.xlu1 %v2947_v52  ;;  %9141 = vmatprep.subr.mxu1 %v10590_v3 }
 0x5af   : > { %2933 = vmin.xlane.f32.xlu0 %v2932_v42  ;;  %9142 = vmatpush3.msra.mxu1 %v10590_v3  ;;  %v2884_v3 = vand.u32 65535, %v10816_v20 }
 0x5b0   : > { %9118 = vmatpush3.bf16.msra.mxu0 %v10191_v45  ;;  %9171 = vmatprep.subr.mxu1 %v10439_v6 }
 0x5b1   : > { %9155 = vmatprep.subr.bf16.mxu0 %v10178_v32  ;;  %v2886_v0 = vcvt.s32.f32 %v2884_v3 }
 0x625   : > { %v2859_v49 = vpop.xlane.xlu1 %2858 }
 0x626   : > { %vm2860_vm2 = vcmp.eq.f32.partialorder %v10797_v58, %v2859_v49  ;;  %v2914_v58 = vand.u32 65535, %v10858_v59  ;;  %v2865_v8 = vcvt.f32.s32 %v2859_v49 }
 0x627   : > { %v2844_v56 = vpop.xlane.xlu0 %2843  ;;  %v2861_v34 = vsel %vm2860_vm2, %v2856_v12, inf }
 0x628   : > { %2862 = vmin.xlane.f32.xlu1 %v2861_v34  ;;  %vm2845_vm4 = vcmp.eq.f32.partialorder %v10804_v48, %v2844_v56  ;;  %v2916_v15 = vcvt.s32.f32 %v2914_v58  ;;  %v2850_v53 = vcvt.f32.s32 %v2844_v56  ;;  %v2866_v7 = vshll.u32 %v2865_v8, 16 }
 0x629   : > { %v2846_v33 = vsel %vm2845_vm4, %v2841_v21, inf }
 0x62a   : > { %2847 = vmin.xlane.f32.xlu0 %v2846_v33  ;;  %v2851_v63 = vshll.u32 %v2850_v53, 16 }
 0x62c   : > { %v2889_v6 = vpop.xlane.xlu1 %2888 }
 0x62d   : > { %vm2890_vm5 = vcmp.eq.f32.partialorder %v10828_v4, %v2889_v6  ;;  %v2901_v4 = vcvt.s32.f32 %v2899_v61  ;;  %v2895_v34 = vcvt.f32.s32 %v2889_v6 }
 0x62e   : > { %v2891_v27 = vsel %vm2890_vm5, %v2886_v0, inf }
 0x62f   : > { %2892 = vmin.xlane.f32.xlu1 %v2891_v27  ;;  %v2896_v0 = vshll.u32 %v2895_v34, 16 }
 0x630   : > { %v2874_v28 = vpop.xlane.xlu0 %2873 }
 0x631   : > { %vm2875_vm6 = vcmp.eq.f32.partialorder %v10854_v60, %v2874_v28  ;;  %v2880_v21 = vcvt.f32.s32 %v2874_v28 }
 0x632   : > { %v2876_v48 = vsel %vm2875_vm6, %v2871_v25, inf }
 0x633   : > { %2877 = vmin.xlane.f32.xlu0 %v2876_v48  ;;  %v10912_v20 = vpop.xlane.xlu1 %2918  ;;  %v2881_v27 = vshll.u32 %v2880_v21, 16 }
 0x634   : > { %v10915_v46 = vpop.xlane.xlu0 %2903  ;;  %vm2920_vm7 = vcmp.eq.f32.partialorder %v2917_v44, %v10912_v20  ;;  %v2925_v48 = vcvt.f32.s32 %v10912_v20 }
 0x635   : > { %v2921_v59 = vsel %vm2920_vm7, %v2916_v15, inf  ;;  %vm2905_vm8 = vcmp.eq.f32.partialorder %v2902_v57, %v10915_v46 }
 0x636   : > { %2922 = vmin.xlane.f32.xlu1 %v2921_v59  ;;  %v2906_v54 = vsel %vm2905_vm8, %v2901_v4, inf  ;;  %v2926_v53 = vshll.u32 %v2925_v48, 16 }
 0x637   : > { %2907 = vmin.xlane.f32.xlu0 %v2906_v54  ;;  %v10919_v60 = vpop.xlane.xlu1 %2948 }
 0x638   : > { %v10921_v22 = vpop.xlane.xlu0 %2933  ;;  %vm2950_vm9 = vcmp.eq.f32.partialorder %v2947_v52, %v10919_v60  ;;  %v2955_v20 = vcvt.f32.s32 %v10919_v60  ;;  %v10967_v60 = vld [vmem:[%s9961_s27 + $0x30] sm:$0xff] }
 0x639   : > { %v2951_v23 = vsel %vm2950_vm9, %v2946_v41, inf  ;;  %vm2935_vm10 = vcmp.eq.f32.partialorder %v2932_v42, %v10921_v22  ;;  %v2940_v41 = vcvt.f32.s32 %v10921_v22 }
 0x63a   : > { %2952 = vmin.xlane.f32.xlu1 %v2951_v23  ;;  %v2936_v44 = vsel %vm2935_vm10, %v2931_v51, inf }
 0x63b   : > { %2937 = vmin.xlane.f32.xlu0 %v2936_v44 }
 0x6b1   : > { %v2863_v57 = vpop.xlane.xlu1 %2862 }
 0x6b2   : > { %v2864_v30 = vcvt.f32.s32 %v2863_v57 }
 0x6b3   : > { %v2848_v47 = vpop.xlane.xlu0 %2847 }
 0x6b4   : > { %v2867_v5 = vadd.s32 %v2866_v7, %v2864_v30  ;;  %v2849_v12 = vcvt.f32.s32 %v2848_v47 }
 0x6b6   : > { %v2959_v3 = vand.u32 63, %v2867_v5  ;;  %v2852_v52 = vadd.s32 %v2851_v63, %v2849_v12  ;;  %v10982_v12 = vld [vmem:[%s9961_s27 + $0x28] sm:$0xff] }
 0x6b8   : > { %vm2967_vm11 = vcmp.eq.s32.totalorder %v10199_v19, %v2959_v3  ;;  %v2958_v33 = vand.u32 63, %v2852_v52  ;;  %v2893_v42 = vpop.xlane.xlu1 %2892  ;;  %v2956_v3 = vshll.u32 %v2955_v20, 16  ;;  %v2941_v52 = vshll.u32 %v2940_v41, 16 }
 0x6b9   : > { %v2894_v9 = vcvt.f32.s32 %v2893_v42  ;;  %v8258_v49 = vsel %vm2967_vm11, 1.0, %v9822_v2  ;;  %v10928_v56 = vsel %vm2967_vm11, 2147483647, %v10776_v38  ;;  %v2910_v38 = vcvt.f32.s32 %v10915_v46  ;;  %v10954_v46 = vld [vmem:[%s9961_s27 + $0x38] sm:$0xff] }
 0x6ba   : > { %vm2966_vm12 = vcmp.eq.s32.totalorder %v10199_v19, %v2958_v33  ;;  %v10933_v6 = vsel %vm1325_vm3, %v10928_v56, 2147483647 }
 0x6bb   : > { %v2897_v58 = vadd.s32 %v2896_v0, %v2894_v9  ;;  %v8257_v28 = vsel %vm2966_vm12, 1.0, %v9822_v2  ;;  %v3233_v25 = vshra.s32 %v10933_v6, 16  ;;  %v10938_v61 = vsel %vm2966_vm12, 2147483647, %v10787_v40  ;;  %v10992_v0 = vld [vmem:[%s9961_s27 + $0x20] sm:$0xff] }
 0x6bc   : > { %v2878_v15 = vpop.xlane.xlu0 %2877  ;;  %v2990_v29 = vpack.c.bf16 %v8258_v49, %v8257_v28  ;;  %9143 = vmatprep.mubr.msk.f32.mxu1 %vm1325_vm3, %v8257_v28  ;;  %v10945_v4 = vsel %vm1325_vm3, %v10938_v61, 2147483647  ;;  %v2911_v30 = vshll.u32 %v2910_v38, 16 }
 0x6bd   : > { %v2961_v43 = vand.u32 63, %v2897_v58  ;;  %v2879_v59 = vcvt.f32.s32 %v2878_v15  ;;  %9144 = vmatmul.mubr.msk.f32.vlgmr.msra.gmra.mxu1 %vm1325_vm3, %v8258_v49  ;;  %v10948_v54 = vcvt.s32.f32 %v3233_v25  ;;  %v3218_v40 = vshra.s32 %v10945_v4, 16 }
 0x6be   : > { %9119 = vmatprep.mubr.msk.bf16.mxu0 %vm1325_vm3, %v2990_v29  ;;  %9172 = vmatpush3.msra.mxu1 %v10954_v46  ;;  %v11004_v29 = vld [vmem:[%s9961_s27 + $0x18] sm:$0xff] }
 0x6bf   : > { %v2882_v51 = vadd.s32 %v2881_v27, %v2879_v59  ;;  %v2923_v23 = vpop.xlane.xlu1 %2922  ;;  %3236 = vmin.xlane.f32.xlu1 %v10948_v54  ;;  %v10959_v44 = vcvt.s32.f32 %v3218_v40  ;;  %vm10962_vm13 = vcmp.eq.s32.totalorder %v10199_v19, %v2961_v43  ;;  %9173 = vmatprep.subr.mxu1 %v10967_v60 }
 0x6c0   : > { %v2924_v57 = vcvt.f32.s32 %v2923_v23  ;;  %v2908_v7 = vpop.xlane.xlu0 %2907  ;;  %v10973_v22 = vsel %vm10962_vm13, 2147483647, %v10809_v1  ;;  %9174 = vmatpush3.msra.mxu1 %v10967_v60  ;;  %v8260_v1 = vsel %vm10962_vm13, 1.0, %v9822_v2 }
 0x6c1   : > { %v2960_v47 = vand.u32 63, %v2882_v51  ;;  %v2909_v63 = vcvt.f32.s32 %v2908_v7  ;;  %3221 = vmin.xlane.f32.xlu0 %v10959_v44  ;;  %v10979_v5 = vsel %vm1325_vm3, %v10973_v22, 2147483647  ;;  %9175 = vmatprep.subr.mxu1 %v10982_v12 }
 0x6c2   : > { %v2927_v34 = vadd.s32 %v2926_v53, %v2924_v57  ;;  %v3263_v21 = vshra.s32 %v10979_v5, 16  ;;  %9176 = vmatpush3.msra.mxu1 %v10982_v12  ;;  %v11031_v53 = vld [vmem:[%s9961_s27 + $0x10] sm:$0xff] }
 0x6c3   : > { %v2912_v33 = vadd.s32 %v2911_v30, %v2909_v63  ;;  %v2953_v42 = vpop.xlane.xlu1 %2952  ;;  %vm2968_vm14 = vcmp.eq.s32.totalorder %v10199_v19, %v2960_v47  ;;  %9177 = vmatprep.subr.mxu1 %v10992_v0 }
 0x6c4   : > { %v2963_v9 = vand.u32 63, %v2927_v34  ;;  %v2954_v49 = vcvt.f32.s32 %v2953_v42  ;;  %v2938_v27 = vpop.xlane.xlu0 %2937  ;;  %v8259_v58 = vsel %vm2968_vm14, 1.0, %v9822_v2  ;;  %v10996_v28 = vcvt.s32.f32 %v3263_v21  ;;  %9178 = vmatpush3.msra.mxu1 %v10992_v0 }
 0x6c5   : > { %v2962_v25 = vand.u32 63, %v2912_v33  ;;  %v2939_v48 = vcvt.f32.s32 %v2938_v27  ;;  %9146 = vmatprep.mubr.msk.f32.mxu1 %vm1325_vm3, %v8259_v58  ;;  %v2991_v38 = vpack.c.bf16 %v8260_v1, %v8259_v58  ;;  %v11001_v15 = vsel %vm2968_vm14, 2147483647, %v10824_v55  ;;  %9179 = vmatprep.subr.mxu1 %v11004_v29 }
 0x6c6   : > { %v2957_v43 = vadd.s32 %v2956_v3, %v2954_v49  ;;  %9147 = vmatmul.mubr.msk.f32.gmra.mxu1 %vm1325_vm3, %v8260_v1  ;;  %3266 = vmin.xlane.f32.xlu1 %v10996_v28  ;;  %v11011_v59 = vsel %vm1325_vm3, %v11001_v15, 2147483647  ;;  %vm2971_vm15 = vcmp.eq.s32.totalorder %v10199_v19, %v2963_v9 }
 0x6c7   : > { %v2942_v40 = vadd.s32 %v2941_v52, %v2939_v48  ;;  %9120 = vmatmul.mubr.msk.bf16.vlgmr.msra.gmra.mxu0 %vm1325_vm3, %v2991_v38  ;;  %vm11016_vm2 = vcmp.eq.s32.totalorder %v10199_v19, %v2962_v25  ;;  %v3248_v20 = vshra.s32 %v11011_v59, 16  ;;  %9180 = vmatpush3.msra.mxu1 %v11004_v29  ;;  %v8262_v23 = vsel %vm2971_vm15, 1.0, %v9822_v2  ;;  %v11083_v25 = vld [vmem:[%s9961_s27 + $0x8] sm:$0xff]  ;;  %v11090_v38 = vld [vmem:[%s9961_s27] sm:$0xff] }
 0x6c8   : > { %v2965_v41 = vand.u32 63, %v2957_v43  ;;  %9156 = vmatpush3.bf16.msra.mxu0 %v10178_v32  ;;  %v8261_v51 = vsel %vm11016_vm2, 1.0, %v9822_v2  ;;  %v11028_v8 = vsel %vm2971_vm15, 2147483647, %v10846_v62  ;;  %9181 = vmatprep.subr.mxu1 %v11031_v53  ;;  %v11047_v63 = vsel %vm11016_vm2, 2147483647, %v10849_v36 }
 0x6c9   : > { %v2964_v57 = vand.u32 63, %v2942_v40  ;;  %9157 = vmatprep.subr.bf16.mxu0 %v10182_v37  ;;  %9149 = vmatprep.mubr.msk.f32.mxu1 %vm1325_vm3, %v8261_v51  ;;  %v11036_v7 = vcvt.s32.f32 %v3248_v20  ;;  %v2992_v30 = vpack.c.bf16 %v8262_v23, %v8261_v51  ;;  %v11040_v47 = vsel %vm1325_vm3, %v11028_v8, 2147483647 }
 0x6ca   : > { %9150 = vmatmul.mubr.msk.f32.gmra.mxu1 %vm1325_vm3, %v8262_v23  ;;  %v3293_v62 = vshra.s32 %v11040_v47, 16  ;;  %vm2973_vm4 = vcmp.eq.s32.totalorder %v10199_v19, %v2965_v41  ;;  %v11055_v34 = vsel %vm1325_vm3, %v11047_v63, 2147483647  ;;  %v3232_v43 = vand.u32 65535, %v10933_v6 }
 0x6cb   : > { %3251 = vmin.xlane.f32.xlu0 %v11036_v7  ;;  %9123 = vmatprep.mubr.msk.bf16.mxu0 %vm1325_vm3, %v2992_v30  ;;  %vm2972_vm5 = vcmp.eq.s32.totalorder %v10199_v19, %v2964_v57  ;;  %v8264_v1 = vsel %vm2973_vm4, 1.0, %v9822_v2  ;;  %v11059_v21 = vsel %vm2973_vm4, 2147483647, %v10874_v11  ;;  %v3278_v52 = vshra.s32 %v11055_v34, 16 }
 0x6cc   : > { %9158 = vmatpush3.bf16.msra.mxu0 %v10182_v37  ;;  %v8263_v36 = vsel %vm2972_vm5, 1.0, %v9822_v2  ;;  %v11063_v3 = vcvt.s32.f32 %v3293_v62  ;;  %9182 = vmatpush3.msra.mxu1 %v11031_v53  ;;  %v11071_v11 = vsel %vm1325_vm3, %v11059_v21, 2147483647  ;;  %v11074_v42 = vsel %vm2972_vm5, 2147483647, %v10883_v18 }
 0x6cd   : > { %9159 = vmatprep.subr.bf16.mxu0 %v10187_v39  ;;  %9152 = vmatprep.mubr.msk.f32.mxu1 %vm1325_vm3, %v8263_v36  ;;  %v2993_v33 = vpack.c.bf16 %v8264_v1, %v8263_v36  ;;  %v3280_v9 = vcvt.s32.f32 %v3278_v52  ;;  %v3323_v49 = vshra.s32 %v11071_v11, 16  ;;  %v3306_v27 = vsel %vm1325_vm3, %v11074_v42, 2147483647 }
 0x6ce   : > { %3296 = vmin.xlane.f32.xlu1 %v11063_v3  ;;  %9153 = vmatmul.mubr.msk.f32.gmra.mxu1 %vm1325_vm3, %v8264_v1  ;;  %v3308_v58 = vshra.s32 %v3306_v27, 16  ;;  %v3217_v40 = vand.u32 65535, %v10945_v4  ;;  %v3234_v20 = vcvt.s32.f32 %v3232_v43  ;;  %v3262_v57 = vand.u32 65535, %v10979_v5 }
 0x6cf   : > { %9124 = vmatmul.mubr.msk.bf16.gmra.mxu0 %vm1325_vm3, %v2993_v33  ;;  %9183 = vmatprep.subr.mxu1 %v11083_v25  ;;  %v3325_v18 = vcvt.s32.f32 %v3323_v49  ;;  %v3247_v6 = vand.u32 65535, %v11011_v59  ;;  %v3277_v5 = vand.u32 65535, %v11055_v34  ;;  %v3322_v33 = vand.u32 65535, %v11071_v11 }
 0x6d0   : > { %3281 = vmin.xlane.f32.xlu0 %v3280_v9  ;;  %9160 = vmatpush3.bf16.msra.mxu0 %v10187_v39  ;;  %v3310_v48 = vcvt.s32.f32 %v3308_v58  ;;  %v3219_v23 = vcvt.s32.f32 %v3217_v40  ;;  %v3264_v1 = vcvt.s32.f32 %v3262_v57 }
 0x6d1   : > { %9161 = vmatprep.subr.bf16.mxu0 %v10191_v45  ;;  %9184 = vmatpush3.msra.mxu1 %v11083_v25  ;;  %v3249_v52 = vcvt.s32.f32 %v3247_v6  ;;  %v3279_v43 = vcvt.s32.f32 %v3277_v5  ;;  %v3324_v40 = vcvt.s32.f32 %v3322_v33 }
 0x6d2   : > { %3326 = vmin.xlane.f32.xlu1 %v3325_v18  ;;  %9185 = vmatprep.subr.mxu1 %v11090_v38 }
 0x6d3   : > { %9186 = vmatpush3.msra.mxu1 %v11090_v38 }
 0x6d4   : > { %3311 = vmin.xlane.f32.xlu0 %v3310_v48  ;;  %9162 = vmatpush3.bf16.msra.mxu0 %v10191_v45 }
 0x6d5   : > { %9199 = vmatprep.subr.bf16.mxu0 %v10178_v32  ;;  %9215 = vmatprep.subr.mxu1 %v10954_v46 }
 0x748   : > { %v3237_v55 = vpop.xlane.xlu1 %3236 }
 0x749   : > { %vm3238_vm6 = vcmp.eq.f32.partialorder %v10948_v54, %v3237_v55  ;;  %v3292_v54 = vand.u32 65535, %v11040_v47 }
 0x74a   : > { %v3222_v41 = vpop.xlane.xlu0 %3221  ;;  %v3239_v51 = vsel %vm3238_vm6, %v3234_v20, inf }
 0x74b   : > { %3240 = vmin.xlane.f32.xlu1 %v3239_v51  ;;  %vm3223_vm7 = vcmp.eq.f32.partialorder %v10959_v44, %v3222_v41  ;;  %v3294_v59 = vcvt.s32.f32 %v3292_v54 }
 0x74c   : > { %v3224_v30 = vsel %vm3223_vm7, %v3219_v23, inf  ;;  %v3228_v23 = vcvt.f32.s32 %v3222_v41 }
 0x74d   : > { %3225 = vmin.xlane.f32.xlu0 %v3224_v30 }
 0x74e   : > { %v3229_v6 = vshll.u32 %v3228_v23, 16 }
 0x74f   : > { %v3267_v62 = vpop.xlane.xlu1 %3266 }
 0x750   : > { %vm3268_vm8 = vcmp.eq.f32.partialorder %v10996_v28, %v3267_v62  ;;  %v3307_v28 = vand.u32 65535, %v3306_v27  ;;  %v3243_v27 = vcvt.f32.s32 %v3237_v55 }
 0x751   : > { %v3269_v4 = vsel %vm3268_vm8, %v3264_v1, inf }
 0x752   : > { %3270 = vmin.xlane.f32.xlu1 %v3269_v4  ;;  %v3309_v51 = vcvt.s32.f32 %v3307_v28 }
 0x754   : > { %v11105_v36 = vpop.xlane.xlu0 %3251 }
 0x755   : > { %vm3253_vm9 = vcmp.eq.f32.partialorder %v11036_v7, %v11105_v36  ;;  %v3258_v41 = vcvt.f32.s32 %v11105_v36 }
 0x756   : > { %v3254_v44 = vsel %vm3253_vm9, %v3249_v52, inf  ;;  %v3273_v52 = vcvt.f32.s32 %v3267_v62 }
 0x757   : > { %3255 = vmin.xlane.f32.xlu0 %v3254_v44  ;;  %v11111_v49 = vpop.xlane.xlu1 %3296  ;;  %v3259_v23 = vshll.u32 %v3258_v41, 16 }
 0x758   : > { %vm3298_vm10 = vcmp.eq.f32.partialorder %v11063_v3, %v11111_v49  ;;  %v3303_v36 = vcvt.f32.s32 %v11111_v49 }
 0x759   : > { %v11115_v47 = vpop.xlane.xlu0 %3281  ;;  %v3299_v58 = vsel %vm3298_vm10, %v3294_v59, inf  ;;  %v3274_v59 = vshll.u32 %v3273_v52, 16 }
 0x75a   : > { %3300 = vmin.xlane.f32.xlu1 %v3299_v58  ;;  %vm3283_vm11 = vcmp.eq.f32.partialorder %v3280_v9, %v11115_v47  ;;  %v3244_v9 = vshll.u32 %v3243_v27, 16 }
 0x75b   : > { %v3284_v34 = vsel %vm3283_vm11, %v3279_v43, inf  ;;  %v11118_v7 = vpop.xlane.xlu1 %3326 }
 0x75c   : > { %3285 = vmin.xlane.f32.xlu0 %v3284_v34  ;;  %vm3328_vm12 = vcmp.eq.f32.partialorder %v3325_v18, %v11118_v7 }
 0x75d   : > { %v11121_v11 = vpop.xlane.xlu0 %3311  ;;  %v3329_v20 = vsel %vm3328_vm12, %v3324_v40, inf }
 0x75e   : > { %3330 = vmin.xlane.f32.xlu1 %v3329_v20  ;;  %vm3313_vm13 = vcmp.eq.f32.partialorder %v3310_v48, %v11121_v11 }
 0x75f   : > { %v3314_v3 = vsel %vm3313_vm13, %v3309_v51, inf }
 0x760   : > { %3315 = vmin.xlane.f32.xlu0 %v3314_v3 }
 0x7d4   : > { %v3241_v57 = vpop.xlane.xlu1 %3240 }
 0x7d5   : > { %v3242_v30 = vcvt.f32.s32 %v3241_v57 }
 0x7d6   : > { %v3226_v1 = vpop.xlane.xlu0 %3225 }
 0x7d7   : > { %v3245_v4 = vadd.s32 %v3244_v9, %v3242_v30  ;;  %v3227_v54 = vcvt.f32.s32 %v3226_v1  ;;  %v3288_v9 = vcvt.f32.s32 %v11115_v47  ;;  %v3333_v1 = vcvt.f32.s32 %v11118_v7 }
 0x7d8   : > { %v3304_v47 = vshll.u32 %v3303_v36, 16  ;;  %v3318_v7 = vcvt.f32.s32 %v11121_v11 }
 0x7d9   : > { %v3337_v18 = vand.u32 63, %v3245_v4  ;;  %v3230_v5 = vadd.s32 %v3229_v6, %v3227_v54  ;;  %v3334_v41 = vshll.u32 %v3333_v1, 16 }
 0x7db   : > { %vm3345_vm14 = vcmp.eq.s32.totalorder %v10199_v19, %v3337_v18  ;;  %v3336_v44 = vand.u32 63, %v3230_v5  ;;  %v3271_v33 = vpop.xlane.xlu1 %3270 }
 0x7dc   : > { %v3272_v48 = vcvt.f32.s32 %v3271_v33  ;;  %v8278_v28 = vsel %vm3345_vm14, 1.0, %v9822_v2  ;;  %v11127_v55 = vsel %vm3345_vm14, 2147483647, %v10928_v56 }
 0x7dd   : > { %vm3344_vm15 = vcmp.eq.s32.totalorder %v10199_v19, %v3336_v44  ;;  %v11133_v62 = vsel %vm1325_vm3, %v11127_v55, 2147483647 }
 0x7de   : > { %v3275_v58 = vadd.s32 %v3274_v59, %v3272_v48  ;;  %v8277_v43 = vsel %vm3344_vm15, 1.0, %v9822_v2  ;;  %v11137_v34 = vsel %vm3344_vm15, 2147483647, %v10938_v61  ;;  %v3611_v40 = vshra.s32 %v11133_v62, 16 }
 0x7df   : > { %v3368_v20 = vpack.c.bf16 %v8278_v28, %v8277_v43  ;;  %9187 = vmatprep.mubr.msk.f32.mxu1 %vm1325_vm3, %v8277_v43  ;;  %v11143_v56 = vsel %vm1325_vm3, %v11137_v34, 2147483647 }
 0x7e0   : > { %v3339_v51 = vand.u32 63, %v3275_v58  ;;  %v3256_v3 = vpop.xlane.xlu0 %3255  ;;  %9188 = vmatmul.mubr.msk.f32.vlgmr.msra.gmra.mxu1 %vm1325_vm3, %v8278_v28  ;;  %v11147_v27 = vcvt.s32.f32 %v3611_v40  ;;  %v3596_v61 = vshra.s32 %v11143_v56, 16 }
 0x7e1   : > { %v3257_v57 = vcvt.f32.s32 %v3256_v3  ;;  %9163 = vmatprep.mubr.msk.bf16.mxu0 %vm1325_vm3, %v3368_v20  ;;  %9216 = vmatpush3.msra.mxu1 %v10954_v46 }
 0x7e2   : > { %3614 = vmin.xlane.f32.xlu1 %v11147_v27  ;;  %v11154_v30 = vcvt.s32.f32 %v3596_v61  ;;  %vm11157_vm2 = vcmp.eq.s32.totalorder %v10199_v19, %v3339_v51  ;;  %9217 = vmatprep.subr.mxu1 %v10967_v60  ;;  %v3319_v51 = vshll.u32 %v3318_v7, 16 }
 0x7e3   : > { %v3260_v6 = vadd.s32 %v3259_v23, %v3257_v57  ;;  %v3301_v4 = vpop.xlane.xlu1 %3300  ;;  %v11166_v54 = vsel %vm11157_vm2, 2147483647, %v10973_v22  ;;  %9218 = vmatpush3.msra.mxu1 %v10967_v60  ;;  %v3289_v22 = vshll.u32 %v3288_v9, 16  ;;  %v8280_v28 = vsel %vm11157_vm2, 1.0, %v9822_v2 }
 0x7e4   : > { %v3302_v52 = vcvt.f32.s32 %v3301_v4  ;;  %3599 = vmin.xlane.f32.xlu0 %v11154_v30  ;;  %v11172_v18 = vsel %vm1325_vm3, %v11166_v54, 2147483647  ;;  %9219 = vmatprep.subr.mxu1 %v10982_v12 }
 0x7e5   : > { %v3338_v5 = vand.u32 63, %v3260_v6  ;;  %v3286_v44 = vpop.xlane.xlu0 %3285  ;;  %v3641_v33 = vshra.s32 %v11172_v18, 16  ;;  %9220 = vmatpush3.msra.mxu1 %v10982_v12 }
 0x7e6   : > { %v3305_v59 = vadd.s32 %v3304_v47, %v3302_v52  ;;  %v3287_v48 = vcvt.f32.s32 %v3286_v44  ;;  %9221 = vmatprep.subr.mxu1 %v10992_v0 }
 0x7e7   : > { %v3331_v58 = vpop.xlane.xlu1 %3330  ;;  %vm3346_vm4 = vcmp.eq.s32.totalorder %v10199_v19, %v3338_v5  ;;  %v11183_v11 = vcvt.s32.f32 %v3641_v33  ;;  %9222 = vmatpush3.msra.mxu1 %v10992_v0 }
 0x7e8   : > { %v3341_v43 = vand.u32 63, %v3305_v59  ;;  %v3290_v40 = vadd.s32 %v3289_v22, %v3287_v48  ;;  %v3332_v20 = vcvt.f32.s32 %v3331_v58  ;;  %v8279_v36 = vsel %vm3346_vm4, 1.0, %v9822_v2  ;;  %9223 = vmatprep.subr.mxu1 %v11004_v29 }
 0x7e9   : > { %v3316_v3 = vpop.xlane.xlu0 %3315  ;;  %9190 = vmatprep.mubr.msk.f32.mxu1 %vm1325_vm3, %v8279_v36  ;;  %v11190_v61 = vsel %vm3346_vm4, 2147483647, %v11001_v15  ;;  %v3369_v23 = vpack.c.bf16 %v8280_v28, %v8279_v36  ;;  %3644 = vmin.xlane.f32.xlu1 %v11183_v11 }
 0x7ea   : > { %v3340_v57 = vand.u32 63, %v3290_v40  ;;  %v3335_v9 = vadd.s32 %v3334_v41, %v3332_v20  ;;  %v3317_v49 = vcvt.f32.s32 %v3316_v3  ;;  %9191 = vmatmul.mubr.msk.f32.gmra.mxu1 %vm1325_vm3, %v8280_v28  ;;  %v11196_v1 = vsel %vm1325_vm3, %v11190_v61, 2147483647 }
 0x7eb   : > { %9164 = vmatmul.mubr.msk.bf16.vlgmr.msra.gmra.mxu0 %vm1325_vm3, %v3369_v23  ;;  %v3626_v6 = vshra.s32 %v11196_v1, 16  ;;  %vm3349_vm5 = vcmp.eq.s32.totalorder %v10199_v19, %v3341_v43  ;;  %9224 = vmatpush3.msra.mxu1 %v11004_v29 }
 0x7ec   : > { %v3343_v15 = vand.u32 63, %v3335_v9  ;;  %v3320_v4 = vadd.s32 %v3319_v51, %v3317_v49  ;;  %9200 = vmatpush3.bf16.msra.mxu0 %v10178_v32  ;;  %vm3348_vm6 = vcmp.eq.s32.totalorder %v10199_v19, %v3340_v57  ;;  %v8282_v47 = vsel %vm3349_vm5, 1.0, %v9822_v2  ;;  %9225 = vmatprep.subr.mxu1 %v11031_v53 }
 0x7ed   : > { %9201 = vmatprep.subr.bf16.mxu0 %v10182_v37  ;;  %v8281_v52 = vsel %vm3348_vm6, 1.0, %v9822_v2  ;;  %v11209_v7 = vsel %vm3348_vm6, 2147483647, %v11047_v63  ;;  %v11211_v5 = vcvt.s32.f32 %v3626_v6  ;;  %v11214_v44 = vsel %vm3349_vm5, 2147483647, %v11028_v8  ;;  %9226 = vmatpush3.msra.mxu1 %v11031_v53 }
 0x7ee   : > { %v3342_v33 = vand.u32 63, %v3320_v4  ;;  %9193 = vmatprep.mubr.msk.f32.mxu1 %vm1325_vm3, %v8281_v52  ;;  %v3370_v22 = vpack.c.bf16 %v8282_v47, %v8281_v52  ;;  %v11220_v59 = vsel %vm1325_vm3, %v11214_v44, 2147483647  ;;  %v11224_v48 = vsel %vm1325_vm3, %v11209_v7, 2147483647  ;;  %9227 = vmatprep.subr.mxu1 %v11083_v25 }
 0x7ef   : > { %3629 = vmin.xlane.f32.xlu0 %v11211_v5  ;;  %9194 = vmatmul.mubr.msk.f32.gmra.mxu1 %vm1325_vm3, %v8282_v47  ;;  %v3671_v8 = vshra.s32 %v11220_v59, 16  ;;  %v3656_v63 = vshra.s32 %v11224_v48, 16  ;;  %vm3351_vm7 = vcmp.eq.s32.totalorder %v10199_v19, %v3343_v15  ;;  %v3610_v9 = vand.u32 65535, %v11133_v62 }
 0x7f0   : > { %9167 = vmatprep.mubr.msk.bf16.mxu0 %vm1325_vm3, %v3370_v22  ;;  %9202 = vmatpush3.bf16.msra.mxu0 %v10182_v37  ;;  %vm3350_vm8 = vcmp.eq.s32.totalorder %v10199_v19, %v3342_v33  ;;  %v8284_v28 = vsel %vm3351_vm7, 1.0, %v9822_v2  ;;  %v11237_v41 = vsel %vm3351_vm7, 2147483647, %v11059_v21  ;;  %v3595_v49 = vand.u32 65535, %v11143_v56 }
 0x7f1   : > { %9203 = vmatprep.subr.bf16.mxu0 %v10187_v39  ;;  %v8283_v58 = vsel %vm3350_vm8, 1.0, %v9822_v2  ;;  %v11242_v43 = vsel %vm3350_vm8, 2147483647, %v11074_v42  ;;  %v3673_v40 = vcvt.s32.f32 %v3671_v8  ;;  %v3658_v20 = vcvt.s32.f32 %v3656_v63  ;;  %9228 = vmatpush3.msra.mxu1 %v11083_v25 }
 0x7f2   : > { %9196 = vmatprep.mubr.msk.f32.mxu1 %vm1325_vm3, %v8283_v58  ;;  %v3371_v36 = vpack.c.bf16 %v8284_v28, %v8283_v58  ;;  %v3699_v51 = vsel %vm1325_vm3, %v11237_v41, 2147483647  ;;  %v3684_v21 = vsel %vm1325_vm3, %v11242_v43, 2147483647  ;;  %9229 = vmatprep.subr.mxu1 %v11090_v38  ;;  %v3612_v15 = vcvt.s32.f32 %v3610_v9 }
 0x7f3   : > { %3674 = vmin.xlane.f32.xlu1 %v3673_v40  ;;  %3659 = vmin.xlane.f32.xlu0 %v3658_v20  ;;  %v3701_v3 = vshra.s32 %v3699_v51, 16  ;;  %v3686_v42 = vshra.s32 %v3684_v21, 16  ;;  %v3597_v52 = vcvt.s32.f32 %v3595_v49  ;;  %v3640_v33 = vand.u32 65535, %v11172_v18 }
 0x7f4   : > { %9197 = vmatmul.mubr.msk.f32.gmra.mxu1 %vm1325_vm3, %v8284_v28  ;;  %9168 = vmatmul.mubr.msk.bf16.gmra.mxu0 %vm1325_vm3, %v3371_v36  ;;  %v3625_v56 = vand.u32 65535, %v11196_v1  ;;  %v3670_v58 = vand.u32 65535, %v11220_v59  ;;  %v3655_v36 = vand.u32 65535, %v11224_v48  ;;  %v3700_v9 = vand.u32 65535, %v3699_v51 }
 0x7f5   : > { %9204 = vmatpush3.bf16.msra.mxu0 %v10187_v39  ;;  %v3703_v23 = vcvt.s32.f32 %v3701_v3  ;;  %v3688_v57 = vcvt.s32.f32 %v3686_v42  ;;  %9230 = vmatpush3.msra.mxu1 %v11090_v38  ;;  %v3642_v63 = vcvt.s32.f32 %v3640_v33  ;;  %v3685_v49 = vand.u32 65535, %v3684_v21 }
 0x7f6   : > { %9205 = vmatprep.subr.bf16.mxu0 %v10191_v45  ;;  %9259 = vmatprep.subr.mxu1 %v10954_v46  ;;  %v3672_v42 = vcvt.s32.f32 %v3670_v58 }
 0x7f7   : > { %3704 = vmin.xlane.f32.xlu1 %v3703_v23  ;;  %3689 = vmin.xlane.f32.xlu0 %v3688_v57 }
 0x7f9   : > { %9206 = vmatpush3.bf16.msra.mxu0 %v10191_v45 }
 0x7fa   : > { %9243 = vmatprep.subr.bf16.mxu0 %v10178_v32 }
 0x86b   : > { %v3615_v6 = vpop.xlane.xlu1 %3614 }
 0x86c   : > { %vm3616_vm9 = vcmp.eq.f32.partialorder %v11147_v27, %v3615_v6  ;;  %v3627_v27 = vcvt.s32.f32 %v3625_v56 }
 0x86d   : > { %v3600_v4 = vpop.xlane.xlu0 %3599  ;;  %v3617_v47 = vsel %vm3616_vm9, %v3612_v15, inf  ;;  %v3702_v15 = vcvt.s32.f32 %v3700_v9 }
 0x86e   : > { %3618 = vmin.xlane.f32.xlu1 %v3617_v47  ;;  %vm3601_vm10 = vcmp.eq.f32.partialorder %v11154_v30, %v3600_v4  ;;  %v3687_v47 = vcvt.s32.f32 %v3685_v49 }
 0x86f   : > { %v3602_v22 = vsel %vm3601_vm10, %v3597_v52, inf }
 0x870   : > { %3603 = vmin.xlane.f32.xlu0 %v3602_v22 }
 0x872   : > { %v3645_v8 = vpop.xlane.xlu1 %3644 }
 0x873   : > { %vm3646_vm11 = vcmp.eq.f32.partialorder %v11183_v11, %v3645_v8  ;;  %v3657_v11 = vcvt.s32.f32 %v3655_v36  ;;  %v3651_v58 = vcvt.f32.s32 %v3645_v8 }
 0x874   : > { %v3647_v62 = vsel %vm3646_vm11, %v3642_v63, inf }
 0x875   : > { %3648 = vmin.xlane.f32.xlu1 %v3647_v62 }
 0x878   : > { %v3630_v28 = vpop.xlane.xlu0 %3629 }
 0x879   : > { %vm3631_vm12 = vcmp.eq.f32.partialorder %v11211_v5, %v3630_v28 }
 0x87a   : > { %v3632_v30 = vsel %vm3631_vm12, %v3627_v27, inf }
 0x87b   : > { %3633 = vmin.xlane.f32.xlu0 %v3632_v30 }
 0x87c   : > { %v11269_v18 = vpop.xlane.xlu1 %3674  ;;  %v11271_v3 = vpop.xlane.xlu0 %3659 }
 0x87d   : > { %vm3676_vm13 = vcmp.eq.f32.partialorder %v3673_v40, %v11269_v18  ;;  %vm3661_vm14 = vcmp.eq.f32.partialorder %v3658_v20, %v11271_v3  ;;  %v3621_v40 = vcvt.f32.s32 %v3615_v6  ;;  %v3606_v20 = vcvt.f32.s32 %v3600_v4 }
 0x87e   : > { %v3677_v1 = vsel %vm3676_vm13, %v3672_v42, inf  ;;  %v3662_v59 = vsel %vm3661_vm14, %v3657_v11, inf  ;;  %v3652_v42 = vshll.u32 %v3651_v58, 16  ;;  %v3636_v4 = vcvt.f32.s32 %v3630_v28 }
 0x87f   : > { %3678 = vmin.xlane.f32.xlu1 %v3677_v1  ;;  %3663 = vmin.xlane.f32.xlu0 %v3662_v59  ;;  %v3622_v33 = vshll.u32 %v3621_v40, 16  ;;  %v3607_v62 = vshll.u32 %v3606_v20, 16  ;;  %v3681_v20 = vcvt.f32.s32 %v11269_v18 }
 0x880   : > { %v11275_v48 = vpop.xlane.xlu1 %3704  ;;  %v11277_v5 = vpop.xlane.xlu0 %3689  ;;  %v3637_v40 = vshll.u32 %v3636_v4, 16 }
 0x881   : > { %vm3706_vm15 = vcmp.eq.f32.partialorder %v3703_v23, %v11275_v48  ;;  %vm3691_vm2 = vcmp.eq.f32.partialorder %v3688_v57, %v11277_v5 }
 0x882   : > { %v3707_v51 = vsel %vm3706_vm15, %v3702_v15, inf  ;;  %v3692_v21 = vsel %vm3691_vm2, %v3687_v47, inf }
 0x883   : > { %3708 = vmin.xlane.f32.xlu1 %v3707_v51  ;;  %3693 = vmin.xlane.f32.xlu0 %v3692_v21 }
 0x8f7   : > { %v3619_v52 = vpop.xlane.xlu1 %3618 }
 0x8f8   : > { %v3620_v22 = vcvt.f32.s32 %v3619_v52 }
 0x8f9   : > { %v3604_v63 = vpop.xlane.xlu0 %3603 }
 0x8fa   : > { %v3623_v56 = vadd.s32 %v3622_v33, %v3620_v22  ;;  %v3605_v27 = vcvt.f32.s32 %v3604_v63 }
 0x8fc   : > { %v3715_v36 = vand.u32 63, %v3623_v56  ;;  %v3608_v30 = vadd.s32 %v3607_v62, %v3605_v27  ;;  %v3682_v62 = vshll.u32 %v3681_v20, 16  ;;  %v3711_v56 = vcvt.f32.s32 %v11275_v48 }
 0x8fd   : > { %v3696_v27 = vcvt.f32.s32 %v11277_v5 }
 0x8fe   : > { %vm3723_vm4 = vcmp.eq.s32.totalorder %v10199_v19, %v3715_v36  ;;  %v3714_v23 = vand.u32 63, %v3608_v30  ;;  %v3649_v57 = vpop.xlane.xlu1 %3648 }
 0x8ff   : > { %v3650_v11 = vcvt.f32.s32 %v3649_v57  ;;  %v8298_v9 = vsel %vm3723_vm4, 1.0, %v9822_v2  ;;  %v3965_v6 = vsel %vm3723_vm4, 2147483647, %v11127_v55 }
 0x900   : > { %vm3722_vm5 = vcmp.eq.s32.totalorder %v10199_v19, %v3714_v23  ;;  %v11286_v49 = vsel %vm1325_vm3, %v3965_v6, 2147483647  ;;  %v3697_v6 = vshll.u32 %v3696_v27, 16 }
 0x901   : > { %v3653_v1 = vadd.s32 %v3652_v42, %v3650_v11  ;;  %v8297_v8 = vsel %vm3722_vm5, 1.0, %v9822_v2  ;;  %v3964_v59 = vsel %vm3722_vm5, 2147483647, %v11137_v34  ;;  %v3989_v15 = vshra.s32 %v11286_v49, 16 }
 0x902   : > { %v3746_v47 = vpack.c.bf16 %v8298_v9, %v8297_v8  ;;  %9231 = vmatprep.mubr.msk.f32.mxu1 %vm1325_vm3, %v8297_v8  ;;  %v11293_v51 = vsel %vm1325_vm3, %v3964_v59, 2147483647  ;;  %v3666_v34 = vcvt.f32.s32 %v11271_v3 }
 0x903   : > { %v3717_v55 = vand.u32 63, %v3653_v1  ;;  %9232 = vmatmul.mubr.msk.f32.vlgmr.msra.gmra.mxu1 %vm1325_vm3, %v8298_v9  ;;  %v11296_v28 = vcvt.s32.f32 %v3989_v15  ;;  %v3974_v21 = vshra.s32 %v11293_v51, 16  ;;  %v3712_v9 = vshll.u32 %v3711_v56, 16 }
 0x904   : > { %v3634_v52 = vpop.xlane.xlu0 %3633  ;;  %9207 = vmatprep.mubr.msk.bf16.mxu0 %vm1325_vm3, %v3746_v47  ;;  %9260 = vmatpush3.msra.mxu1 %v10954_v46 }
 0x905   : > { %v3635_v33 = vcvt.f32.s32 %v3634_v52  ;;  %3992 = vmin.xlane.f32.xlu1 %v11296_v28  ;;  %v11304_v22 = vcvt.s32.f32 %v3974_v21  ;;  %vm11307_vm6 = vcmp.eq.s32.totalorder %v10199_v19, %v3717_v55  ;;  %9261 = vmatprep.subr.mxu1 %v10967_v60 }
 0x906   : > { %v3967_v18 = vsel %vm11307_vm6, 2147483647, %v11166_v54  ;;  %9262 = vmatpush3.msra.mxu1 %v10967_v60  ;;  %v3667_v60 = vshll.u32 %v3666_v34, 16 }
 0x907   : > { %v3638_v46 = vadd.s32 %v3637_v40, %v3635_v33  ;;  %3977 = vmin.xlane.f32.xlu0 %v11304_v22  ;;  %v11318_v3 = vsel %vm1325_vm3, %v3967_v18, 2147483647  ;;  %9263 = vmatprep.subr.mxu1 %v10982_v12 }
 0x908   : > { %v3679_v58 = vpop.xlane.xlu1 %3678  ;;  %v3664_v36 = vpop.xlane.xlu0 %3663  ;;  %v4019_v30 = vshra.s32 %v11318_v3, 16  ;;  %9264 = vmatpush3.msra.mxu1 %v10982_v12  ;;  %v8300_v12 = vsel %vm11307_vm6, 1.0, %v9822_v2 }
 0x909   : > { %v3716_v54 = vand.u32 63, %v3638_v46  ;;  %v3680_v23 = vcvt.f32.s32 %v3679_v58  ;;  %v3665_v57 = vcvt.f32.s32 %v3664_v36  ;;  %9265 = vmatprep.subr.mxu1 %v10992_v0 }
 0x90a   : > { %v11326_v42 = vcvt.s32.f32 %v4019_v30  ;;  %9266 = vmatpush3.msra.mxu1 %v10992_v0  ;;  %v11469_v30 = vpop.f32.mrf.mxu1 }
 0x90b   : > { %v3683_v11 = vadd.s32 %v3682_v62, %v3680_v23  ;;  %v3668_v48 = vadd.s32 %v3667_v60, %v3665_v57  ;;  %vm11330_vm7 = vcmp.eq.s32.totalorder %v10199_v19, %v3716_v54  ;;  %9267 = vmatprep.subr.mxu1 %v11004_v29 }
 0x90c   : > { %v3709_v4 = vpop.xlane.xlu1 %3708  ;;  %v3694_v1 = vpop.xlane.xlu0 %3693  ;;  %v8299_v0 = vsel %vm11330_vm7, 1.0, %v9822_v2  ;;  %v3966_v8 = vsel %vm11330_vm7, 2147483647, %v11190_v61  ;;  %4022 = vmin.xlane.f32.xlu1 %v11326_v42  ;;  %9268 = vmatpush3.msra.mxu1 %v11004_v29  ;;  %vm4478_vm7 = vcmask 1040384  }
 0x90d   : > { %v3719_v59 = vand.u32 63, %v3683_v11  ;;  %v3718_v15 = vand.u32 63, %v3668_v48  ;;  %v3710_v47 = vcvt.f32.s32 %v3709_v4  ;;  %v3695_v55 = vcvt.f32.s32 %v3694_v1  ;;  %9234 = vmatprep.mubr.msk.f32.mxu1 %vm1325_vm3, %v8299_v0  ;;  %9269 = vmatprep.subr.mxu1 %v11031_v53 }
 0x90e   : > { %v3747_v21 = vpack.c.bf16 %v8300_v12, %v8299_v0  ;;  %9235 = vmatmul.mubr.msk.f32.gmra.mxu1 %vm1325_vm3, %v8300_v12  ;;  %v11350_v40 = vsel %vm1325_vm3, %v3966_v8, 2147483647  ;;  %v3973_v4 = vand.u32 65535, %v11293_v51 }
 0x90f   : > { %v3713_v20 = vadd.s32 %v3712_v9, %v3710_v47  ;;  %v3698_v61 = vadd.s32 %v3697_v6, %v3695_v55  ;;  %vm11353_vm8 = vcmp.eq.s32.totalorder %v10199_v19, %v3718_v15  ;;  %v4004_v29 = vshra.s32 %v11350_v40, 16  ;;  %9270 = vmatpush3.msra.mxu1 %v11031_v53 }
 0x910   : > { %9208 = vmatmul.mubr.msk.bf16.vlgmr.msra.gmra.mxu0 %vm1325_vm3, %v3747_v21  ;;  %v8301_v34 = vsel %vm11353_vm8, 1.0, %v9822_v2  ;;  %v3968_v33 = vsel %vm11353_vm8, 2147483647, %v11209_v7  ;;  %vm11367_vm9 = vcmp.eq.s32.totalorder %v10199_v19, %v3719_v59  ;;  %9271 = vmatprep.subr.mxu1 %v11083_v25  ;;  %v3988_v6 = vand.u32 65535, %v11286_v49 }
 0x911   : > { %v3721_v18 = vand.u32 63, %v3713_v20  ;;  %v3720_v46 = vand.u32 63, %v3698_v61  ;;  %9244 = vmatpush3.bf16.msra.mxu0 %v10178_v32  ;;  %9237 = vmatprep.mubr.msk.f32.mxu1 %vm1325_vm3, %v8301_v34  ;;  %v11374_v53 = vcvt.s32.f32 %v4004_v29  ;;  %v8302_v62 = vsel %vm11367_vm9, 1.0, %v9822_v2 }
 0x912   : > { %9245 = vmatprep.subr.bf16.mxu0 %v10182_v37  ;;  %v3748_v7 = vpack.c.bf16 %v8302_v62, %v8301_v34  ;;  %9238 = vmatmul.mubr.msk.f32.gmra.mxu1 %vm1325_vm3, %v8302_v62  ;;  %v3969_v56 = vsel %vm11367_vm9, 2147483647, %v11214_v44  ;;  %v11385_v27 = vsel %vm1325_vm3, %v3968_v33, 2147483647  ;;  %v3975_v8 = vcvt.s32.f32 %v3973_v4 }
 0x913   : > { %4007 = vmin.xlane.f32.xlu0 %v11374_v53  ;;  %vm11389_vm10 = vcmp.eq.s32.totalorder %v10199_v19, %v3720_v46  ;;  %v11394_v58 = vsel %vm1325_vm3, %v3969_v56, 2147483647  ;;  %v4034_v36 = vshra.s32 %v11385_v27, 16  ;;  %vm11398_vm11 = vcmp.eq.s32.totalorder %v10199_v19, %v3721_v18  ;;  %9272 = vmatpush3.msra.mxu1 %v11083_v25  ;;  %v4374_v56 = vld [vmem:[%s13933_s8] sm:$0x3] }
 0x914   : > { %9211 = vmatprep.mubr.msk.bf16.mxu0 %vm1325_vm3, %v3748_v7  ;;  %v8303_v44 = vsel %vm11389_vm10, 1.0, %v9822_v2  ;;  %v3970_v60 = vsel %vm11389_vm10, 2147483647, %v11242_v43  ;;  %v4049_v54 = vshra.s32 %v11394_v58, 16  ;;  %v8304_v23 = vsel %vm11398_vm11, 1.0, %v9822_v2  ;;  %9273 = vmatprep.subr.mxu1 %v11090_v38 }
 0x915   : > { %9246 = vmatpush3.bf16.msra.mxu0 %v10182_v37  ;;  %9240 = vmatprep.mubr.msk.f32.mxu1 %vm1325_vm3, %v8303_v44  ;;  %v4036_v25 = vcvt.s32.f32 %v4034_v36  ;;  %v3749_v57 = vpack.c.bf16 %v8304_v23, %v8303_v44  ;;  %v3971_v11 = vsel %vm11398_vm11, 2147483647, %v11237_v41  ;;  %v4062_v43 = vsel %vm1325_vm3, %v3970_v60, 2147483647  ;;  %v11471_v44 = vpop.f32.mrf.mxu1 }
 0x916   : > { %9247 = vmatprep.subr.bf16.mxu0 %v10187_v39  ;;  %v4051_v48 = vcvt.s32.f32 %v4049_v54  ;;  %9241 = vmatmul.mubr.msk.f32.gmra.mxu1 %vm1325_vm3, %v8304_v23  ;;  %v4077_v5 = vsel %vm1325_vm3, %v3971_v11, 2147483647  ;;  %v4064_v12 = vshra.s32 %v4062_v43, 16  ;;  %v4033_v21 = vand.u32 65535, %v11385_v27 }
 0x917   : > { %4037 = vmin.xlane.f32.xlu0 %v4036_v25  ;;  %v4079_v37 = vshra.s32 %v4077_v5, 16  ;;  %9274 = vmatpush3.msra.mxu1 %v11090_v38  ;;  %v3990_v38 = vcvt.s32.f32 %v3988_v6  ;;  %vm4479_vm8 = vcmask 1041408   ;;  %v9825_v27 = vmov 65535   ;;  %v11473_v60 = vpop.f32.mrf.mxu1 }
 0x918   : > { %4052 = vmin.xlane.f32.xlu1 %v4051_v48  ;;  %9212 = vmatmul.mubr.msk.bf16.gmra.mxu0 %vm1325_vm3, %v3749_v57  ;;  %v4066_v9 = vcvt.s32.f32 %v4064_v12  ;;  %v4035_v61 = vcvt.s32.f32 %v4033_v21  ;;  %v4480_v32 = vsel %vm4478_vm7, 4294967295, %v9825_v27 }
 0x919   : > { %9248 = vmatpush3.bf16.msra.mxu0 %v10187_v39  ;;  %v4081_v41 = vcvt.s32.f32 %v4079_v37  ;;  %v11475_v54 = vpop.f32.mrf.mxu1  ;;  %9353 = vmatprep.subr.bf16.mxu1 %v9615_v17 }
 0x91a   : > { %9249 = vmatprep.subr.bf16.mxu0 %v10191_v45 }
 0x91b   : > { %4067 = vmin.xlane.f32.xlu0 %v4066_v9  ;;  %v11477_v23 = vpop.f32.mrf.mxu1 }
 0x91c   : > { %4082 = vmin.xlane.f32.xlu1 %v4081_v41 }
 0x91d   : > { %9250 = vmatpush3.bf16.msra.mxu0 %v10191_v45  ;;  %v4018_v45 = vand.u32 65535, %v11318_v3 }
 0x91f   : > { %v4020_v51 = vcvt.s32.f32 %v4018_v45 }
 0x98e   : > { %v11431_v1 = vpop.xlane.xlu1 %3992 }
 0x98f   : > { %vm3994_vm12 = vcmp.eq.f32.partialorder %v11296_v28, %v11431_v1  ;;  %v4003_v28 = vand.u32 65535, %v11350_v40  ;;  %v4078_v40 = vand.u32 65535, %v4077_v5 }
 0x990   : > { %v11435_v0 = vpop.xlane.xlu0 %3977  ;;  %v3995_v39 = vsel %vm3994_vm12, %v3990_v38, inf }
 0x991   : > { %3996 = vmin.xlane.f32.xlu1 %v3995_v39  ;;  %vm3979_vm13 = vcmp.eq.f32.partialorder %v11304_v22, %v11435_v0  ;;  %v4005_v55 = vcvt.s32.f32 %v4003_v28  ;;  %v4048_v22 = vand.u32 65535, %v11394_v58  ;;  %v4481_v58 = vsel %vm4479_vm8, %v4480_v32, 0 }
 0x992   : > { %v3980_v59 = vsel %vm3979_vm13, %v3975_v8, inf  ;;  %v11466_v36 = vand.u32 %v4481_v58, %v4374_v56  ;;  %v3999_v8 = vcvt.f32.s32 %v11431_v1  ;;  %v3984_v45 = vcvt.f32.s32 %v11435_v0 }
 0x993   : > { %3981 = vmin.xlane.f32.xlu0 %v3980_v59  ;;  %v4050_v29 = vcvt.s32.f32 %v4048_v22 }
 0x994   : > { %9287 = vmatprep.subr.bf16.mxu0 %v11466_v36  ;;  %v3985_v21 = vshll.u32 %v3984_v45, 16 }
 0x995   : > { %v11440_v49 = vpop.xlane.xlu1 %4022 }
 0x996   : > { %vm4024_vm14 = vcmp.eq.f32.partialorder %v11326_v42, %v11440_v49  ;;  %v4063_v42 = vand.u32 65535, %v4062_v43 }
 0x997   : > { %v4025_v15 = vsel %vm4024_vm14, %v4020_v51, inf }
 0x998   : > { %4026 = vmin.xlane.f32.xlu1 %v4025_v15  ;;  %v4065_v18 = vcvt.s32.f32 %v4063_v42  ;;  %v4000_v15 = vshll.u32 %v3999_v8, 16 }
 0x99c   : > { %v11445_v47 = vpop.xlane.xlu0 %4007 }
 0x99d   : > { %vm4009_vm15 = vcmp.eq.f32.partialorder %v11374_v53, %v11445_v47  ;;  %v4080_v53 = vcvt.s32.f32 %v4078_v40  ;;  %v4014_v27 = vcvt.f32.s32 %v11445_v47 }
 0x99e   : > { %v4010_v3 = vsel %vm4009_vm15, %v4005_v55, inf }
 0x99f   : > { %4011 = vmin.xlane.f32.xlu0 %v4010_v3 }
 0x9a0   : > { %v11451_v20 = vpop.xlane.xlu0 %4037 }
 0x9a1   : > { %v11453_v52 = vpop.xlane.xlu1 %4052  ;;  %vm4039_vm2 = vcmp.eq.f32.partialorder %v4036_v25, %v11451_v20  ;;  %v11479_v25 = vpop.f32.mrf.mxu1 }
 0x9a2   : > { %vm4054_vm4 = vcmp.eq.f32.partialorder %v4051_v48, %v11453_v52  ;;  %v4040_v34 = vsel %vm4039_vm2, %v4035_v61, inf  ;;  %v4029_v61 = vcvt.f32.s32 %v11440_v49 }
 0x9a3   : > { %v4055_v33 = vsel %vm4054_vm4, %v4050_v29, inf  ;;  %4041 = vmin.xlane.f32.xlu0 %v4040_v34  ;;  %v11481_v57 = vpop.f32.mrf.mxu1  ;;  %v11514_v34 = vpop.f32.mrf.mxu0 }
 0x9a4   : > { %4056 = vmin.xlane.f32.xlu1 %v4055_v33  ;;  %v11457_v63 = vpop.xlane.xlu0 %4067  ;;  %v4030_v33 = vshll.u32 %v4029_v61, 16 }
 0x9a5   : > { %v11459_v46 = vpop.xlane.xlu1 %4082  ;;  %vm4069_vm5 = vcmp.eq.f32.partialorder %v4066_v9, %v11457_v63  ;;  %v11483_v11 = vpop.f32.mrf.mxu1 }
 0x9a6   : > { %vm4084_vm6 = vcmp.eq.f32.partialorder %v4081_v41, %v11459_v46  ;;  %v4070_v62 = vsel %vm4069_vm5, %v4065_v18, inf }
 0x9a7   : > { %v4085_v7 = vsel %vm4084_vm6, %v4080_v53, inf  ;;  %4071 = vmin.xlane.f32.xlu0 %v4070_v62  ;;  %v11485_v43 = vpop.f32.mrf.mxu1 }
 0x9a8   : > { %4086 = vmin.xlane.f32.xlu1 %v4085_v7  ;;  %v11521_v7 = vpop.f32.mrf.mxu0 }
 0x9a9   : > { %v11487_v48 = vpop.f32.mrf.mxu1 }
 0x9aa   : > { %v11530_v45 = vpop.f32.mrf.mxu0 }
 0x9ab   : > { %v11489_v5 = vpop.f32.mrf.mxu1 }
 0x9ad   : > { %v11491_v12 = vpop.f32.mrf.mxu1 }
 0x9af   : > { %v11493_v37 = vpop.f32.mrf.mxu1 }
 0x9b1   : > { %v11495_v9 = vpop.f32.mrf.mxu1 }
 0x9b3   : > { %v11497_v41 = vpop.f32.mrf.mxu1 }
 0x9b5   : > { %v11499_v6 = vpop.f32.mrf.mxu1 }
 0x9b7   : > { %v11501_v4 = vpop.f32.mrf.mxu1 }
 0x9b9   : > { %v11503_v38 = vpop.f32.mrf.mxu1 }
 0x9bb   : > { %v11505_v39 = vpop.f32.mrf.mxu1 }
 0x9bd   : > { %v11509_v51 = vpop.f32.mrf.mxu1 }
 0x9bf   : > { %v11512_v42 = vpop.f32.mrf.mxu1 }
 0x9c1   : > { %v11518_v62 = vpop.f32.mrf.mxu1 }
 0x9c3   : > { %v11527_v58 = vpop.f32.mrf.mxu1 }
 0x9c5   : > { %v11534_v47 = vpop.f32.mrf.mxu1 }
 0xa1a   : > { %v3997_v59 = vpop.xlane.xlu1 %3996 }
 0xa1b   : > { %v3998_v28 = vcvt.f32.s32 %v3997_v59 }
 0xa1c   : > { %v3982_v55 = vpop.xlane.xlu0 %3981 }
 0xa1d   : > { %v4001_v22 = vadd.s32 %v4000_v15, %v3998_v28  ;;  %v3983_v3 = vcvt.f32.s32 %v3982_v55  ;;  %v4015_v15 = vshll.u32 %v4014_v27, 16  ;;  %v4044_v28 = vcvt.f32.s32 %v11451_v20 }
 0xa1f   : > { %v4093_v29 = vand.u32 63, %v4001_v22  ;;  %v3986_v40 = vadd.s32 %v3985_v21, %v3983_v3  ;;  %v4059_v21 = vcvt.f32.s32 %v11453_v52  ;;  %v11537_v3 = vpop.f32.mrf.mxu0 }
 0xa21   : > { %vm4101_vm9 = vcmp.eq.s32.totalorder %v10199_v19, %v4093_v29  ;;  %v4092_v1 = vand.u32 63, %v3986_v40  ;;  %v4027_v0 = vpop.xlane.xlu1 %4026  ;;  %v11539_v29 = vpop.f32.mrf.mxu1  ;;  %v4045_v40 = vshll.u32 %v4044_v28, 16  ;;  %v4060_v20 = vshll.u32 %v4059_v21, 16 }
 0xa22   : > { %v4028_v18 = vcvt.f32.s32 %v4027_v0  ;;  %v8318_v53 = vsel %vm4101_vm9, 1.0, %v9822_v2  ;;  %v11545_v27 = vpop.f32.mrf.mxu0 }
 0xa23   : > { %vm4100_vm10 = vcmp.eq.s32.totalorder %v10199_v19, %v4092_v1  ;;  %v4074_v1 = vcvt.f32.s32 %v11457_v63 }
 0xa24   : > { %v4031_v49 = vadd.s32 %v4030_v33, %v4028_v18  ;;  %v8317_v56 = vsel %vm4100_vm10, 1.0, %v9822_v2 }
 0xa25   : > { %v4124_v32 = vpack.c.bf16 %v8318_v53, %v8317_v56  ;;  %9275 = vmatprep.mubr.msk.f32.mxu1 %vm1325_vm3, %v8317_v56  ;;  %v4075_v63 = vshll.u32 %v4074_v1, 16 }
 0xa26   : > { %9276 = vmatmul.mubr.msk.f32.vlgmr.msra.gmra.mxu1 %vm1325_vm3, %v8318_v53  ;;  %v4095_v8 = vand.u32 63, %v4031_v49  ;;  %v4089_v53 = vcvt.f32.s32 %v11459_v46 }
 0xa27   : > { %9251 = vmatprep.mubr.msk.bf16.mxu0 %vm1325_vm3, %v4124_v32  ;;  %9354 = vmatpush3.bf16.msra.mxu1 %v9615_v17 }
 0xa28   : > { %v4012_v59 = vpop.xlane.xlu0 %4011  ;;  %vm4103_vm11 = vcmp.eq.s32.totalorder %v10199_v19, %v4095_v8 }
 0xa29   : > { %v4013_v55 = vcvt.f32.s32 %v4012_v59  ;;  %v8320_v49 = vsel %vm4103_vm11, 1.0, %v9822_v2 }
 0xa2b   : > { %v4016_v22 = vadd.s32 %v4015_v15, %v4013_v55  ;;  %v11548_v15 = vpop.f32.mrf.mxu1 }
 0xa2c   : > { %v4042_v61 = vpop.xlane.xlu0 %4041 }
 0xa2d   : > { %v4094_v0 = vand.u32 63, %v4016_v22  ;;  %v4057_v33 = vpop.xlane.xlu1 %4056  ;;  %v4043_v18 = vcvt.f32.s32 %v4042_v61  ;;  %v4090_v22 = vshll.u32 %v4089_v53, 16 }
 0xa2e   : > { %v4058_v52 = vcvt.f32.s32 %v4057_v33 }
 0xa2f   : > { %v4046_v56 = vadd.s32 %v4045_v40, %v4043_v18  ;;  %vm4102_vm12 = vcmp.eq.s32.totalorder %v10199_v19, %v4094_v0  ;;  %v11557_v18 = vpop.f32.mrf.mxu0 }
 0xa30   : > { %v4061_v32 = vadd.s32 %v4060_v20, %v4058_v52  ;;  %v4072_v8 = vpop.xlane.xlu0 %4071  ;;  %v8319_v59 = vsel %vm4102_vm12, 1.0, %v9822_v2  ;;  %v11559_v20 = vpop.f32.mrf.mxu1 }
 0xa31   : > { %v4096_v28 = vand.u32 63, %v4046_v56  ;;  %v4087_v55 = vpop.xlane.xlu1 %4086  ;;  %v4073_v21 = vcvt.f32.s32 %v4072_v8  ;;  %9278 = vmatprep.mubr.msk.f32.mxu1 %vm1325_vm3, %v8319_v59  ;;  %v4125_v46 = vpack.c.bf16 %v8320_v49, %v8319_v59  ;;  %v11574_v59 = vld [vmem:[%s9992_s1 + $0x8] sm:$0xff] }
 0xa32   : > { %v4097_v61 = vand.u32 63, %v4061_v32  ;;  %v4088_v40 = vcvt.f32.s32 %v4087_v55  ;;  %9279 = vmatmul.mubr.msk.f32.gmra.mxu1 %vm1325_vm3, %v8320_v49  ;;  %v11565_v32 = vld [vmem:[%s9992_s1] sm:$0xff]  ;;  %v11580_v55 = vpop.f32.mrf.mxu1 }
 0xa33   : > { %v4076_v0 = vadd.s32 %v4075_v63, %v4073_v21  ;;  %9252 = vmatmul.mubr.msk.bf16.vlgmr.msra.gmra.mxu0 %vm1325_vm3, %v4125_v46  ;;  %vm4104_vm13 = vcmp.eq.s32.totalorder %v10199_v19, %v4096_v28  ;;  %v1688_v8 = vsub.f32 %v11565_v32, %v11471_v44  ;;  %v1689_v63 = vsub.f32 %v11574_v59, %v11469_v30  ;;  %v11578_v28 = vpop.f32.mrf.mxu0  ;;  %v11592_v30 = vld [vmem:[%s9992_s1 + $0x10] sm:$0xff] }
 0xa34   : > { %v4091_v33 = vadd.s32 %v4090_v22, %v4088_v40  ;;  %v8321_v1 = vsel %vm4104_vm13, 1.0, %v9822_v2  ;;  %vm4105_vm14 = vcmp.eq.s32.totalorder %v10199_v19, %v4097_v61  ;;  %9288 = vmatpush3.bf16.msra.mxu0 %v11466_v36  ;;  %v11588_v22 = vpop.f32.mrf.mxu1  ;;  %v1690_v61 = vsub.f32 %v11592_v30, %v11475_v54  ;;  %v11597_v40 = vld [vmem:[%s9992_s1 + $0x20] sm:$0xff] }
 0xa35   : > { %v4098_v53 = vand.u32 63, %v4076_v0  ;;  %9281 = vmatprep.mubr.msk.f32.mxu1 %vm1325_vm3, %v8321_v1  ;;  %v8322_v52 = vsel %vm4105_vm14, 1.0, %v9822_v2  ;;  %v11586_v46 = vpop.f32.mrf.mxu0 }
 0xa36   : > { %v4099_v49 = vand.u32 63, %v4091_v33  ;;  %v4126_v56 = vpack.c.bf16 %v8322_v52, %v8321_v1  ;;  %9282 = vmatmul.mubr.msk.f32.gmra.mxu1 %vm1325_vm3, %v8322_v52  ;;  %v11604_v33 = vld [vmem:[%s9992_s1 + $0x18] sm:$0xff] }
 0xa37   : > { %vm4106_vm15 = vcmp.eq.s32.totalorder %v10199_v19, %v4098_v53  ;;  %v11601_v0 = vpop.f32.mrf.mxu0  ;;  %v1691_v1 = vsub.f32 %v11604_v33, %v11473_v60  ;;  %v11609_v53 = vld [vmem:[%s9992_s1 + $0x28] sm:$0xff]  ;;  %v2825_v35 = vsub.f32 %v11604_v33, %v11559_v20 }
 0xa38   : > { %9255 = vmatprep.mubr.msk.bf16.mxu0 %vm1325_vm3, %v4126_v56  ;;  %v8323_v36 = vsel %vm4106_vm15, 1.0, %v9822_v2  ;;  %vm4107_vm2 = vcmp.eq.s32.totalorder %v10199_v19, %v4099_v49  ;;  %v4342_v19 = vpack.c.bf16 %v1689_v63, %v1688_v8  ;;  %v1693_v52 = vsub.f32 %v11609_v53, %v11477_v23  ;;  %v11613_v49 = vpop.f32.mrf.mxu1 }
 0xa39   : > { %9284 = vmatprep.mubr.msk.f32.mxu1 %vm1325_vm3, %v8323_v36  ;;  %v8324_v44 = vsel %vm4107_vm2, 1.0, %v9822_v2  ;;  %v1692_v2 = vsub.f32 %v11597_v40, %v11479_v25  ;;  %v4343_v54 = vpack.c.bf16 %v1691_v1, %v1690_v61  ;;  %v11615_v8 = vpop.f32.mrf.mxu0  ;;  %v2066_v23 = vsub.f32 %v11565_v32, %v11487_v48 }
 0xa3a   : > { %v4127_v21 = vpack.c.bf16 %v8324_v44, %v8323_v36  ;;  %9285 = vmatmul.mubr.msk.f32.gmra.mxu1 %vm1325_vm3, %v8324_v44  ;;  %v11618_v25 = vpop.f32.mrf.mxu1  ;;  %v11622_v36 = vld [vmem:[%s9992_s1 + $0x30] sm:$0xff]  ;;  %v11631_v44 = vld [vmem:[%s9992_s1 + $0x38] sm:$0xff]  ;;  %v2068_v48 = vsub.f32 %v11592_v30, %v11491_v12 }
 0xa3b   : > { %v4344_v56 = vpack.c.bf16 %v1693_v52, %v1692_v2  ;;  %v1694_v60 = vsub.f32 %v11622_v36, %v11483_v11  ;;  %v11628_v63 = vpop.f32.mrf.mxu0  ;;  %v2072_v12 = vsub.f32 %v11622_v36, %v11499_v6 }
 0xa3c   : > { %9256 = vmatmul.mubr.msk.bf16.gmra.mxu0 %vm1325_vm3, %v4127_v21  ;;  %v1695_v21 = vsub.f32 %v11631_v44, %v11481_v57  ;;  %v11637_v61 = vpop.f32.mrf.mxu1  ;;  %v2070_v57 = vsub.f32 %v11597_v40, %v11495_v9  ;;  %vm4893_vm3 = vcmask 261120  }
 0xa3d   : > { %9289 = vmatprep.mubr.msk.bf16.mxu0 %vm972_vm0, %v4342_v19  ;;  %v2067_v19 = vsub.f32 %v11574_v59, %v11485_v43  ;;  %v11639_v52 = vpop.f32.mrf.mxu0 }
 0xa3e   : > { %v4345_v2 = vpack.c.bf16 %v1695_v21, %v1694_v60  ;;  %v11641_v11 = vpop.f32.mrf.mxu1  ;;  %v2071_v60 = vsub.f32 %v11609_v53, %v11493_v37  ;;  %v2073_v37 = vsub.f32 %v11631_v44, %v11497_v41  ;;  %v2448_v41 = vsub.f32 %v11597_v40, %v11518_v62 }
 0xa3f   : > { %v4346_v1 = vpack.c.bf16 %v2067_v19, %v2066_v23 }
 0xa40   : > { %v11651_v43 = vpop.f32.mrf.mxu1  ;;  %v4348_v21 = vpack.c.bf16 %v2071_v60, %v2070_v57  ;;  %v4349_v57 = vpack.c.bf16 %v2073_v37, %v2072_v12 }
 0xa41   : > { %v3200_v20 = vsub.f32 %v11565_v32, %v11651_v43 }
 0xa44   : > { %9290 = vmatmul.mubr.msk.bf16.vlgmr.msra.gmra.mxu0 %vm972_vm0, %v4343_v54  ;;  %v11649_v54 = vpop.f32.mrf.mxu0 }
 0xa45   : > { %9293 = vmatprep.mubr.msk.bf16.mxu0 %vm972_vm0, %v4344_v56  ;;  %v2069_v56 = vsub.f32 %v11604_v33, %v11489_v5  ;;  %v2444_v5 = vsub.f32 %v11565_v32, %v11503_v38  ;;  %v2446_v38 = vsub.f32 %v11592_v30, %v11509_v51  ;;  %v2450_v51 = vsub.f32 %v11622_v36, %v11534_v47 }
 0xa46   : > { %v11657_v19 = vpop.f32.mrf.mxu0 }
 0xa47   : > { %v4347_v23 = vpack.c.bf16 %v2069_v56, %v2068_v48  ;;  %v2445_v48 = vsub.f32 %v11574_v59, %v11501_v4  ;;  %v2447_v4 = vsub.f32 %v11604_v33, %v11505_v39  ;;  %v2822_v39 = vsub.f32 %v11565_v32, %v11548_v15 }
 0xa48   : > { %v11665_v9 = vpop.f32.mrf.mxu0  ;;  %v2824_v15 = vsub.f32 %v11592_v30, %v11580_v55  ;;  %v2828_v55 = vsub.f32 %v11622_v36, %v11637_v61 }
 0xa49   : > { %v4350_v60 = vpack.c.bf16 %v2445_v48, %v2444_v5  ;;  %v2449_v5 = vsub.f32 %v11609_v53, %v11512_v42  ;;  %v4351_v37 = vpack.c.bf16 %v2447_v4, %v2446_v38  ;;  %v2451_v42 = vsub.f32 %v11631_v44, %v11527_v58 }
 0xa4a   : > { %v11675_v56 = vpop.f32.mrf.mxu0  ;;  %v2826_v58 = vsub.f32 %v11597_v40, %v11613_v49  ;;  %v2829_v49 = vsub.f32 %v11631_v44, %v11618_v25 }
 0xa4b   : > { %v4352_v48 = vpack.c.bf16 %v2449_v5, %v2448_v41  ;;  %v2823_v41 = vsub.f32 %v11574_v59, %v11539_v29  ;;  %v4353_v5 = vpack.c.bf16 %v2451_v42, %v2450_v51  ;;  %v2827_v51 = vsub.f32 %v11609_v53, %v11588_v22 }
 0xa4c   : > { %9294 = vmatmul.mubr.msk.bf16.gmra.mxu0 %vm972_vm0, %v4345_v2  ;;  %v11659_v2 = vpop.f32.mrf.mxu1  ;;  %v11680_v6 = vpop.f32.mrf.mxu0  ;;  %v4355_v42 = vpack.c.bf16 %v2825_v35, %v2824_v15  ;;  %v3201_v35 = vsub.f32 %v11574_v59, %v11641_v11 }
 0xa4d   : > { %9297 = vmatprep.mubr.msk.bf16.mxu0 %vm972_vm0, %v4346_v1  ;;  %v3203_v11 = vsub.f32 %v11604_v33, %v11659_v2 }
 0xa4e   : > { %v11669_v1 = vpop.f32.mrf.mxu1  ;;  %v11689_v12 = vpop.f32.mrf.mxu0 }
 0xa4f   : > { %v3202_v61 = vsub.f32 %v11592_v30, %v11669_v1 }
 0xa54   : > { %9298 = vmatmul.mubr.msk.bf16.gmra.mxu0 %vm972_vm0, %v4347_v23  ;;  %v11677_v23 = vpop.f32.mrf.mxu1 }
 0xa55   : > { %9301 = vmatprep.mubr.msk.bf16.mxu0 %vm972_vm0, %v4348_v21 }
 0xa56   : > { %v3181_v21 = vpop.f32.mrf.mxu1 }
 0xa57   : > { %v3204_v25 = vsub.f32 %v11597_v40, %v3181_v21 }
 0xa5c   : > { %9302 = vmatmul.mubr.msk.bf16.gmra.mxu0 %vm972_vm0, %v4349_v57  ;;  %v11693_v57 = vpop.f32.mrf.mxu1 }
 0xa5d   : > { %9305 = vmatprep.mubr.msk.bf16.mxu0 %vm972_vm0, %v4350_v60  ;;  %v11696_v60 = vpop.f32.mrf.mxu0 }
 0xa5e   : > { %v3191_v62 = vpop.f32.mrf.mxu1 }
 0xa5f   : > { %v11705_v38 = vpop.f32.mrf.mxu0  ;;  %v3206_v2 = vsub.f32 %v11622_v36, %v3191_v62 }
 0xa60   : > { %v9189_v4 = vpop.f32.mrf.mxu1 }
 0xa62   : > { %v3539_v47 = vpop.f32.mrf.mxu1 }
 0xa64   : > { %9306 = vmatmul.mubr.msk.bf16.gmra.mxu0 %vm972_vm0, %v4351_v37  ;;  %v4354_v37 = vpack.c.bf16 %v2823_v41, %v2822_v39  ;;  %v9192_v39 = vpop.f32.mrf.mxu1  ;;  %v4356_v41 = vpack.c.bf16 %v2827_v51, %v2826_v58  ;;  %v4357_v58 = vpack.c.bf16 %v2829_v49, %v2828_v55  ;;  %v3205_v55 = vsub.f32 %v11609_v53, %v11677_v23 }
 0xa65   : > { %9309 = vmatprep.mubr.msk.bf16.mxu0 %vm972_vm0, %v4352_v48  ;;  %v11710_v48 = vpop.f32.mrf.mxu0 }
 0xa66   : > { %v4360_v1 = vpack.c.bf16 %v3205_v55, %v3204_v25  ;;  %v11768_v25 = vld [vmem:[%s13937_s12] sm:$0xff]   ;;  %v3579_v55 = vsub.f32 %v11574_v59, %v9189_v4 }
 0xa67   : > { %v11719_v29 = vpop.f32.mrf.mxu0 }
 0xa6c   : > { %9310 = vmatmul.mubr.msk.bf16.gmra.mxu0 %vm972_vm0, %v4353_v5  ;;  %v11724_v5 = vpop.f32.mrf.mxu0 }
 0xa6d   : > { %9313 = vmatprep.mubr.msk.bf16.mxu0 %vm972_vm0, %v4354_v37  ;;  %v3549_v37 = vpop.f32.mrf.mxu1 }
 0xa6e   : > { %v11733_v22 = vpop.f32.mrf.mxu0 }
 0xa6f   : > { %v9195_v15 = vpop.f32.mrf.mxu1 }
 0xa70   : > { %v11737_v51 = vpop.f32.mrf.mxu0 }
 0xa72   : > { %v11743_v43 = vpop.f32.mrf.mxu0 }
 0xa74   : > { %9314 = vmatmul.mubr.msk.bf16.gmra.mxu0 %vm972_vm0, %v4355_v42  ;;  %v4358_v42 = vpack.c.bf16 %v3201_v35, %v3200_v20  ;;  %v4359_v20 = vpack.c.bf16 %v3203_v11, %v3202_v61  ;;  %v11753_v35 = vld [vmem:[%s13937_s12 + $0x8] sm:$0xff]   ;;  %v3207_v11 = vsub.f32 %v11631_v44, %v11693_v57  ;;  %v3580_v57 = vsub.f32 %v11592_v30, %v3549_v37 }
 0xa75   : > { %9317 = vmatprep.mubr.msk.bf16.mxu0 %vm972_vm0, %v4356_v41  ;;  %v3559_v41 = vpop.f32.mrf.mxu1  ;;  %9421 = vmatprep.subr.bf16.mxu0 %v11753_v35 }
 0xa76   : > { %9422 = vmatpush3.bf16.msra.mxu0 %v11753_v35 }
 0xa77   : > { %v9198_v49 = vpop.f32.mrf.mxu1  ;;  %9423 = vmatprep.subr.bf16.mxu0 %v11768_v25 }
 0xa79   : > { %v3569_v21 = vpop.f32.mrf.mxu1 }
 0xa7a   : > { %9424 = vmatpush3.bf16.msra.mxu0 %v11768_v25 }
 0xa7b   : > { %v9233_v61 = vpop.f32.mrf.mxu1 }
 0xa7c   : > { %9318 = vmatmul.mubr.msk.bf16.gmra.mxu0 %vm972_vm0, %v4357_v58  ;;  %v11755_v58 = vpop.f32.mrf.mxu0 }
 0xa7d   : > { %9321 = vmatprep.mubr.msk.bf16.mxu0 %vm972_vm0, %v4358_v42  ;;  %v3578_v42 = vsub.f32 %v11565_v32, %v3539_v47  ;;  %v3917_v47 = vpop.f32.mrf.mxu1 }
 0xa7e   : > { %v11762_v23 = vpop.f32.mrf.mxu0 }
 0xa80   : > { %v11775_v62 = vpop.f32.mrf.mxu0 }
 0xa81   : > { %14040 = vst [vmem:[#allocation2_spill] sm:$0xff] %v11775_v62  ;;  %v3583_v62 = vsub.f32 %v11609_v53, %v9195_v15 }
 0xa82   : > { %v11783_v4 = vpop.f32.mrf.mxu0 }
 0xa83   : > { %14041 = vst [vmem:[#allocation3_spill] sm:$0xff] %v11783_v4 }
 0xa84   : > { %9322 = vmatmul.mubr.msk.bf16.gmra.mxu0 %vm972_vm0, %v4359_v20  ;;  %v4361_v20 = vpack.c.bf16 %v3207_v11, %v3206_v2  ;;  %v3582_v2 = vsub.f32 %v11597_v40, %v3559_v41  ;;  %v9236_v11 = vpop.f32.mrf.mxu1  ;;  %v3584_v41 = vsub.f32 %v11622_v36, %v3569_v21 }
 0xa85   : > { %9325 = vmatprep.mubr.msk.bf16.mxu0 %vm972_vm0, %v4360_v1  ;;  %v4362_v1 = vpack.c.bf16 %v3579_v55, %v3578_v42  ;;  %v9616_v42 = vld [vmem:[%s13935_s10] sm:$0xff]   ;;  %v3581_v55 = vsub.f32 %v11604_v33, %v9192_v39  ;;  %v3956_v39 = vsub.f32 %v11565_v32, %v3917_v47 }
 0xa86   : > { %9355 = vmatprep.subr.bf16.mxu1 %v9616_v42  ;;  %v4364_v37 = vpack.c.bf16 %v3583_v62, %v3582_v2  ;;  %v3927_v17 = vpop.f32.mrf.mxu1  ;;  %v3957_v62 = vsub.f32 %v11574_v59, %v9233_v61 }
 0xa87   : > { %9356 = vmatpush3.bf16.msra.mxu1 %v9616_v42  ;;  %v3958_v21 = vsub.f32 %v11592_v30, %v3927_v17 }
 0xa88   : > { %9433 = vmatprep.subr.bf16.mxu1 %v11753_v35  ;;  %v9239_v15 = vpop.f32.mrf.mxu1 }
 0xa89   : > { %v3961_v61 = vsub.f32 %v11609_v53, %v9239_v15 }
 0xa8c   : > { %9326 = vmatmul.mubr.msk.bf16.gmra.mxu0 %vm972_vm0, %v4361_v20  ;;  %v4363_v20 = vpack.c.bf16 %v3581_v55, %v3580_v57  ;;  %v3585_v57 = vsub.f32 %v11631_v44, %v9198_v49  ;;  %v4366_v55 = vpack.c.bf16 %v3957_v62, %v3956_v39  ;;  %v3959_v49 = vsub.f32 %v11604_v33, %v9236_v11 }
 0xa8d   : > { %9329 = vmatprep.mubr.msk.bf16.mxu0 %vm972_vm0, %v4362_v1  ;;  %v11791_v1 = vpop.f32.mrf.mxu0 }
 0xa8e   : > { %14042 = vst [vmem:[#allocation4_spill] sm:$0xff] %v11791_v1  ;;  %v4365_v2 = vpack.c.bf16 %v3585_v57, %v3584_v41  ;;  %v3937_v1 = vpop.f32.mrf.mxu1  ;;  %v4367_v41 = vpack.c.bf16 %v3959_v49, %v3958_v21 }
 0xa8f   : > { %v11797_v4 = vpop.f32.mrf.mxu0  ;;  %v3960_v47 = vsub.f32 %v11597_v40, %v3937_v1 }
 0xa90   : > { %14043 = vst [vmem:[#allocation5_spill] sm:$0xff] %v11797_v4 }
 0xa91   : > { %v11801_v42 = vpop.f32.mrf.mxu0  ;;  %v4368_v39 = vpack.c.bf16 %v3961_v61, %v3960_v47 }
 0xa94   : > { %9330 = vmatmul.mubr.msk.bf16.gmra.mxu0 %vm972_vm0, %v4363_v20  ;;  %v11805_v20 = vpop.f32.mrf.mxu0 }
 0xa95   : > { %9333 = vmatprep.mubr.msk.bf16.mxu0 %vm972_vm0, %v4364_v37  ;;  %v9242_v37 = vpop.f32.mrf.mxu1 }
 0xa96   : > { %v11811_v4 = vpop.f32.mrf.mxu0  ;;  %v3963_v1 = vsub.f32 %v11631_v44, %v9242_v37 }
 0xa97   : > { %v3947_v57 = vpop.f32.mrf.mxu1 }
 0xa98   : > { %v11815_v62 = vpop.f32.mrf.mxu0  ;;  %v3962_v17 = vsub.f32 %v11622_v36, %v3947_v57 }
 0xa9a   : > { %v4369_v11 = vpack.c.bf16 %v3963_v1, %v3962_v17 }
 0xa9c   : > { %9334 = vmatmul.mubr.msk.bf16.gmra.mxu0 %vm972_vm0, %v4365_v2  ;;  %v11820_v2 = vpop.f32.mrf.mxu0 }
 0xa9d   : > { %9337 = vmatprep.mubr.msk.bf16.mxu0 %vm972_vm0, %v4366_v55  ;;  %14044 = vst [vmem:[#allocation6_spill] sm:$0xff] %v11820_v2 }
 0xa9e   : > { %v11823_v55 = vpop.f32.mrf.mxu0 }
 0xa9f   : > { %14045 = vst [vmem:[#allocation7_spill] sm:$0xff] %v11823_v55 }
 0xaa0   : > { %v11825_v15 = vpop.f32.mrf.mxu0 }
 0xaa1   : > { %14046 = vst [vmem:[#allocation8_spill] sm:$0xff] %v11825_v15 }
 0xaa2   : > { %v11827_v21 = vpop.f32.mrf.mxu0 }
 0xaa3   : > { %14047 = vst [vmem:[#allocation9_spill] sm:$0xff] %v11827_v21 }
 0xaa4   : > { %9338 = vmatmul.mubr.msk.bf16.gmra.mxu0 %vm972_vm0, %v4367_v41  ;;  %v11829_v47 = vpop.f32.mrf.mxu0 }
 0xaa5   : > { %9341 = vmatprep.mubr.msk.bf16.mxu0 %vm972_vm0, %v4368_v39  ;;  %14048 = vst [vmem:[#allocation10_spill] sm:$0xff] %v11829_v47 }
 0xaa6   : > { %v11831_v49 = vpop.f32.mrf.mxu0 }
 0xaa7   : > { %14049 = vst [vmem:[#allocation11_spill] sm:$0xff] %v11831_v49 }
 0xaa8   : > { %v11833_v61 = vpop.f32.mrf.mxu0 }
 0xaa9   : > { %14050 = vst [vmem:[#allocation12_spill] sm:$0xff] %v11833_v61 }
 0xaaa   : > { %v11835_v41 = vpop.f32.mrf.mxu0 }
 0xaab   : > { %14051 = vst [vmem:[#allocation13_spill] sm:$0xff] %v11835_v41 }
 0xaac   : > { %9342 = vmatmul.mubr.msk.bf16.gmra.mxu0 %vm972_vm0, %v4369_v11  ;;  %v11837_v37 = vpop.f32.mrf.mxu0 }
 0xaad   : > { %14052 = vst [vmem:[#allocation14_spill] sm:$0xff] %v11837_v37 }
 0xaae   : > { %v11839_v39 = vpop.f32.mrf.mxu0 }
 0xaaf   : > { %14053 = vst [vmem:[#allocation15_spill] sm:$0xff] %v11839_v39 }
 0xab0   : > { %v11841_v57 = vpop.f32.mrf.mxu0 }
 0xab1   : > { %14054 = vst [vmem:[#allocation16_spill] sm:$0xff] %v11841_v57 }
 0xab2   : > { %v11843_v17 = vpop.f32.mrf.mxu0 }
 0xab3   : > { %14055 = vst [vmem:[#allocation17_spill] sm:$0xff] %v11843_v17 }
 0xab4   : > { %v11845_v1 = vpop.f32.mrf.mxu0 }
 0xab5   : > { %14056 = vst [vmem:[#allocation18_spill] sm:$0xff] %v11845_v1 }
 0xab6   : > { %v11847_v11 = vpop.f32.mrf.mxu0 }
 0xab7   : > { %14057 = vst [vmem:[#allocation19_spill] sm:$0xff] %v11847_v11 }
 0xab8   : > { %v11849_v2 = vpop.f32.mrf.mxu0 }
 0xab9   : > { %14058 = vst [vmem:[#allocation20_spill] sm:$0xff] %v11849_v2 }
 0xaba   : > { %v11851_v47 = vpop.f32.mrf.mxu0 }
 0xabb   : > { %14059 = vst [vmem:[#allocation21_spill] sm:$0xff] %v11851_v47 }
 0xabc   : > { %v11853_v49 = vpop.f32.mrf.mxu0 }
 0xabd   : > { %14060 = vst [vmem:[#allocation22_spill] sm:$0xff] %v11853_v49 }
 0xabe   : > { %v11855_v21 = vpop.f32.mrf.mxu0 }
 0xabf   : > { %14061 = vst [vmem:[#allocation23_spill] sm:$0xff] %v11855_v21 }
 0xac0   : > { %v11859_v17 = vpop.f32.mrf.mxu0 }
 0xac2   : > { %v11862_v1 = vpop.f32.mrf.mxu0 }
 0xac3   : > { %14062 = vst [vmem:[#allocation24_spill] sm:$0xff] %v11862_v1 }
 0xae6   : > { %v9277_v61 = vpop.f32.mrf.mxu1 }
 0xae7   : > { %v4335_v37 = vsub.f32 %v11574_v59, %v9277_v61 }
 0xae8   : > { %v4295_v41 = vpop.f32.mrf.mxu1 }
 0xae9   : > { %v4334_v39 = vsub.f32 %v11565_v32, %v4295_v41 }
 0xaeb   : > { %v4370_v57 = vpack.c.bf16 %v4335_v37, %v4334_v39 }
 0xaed   : > { %9345 = vmatprep.mubr.msk.bf16.mxu0 %vm972_vm0, %v4370_v57 }
 0xaf2   : > { %v9280_v11 = vpop.f32.mrf.mxu1 }
 0xaf3   : > { %v11864_v2 = vpop.f32.mrf.mxu0  ;;  %v4337_v49 = vsub.f32 %v11604_v33, %v9280_v11 }
 0xaf4   : > { %14063 = vst [vmem:[#allocation25_spill] sm:$0xff] %v11864_v2  ;;  %v4305_v47 = vpop.f32.mrf.mxu1 }
 0xaf5   : > { %v4336_v55 = vsub.f32 %v11592_v30, %v4305_v47  ;;  %v11868_v21 = vpop.f32.mrf.mxu0  ;;  %v9789_v30 = vld [vmem:[%s13932_s7] ss:$0 sm:$0xff] }
 0xaf6   : > { %v9283_v59 = vpop.f32.mrf.mxu1  ;;  %v945_v33 = vadd.f32 %v9789_v30, %v10165_v16 }
 0xaf7   : > { %v4371_v61 = vpack.c.bf16 %v4337_v49, %v4336_v55  ;;  %v11870_v32 = vpop.f32.mrf.mxu0  ;;  %v4339_v37 = vsub.f32 %v11609_v53, %v9283_v59 }
 0xaf8   : > { %v4315_v41 = vpop.f32.mrf.mxu1 }
 0xaf9   : > { %v4338_v39 = vsub.f32 %v11597_v40, %v4315_v41  ;;  %v11874_v57 = vpop.f32.mrf.mxu0  ;;  %9346 = vmatmul.mubr.msk.bf16.gmra.mxu0 %vm972_vm0, %v4371_v61  ;;  %v942_v40 = vadd.f32 %v9789_v30, %v10159_v10  ;;  %v11900_v10 = vld [vmem:[%s13934_s9] ss:$0 sm:$0xff] }
 0xafa   : > { %v9286_v2 = vpop.f32.mrf.mxu1 }
 0xafb   : > { %v4372_v1 = vpack.c.bf16 %v4339_v37, %v4338_v39  ;;  %v4341_v49 = vsub.f32 %v11631_v44, %v9286_v2  ;;  %v5279_v61 = vpack.c.bf16 %v945_v33, %v942_v40  ;;  %v958_v44 = vadd.f32 %v9789_v30, %v10172_v24 }
 0xafc   : > { %v11881_v55 = vpop.f32.mrf.mxu0  ;;  %v4325_v47 = vpop.f32.mrf.mxu1 }
 0xafd   : > { %14064 = vst [vmem:[#allocation26_spill] sm:$0xff] %v11881_v55  ;;  %v4340_v53 = vsub.f32 %v11622_v36, %v4325_v47  ;;  %9349 = vmatprep.mubr.msk.bf16.mxu0 %vm972_vm0, %v4372_v1  ;;  %v961_v36 = vadd.f32 %v9789_v30, %v10196_v50 }
 0xafe   : > { %v11887_v11 = vpop.f32.mrf.mxu0 }
 0xaff   : > { %v4373_v59 = vpack.c.bf16 %v4341_v49, %v4340_v53  ;;  %v5281_v37 = vpack.c.bf16 %v961_v36, %v958_v44  ;;  %v14065_v49 = vpack.c.bf16 %v10163_v14, %v10161_v13 }
 0xb00   : > { %v11889_v41 = vpop.f32.mrf.mxu0 }
 0xb01   : > { %9350 = vmatmul.mubr.msk.bf16.gmra.mxu0 %vm972_vm0, %v4373_v59 }
 0xb02   : > { %v11892_v16 = vpop.f32.mrf.mxu0  ;;  %9425 = vmatprep.mubr.msk.bf16.mxu0 %vm4893_vm3, %v5279_v61 }
 0xb04   : > { %v9291_v2 = vpop.f32.mrf.mxu0 }
 0xb05   : > { %v4528_v24 = vadd.f32 %v9291_v2, %v11900_v10  ;;  %v14066_v2 = vpack.c.bf16 %v10176_v31, %v10174_v26 }
 0xb06   : > { %v4519_v1 = vpop.f32.mrf.mxu0 }
 0xb07   : > { %v4520_v33 = vadd.f32 %v11900_v10, %v4519_v1  ;;  %v4776_v44 = vmax.f32 %v4528_v24, 0.0 }
 0xb08   : > { %v9292_v39 = vpop.f32.mrf.mxu0 }
 0xb09   : > { %v4531_v47 = vadd.f32 %v9292_v39, %v11900_v10  ;;  %9426 = vmatmul.mubr.msk.bf16.vlgmr.msra.gmra.mxu0 %vm4893_vm3, %v14065_v49  ;;  %v4774_v59 = vmax.f32 %v4520_v33, 0.0 }
 0xb0a   : > { %v4522_v50 = vpop.f32.mrf.mxu0  ;;  %9429 = vmatprep.mubr.msk.bf16.mxu0 %vm4893_vm3, %v5281_v37 }
 0xb0b   : > { %v4523_v30 = vadd.f32 %v11900_v10, %v4522_v50  ;;  %v4777_v53 = vmax.f32 %v4531_v47, 0.0 }
 0xb0c   : > { %v9295_v40 = vpop.f32.mrf.mxu0 }
 0xb0d   : > { %v4775_v61 = vmax.f32 %v4523_v30, 0.0  ;;  %v4839_v39 = vpack.c.bf16 %v4777_v53, %v4776_v44  ;;  %v4544_v37 = vadd.f32 %v9295_v40, %v11900_v10 }
 0xb0e   : > { %v4535_v36 = vpop.f32.mrf.mxu0 }
 0xb0f   : > { %v4838_v1 = vpack.c.bf16 %v4775_v61, %v4774_v59  ;;  %v4536_v13 = vadd.f32 %v11900_v10, %v4535_v36  ;;  %v4780_v30 = vmax.f32 %v4544_v37, 0.0 }
 0xb10   : > { %v9296_v55 = vpop.f32.mrf.mxu0 }
 0xb11   : > { %v4547_v14 = vadd.f32 %v9296_v55, %v11900_v10  ;;  %9357 = vmatprep.mubr.msk.bf16.mxu1 %vm4893_vm3, %v4838_v1  ;;  %9430 = vmatmul.mubr.msk.bf16.gmra.mxu0 %vm4893_vm3, %v14066_v2  ;;  %v4778_v55 = vmax.f32 %v4536_v13, 0.0 }
 0xb12   : > { %v4538_v33 = vpop.f32.mrf.mxu0  ;;  %9358 = vmatmul.mubr.msk.bf16.vlgmr.msra.gmra.mxu1 %vm4893_vm3, %v4839_v39 }
 0xb13   : > { %v4539_v47 = vadd.f32 %v11900_v10, %v4538_v33  ;;  %9434 = vmatpush3.bf16.msra.mxu1 %v11753_v35  ;;  %v4781_v49 = vmax.f32 %v4547_v14, 0.0 }
 0xb14   : > { %v9299_v24 = vpop.f32.mrf.mxu0  ;;  %9435 = vmatprep.subr.bf16.mxu1 %v11768_v25 }
 0xb15   : > { %v4779_v50 = vmax.f32 %v4539_v47, 0.0  ;;  %v4841_v31 = vpack.c.bf16 %v4781_v49, %v4780_v30  ;;  %v4560_v35 = vadd.f32 %v9299_v24, %v11900_v10 }
 0xb16   : > { %v4551_v53 = vpop.f32.mrf.mxu0 }
 0xb17   : > { %v4840_v26 = vpack.c.bf16 %v4779_v50, %v4778_v55  ;;  %9436 = vmatpush3.bf16.msra.mxu1 %v11768_v25  ;;  %v4552_v59 = vadd.f32 %v11900_v10, %v4551_v53  ;;  %v4784_v25 = vmax.f32 %v4560_v35, 0.0 }
 0xb18   : > { %v9300_v40 = vpop.f32.mrf.mxu0 }
 0xb19   : > { %v4563_v61 = vadd.f32 %v9300_v40, %v11900_v10  ;;  %9361 = vmatprep.mubr.msk.bf16.mxu1 %vm4893_vm3, %v4840_v26  ;;  %v4782_v13 = vmax.f32 %v4552_v59, 0.0 }
 0xb1a   : > { %v4554_v44 = vpop.f32.mrf.mxu0  ;;  %9362 = vmatmul.mubr.msk.bf16.gmra.mxu1 %vm4893_vm3, %v4841_v31 }
 0xb1b   : > { %v4555_v36 = vadd.f32 %v11900_v10, %v4554_v44  ;;  %v4785_v1 = vmax.f32 %v4563_v61, 0.0 }
 0xb1c   : > { %v9303_v39 = vpop.f32.mrf.mxu0 }
 0xb1d   : > { %v4783_v14 = vmax.f32 %v4555_v36, 0.0  ;;  %v4843_v33 = vpack.c.bf16 %v4785_v1, %v4784_v25  ;;  %v4576_v24 = vadd.f32 %v9303_v39, %v11900_v10 }
 0xb1e   : > { %v4567_v2 = vpop.f32.mrf.mxu0 }
 0xb1f   : > { %v4842_v37 = vpack.c.bf16 %v4783_v14, %v4782_v13  ;;  %v4568_v49 = vadd.f32 %v11900_v10, %v4567_v2  ;;  %v4788_v59 = vmax.f32 %v4576_v24, 0.0 }
 0xb20   : > { %v9304_v47 = vpop.f32.mrf.mxu0 }
 0xb21   : > { %v4579_v55 = vadd.f32 %v9304_v47, %v11900_v10  ;;  %9365 = vmatprep.mubr.msk.bf16.mxu1 %vm4893_vm3, %v4842_v37  ;;  %v4786_v31 = vmax.f32 %v4568_v49, 0.0 }
 0xb22   : > { %v4570_v50 = vpop.f32.mrf.mxu0  ;;  %9366 = vmatmul.mubr.msk.bf16.gmra.mxu1 %vm4893_vm3, %v4843_v33 }
 0xb23   : > { %v4571_v30 = vadd.f32 %v11900_v10, %v4570_v50  ;;  %v4789_v53 = vmax.f32 %v4579_v55, 0.0 }
 0xb24   : > { %v9307_v26 = vpop.f32.mrf.mxu0 }
 0xb25   : > { %v4787_v40 = vmax.f32 %v4571_v30, 0.0  ;;  %v4845_v44 = vpack.c.bf16 %v4789_v53, %v4788_v59  ;;  %v4592_v39 = vadd.f32 %v9307_v26, %v11900_v10 }
 0xb26   : > { %v4583_v61 = vpop.f32.mrf.mxu0 }
 0xb27   : > { %v4844_v35 = vpack.c.bf16 %v4787_v40, %v4786_v31  ;;  %v4584_v1 = vadd.f32 %v11900_v10, %v4583_v61  ;;  %v4792_v49 = vmax.f32 %v4592_v39, 0.0 }
 0xb28   : > { %v9308_v36 = vpop.f32.mrf.mxu0 }
 0xb29   : > { %v4595_v13 = vadd.f32 %v9308_v36, %v11900_v10  ;;  %9369 = vmatprep.mubr.msk.bf16.mxu1 %vm4893_vm3, %v4844_v35  ;;  %v4790_v33 = vmax.f32 %v4584_v1, 0.0 }
 0xb2a   : > { %v4586_v14 = vpop.f32.mrf.mxu0  ;;  %9370 = vmatmul.mubr.msk.bf16.gmra.mxu1 %vm4893_vm3, %v4845_v44 }
 0xb2b   : > { %v4587_v25 = vadd.f32 %v11900_v10, %v4586_v14  ;;  %v4793_v2 = vmax.f32 %v4595_v13, 0.0 }
 0xb2c   : > { %v9311_v37 = vpop.f32.mrf.mxu0 }
 0xb2d   : > { %v4791_v47 = vmax.f32 %v4587_v25, 0.0  ;;  %v4847_v50 = vpack.c.bf16 %v4793_v2, %v4792_v49  ;;  %v4608_v26 = vadd.f32 %v9311_v37, %v11900_v10 }
 0xb2e   : > { %v4599_v55 = vpop.f32.mrf.mxu0 }
 0xb2f   : > { %v4846_v24 = vpack.c.bf16 %v4791_v47, %v4790_v33  ;;  %v4600_v53 = vadd.f32 %v11900_v10, %v4599_v55  ;;  %v4796_v1 = vmax.f32 %v4608_v26, 0.0 }
 0xb30   : > { %v9312_v30 = vpop.f32.mrf.mxu0 }
 0xb31   : > { %v4611_v31 = vadd.f32 %v9312_v30, %v11900_v10  ;;  %9373 = vmatprep.mubr.msk.bf16.mxu1 %vm4893_vm3, %v4846_v24  ;;  %v4794_v44 = vmax.f32 %v4600_v53, 0.0 }
 0xb32   : > { %v4602_v40 = vpop.f32.mrf.mxu0  ;;  %9374 = vmatmul.mubr.msk.bf16.gmra.mxu1 %vm4893_vm3, %v4847_v50 }
 0xb33   : > { %v4603_v59 = vadd.f32 %v11900_v10, %v4602_v40  ;;  %v4797_v61 = vmax.f32 %v4611_v31, 0.0 }
 0xb34   : > { %v9315_v35 = vpop.f32.mrf.mxu0 }
 0xb35   : > { %v4795_v36 = vmax.f32 %v4603_v59, 0.0  ;;  %v4849_v14 = vpack.c.bf16 %v4797_v61, %v4796_v1  ;;  %v4624_v37 = vadd.f32 %v9315_v35, %v11900_v10 }
 0xb36   : > { %v4615_v13 = vpop.f32.mrf.mxu0 }
 0xb37   : > { %v4848_v39 = vpack.c.bf16 %v4795_v36, %v4794_v44  ;;  %v4616_v2 = vadd.f32 %v11900_v10, %v4615_v13  ;;  %v4800_v53 = vmax.f32 %v4624_v37, 0.0 }
 0xb38   : > { %v9316_v25 = vpop.f32.mrf.mxu0 }
 0xb39   : > { %v4627_v33 = vadd.f32 %v9316_v25, %v11900_v10  ;;  %9377 = vmatprep.mubr.msk.bf16.mxu1 %vm4893_vm3, %v4848_v39  ;;  %v4798_v50 = vmax.f32 %v4616_v2, 0.0 }
 0xb3a   : > { %v4618_v47 = vpop.f32.mrf.mxu0  ;;  %9378 = vmatmul.mubr.msk.bf16.gmra.mxu1 %vm4893_vm3, %v4849_v14 }
 0xb3b   : > { %v4619_v49 = vadd.f32 %v11900_v10, %v4618_v47  ;;  %v4801_v55 = vmax.f32 %v4627_v33, 0.0 }
 0xb3c   : > { %v9319_v24 = vpop.f32.mrf.mxu0 }
 0xb3d   : > { %v4799_v30 = vmax.f32 %v4619_v49, 0.0  ;;  %v4851_v40 = vpack.c.bf16 %v4801_v55, %v4800_v53  ;;  %v4640_v35 = vadd.f32 %v9319_v24, %v11900_v10 }
 0xb3e   : > { %v4631_v31 = vpop.f32.mrf.mxu0 }
 0xb3f   : > { %v4850_v26 = vpack.c.bf16 %v4799_v30, %v4798_v50  ;;  %v4632_v61 = vadd.f32 %v11900_v10, %v4631_v31  ;;  %v4804_v2 = vmax.f32 %v4640_v35, 0.0 }
 0xb40   : > { %v9320_v59 = vpop.f32.mrf.mxu0 }
 0xb41   : > { %v4643_v44 = vadd.f32 %v9320_v59, %v11900_v10  ;;  %9381 = vmatprep.mubr.msk.bf16.mxu1 %vm4893_vm3, %v4850_v26  ;;  %v4802_v14 = vmax.f32 %v4632_v61, 0.0 }
 0xb42   : > { %v4634_v36 = vpop.f32.mrf.mxu0  ;;  %9382 = vmatmul.mubr.msk.bf16.gmra.mxu1 %vm4893_vm3, %v4851_v40 }
 0xb43   : > { %v4635_v1 = vadd.f32 %v11900_v10, %v4634_v36  ;;  %v4805_v13 = vmax.f32 %v4643_v44, 0.0 }
 0xb44   : > { %v9323_v39 = vpop.f32.mrf.mxu0 }
 0xb45   : > { %v4803_v25 = vmax.f32 %v4635_v1, 0.0  ;;  %v4853_v47 = vpack.c.bf16 %v4805_v13, %v4804_v2  ;;  %v4656_v24 = vadd.f32 %v9323_v39, %v11900_v10 }
 0xb46   : > { %v4647_v33 = vpop.f32.mrf.mxu0 }
 0xb47   : > { %v4852_v37 = vpack.c.bf16 %v4803_v25, %v4802_v14  ;;  %v4648_v55 = vadd.f32 %v11900_v10, %v4647_v33  ;;  %v4808_v61 = vmax.f32 %v4656_v24, 0.0 }
 0xb48   : > { %v9324_v49 = vpop.f32.mrf.mxu0 }
 0xb49   : > { %v4659_v50 = vadd.f32 %v9324_v49, %v11900_v10  ;;  %9385 = vmatprep.mubr.msk.bf16.mxu1 %vm4893_vm3, %v4852_v37  ;;  %v4806_v40 = vmax.f32 %v4648_v55, 0.0 }
 0xb4a   : > { %v4650_v30 = vpop.f32.mrf.mxu0  ;;  %9386 = vmatmul.mubr.msk.bf16.gmra.mxu1 %vm4893_vm3, %v4853_v47 }
 0xb4b   : > { %v4651_v53 = vadd.f32 %v11900_v10, %v4650_v30  ;;  %v4809_v31 = vmax.f32 %v4659_v50, 0.0 }
 0xb4c   : > { %v9327_v26 = vpop.f32.mrf.mxu0 }
 0xb4d   : > { %v4807_v59 = vmax.f32 %v4651_v53, 0.0  ;;  %v4855_v36 = vpack.c.bf16 %v4809_v31, %v4808_v61  ;;  %v4672_v39 = vadd.f32 %v9327_v26, %v11900_v10 }
 0xb4e   : > { %v4663_v44 = vpop.f32.mrf.mxu0 }
 0xb4f   : > { %v4854_v35 = vpack.c.bf16 %v4807_v59, %v4806_v40  ;;  %v4664_v13 = vadd.f32 %v11900_v10, %v4663_v44  ;;  %v4812_v55 = vmax.f32 %v4672_v39, 0.0 }
 0xb50   : > { %v9328_v1 = vpop.f32.mrf.mxu0 }
 0xb51   : > { %v4675_v14 = vadd.f32 %v9328_v1, %v11900_v10  ;;  %9389 = vmatprep.mubr.msk.bf16.mxu1 %vm4893_vm3, %v4854_v35  ;;  %v4810_v47 = vmax.f32 %v4664_v13, 0.0 }
 0xb52   : > { %v4666_v25 = vpop.f32.mrf.mxu0  ;;  %9390 = vmatmul.mubr.msk.bf16.gmra.mxu1 %vm4893_vm3, %v4855_v36 }
 0xb53   : > { %v4667_v2 = vadd.f32 %v11900_v10, %v4666_v25  ;;  %v4813_v33 = vmax.f32 %v4675_v14, 0.0 }
 0xb54   : > { %v9331_v37 = vpop.f32.mrf.mxu0 }
 0xb55   : > { %v4811_v49 = vmax.f32 %v4667_v2, 0.0  ;;  %v4857_v30 = vpack.c.bf16 %v4813_v33, %v4812_v55  ;;  %v4688_v26 = vadd.f32 %v9331_v37, %v11900_v10 }
 0xb56   : > { %v4679_v50 = vpop.f32.mrf.mxu0 }
 0xb57   : > { %v4856_v24 = vpack.c.bf16 %v4811_v49, %v4810_v47  ;;  %v4680_v31 = vadd.f32 %v11900_v10, %v4679_v50  ;;  %v4816_v13 = vmax.f32 %v4688_v26, 0.0 }
 0xb58   : > { %v9332_v53 = vpop.f32.mrf.mxu0 }
 0xb59   : > { %v4691_v40 = vadd.f32 %v9332_v53, %v11900_v10  ;;  %9393 = vmatprep.mubr.msk.bf16.mxu1 %vm4893_vm3, %v4856_v24  ;;  %v4814_v36 = vmax.f32 %v4680_v31, 0.0 }
 0xb5a   : > { %v4682_v59 = vpop.f32.mrf.mxu0  ;;  %9394 = vmatmul.mubr.msk.bf16.gmra.mxu1 %vm4893_vm3, %v4857_v30 }
 0xb5b   : > { %v4683_v61 = vadd.f32 %v11900_v10, %v4682_v59  ;;  %v4817_v44 = vmax.f32 %v4691_v40, 0.0 }
 0xb5c   : > { %v9335_v35 = vpop.f32.mrf.mxu0 }
 0xb5d   : > { %v4815_v1 = vmax.f32 %v4683_v61, 0.0  ;;  %v4859_v25 = vpack.c.bf16 %v4817_v44, %v4816_v13  ;;  %v4704_v37 = vadd.f32 %v9335_v35, %v11900_v10 }
 0xb5e   : > { %v4695_v14 = vpop.f32.mrf.mxu0 }
 0xb5f   : > { %v4858_v39 = vpack.c.bf16 %v4815_v1, %v4814_v36  ;;  %v4696_v33 = vadd.f32 %v11900_v10, %v4695_v14  ;;  %v4820_v31 = vmax.f32 %v4704_v37, 0.0 }
 0xb60   : > { %v9336_v2 = vpop.f32.mrf.mxu0 }
 0xb61   : > { %v4707_v47 = vadd.f32 %v9336_v2, %v11900_v10  ;;  %9397 = vmatprep.mubr.msk.bf16.mxu1 %vm4893_vm3, %v4858_v39  ;;  %v4818_v30 = vmax.f32 %v4696_v33, 0.0 }
 0xb62   : > { %v4698_v49 = vpop.f32.mrf.mxu0  ;;  %9398 = vmatmul.mubr.msk.bf16.gmra.mxu1 %vm4893_vm3, %v4859_v25 }
 0xb63   : > { %v4699_v55 = vadd.f32 %v11900_v10, %v4698_v49  ;;  %v4821_v50 = vmax.f32 %v4707_v47, 0.0 }
 0xb64   : > { %v9339_v24 = vpop.f32.mrf.mxu0 }
 0xb65   : > { %v4819_v53 = vmax.f32 %v4699_v55, 0.0  ;;  %v4861_v59 = vpack.c.bf16 %v4821_v50, %v4820_v31  ;;  %v4720_v35 = vadd.f32 %v9339_v24, %v11900_v10 }
 0xb66   : > { %v4711_v40 = vpop.f32.mrf.mxu0 }
 0xb67   : > { %v4860_v26 = vpack.c.bf16 %v4819_v53, %v4818_v30  ;;  %v4712_v44 = vadd.f32 %v11900_v10, %v4711_v40  ;;  %v4824_v33 = vmax.f32 %v4720_v35, 0.0 }
 0xb68   : > { %v9340_v61 = vpop.f32.mrf.mxu0 }
 0xb69   : > { %v4723_v36 = vadd.f32 %v9340_v61, %v11900_v10  ;;  %9401 = vmatprep.mubr.msk.bf16.mxu1 %vm4893_vm3, %v4860_v26  ;;  %v4822_v25 = vmax.f32 %v4712_v44, 0.0 }
 0xb6a   : > { %v4714_v1 = vpop.f32.mrf.mxu0  ;;  %9402 = vmatmul.mubr.msk.bf16.gmra.mxu1 %vm4893_vm3, %v4861_v59 }
 0xb6b   : > { %v4715_v13 = vadd.f32 %v11900_v10, %v4714_v1  ;;  %v4825_v14 = vmax.f32 %v4723_v36, 0.0 }
 0xb6c   : > { %v9343_v39 = vpop.f32.mrf.mxu0 }
 0xb6d   : > { %v4823_v2 = vmax.f32 %v4715_v13, 0.0  ;;  %v4863_v49 = vpack.c.bf16 %v4825_v14, %v4824_v33  ;;  %v4736_v24 = vadd.f32 %v9343_v39, %v11900_v10 }
 0xb6e   : > { %v4727_v47 = vpop.f32.mrf.mxu0 }
 0xb6f   : > { %v4862_v37 = vpack.c.bf16 %v4823_v2, %v4822_v25  ;;  %v4728_v50 = vadd.f32 %v11900_v10, %v4727_v47  ;;  %v4828_v61 = vmax.f32 %v4736_v24, 0.0 }
 0xb70   : > { %v9344_v55 = vpop.f32.mrf.mxu0 }
 0xb71   : > { %v4739_v30 = vadd.f32 %v9344_v55, %v11900_v10  ;;  %9405 = vmatprep.mubr.msk.bf16.mxu1 %vm4893_vm3, %v4862_v37  ;;  %v4826_v26 = vmax.f32 %v4728_v50, 0.0 }
 0xb72   : > { %v4730_v53 = vpop.f32.mrf.mxu0  ;;  %9406 = vmatmul.mubr.msk.bf16.gmra.mxu1 %vm4893_vm3, %v4863_v49 }
 0xb73   : > { %v4731_v31 = vadd.f32 %v11900_v10, %v4730_v53  ;;  %v4829_v40 = vmax.f32 %v4739_v30, 0.0 }
 0xb75   : > { %v4827_v59 = vmax.f32 %v4731_v31, 0.0  ;;  %v4865_v36 = vpack.c.bf16 %v4829_v40, %v4828_v61 }
 0xb77   : > { %v4864_v44 = vpack.c.bf16 %v4827_v59, %v4826_v26 }
 0xb79   : > { %9409 = vmatprep.mubr.msk.bf16.mxu1 %vm4893_vm3, %v4864_v44 }
 0xb7a   : > { %9410 = vmatmul.mubr.msk.bf16.gmra.mxu1 %vm4893_vm3, %v4865_v36 }
 0xbb9   : > { %v9347_v35 = vpop.f32.mrf.mxu0 }
 0xbba   : > { %v4752_v25 = vadd.f32 %v9347_v35, %v11900_v10 }
 0xbbb   : > { %v4743_v1 = vpop.f32.mrf.mxu0 }
 0xbbc   : > { %v4744_v14 = vadd.f32 %v11900_v10, %v4743_v1  ;;  %v4832_v50 = vmax.f32 %v4752_v25, 0.0  ;;  %v12013_v25 = vld [vmem:[%s13936_s11] ss:$0 sm:$0xff] }
 0xbbd   : > { %v9348_v13 = vpop.f32.mrf.mxu0 }
 0xbbe   : > { %v4755_v39 = vadd.f32 %v9348_v13, %v11900_v10  ;;  %v4830_v49 = vmax.f32 %v4744_v14, 0.0 }
 0xbbf   : > { %v4746_v2 = vpop.f32.mrf.mxu0 }
 0xbc0   : > { %v4747_v33 = vadd.f32 %v11900_v10, %v4746_v2  ;;  %v4833_v47 = vmax.f32 %v4755_v39, 0.0 }
 0xbc1   : > { %v9351_v37 = vpop.f32.mrf.mxu0 }
 0xbc2   : > { %v4831_v55 = vmax.f32 %v4747_v33, 0.0  ;;  %v4867_v53 = vpack.c.bf16 %v4833_v47, %v4832_v50  ;;  %v4768_v59 = vadd.f32 %v9351_v37, %v11900_v10 }
 0xbc3   : > { %v4759_v30 = vpop.f32.mrf.mxu0 }
 0xbc4   : > { %v4866_v24 = vpack.c.bf16 %v4831_v55, %v4830_v49  ;;  %v4760_v40 = vadd.f32 %v11900_v10, %v4759_v30  ;;  %v4836_v13 = vmax.f32 %v4768_v59, 0.0 }
 0xbc5   : > { %v9352_v31 = vpop.f32.mrf.mxu0 }
 0xbc6   : > { %v4771_v26 = vadd.f32 %v9352_v31, %v11900_v10  ;;  %9413 = vmatprep.mubr.msk.bf16.mxu1 %vm4893_vm3, %v4866_v24  ;;  %v4834_v35 = vmax.f32 %v4760_v40, 0.0 }
 0xbc7   : > { %v4762_v61 = vpop.f32.mrf.mxu0  ;;  %9414 = vmatmul.mubr.msk.bf16.gmra.mxu1 %vm4893_vm3, %v4867_v53 }
 0xbc8   : > { %v4763_v44 = vadd.f32 %v11900_v10, %v4762_v61  ;;  %v4837_v36 = vmax.f32 %v4771_v26, 0.0 }
 0xbca   : > { %v4835_v1 = vmax.f32 %v4763_v44, 0.0  ;;  %v4869_v39 = vpack.c.bf16 %v4837_v36, %v4836_v13 }
 0xbcc   : > { %v4868_v14 = vpack.c.bf16 %v4835_v1, %v4834_v35 }
 0xbce   : > { %9417 = vmatprep.mubr.msk.bf16.mxu1 %vm4893_vm3, %v4868_v14 }
 0xbcf   : > { %9418 = vmatmul.mubr.msk.bf16.gmra.mxu1 %vm4893_vm3, %v4869_v39 }
 0xbd2   : > { %v9359_v2 = vpop.f32.mrf.mxu1 }
 0xbd3   : > { %v5033_v33 = vadd.f32 %v9359_v2, %v12013_v25 }
 0xbd4   : > { %v5024_v47 = vpop.f32.mrf.mxu1 }
 0xbd5   : > { %7068 = vrot.lane.b32.xlu0 %v5033_v33, %s9826_s23  ;;  %v5025_v37 = vadd.f32 %v12013_v25, %v5024_v47  ;;  %v5385_v26 = vsub.f32 %v5033_v33, %v11514_v34 }
 0xbd6   : > { %v9360_v10 = vpop.f32.mrf.mxu1 }
 0xbd7   : > { %v5036_v49 = vadd.f32 %v9360_v10, %v12013_v25  ;;  %v5383_v53 = vsub.f32 %v5025_v37, %v11521_v7 }
 0xbd8   : > { %v5027_v55 = vpop.f32.mrf.mxu1 }
 0xbd9   : > { %v5028_v50 = vadd.f32 %v12013_v25, %v5027_v55  ;;  %7070 = vrot.lane.b32.xlu1 %v5036_v49, %s9826_s23  ;;  %7064 = vrot.lane.b32.xlu0 %v5025_v37, %s9826_s23  ;;  %v5386_v30 = vsub.f32 %v5036_v49, %v11530_v45 }
 0xbda   : > { %v9363_v24 = vpop.f32.mrf.mxu1 }
 0xbdb   : > { %v5384_v31 = vsub.f32 %v5028_v50, %v11537_v3  ;;  %v5049_v40 = vadd.f32 %v9363_v24, %v12013_v25  ;;  %v5448_v44 = vpack.c.bf16 %v5386_v30, %v5385_v26 }
 0xbdc   : > { %v5040_v59 = vpop.f32.mrf.mxu1 }
 0xbdd   : > { %v5447_v61 = vpack.c.bf16 %v5384_v31, %v5383_v53  ;;  %7066 = vrot.lane.b32.xlu1 %v5028_v50, %s9826_s23  ;;  %7076 = vrot.lane.b32.xlu0 %v5049_v40, %s9826_s23  ;;  %v5041_v35 = vadd.f32 %v12013_v25, %v5040_v59  ;;  %v5389_v37 = vsub.f32 %v5049_v40, %v11545_v27 }
 0xbde   : > { %v9364_v36 = vpop.f32.mrf.mxu1 }
 0xbdf   : > { %v5052_v1 = vadd.f32 %v9364_v36, %v12013_v25  ;;  %9437 = vmatprep.mubr.msk.bf16.mxu1 %vm4893_vm3, %v5447_v61  ;;  %v5387_v33 = vsub.f32 %v5041_v35, %v11557_v18 }
 0xbe0   : > { %v5043_v13 = vpop.f32.mrf.mxu1  ;;  %9438 = vmatmul.mubr.msk.bf16.vlgmr.msra.gmra.mxu1 %vm4893_vm3, %v5448_v44 }
 0xbe1   : > { %v5044_v14 = vadd.f32 %v12013_v25, %v5043_v13  ;;  %7078 = vrot.lane.b32.xlu1 %v5052_v1, %s9826_s23  ;;  %7072 = vrot.lane.b32.xlu0 %v5041_v35, %s9826_s23  ;;  %v5390_v39 = vsub.f32 %v5052_v1, %v11578_v28 }
 0xbe2   : > { %v9367_v2 = vpop.f32.mrf.mxu1 }
 0xbe3   : > { %v5388_v47 = vsub.f32 %v5044_v14, %v11586_v46  ;;  %v5065_v10 = vadd.f32 %v9367_v2, %v12013_v25  ;;  %v5450_v50 = vpack.c.bf16 %v5390_v39, %v5389_v37 }
 0xbe4   : > { %v5056_v49 = vpop.f32.mrf.mxu1 }
 0xbe5   : > { %v5449_v55 = vpack.c.bf16 %v5388_v47, %v5387_v33  ;;  %7074 = vrot.lane.b32.xlu1 %v5044_v14, %s9826_s23  ;;  %7084 = vrot.lane.b32.xlu0 %v5065_v10, %s9826_s23  ;;  %v5057_v24 = vadd.f32 %v12013_v25, %v5056_v49  ;;  %v5393_v35 = vsub.f32 %v5065_v10, %v11601_v0 }
 0xbe6   : > { %v9368_v30 = vpop.f32.mrf.mxu1 }
 0xbe7   : > { %v5068_v53 = vadd.f32 %v9368_v30, %v12013_v25  ;;  %9441 = vmatprep.mubr.msk.bf16.mxu1 %vm4893_vm3, %v5449_v55  ;;  %v5391_v61 = vsub.f32 %v5057_v24, %v11615_v8 }
 0xbe8   : > { %v5059_v31 = vpop.f32.mrf.mxu1  ;;  %9442 = vmatmul.mubr.msk.bf16.gmra.mxu1 %vm4893_vm3, %v5450_v50 }
 0xbe9   : > { %v5060_v26 = vadd.f32 %v12013_v25, %v5059_v31  ;;  %7080 = vrot.lane.b32.xlu1 %v5057_v24, %s9826_s23  ;;  %v5394_v40 = vsub.f32 %v5068_v53, %v11628_v63 }
 0xbea   : > { %v9371_v59 = vpop.f32.mrf.mxu1 }
 0xbeb   : > { %v5392_v44 = vsub.f32 %v5060_v26, %v11639_v52  ;;  %v5081_v36 = vadd.f32 %v9371_v59, %v12013_v25  ;;  %v5452_v14 = vpack.c.bf16 %v5394_v40, %v5393_v35 }
 0xbec   : > { %v5072_v1 = vpop.f32.mrf.mxu1 }
 0xbed   : > { %v5451_v13 = vpack.c.bf16 %v5392_v44, %v5391_v61  ;;  %7086 = vrot.lane.b32.xlu1 %v5068_v53, %s9826_s23  ;;  %7092 = vrot.lane.b32.xlu0 %v5081_v36, %s9826_s23  ;;  %v5073_v2 = vadd.f32 %v12013_v25, %v5072_v1  ;;  %v5397_v24 = vsub.f32 %v5081_v36, %v11649_v54 }
 0xbee   : > { %v9372_v39 = vpop.f32.mrf.mxu1 }
 0xbef   : > { %v5084_v33 = vadd.f32 %v9372_v39, %v12013_v25  ;;  %9445 = vmatprep.mubr.msk.bf16.mxu1 %vm4893_vm3, %v5451_v13  ;;  %v5395_v55 = vsub.f32 %v5073_v2, %v11657_v19 }
 0xbf0   : > { %v5075_v47 = vpop.f32.mrf.mxu1  ;;  %9446 = vmatmul.mubr.msk.bf16.gmra.mxu1 %vm4893_vm3, %v5452_v14 }
 0xbf1   : > { %v5076_v37 = vadd.f32 %v12013_v25, %v5075_v47  ;;  %7082 = vrot.lane.b32.xlu1 %v5060_v26, %s9826_s23  ;;  %7088 = vrot.lane.b32.xlu0 %v5073_v2, %s9826_s23  ;;  %v5398_v10 = vsub.f32 %v5084_v33, %v11665_v9 }
 0xbf2   : > { %v9375_v49 = vpop.f32.mrf.mxu1 }
 0xbf3   : > { %v5396_v50 = vsub.f32 %v5076_v37, %v11675_v56  ;;  %v5097_v30 = vadd.f32 %v9375_v49, %v12013_v25  ;;  %v5454_v26 = vpack.c.bf16 %v5398_v10, %v5397_v24 }
 0xbf4   : > { %v5088_v53 = vpop.f32.mrf.mxu1 }
 0xbf5   : > { %v5453_v31 = vpack.c.bf16 %v5396_v50, %v5395_v55  ;;  %7094 = vrot.lane.b32.xlu1 %v5084_v33, %s9826_s23  ;;  %7100 = vrot.lane.b32.xlu0 %v5097_v30, %s9826_s23  ;;  %v5089_v59 = vadd.f32 %v12013_v25, %v5088_v53  ;;  %v5401_v2 = vsub.f32 %v5097_v30, %v11680_v6 }
 0xbf6   : > { %v9376_v40 = vpop.f32.mrf.mxu1 }
 0xbf7   : > { %v5100_v61 = vadd.f32 %v9376_v40, %v12013_v25  ;;  %9449 = vmatprep.mubr.msk.bf16.mxu1 %vm4893_vm3, %v5453_v31  ;;  %v5399_v13 = vsub.f32 %v5089_v59, %v11689_v12 }
 0xbf8   : > { %v5091_v44 = vpop.f32.mrf.mxu1  ;;  %9450 = vmatmul.mubr.msk.bf16.gmra.mxu1 %vm4893_vm3, %v5454_v26 }
 0xbf9   : > { %v5092_v35 = vadd.f32 %v12013_v25, %v5091_v44  ;;  %7090 = vrot.lane.b32.xlu1 %v5076_v37, %s9826_s23  ;;  %7096 = vrot.lane.b32.xlu0 %v5089_v59, %s9826_s23  ;;  %v5402_v36 = vsub.f32 %v5100_v61, %v11696_v60 }
 0xbfa   : > { %v9379_v1 = vpop.f32.mrf.mxu1 }
 0xbfb   : > { %v5400_v14 = vsub.f32 %v5092_v35, %v11705_v38  ;;  %v5113_v39 = vadd.f32 %v9379_v1, %v12013_v25  ;;  %v5456_v37 = vpack.c.bf16 %v5402_v36, %v5401_v2 }
 0xbfc   : > { %v5104_v33 = vpop.f32.mrf.mxu1 }
 0xbfd   : > { %v5455_v47 = vpack.c.bf16 %v5400_v14, %v5399_v13  ;;  %7102 = vrot.lane.b32.xlu1 %v5100_v61, %s9826_s23  ;;  %7108 = vrot.lane.b32.xlu0 %v5113_v39, %s9826_s23  ;;  %v5105_v49 = vadd.f32 %v12013_v25, %v5104_v33  ;;  %v5405_v59 = vsub.f32 %v5113_v39, %v11710_v48 }
 0xbfe   : > { %v9380_v10 = vpop.f32.mrf.mxu1 }
 0xbff   : > { %v5116_v55 = vadd.f32 %v9380_v10, %v12013_v25  ;;  %9453 = vmatprep.mubr.msk.bf16.mxu1 %vm4893_vm3, %v5455_v47  ;;  %v5403_v31 = vsub.f32 %v5105_v49, %v11719_v29 }
 0xc00   : > { %v5107_v50 = vpop.f32.mrf.mxu1  ;;  %9454 = vmatmul.mubr.msk.bf16.gmra.mxu1 %vm4893_vm3, %v5456_v37 }
 0xc01   : > { %v5108_v24 = vadd.f32 %v12013_v25, %v5107_v50  ;;  %7098 = vrot.lane.b32.xlu1 %v5092_v35, %s9826_s23  ;;  %7104 = vrot.lane.b32.xlu0 %v5105_v49, %s9826_s23  ;;  %v5406_v30 = vsub.f32 %v5116_v55, %v11724_v5 }
 0xc02   : > { %v9383_v53 = vpop.f32.mrf.mxu1 }
 0xc03   : > { %v5404_v26 = vsub.f32 %v5108_v24, %v11733_v22  ;;  %v5129_v40 = vadd.f32 %v9383_v53, %v12013_v25  ;;  %v5458_v35 = vpack.c.bf16 %v5406_v30, %v5405_v59 }
 0xc04   : > { %v5120_v61 = vpop.f32.mrf.mxu1 }
 0xc05   : > { %v5457_v44 = vpack.c.bf16 %v5404_v26, %v5403_v31  ;;  %7110 = vrot.lane.b32.xlu1 %v5116_v55, %s9826_s23  ;;  %7116 = vrot.lane.b32.xlu0 %v5129_v40, %s9826_s23  ;;  %v5121_v1 = vadd.f32 %v12013_v25, %v5120_v61  ;;  %v5409_v49 = vsub.f32 %v5129_v40, %v11737_v51  ;;  %v14067_v40 = vld [vmem:[#allocation4_spill] sm:$0xff] }
 0xc06   : > { %v9384_v36 = vpop.f32.mrf.mxu1 }
 0xc07   : > { %v5132_v13 = vadd.f32 %v9384_v36, %v12013_v25  ;;  %9457 = vmatprep.mubr.msk.bf16.mxu1 %vm4893_vm3, %v5457_v44  ;;  %v5407_v47 = vsub.f32 %v5121_v1, %v11743_v43 }
 0xc08   : > { %v5123_v14 = vpop.f32.mrf.mxu1  ;;  %9458 = vmatmul.mubr.msk.bf16.gmra.mxu1 %vm4893_vm3, %v5458_v35  ;;  %v14068_v35 = vld [vmem:[#allocation3_spill] sm:$0xff] }
 0xc09   : > { %v5124_v2 = vadd.f32 %v12013_v25, %v5123_v14  ;;  %7106 = vrot.lane.b32.xlu1 %v5108_v24, %s9826_s23  ;;  %7112 = vrot.lane.b32.xlu0 %v5121_v1, %s9826_s23  ;;  %v5410_v39 = vsub.f32 %v5132_v13, %v11755_v58  ;;  %v14069_v1 = vld [vmem:[#allocation5_spill] sm:$0xff] }
 0xc0a   : > { %v9387_v33 = vpop.f32.mrf.mxu1 }
 0xc0b   : > { %v5408_v37 = vsub.f32 %v5124_v2, %v11762_v23  ;;  %v5145_v10 = vadd.f32 %v9387_v33, %v12013_v25  ;;  %v5460_v24 = vpack.c.bf16 %v5410_v39, %v5409_v49  ;;  %v14070_v39 = vld [vmem:[#allocation2_spill] sm:$0xff] }
 0xc0c   : > { %v5136_v55 = vpop.f32.mrf.mxu1 }
 0xc0d   : > { %v5459_v50 = vpack.c.bf16 %v5408_v37, %v5407_v47  ;;  %7118 = vrot.lane.b32.xlu1 %v5132_v13, %s9826_s23  ;;  %7124 = vrot.lane.b32.xlu0 %v5145_v10, %s9826_s23  ;;  %v5137_v53 = vadd.f32 %v12013_v25, %v5136_v55  ;;  %v5413_v33 = vsub.f32 %v5145_v10, %v14070_v39 }
 0xc0e   : > { %v9388_v30 = vpop.f32.mrf.mxu1 }
 0xc0f   : > { %v5148_v31 = vadd.f32 %v9388_v30, %v12013_v25  ;;  %9461 = vmatprep.mubr.msk.bf16.mxu1 %vm4893_vm3, %v5459_v50  ;;  %v5411_v36 = vsub.f32 %v5137_v53, %v14068_v35 }
 0xc10   : > { %v5139_v26 = vpop.f32.mrf.mxu1  ;;  %9462 = vmatmul.mubr.msk.bf16.gmra.mxu1 %vm4893_vm3, %v5460_v24 }
 0xc11   : > { %v5140_v59 = vadd.f32 %v12013_v25, %v5139_v26  ;;  %7114 = vrot.lane.b32.xlu1 %v5124_v2, %s9826_s23  ;;  %7120 = vrot.lane.b32.xlu0 %v5137_v53, %s9826_s23  ;;  %v5414_v61 = vsub.f32 %v5148_v31, %v14067_v40 }
 0xc12   : > { %v9391_v44 = vpop.f32.mrf.mxu1 }
 0xc13   : > { %v5412_v13 = vsub.f32 %v5140_v59, %v14069_v1  ;;  %v5161_v14 = vadd.f32 %v9391_v44, %v12013_v25  ;;  %v5462_v2 = vpack.c.bf16 %v5414_v61, %v5413_v33 }
 0xc14   : > { %v5152_v47 = vpop.f32.mrf.mxu1 }
 0xc15   : > { %v5461_v37 = vpack.c.bf16 %v5412_v13, %v5411_v36  ;;  %7126 = vrot.lane.b32.xlu1 %v5148_v31, %s9826_s23  ;;  %7132 = vrot.lane.b32.xlu0 %v5161_v14, %s9826_s23  ;;  %v5153_v55 = vadd.f32 %v12013_v25, %v5152_v47  ;;  %v5417_v44 = vsub.f32 %v5161_v14, %v11801_v42 }
 0xc16   : > { %v9392_v49 = vpop.f32.mrf.mxu1 }
 0xc17   : > { %v5164_v50 = vadd.f32 %v9392_v49, %v12013_v25  ;;  %9465 = vmatprep.mubr.msk.bf16.mxu1 %vm4893_vm3, %v5461_v37  ;;  %v5415_v31 = vsub.f32 %v5153_v55, %v11805_v20 }
 0xc18   : > { %v5155_v24 = vpop.f32.mrf.mxu1  ;;  %9466 = vmatmul.mubr.msk.bf16.gmra.mxu1 %vm4893_vm3, %v5462_v2 }
 0xc19   : > { %v5156_v30 = vadd.f32 %v12013_v25, %v5155_v24  ;;  %7122 = vrot.lane.b32.xlu1 %v5140_v59, %s9826_s23  ;;  %7128 = vrot.lane.b32.xlu0 %v5153_v55, %s9826_s23  ;;  %v5418_v10 = vsub.f32 %v5164_v50, %v11811_v4 }
 0xc1a   : > { %v9395_v53 = vpop.f32.mrf.mxu1 }
 0xc1b   : > { %v5416_v26 = vsub.f32 %v5156_v30, %v11815_v62  ;;  %v5177_v61 = vadd.f32 %v9395_v53, %v12013_v25  ;;  %v5464_v59 = vpack.c.bf16 %v5418_v10, %v5417_v44  ;;  %v14072_v10 = vld [vmem:[#allocation9_spill] sm:$0xff] }
 0xc1c   : > { %v5168_v36 = vpop.f32.mrf.mxu1 }
 0xc1d   : > { %v5463_v13 = vpack.c.bf16 %v5416_v26, %v5415_v31  ;;  %7134 = vrot.lane.b32.xlu1 %v5164_v50, %s9826_s23  ;;  %7140 = vrot.lane.b32.xlu0 %v5177_v61, %s9826_s23  ;;  %v5169_v47 = vadd.f32 %v12013_v25, %v5168_v36  ;;  %v14071_v50 = vld [vmem:[#allocation7_spill] sm:$0xff]  ;;  %v14073_v26 = vld [vmem:[#allocation6_spill] sm:$0xff] }
 0xc1e   : > { %v9396_v33 = vpop.f32.mrf.mxu1  ;;  %v5421_v44 = vsub.f32 %v5177_v61, %v14073_v26 }
 0xc1f   : > { %v5180_v37 = vadd.f32 %v9396_v33, %v12013_v25  ;;  %9469 = vmatprep.mubr.msk.bf16.mxu1 %vm4893_vm3, %v5463_v13  ;;  %v5419_v24 = vsub.f32 %v5169_v47, %v14071_v50 }
 0xc20   : > { %v5171_v2 = vpop.f32.mrf.mxu1  ;;  %9470 = vmatmul.mubr.msk.bf16.gmra.mxu1 %vm4893_vm3, %v5464_v59 }
 0xc21   : > { %v5172_v49 = vadd.f32 %v12013_v25, %v5171_v2  ;;  %7130 = vrot.lane.b32.xlu1 %v5156_v30, %s9826_s23  ;;  %7136 = vrot.lane.b32.xlu0 %v5169_v47, %s9826_s23  ;;  %v5422_v14 = vsub.f32 %v5180_v37, %v11825_v15  ;;  %v9617_v47 = vld [vmem:[%s13939_s14 + $0x8] sm:$0xff]  }
 0xc22   : > { %v9399_v55 = vpop.f32.mrf.mxu1  ;;  %9501 = vmatprep.subr.bf16.mxu0 %v9617_v47 }
 0xc23   : > { %v5420_v53 = vsub.f32 %v5172_v49, %v14072_v10  ;;  %v5193_v31 = vadd.f32 %v9399_v55, %v12013_v25  ;;  %v5466_v30 = vpack.c.bf16 %v5422_v14, %v5421_v44  ;;  %9502 = vmatpush3.bf16.msra.mxu0 %v9617_v47 }
 0xc24   : > { %v5184_v36 = vpop.f32.mrf.mxu1 }
 0xc25   : > { %v5465_v13 = vpack.c.bf16 %v5420_v53, %v5419_v24  ;;  %7142 = vrot.lane.b32.xlu1 %v5180_v37, %s9826_s23  ;;  %7148 = vrot.lane.b32.xlu0 %v5193_v31, %s9826_s23  ;;  %v5185_v33 = vadd.f32 %v12013_v25, %v5184_v36  ;;  %v14074_v37 = vld [vmem:[#allocation12_spill] sm:$0xff]  ;;  %v14075_v53 = vld [vmem:[#allocation11_spill] sm:$0xff]  ;;  %v14076_v36 = vld [vmem:[#allocation13_spill] sm:$0xff] }
 0xc26   : > { %v9400_v59 = vpop.f32.mrf.mxu1 }
 0xc27   : > { %v5196_v2 = vadd.f32 %v9400_v59, %v12013_v25  ;;  %9473 = vmatprep.mubr.msk.bf16.mxu1 %vm4893_vm3, %v5465_v13  ;;  %v5423_v44 = vsub.f32 %v5185_v33, %v14075_v53 }
 0xc28   : > { %v5187_v55 = vpop.f32.mrf.mxu1  ;;  %9474 = vmatmul.mubr.msk.bf16.gmra.mxu1 %vm4893_vm3, %v5466_v30  ;;  %v9618_v30 = vld [vmem:[%s13939_s14] sm:$0xff]  }
 0xc29   : > { %v5188_v61 = vadd.f32 %v12013_v25, %v5187_v55  ;;  %7138 = vrot.lane.b32.xlu1 %v5172_v49, %s9826_s23  ;;  %7144 = vrot.lane.b32.xlu0 %v5185_v33, %s9826_s23  ;;  %v5426_v14 = vsub.f32 %v5196_v2, %v14074_v37  ;;  %v14077_v55 = vld [vmem:[#allocation10_spill] sm:$0xff] }
 0xc2a   : > { %v9403_v24 = vpop.f32.mrf.mxu1  ;;  %v5425_v15 = vsub.f32 %v5193_v31, %v14077_v55  ;;  %9503 = vmatprep.subr.bf16.mxu0 %v9618_v30 }
 0xc2b   : > { %v5424_v13 = vsub.f32 %v5188_v61, %v14076_v36  ;;  %v5209_v59 = vadd.f32 %v9403_v24, %v12013_v25  ;;  %9504 = vmatpush3.bf16.msra.mxu0 %v9618_v30 }
 0xc2c   : > { %v5200_v49 = vpop.f32.mrf.mxu1  ;;  %v5468_v37 = vpack.c.bf16 %v5426_v14, %v5425_v15 }
 0xc2d   : > { %v5467_v10 = vpack.c.bf16 %v5424_v13, %v5423_v44  ;;  %7150 = vrot.lane.b32.xlu1 %v5196_v2, %s9826_s23  ;;  %7156 = vrot.lane.b32.xlu0 %v5209_v59, %s9826_s23  ;;  %v5201_v33 = vadd.f32 %v12013_v25, %v5200_v49  ;;  %v14078_v2 = vld [vmem:[#allocation16_spill] sm:$0xff]  ;;  %v14079_v44 = vld [vmem:[#allocation15_spill] sm:$0xff]  ;;  %v14080_v49 = vld [vmem:[#allocation17_spill] sm:$0xff] }
 0xc2e   : > { %v9404_v26 = vpop.f32.mrf.mxu1 }
 0xc2f   : > { %v5212_v24 = vadd.f32 %v9404_v26, %v12013_v25  ;;  %9477 = vmatprep.mubr.msk.bf16.mxu1 %vm4893_vm3, %v5467_v10  ;;  %v5427_v13 = vsub.f32 %v5201_v33, %v14079_v44  ;;  %v14081_v10 = vld [vmem:[#allocation14_spill] sm:$0xff] }
 0xc30   : > { %v5203_v47 = vpop.f32.mrf.mxu1  ;;  %9478 = vmatmul.mubr.msk.bf16.gmra.mxu1 %vm4893_vm3, %v5468_v37  ;;  %v5429_v30 = vsub.f32 %v5209_v59, %v14081_v10 }
 0xc31   : > { %v5204_v31 = vadd.f32 %v12013_v25, %v5203_v47  ;;  %7146 = vrot.lane.b32.xlu1 %v5188_v61, %s9826_s23  ;;  %7152 = vrot.lane.b32.xlu0 %v5201_v33, %s9826_s23  ;;  %v5430_v15 = vsub.f32 %v5212_v24, %v14078_v2 }
 0xc32   : > { %v9407_v14 = vpop.f32.mrf.mxu1 }
 0xc33   : > { %v5428_v36 = vsub.f32 %v5204_v31, %v14080_v49  ;;  %v5225_v26 = vadd.f32 %v9407_v14, %v12013_v25  ;;  %v5470_v61 = vpack.c.bf16 %v5430_v15, %v5429_v30  ;;  %v14083_v15 = vld [vmem:[#allocation19_spill] sm:$0xff]  ;;  %v14084_v30 = vld [vmem:[#allocation21_spill] sm:$0xff]  ;;  %v14085_v49 = vld [vmem:[#allocation18_spill] sm:$0xff] }
 0xc34   : > { %v5216_v53 = vpop.f32.mrf.mxu1 }
 0xc35   : > { %v5469_v55 = vpack.c.bf16 %v5428_v36, %v5427_v13  ;;  %7158 = vrot.lane.b32.xlu1 %v5212_v24, %s9826_s23  ;;  %7164 = vrot.lane.b32.xlu0 %v5225_v26, %s9826_s23  ;;  %v5217_v47 = vadd.f32 %v12013_v25, %v5216_v53  ;;  %v14082_v36 = vld [vmem:[#allocation20_spill] sm:$0xff] }
 0xc36   : > { %v9408_v37 = vpop.f32.mrf.mxu1 }
 0xc37   : > { %v5228_v2 = vadd.f32 %v9408_v37, %v12013_v25  ;;  %9481 = vmatprep.mubr.msk.bf16.mxu1 %vm4893_vm3, %v5469_v55  ;;  %v5431_v13 = vsub.f32 %v5217_v47, %v14083_v15  ;;  %v5433_v55 = vsub.f32 %v5225_v26, %v14085_v49  ;;  %v14086_v26 = vld [vmem:[#allocation23_spill] sm:$0xff] }
 0xc38   : > { %v5219_v33 = vpop.f32.mrf.mxu1  ;;  %9482 = vmatmul.mubr.msk.bf16.gmra.mxu1 %vm4893_vm3, %v5470_v61 }
 0xc39   : > { %v5220_v14 = vadd.f32 %v12013_v25, %v5219_v33  ;;  %7154 = vrot.lane.b32.xlu1 %v5204_v31, %s9826_s23  ;;  %7160 = vrot.lane.b32.xlu0 %v5217_v47, %s9826_s23  ;;  %v5434_v59 = vsub.f32 %v5228_v2, %v14082_v36 }
 0xc3a   : > { %v9411_v24 = vpop.f32.mrf.mxu1 }
 0xc3b   : > { %v5432_v53 = vsub.f32 %v5220_v14, %v14084_v30  ;;  %v5241_v37 = vadd.f32 %v9411_v24, %v12013_v25  ;;  %v5472_v31 = vpack.c.bf16 %v5434_v59, %v5433_v55 }
 0xc3c   : > { %v5232_v44 = vpop.f32.mrf.mxu1 }
 0xc3d   : > { %v5471_v10 = vpack.c.bf16 %v5432_v53, %v5431_v13  ;;  %7166 = vrot.lane.b32.xlu1 %v5228_v2, %s9826_s23  ;;  %7172 = vrot.lane.b32.xlu0 %v5241_v37, %s9826_s23  ;;  %v5233_v33 = vadd.f32 %v12013_v25, %v5232_v44  ;;  %v14087_v13 = vld [vmem:[#allocation24_spill] sm:$0xff]  ;;  %v14088_v44 = vld [vmem:[#allocation22_spill] sm:$0xff] }
 0xc3e   : > { %v9412_v61 = vpop.f32.mrf.mxu1  ;;  %v5437_v55 = vsub.f32 %v5241_v37, %v14088_v44 }
 0xc3f   : > { %v5244_v36 = vadd.f32 %v9412_v61, %v12013_v25  ;;  %9485 = vmatprep.mubr.msk.bf16.mxu1 %vm4893_vm3, %v5471_v10  ;;  %v5435_v59 = vsub.f32 %v5233_v33, %v14086_v26 }
 0xc40   : > { %v5235_v47 = vpop.f32.mrf.mxu1  ;;  %9486 = vmatmul.mubr.msk.bf16.gmra.mxu1 %vm4893_vm3, %v5472_v31 }
 0xc41   : > { %v5236_v24 = vadd.f32 %v12013_v25, %v5235_v47  ;;  %7162 = vrot.lane.b32.xlu1 %v5220_v14, %s9826_s23  ;;  %7168 = vrot.lane.b32.xlu0 %v5233_v33, %s9826_s23  ;;  %v5438_v2 = vsub.f32 %v5244_v36, %v11859_v17 }
 0xc43   : > { %v5436_v53 = vsub.f32 %v5236_v24, %v14087_v13  ;;  %v5474_v10 = vpack.c.bf16 %v5438_v2, %v5437_v55 }
 0xc45   : > { %v5473_v61 = vpack.c.bf16 %v5436_v53, %v5435_v59  ;;  %7174 = vrot.lane.b32.xlu1 %v5244_v36, %s9826_s23 }
 0xc47   : > { %v7069_v30 = vpop.permute.xlu0 %7068  ;;  %9489 = vmatprep.mubr.msk.bf16.mxu1 %vm4893_vm3, %v5473_v61 }
 0xc48   : > { %v7258_v31 = vadd.f32 %v11514_v34, %v7069_v30  ;;  %9490 = vmatmul.mubr.msk.bf16.gmra.mxu1 %vm4893_vm3, %v5474_v10 }
 0xc49   : > { %7170 = vrot.lane.b32.xlu1 %v5236_v24, %s9826_s23 }
 0xc4a   : > { %7388 = vrot.lane.b32.xlu0 %v7258_v31, %s9827_s29 }
 0xc4b   : > { %v7071_v14 = vpop.permute.xlu1 %7070  ;;  %v7065_v33 = vpop.permute.xlu0 %7064 }
 0xc4c   : > { %v7259_v37 = vadd.f32 %v11530_v45, %v7071_v14  ;;  %v7256_v47 = vadd.f32 %v7065_v33, %v11521_v7 }
 0xc4e   : > { %7390 = vrot.lane.b32.xlu1 %v7259_v37, %s9827_s29  ;;  %7384 = vrot.lane.b32.xlu0 %v7256_v47, %s9827_s29 }
 0xc4f   : > { %v7067_v36 = vpop.permute.xlu1 %7066  ;;  %v7077_v2 = vpop.permute.xlu0 %7076 }
 0xc50   : > { %v7257_v34 = vadd.f32 %v7067_v36, %v11537_v3  ;;  %v7262_v30 = vadd.f32 %v11545_v27, %v7077_v2 }
 0xc52   : > { %7386 = vrot.lane.b32.xlu1 %v7257_v34, %s9827_s29  ;;  %7396 = vrot.lane.b32.xlu0 %v7262_v30, %s9827_s29 }
 0xc53   : > { %v7079_v24 = vpop.permute.xlu1 %7078  ;;  %v7073_v59 = vpop.permute.xlu0 %7072 }
 0xc54   : > { %v7263_v45 = vadd.f32 %v11578_v28, %v7079_v24  ;;  %v7260_v7 = vadd.f32 %v7073_v59, %v11557_v18 }
 0xc56   : > { %7398 = vrot.lane.b32.xlu1 %v7263_v45, %s9827_s29  ;;  %7392 = vrot.lane.b32.xlu0 %v7260_v7, %s9827_s29 }
 0xc57   : > { %v7075_v53 = vpop.permute.xlu1 %7074  ;;  %v7085_v55 = vpop.permute.xlu0 %7084 }
 0xc58   : > { %v7261_v3 = vadd.f32 %v7075_v53, %v11586_v46  ;;  %v7266_v27 = vadd.f32 %v11601_v0, %v7085_v55 }
 0xc5a   : > { %7394 = vrot.lane.b32.xlu1 %v7261_v3, %s9827_s29  ;;  %7404 = vrot.lane.b32.xlu0 %v7266_v27, %s9827_s29 }
 0xc5b   : > { %v7081_v61 = vpop.permute.xlu1 %7080 }
 0xc5c   : > { %v7264_v10 = vadd.f32 %v7081_v61, %v11615_v8 }
 0xc5e   : > { %7400 = vrot.lane.b32.xlu0 %v7264_v10, %s9827_s29 }
 0xc5f   : > { %v7087_v18 = vpop.permute.xlu1 %7086  ;;  %v7093_v28 = vpop.permute.xlu0 %7092 }
 0xc60   : > { %v7267_v31 = vadd.f32 %v11628_v63, %v7087_v18  ;;  %v7270_v14 = vadd.f32 %v11649_v54, %v7093_v28 }
 0xc62   : > { %7406 = vrot.lane.b32.xlu1 %v7267_v31, %s9827_s29  ;;  %7412 = vrot.lane.b32.xlu0 %v7270_v14, %s9827_s29 }
 0xc63   : > { %v7083_v46 = vpop.permute.xlu1 %7082  ;;  %v7089_v0 = vpop.permute.xlu0 %7088 }
 0xc64   : > { %v7265_v33 = vadd.f32 %v7083_v46, %v11639_v52  ;;  %v7268_v37 = vadd.f32 %v7089_v0, %v11657_v19 }
 0xc66   : > { %7402 = vrot.lane.b32.xlu1 %v7265_v33, %s9827_s29  ;;  %7408 = vrot.lane.b32.xlu0 %v7268_v37, %s9827_s29  ;;  %v12286_v37 = vpop.f32.mrf.mxu0 }
 0xc67   : > { %v7095_v8 = vpop.permute.xlu1 %7094  ;;  %v7101_v47 = vpop.permute.xlu0 %7100 }
 0xc68   : > { %v7271_v63 = vadd.f32 %v11665_v9, %v7095_v8  ;;  %v7274_v54 = vadd.f32 %v11680_v6, %v7101_v47 }
 0xc6a   : > { %7414 = vrot.lane.b32.xlu1 %v7271_v63, %s9827_s29  ;;  %7420 = vrot.lane.b32.xlu0 %v7274_v54, %s9827_s29 }
 0xc6b   : > { %v7091_v36 = vpop.permute.xlu1 %7090  ;;  %v7097_v2 = vpop.permute.xlu0 %7096 }
 0xc6c   : > { %v7269_v52 = vadd.f32 %v7091_v36, %v11675_v56  ;;  %v7272_v19 = vadd.f32 %v7097_v2, %v11689_v12 }
 0xc6e   : > { %7410 = vrot.lane.b32.xlu1 %v7269_v52, %s9827_s29  ;;  %7416 = vrot.lane.b32.xlu0 %v7272_v19, %s9827_s29 }
 0xc6f   : > { %v7103_v34 = vpop.permute.xlu1 %7102  ;;  %v7109_v30 = vpop.permute.xlu0 %7108 }
 0xc70   : > { %v7275_v9 = vadd.f32 %v11696_v60, %v7103_v34  ;;  %v7278_v6 = vadd.f32 %v11710_v48, %v7109_v30  ;;  %v5352_v30 = vpop.f32.mrf.mxu0 }
 0xc72   : > { %7422 = vrot.lane.b32.xlu1 %v7275_v9, %s9827_s29  ;;  %7428 = vrot.lane.b32.xlu0 %v7278_v6, %s9827_s29  ;;  %v14089_v6 = vld [vmem:[#allocation25_spill] sm:$0xff] }
 0xc73   : > { %v7099_v24 = vpop.permute.xlu1 %7098  ;;  %v7105_v59 = vpop.permute.xlu0 %7104 }
 0xc74   : > { %v7273_v56 = vadd.f32 %v7099_v24, %v11705_v38  ;;  %v7276_v12 = vadd.f32 %v7105_v59, %v11719_v29 }
 0xc76   : > { %7418 = vrot.lane.b32.xlu1 %v7273_v56, %s9827_s29  ;;  %7424 = vrot.lane.b32.xlu0 %v7276_v12, %s9827_s29 }
 0xc77   : > { %v7111_v45 = vpop.permute.xlu1 %7110  ;;  %v7117_v7 = vpop.permute.xlu0 %7116 }
 0xc78   : > { %v7279_v60 = vadd.f32 %v11724_v5, %v7111_v45  ;;  %v7282_v48 = vadd.f32 %v11737_v51, %v7117_v7 }
 0xc7a   : > { %7430 = vrot.lane.b32.xlu1 %v7279_v60, %s9827_s29  ;;  %7436 = vrot.lane.b32.xlu0 %v7282_v48, %s9827_s29  ;;  %v9428_v60 = vpop.f32.mrf.mxu0 }
 0xc7b   : > { %v7107_v53 = vpop.permute.xlu1 %7106  ;;  %v7113_v55 = vpop.permute.xlu0 %7112 }
 0xc7c   : > { %v7277_v38 = vadd.f32 %v7107_v53, %v11733_v22  ;;  %v7280_v29 = vadd.f32 %v7113_v55, %v11743_v43 }
 0xc7e   : > { %7426 = vrot.lane.b32.xlu1 %v7277_v38, %s9827_s29  ;;  %7432 = vrot.lane.b32.xlu0 %v7280_v29, %s9827_s29 }
 0xc7f   : > { %v7119_v3 = vpop.permute.xlu1 %7118  ;;  %v12269_v27 = vpop.permute.xlu0 %7124 }
 0xc80   : > { %v7283_v5 = vadd.f32 %v11755_v58, %v7119_v3 }
 0xc82   : > { %7438 = vrot.lane.b32.xlu1 %v7283_v5, %s9827_s29 }
 0xc83   : > { %v7115_v51 = vpop.permute.xlu1 %7114  ;;  %v12273_v61 = vpop.permute.xlu0 %7120 }
 0xc84   : > { %v7281_v10 = vadd.f32 %v7115_v51, %v11762_v23 }
 0xc86   : > { %7434 = vrot.lane.b32.xlu1 %v7281_v10, %s9827_s29 }
 0xc87   : > { %v12277_v22 = vpop.permute.xlu1 %7126  ;;  %v7133_v43 = vpop.permute.xlu0 %7132 }
 0xc88   : > { %v7290_v18 = vadd.f32 %v11801_v42, %v7133_v43  ;;  %v9415_v28 = vpop.f32.mrf.mxu1  ;;  %v5355_v43 = vpop.f32.mrf.mxu0 }
 0xc89   : > { %v5257_v46 = vadd.f32 %v9415_v28, %v12013_v25 }
 0xc8a   : > { %v5248_v31 = vpop.f32.mrf.mxu1  ;;  %7452 = vrot.lane.b32.xlu0 %v7290_v18, %s9827_s29 }
 0xc8b   : > { %v12281_v14 = vpop.permute.xlu1 %7122  ;;  %v7129_v58 = vpop.permute.xlu0 %7128  ;;  %v5249_v33 = vadd.f32 %v12013_v25, %v5248_v31  ;;  %v5441_v24 = vsub.f32 %v5257_v46, %v14089_v6 }
 0xc8c   : > { %v9416_v0 = vpop.f32.mrf.mxu1  ;;  %v7288_v54 = vadd.f32 %v7129_v58, %v11805_v20 }
 0xc8d   : > { %v5260_v23 = vadd.f32 %v9416_v0, %v12013_v25  ;;  %v5439_v52 = vsub.f32 %v5249_v33, %v11868_v21 }
 0xc8e   : > { %v5251_v8 = vpop.f32.mrf.mxu1  ;;  %7180 = vrot.lane.b32.xlu0 %v5257_v46, %s9826_s23 }
 0xc8f   : > { %v5252_v42 = vadd.f32 %v12013_v25, %v5251_v8  ;;  %v7135_v47 = vpop.permute.xlu1 %7134  ;;  %v12290_v63 = vpop.permute.xlu0 %7140  ;;  %v5442_v19 = vsub.f32 %v5260_v23, %v11870_v32 }
 0xc90   : > { %v7291_v36 = vadd.f32 %v11811_v4, %v7135_v47  ;;  %v9419_v2 = vpop.f32.mrf.mxu1  ;;  %v8405_v47 = vld [vmem:[%s13938_s13] ss:$0 sm:$0xff] }
 0xc91   : > { %v5440_v34 = vsub.f32 %v5252_v42, %v11874_v57  ;;  %v5476_v4 = vpack.c.bf16 %v5442_v19, %v5441_v24  ;;  %v5273_v53 = vadd.f32 %v9419_v2, %v12013_v25  ;;  %v12340_v2 = vadd.f32 %v9428_v60, %v8405_v47 }
 0xc92   : > { %v5264_v9 = vpop.f32.mrf.mxu1  ;;  %7454 = vrot.lane.b32.xlu1 %v7291_v36, %s9827_s29  ;;  %7448 = vrot.lane.b32.xlu0 %v7288_v54, %s9827_s29  ;;  %v12338_v36 = vadd.f32 %v8405_v47, %v5352_v30 }
 0xc93   : > { %v5475_v59 = vpack.c.bf16 %v5440_v34, %v5439_v52  ;;  %v7131_v56 = vpop.permute.xlu1 %7130  ;;  %v7137_v20 = vpop.permute.xlu0 %7136  ;;  %v5265_v45 = vadd.f32 %v12013_v25, %v5264_v9  ;;  %v12349_v34 = vadd.f32 %v12286_v37, %v8405_v47  ;;  %v12351_v9 = vadd.f32 %v8405_v47, %v5355_v43 }
 0xc94   : > { %v9420_v12 = vpop.f32.mrf.mxu1  ;;  %v7289_v3 = vadd.f32 %v7131_v56, %v11815_v62  ;;  %v9431_v62 = vpop.f32.mrf.mxu0 }
 0xc95   : > { %v5276_v7 = vadd.f32 %v9420_v12, %v12013_v25  ;;  %9493 = vmatprep.mubr.msk.bf16.mxu1 %vm4893_vm3, %v5475_v59  ;;  %v5443_v5 = vsub.f32 %v5265_v45, %v11887_v11 }
 0xc96   : > { %v5267_v48 = vpop.f32.mrf.mxu1  ;;  %7182 = vrot.lane.b32.xlu1 %v5260_v23, %s9826_s23  ;;  %7176 = vrot.lane.b32.xlu0 %v5249_v33, %s9826_s23  ;;  %v7284_v23 = vadd.f32 %v12273_v61, %v14068_v35  ;;  %v5368_v54 = vpop.f32.mrf.mxu0  ;;  %v7286_v35 = vadd.f32 %v14070_v39, %v12269_v27 }
 0xc97   : > { %v5268_v55 = vadd.f32 %v12013_v25, %v5267_v48  ;;  %9494 = vmatmul.mubr.msk.bf16.gmra.mxu1 %vm4893_vm3, %v5476_v4  ;;  %v12308_v38 = vpop.permute.xlu1 %7142  ;;  %v12310_v29 = vpop.permute.xlu0 %7148  ;;  %v5446_v51 = vsub.f32 %v5276_v7, %v11889_v41  ;;  %v14090_v25 = vld [vmem:[#allocation26_spill] sm:$0xff]  ;;  %v7285_v4 = vadd.f32 %v12281_v14, %v14069_v1  ;;  %v12374_v1 = vadd.f32 %v9431_v62, %v8405_v47 }
 0xc98   : > { %v5445_v18 = vsub.f32 %v5273_v53, %v14090_v25  ;;  %v9432_v59 = vpop.f32.mrf.mxu0  ;;  %v14091_v14 = vld [vmem:[#allocation6_spill] sm:$0xff] }
 0xc99   : > { %v5444_v10 = vsub.f32 %v5268_v55, %v11892_v16 }
 0xc9a   : > { %7450 = vrot.lane.b32.xlu1 %v7289_v3, %s9827_s29  ;;  %7188 = vrot.lane.b32.xlu0 %v5273_v53, %s9826_s23  ;;  %v5478_v46 = vpack.c.bf16 %v5446_v51, %v5445_v18  ;;  %v12370_v51 = vadd.f32 %v9432_v59, %v8405_v47 }
 0xc9b   : > { %v5477_v28 = vpack.c.bf16 %v5444_v10, %v5443_v5  ;;  %v12319_v31 = vpop.permute.xlu1 %7138  ;;  %v12321_v58 = vpop.permute.xlu0 %7144  ;;  %v12368_v5 = vadd.f32 %v8405_v47, %v5368_v54 }
 0xc9d   : > { %9497 = vmatprep.mubr.msk.bf16.mxu1 %vm4893_vm3, %v5477_v28 }
 0xc9e   : > { %7178 = vrot.lane.b32.xlu1 %v5252_v42, %s9826_s23  ;;  %7184 = vrot.lane.b32.xlu0 %v5265_v45, %s9826_s23  ;;  %v7292_v45 = vadd.f32 %v7137_v20, %v14071_v50  ;;  %v7287_v50 = vadd.f32 %v14067_v40, %v12277_v22  ;;  %v7294_v20 = vadd.f32 %v14091_v14, %v12290_v63 }
 0xc9f   : > { %9498 = vmatmul.mubr.msk.bf16.gmra.mxu1 %vm4893_vm3, %v5478_v46  ;;  %v12327_v0 = vpop.permute.xlu1 %7150  ;;  %v12329_v33 = vpop.permute.xlu0 %7156 }
 0xca0   : > { %v9439_v8 = vpop.f32.mrf.mxu1 }
 0xca1   : > { %v5866_v12 = vadd.f32 %v9439_v8, %v12349_v34 }
 0xca2   : > { %7190 = vrot.lane.b32.xlu1 %v5276_v7, %s9826_s23  ;;  %7440 = vrot.lane.b32.xlu0 %v7284_v23, %s9827_s29  ;;  %v5609_v42 = vpop.f32.mrf.mxu1 }
 0xca3   : > { %v12342_v52 = vpop.permute.xlu1 %7146  ;;  %v12344_v19 = vpop.permute.xlu0 %7152  ;;  %v5864_v24 = vadd.f32 %v5609_v42, %v12338_v36  ;;  %v5930_v10 = vmax.f32 %v5866_v12, 0.0 }
 0xca4   : > { %v9440_v61 = vpop.f32.mrf.mxu1 }
 0xca5   : > { %v5867_v30 = vadd.f32 %v9440_v61, %v12340_v2  ;;  %v5928_v60 = vmax.f32 %v5864_v24, 0.0  ;;  %v14093_v61 = vld [vmem:[#allocation9_spill] sm:$0xff] }
 0xca6   : > { %7186 = vrot.lane.b32.xlu1 %v5268_v55, %s9826_s23  ;;  %7444 = vrot.lane.b32.xlu0 %v7286_v35, %s9827_s29  ;;  %v5612_v56 = vpop.f32.mrf.mxu1  ;;  %v5371_v55 = vpop.f32.mrf.mxu0  ;;  %v7293_v24 = vadd.f32 %v12319_v31, %v14093_v61 }
 0xca7   : > { %v5865_v39 = vadd.f32 %v5612_v56, %v12351_v9  ;;  %v12359_v27 = vpop.permute.xlu1 %7158  ;;  %v12361_v37 = vpop.permute.xlu0 %7164  ;;  %v5931_v48 = vmax.f32 %v5867_v30, 0.0  ;;  %v12382_v23 = vadd.f32 %v8405_v47, %v5371_v55  ;;  %v14092_v47 = vld [vmem:[#allocation10_spill] sm:$0xff] }
 0xca8   : > { %v9443_v7 = vpop.f32.mrf.mxu1  ;;  %v7298_v35 = vadd.f32 %v14092_v47, %v12310_v29  ;;  %v14094_v29 = vld [vmem:[#allocation8_spill] sm:$0xff] }
 0xca9   : > { %v5929_v53 = vmax.f32 %v5865_v39, 0.0  ;;  %v5993_v8 = vpack.c.bf16 %v5931_v48, %v5930_v10  ;;  %v5870_v22 = vadd.f32 %v9443_v7, %v12374_v1  ;;  %v7295_v48 = vadd.f32 %v14094_v29, %v12308_v38 }
 0xcaa   : > { %7442 = vrot.lane.b32.xlu1 %v7285_v4, %s9827_s29  ;;  %7456 = vrot.lane.b32.xlu0 %v7292_v45, %s9827_s29  ;;  %v5625_v3 = vpop.f32.mrf.mxu1 }
 0xcab   : > { %v5992_v43 = vpack.c.bf16 %v5929_v53, %v5928_v60  ;;  %v12372_v18 = vpop.permute.xlu1 %7154  ;;  %v12380_v28 = vpop.permute.xlu0 %7160  ;;  %v5868_v54 = vadd.f32 %v5625_v3, %v12368_v5  ;;  %v5934_v45 = vmax.f32 %v5870_v22, 0.0  ;;  %v14095_v53 = vld [vmem:[#allocation11_spill] sm:$0xff] }
 0xcac   : > { %v9444_v46 = vpop.f32.mrf.mxu1  ;;  %v7296_v31 = vadd.f32 %v12321_v58, %v14095_v53 }
 0xcad   : > { %v5871_v42 = vadd.f32 %v9444_v46, %v12370_v51  ;;  %9505 = vmatprep.mubr.msk.bf16.mxu0 %vm4893_vm3, %v5992_v43  ;;  %v5932_v59 = vmax.f32 %v5868_v54, 0.0 }
 0xcae   : > { %7446 = vrot.lane.b32.xlu1 %v7287_v50, %s9827_s29  ;;  %7460 = vrot.lane.b32.xlu0 %v7294_v20, %s9827_s29  ;;  %v5628_v40 = vpop.f32.mrf.mxu1  ;;  %v14096_v20 = vld [vmem:[#allocation12_spill] sm:$0xff] }
 0xcaf   : > { %v5869_v63 = vadd.f32 %v5628_v40, %v12382_v23  ;;  %9506 = vmatmul.mubr.msk.bf16.vlgmr.msra.gmra.mxu0 %vm4893_vm3, %v5993_v8  ;;  %v12392_v62 = vpop.permute.xlu1 %7166  ;;  %v5935_v56 = vmax.f32 %v5871_v42, 0.0  ;;  %v12398_v39 = vpop.permute.xlu0 %7172  ;;  %v7299_v46 = vadd.f32 %v14096_v20, %v12327_v0  ;;  %v14097_v8 = vld [vmem:[#allocation14_spill] sm:$0xff] }
 0xcb0   : > { %v9447_v30 = vpop.f32.mrf.mxu1  ;;  %v7302_v54 = vadd.f32 %v14097_v8, %v12329_v33 }
 0xcb1   : > { %v5933_v12 = vmax.f32 %v5869_v63, 0.0  ;;  %v5995_v3 = vpack.c.bf16 %v5935_v56, %v5934_v45  ;;  %v5874_v14 = vadd.f32 %v9447_v30, %v12349_v34  ;;  %v14099_v56 = vld [vmem:[#allocation15_spill] sm:$0xff] }
 0xcb2   : > { %7458 = vrot.lane.b32.xlu1 %v7293_v24, %s9827_s29  ;;  %7468 = vrot.lane.b32.xlu0 %v7298_v35, %s9827_s29  ;;  %v5641_v4 = vpop.f32.mrf.mxu1  ;;  %v7300_v33 = vadd.f32 %v12344_v19, %v14099_v56  ;;  %v14101_v19 = vld [vmem:[#allocation16_spill] sm:$0xff] }
 0xcb3   : > { %v5994_v7 = vpack.c.bf16 %v5933_v12, %v5932_v59  ;;  %v12402_v60 = vpop.permute.xlu1 %7162  ;;  %v5872_v10 = vadd.f32 %v5641_v4, %v12338_v36  ;;  %v7169_v42 = vpop.permute.xlu0 %7168  ;;  %v5938_v61 = vmax.f32 %v5874_v14, 0.0  ;;  %v14098_v59 = vld [vmem:[#allocation13_spill] sm:$0xff] }
 0xcb4   : > { %v9448_v55 = vpop.f32.mrf.mxu1  ;;  %v7297_v0 = vadd.f32 %v12342_v52, %v14098_v59 }
 0xcb5   : > { %v5875_v43 = vadd.f32 %v9448_v55, %v12340_v2  ;;  %9509 = vmatprep.mubr.msk.bf16.mxu0 %vm4893_vm3, %v5994_v7  ;;  %v5936_v22 = vmax.f32 %v5872_v10, 0.0  ;;  %v7306_v55 = vadd.f32 %v14085_v49, %v12361_v37  ;;  %v7304_v49 = vadd.f32 %v12380_v28, %v14083_v15  ;;  %v14107_v15 = vld [vmem:[#allocation20_spill] sm:$0xff] }
 0xcb6   : > { %7462 = vrot.lane.b32.xlu1 %v7295_v48, %s9827_s29  ;;  %7464 = vrot.lane.b32.xlu0 %v7296_v31, %s9827_s29  ;;  %v5644_v50 = vpop.f32.mrf.mxu1  ;;  %v7303_v31 = vadd.f32 %v14101_v19, %v12359_v27  ;;  %v7307_v28 = vadd.f32 %v14107_v15, %v12392_v62 }
 0xcb7   : > { %v5873_v38 = vadd.f32 %v5644_v50, %v12351_v9  ;;  %9510 = vmatmul.mubr.msk.bf16.gmra.mxu0 %vm4893_vm3, %v5995_v3  ;;  %v12416_v58 = vpop.permute.xlu1 %7174  ;;  %v5939_v63 = vmax.f32 %v5875_v43, 0.0 }
 0xcb8   : > { %v9451_v40 = vpop.f32.mrf.mxu1 }
 0xcb9   : > { %v5937_v47 = vmax.f32 %v5873_v38, 0.0  ;;  %v5997_v45 = vpack.c.bf16 %v5939_v63, %v5938_v61  ;;  %v5878_v52 = vadd.f32 %v9451_v40, %v12374_v1 }
 0xcba   : > { %7470 = vrot.lane.b32.xlu1 %v7299_v46, %s9827_s29  ;;  %7476 = vrot.lane.b32.xlu0 %v7302_v54, %s9827_s29  ;;  %v5657_v35 = vpop.f32.mrf.mxu1  ;;  %v14104_v54 = vld [vmem:[#allocation17_spill] sm:$0xff] }
 0xcbb   : > { %v5996_v24 = vpack.c.bf16 %v5937_v47, %v5936_v22  ;;  %v12424_v30 = vpop.permute.xlu1 %7170  ;;  %v5876_v7 = vadd.f32 %v5657_v35, %v12368_v5  ;;  %v5942_v20 = vmax.f32 %v5878_v52, 0.0  ;;  %v7301_v27 = vadd.f32 %v12372_v18, %v14104_v54  ;;  %v14110_v52 = vld [vmem:[#allocation21_spill] sm:$0xff] }
 0xcbc   : > { %v12430_v12 = vpop.permute.xlu0 %7388  ;;  %v9452_v4 = vpop.f32.mrf.mxu1  ;;  %v7305_v62 = vadd.f32 %v12402_v60, %v14110_v52  ;;  %v7309_v60 = vadd.f32 %v12424_v30, %v14087_v13 }
 0xcbd   : > { %14100 = vst [vmem:[#allocation4_spill] sm:$0xff] %v12430_v12  ;;  %v5879_v29 = vadd.f32 %v9452_v4, %v12370_v51  ;;  %9513 = vmatprep.mubr.msk.bf16.mxu0 %vm4893_vm3, %v5996_v24  ;;  %v5940_v43 = vmax.f32 %v5876_v7, 0.0  ;;  %v7308_v24 = vadd.f32 %v7169_v42, %v14086_v26 }
 0xcbe   : > { %7466 = vrot.lane.b32.xlu1 %v7297_v0, %s9827_s29  ;;  %7472 = vrot.lane.b32.xlu0 %v7300_v33, %s9827_s29  ;;  %v5660_v48 = vpop.f32.mrf.mxu1 }
 0xcbf   : > { %v5877_v53 = vadd.f32 %v5660_v48, %v12382_v23  ;;  %9514 = vmatmul.mubr.msk.bf16.gmra.mxu0 %vm4893_vm3, %v5997_v45  ;;  %v5943_v50 = vmax.f32 %v5879_v29, 0.0 }
 0xcc0   : > { %v12444_v3 = vpop.permute.xlu1 %7390  ;;  %v12446_v10 = vpop.permute.xlu0 %7384 }
 0xcc1   : > { %14102 = vst [vmem:[#allocation3_spill] sm:$0xff] %v12444_v3  ;;  %14103 = vst [vmem:[#allocation5_spill] sm:$0xff] %v12446_v10  ;;  %v5941_v14 = vmax.f32 %v5877_v53, 0.0  ;;  %v9455_v38 = vpop.f32.mrf.mxu1  ;;  %v5999_v22 = vpack.c.bf16 %v5943_v50, %v5942_v20 }
 0xcc2   : > { %7478 = vrot.lane.b32.xlu1 %v7303_v31, %s9827_s29  ;;  %7484 = vrot.lane.b32.xlu0 %v7306_v55, %s9827_s29  ;;  %v5882_v18 = vadd.f32 %v9455_v38, %v12349_v34 }
 0xcc3   : > { %v5998_v46 = vpack.c.bf16 %v5941_v14, %v5940_v43  ;;  %v5673_v8 = vpop.f32.mrf.mxu1 }
 0xcc4   : > { %v12454_v37 = vpop.permute.xlu1 %7386  ;;  %v12456_v40 = vpop.permute.xlu0 %7396  ;;  %v5880_v47 = vadd.f32 %v5673_v8, %v12338_v36  ;;  %v5946_v29 = vmax.f32 %v5882_v18, 0.0 }
 0xcc5   : > { %14105 = vst [vmem:[#allocation2_spill] sm:$0xff] %v12454_v37  ;;  %14106 = vst [vmem:[#allocation7_spill] sm:$0xff] %v12456_v40  ;;  %v9456_v63 = vpop.f32.mrf.mxu1  ;;  %9517 = vmatprep.mubr.msk.bf16.mxu0 %vm4893_vm3, %v5998_v46 }
 0xcc6   : > { %v5883_v35 = vadd.f32 %v9456_v63, %v12340_v2  ;;  %7474 = vrot.lane.b32.xlu1 %v7301_v27, %s9827_s29  ;;  %7480 = vrot.lane.b32.xlu0 %v7304_v49, %s9827_s29  ;;  %v5944_v4 = vmax.f32 %v5880_v47, 0.0 }
 0xcc7   : > { %v5676_v61 = vpop.f32.mrf.mxu1  ;;  %9518 = vmatmul.mubr.msk.bf16.gmra.mxu0 %vm4893_vm3, %v5999_v22 }
 0xcc8   : > { %v5881_v59 = vadd.f32 %v5676_v61, %v12351_v9  ;;  %v12469_v0 = vpop.permute.xlu0 %7392  ;;  %v5947_v56 = vmax.f32 %v5883_v35, 0.0  ;;  %v12471_v7 = vpop.permute.xlu1 %7398 }
 0xcc9   : > { %14108 = vst [vmem:[#allocation19_spill] sm:$0xff] %v12469_v0  ;;  %v9459_v33 = vpop.f32.mrf.mxu1  ;;  %14109 = vst [vmem:[#allocation18_spill] sm:$0xff] %v12471_v7 }
 0xcca   : > { %v5945_v45 = vmax.f32 %v5881_v59, 0.0  ;;  %7486 = vrot.lane.b32.xlu1 %v7307_v28, %s9827_s29  ;;  %7488 = vrot.lane.b32.xlu0 %v7308_v24, %s9827_s29  ;;  %v6001_v53 = vpack.c.bf16 %v5947_v56, %v5946_v29  ;;  %v5886_v43 = vadd.f32 %v9459_v33, %v12374_v1 }
 0xccb   : > { %v5689_v48 = vpop.f32.mrf.mxu1 }
 0xccc   : > { %v6000_v26 = vpack.c.bf16 %v5945_v45, %v5944_v4  ;;  %v12477_v42 = vpop.permute.xlu0 %7404  ;;  %v5884_v31 = vadd.f32 %v5689_v48, %v12368_v5  ;;  %v12487_v14 = vpop.permute.xlu1 %7394  ;;  %v5950_v49 = vmax.f32 %v5886_v43, 0.0 }
 0xccd   : > { %14111 = vst [vmem:[#allocation23_spill] sm:$0xff] %v12477_v42  ;;  %v9460_v19 = vpop.f32.mrf.mxu1  ;;  %14112 = vst [vmem:[#allocation24_spill] sm:$0xff] %v12487_v14 }
 0xcce   : > { %v5887_v55 = vadd.f32 %v9460_v19, %v12370_v51  ;;  %9521 = vmatprep.mubr.msk.bf16.mxu0 %vm4893_vm3, %v6000_v26  ;;  %7482 = vrot.lane.b32.xlu1 %v7305_v62, %s9827_s29  ;;  %v5948_v54 = vmax.f32 %v5884_v31, 0.0 }
 0xccf   : > { %v5692_v50 = vpop.f32.mrf.mxu1  ;;  %9522 = vmatmul.mubr.msk.bf16.gmra.mxu0 %vm4893_vm3, %v6001_v53 }
 0xcd0   : > { %v5885_v38 = vadd.f32 %v5692_v50, %v12382_v23  ;;  %v12490_v20 = vpop.permute.xlu0 %7400  ;;  %v5951_v46 = vmax.f32 %v5887_v55, 0.0 }
 0xcd1   : > { %14113 = vst [vmem:[#allocation22_spill] sm:$0xff] %v12490_v20  ;;  %v9463_v8 = vpop.f32.mrf.mxu1 }
 0xcd2   : > { %v5949_v27 = vmax.f32 %v5885_v38, 0.0  ;;  %7490 = vrot.lane.b32.xlu1 %v7309_v60, %s9827_s29  ;;  %v6003_v13 = vpack.c.bf16 %v5951_v46, %v5950_v49  ;;  %v5890_v15 = vadd.f32 %v9463_v8, %v12349_v34 }
 0xcd3   : > { %v5705_v22 = vpop.f32.mrf.mxu1 }
 0xcd4   : > { %v6002_v63 = vpack.c.bf16 %v5949_v27, %v5948_v54  ;;  %v12493_v47 = vpop.permute.xlu1 %7406  ;;  %v12495_v35 = vpop.permute.xlu0 %7412  ;;  %v5888_v18 = vadd.f32 %v5705_v22, %v12338_v36  ;;  %v5954_v48 = vmax.f32 %v5890_v15, 0.0 }
 0xcd5   : > { %14114 = vst [vmem:[#allocation25_spill] sm:$0xff] %v12493_v47  ;;  %14115 = vst [vmem:[#allocation26_spill] sm:$0xff] %v12495_v35  ;;  %v9464_v30 = vpop.f32.mrf.mxu1 }
 0xcd6   : > { %v5891_v61 = vadd.f32 %v9464_v30, %v12340_v2  ;;  %9525 = vmatprep.mubr.msk.bf16.mxu0 %vm4893_vm3, %v6002_v63  ;;  %v5952_v45 = vmax.f32 %v5888_v18, 0.0 }
 0xcd7   : > { %v5708_v28 = vpop.f32.mrf.mxu1  ;;  %9526 = vmatmul.mubr.msk.bf16.gmra.mxu0 %vm4893_vm3, %v6003_v13 }
 0xcd8   : > { %v5889_v24 = vadd.f32 %v5708_v28, %v12351_v9  ;;  %v12503_v59 = vpop.permute.xlu1 %7402  ;;  %v12505_v56 = vpop.permute.xlu0 %7408  ;;  %v5955_v33 = vmax.f32 %v5891_v61, 0.0 }
 0xcd9   : > { %14116 = vst [vmem:[#allocation6_spill] sm:$0xff] %v12503_v59  ;;  %14117 = vst [vmem:[#allocation10_spill] sm:$0xff] %v12505_v56  ;;  %v9467_v4 = vpop.f32.mrf.mxu1 }
 0xcda   : > { %v5953_v29 = vmax.f32 %v5889_v24, 0.0  ;;  %v6005_v19 = vpack.c.bf16 %v5955_v33, %v5954_v48  ;;  %v5894_v50 = vadd.f32 %v9467_v4, %v12374_v1 }
 0xcdb   : > { %v5721_v52 = vpop.f32.mrf.mxu1 }
 0xcdc   : > { %v6004_v62 = vpack.c.bf16 %v5953_v29, %v5952_v45  ;;  %v12507_v26 = vpop.permute.xlu1 %7414  ;;  %v12509_v53 = vpop.permute.xlu0 %7420  ;;  %v5892_v55 = vadd.f32 %v5721_v52, %v12368_v5  ;;  %v5958_v63 = vmax.f32 %v5894_v50, 0.0 }
 0xcdd   : > { %14118 = vst [vmem:[#allocation9_spill] sm:$0xff] %v12507_v26  ;;  %14119 = vst [vmem:[#allocation8_spill] sm:$0xff] %v12509_v53  ;;  %v9468_v31 = vpop.f32.mrf.mxu1 }
 0xcde   : > { %v5895_v43 = vadd.f32 %v9468_v31, %v12370_v51  ;;  %9529 = vmatprep.mubr.msk.bf16.mxu0 %vm4893_vm3, %v6004_v62  ;;  %v5956_v49 = vmax.f32 %v5892_v55, 0.0 }
 0xcdf   : > { %v5724_v60 = vpop.f32.mrf.mxu1  ;;  %9530 = vmatmul.mubr.msk.bf16.gmra.mxu0 %vm4893_vm3, %v6005_v19 }
 0xce0   : > { %v5893_v38 = vadd.f32 %v5724_v60, %v12382_v23  ;;  %v12517_v46 = vpop.permute.xlu1 %7410  ;;  %v12519_v8 = vpop.permute.xlu0 %7416  ;;  %v5959_v54 = vmax.f32 %v5895_v43, 0.0 }
 0xce1   : > { %14120 = vst [vmem:[#allocation11_spill] sm:$0xff] %v12517_v46  ;;  %14121 = vst [vmem:[#allocation12_spill] sm:$0xff] %v12519_v8  ;;  %v9471_v27 = vpop.f32.mrf.mxu1 }
 0xce2   : > { %v5957_v22 = vmax.f32 %v5893_v38, 0.0  ;;  %v6007_v61 = vpack.c.bf16 %v5959_v54, %v5958_v63  ;;  %v5898_v4 = vadd.f32 %v9471_v27, %v12349_v34 }
 0xce3   : > { %v5737_v13 = vpop.f32.mrf.mxu1 }
 0xce4   : > { %v6006_v30 = vpack.c.bf16 %v5957_v22, %v5956_v49  ;;  %v12521_v18 = vpop.permute.xlu1 %7422  ;;  %v5896_v28 = vadd.f32 %v5737_v13, %v12338_v36  ;;  %v12524_v24 = vpop.permute.xlu0 %7428  ;;  %v5962_v55 = vmax.f32 %v5898_v4, 0.0 }
 0xce5   : > { %14122 = vst [vmem:[#allocation14_spill] sm:$0xff] %v12521_v18  ;;  %v9472_v15 = vpop.f32.mrf.mxu1  ;;  %14123 = vst [vmem:[#allocation13_spill] sm:$0xff] %v12524_v24 }
 0xce6   : > { %v5899_v33 = vadd.f32 %v9472_v15, %v12340_v2  ;;  %9533 = vmatprep.mubr.msk.bf16.mxu0 %vm4893_vm3, %v6006_v30  ;;  %v5960_v19 = vmax.f32 %v5896_v28, 0.0 }
 0xce7   : > { %v5740_v45 = vpop.f32.mrf.mxu1  ;;  %9534 = vmatmul.mubr.msk.bf16.gmra.mxu0 %vm4893_vm3, %v6007_v61 }
 0xce8   : > { %v5897_v29 = vadd.f32 %v5740_v45, %v12351_v9  ;;  %v12531_v48 = vpop.permute.xlu1 %7418  ;;  %v5963_v52 = vmax.f32 %v5899_v33, 0.0  ;;  %v12533_v60 = vpop.permute.xlu0 %7424 }
 0xce9   : > { %14124 = vst [vmem:[#allocation15_spill] sm:$0xff] %v12531_v48  ;;  %v9475_v62 = vpop.f32.mrf.mxu1  ;;  %14125 = vst [vmem:[#allocation16_spill] sm:$0xff] %v12533_v60 }
 0xcea   : > { %v5961_v31 = vmax.f32 %v5897_v29, 0.0  ;;  %v6009_v38 = vpack.c.bf16 %v5963_v52, %v5962_v55  ;;  %v5902_v63 = vadd.f32 %v9475_v62, %v12374_v1 }
 0xceb   : > { %v5753_v43 = vpop.f32.mrf.mxu1 }
 0xcec   : > { %v6008_v50 = vpack.c.bf16 %v5961_v31, %v5960_v19  ;;  %v5900_v27 = vadd.f32 %v5753_v43, %v12368_v5  ;;  %v12536_v49 = vpop.permute.xlu1 %7430  ;;  %v12543_v33 = vpop.permute.xlu0 %7436  ;;  %v5966_v45 = vmax.f32 %v5902_v63, 0.0 }
 0xced   : > { %v9476_v54 = vpop.f32.mrf.mxu1  ;;  %14126 = vst [vmem:[#allocation17_spill] sm:$0xff] %v12536_v49  ;;  %14127 = vst [vmem:[#allocation20_spill] sm:$0xff] %v12543_v33 }
 0xcee   : > { %v5903_v22 = vadd.f32 %v9476_v54, %v12370_v51  ;;  %9537 = vmatprep.mubr.msk.bf16.mxu0 %vm4893_vm3, %v6008_v50  ;;  %v5964_v28 = vmax.f32 %v5900_v27, 0.0 }
 0xcef   : > { %v5756_v13 = vpop.f32.mrf.mxu1  ;;  %9538 = vmatmul.mubr.msk.bf16.gmra.mxu0 %vm4893_vm3, %v6009_v38 }
 0xcf0   : > { %v5901_v30 = vadd.f32 %v5756_v13, %v12382_v23  ;;  %v5967_v61 = vmax.f32 %v5903_v22, 0.0  ;;  %v12545_v19 = vpop.permute.xlu1 %7426  ;;  %v12552_v54 = vpop.permute.xlu0 %7432 }
 0xcf1   : > { %v9479_v15 = vpop.f32.mrf.mxu1  ;;  %14128 = vst [vmem:[#allocation21_spill] sm:$0xff] %v12545_v19  ;;  %14129 = vst [vmem:[#allocation27_spill] sm:$0xff] %v12552_v54 }
 0xcf2   : > { %v5965_v4 = vmax.f32 %v5901_v30, 0.0  ;;  %v6011_v31 = vpack.c.bf16 %v5967_v61, %v5966_v45  ;;  %v5906_v50 = vadd.f32 %v9479_v15, %v12349_v34 }
 0xcf3   : > { %v5769_v29 = vpop.f32.mrf.mxu1 }
 0xcf4   : > { %v6010_v52 = vpack.c.bf16 %v5965_v4, %v5964_v28  ;;  %v5904_v62 = vadd.f32 %v5769_v29, %v12338_v36  ;;  %v12555_v30 = vpop.permute.xlu1 %7438  ;;  %v5970_v28 = vmax.f32 %v5906_v50, 0.0 }
 0xcf5   : > { %v9480_v55 = vpop.f32.mrf.mxu1  ;;  %14130 = vst [vmem:[#allocation28_spill] sm:$0xff] %v12555_v30 }
 0xcf6   : > { %v5907_v43 = vadd.f32 %v9480_v55, %v12340_v2  ;;  %9541 = vmatprep.mubr.msk.bf16.mxu0 %vm4893_vm3, %v6010_v52  ;;  %v5968_v13 = vmax.f32 %v5904_v62, 0.0 }
 0xcf7   : > { %v5772_v38 = vpop.f32.mrf.mxu1  ;;  %9542 = vmatmul.mubr.msk.bf16.gmra.mxu0 %vm4893_vm3, %v6011_v31 }
 0xcf8   : > { %v5905_v27 = vadd.f32 %v5772_v38, %v12351_v9  ;;  %v5971_v22 = vmax.f32 %v5907_v43, 0.0  ;;  %v12564_v62 = vpop.permute.xlu1 %7434 }
 0xcf9   : > { %v9483_v63 = vpop.f32.mrf.mxu1  ;;  %14132 = vst [vmem:[#allocation30_spill] sm:$0xff] %v12564_v62 }
 0xcfa   : > { %v5969_v61 = vmax.f32 %v5905_v27, 0.0  ;;  %v6013_v52 = vpack.c.bf16 %v5971_v22, %v5970_v28  ;;  %v5910_v43 = vadd.f32 %v9483_v63, %v12374_v1 }
 0xcfb   : > { %v5785_v4 = vpop.f32.mrf.mxu1 }
 0xcfc   : > { %v6012_v45 = vpack.c.bf16 %v5969_v61, %v5968_v13  ;;  %v12557_v29 = vpop.permute.xlu0 %7452  ;;  %v5908_v55 = vadd.f32 %v5785_v4, %v12368_v5  ;;  %v5974_v49 = vmax.f32 %v5910_v43, 0.0 }
 0xcfd   : > { %14131 = vst [vmem:[#allocation29_spill] sm:$0xff] %v12557_v29  ;;  %v9484_v15 = vpop.f32.mrf.mxu1 }
 0xcfe   : > { %v5911_v31 = vadd.f32 %v9484_v15, %v12370_v51  ;;  %9545 = vmatprep.mubr.msk.bf16.mxu0 %vm4893_vm3, %v6012_v45  ;;  %v5972_v28 = vmax.f32 %v5908_v55, 0.0 }
 0xcff   : > { %v5788_v38 = vpop.f32.mrf.mxu1  ;;  %9546 = vmatmul.mubr.msk.bf16.gmra.mxu0 %vm4893_vm3, %v6013_v52 }
 0xd00   : > { %v5909_v50 = vadd.f32 %v5788_v38, %v12382_v23  ;;  %v7181_v27 = vpop.permute.xlu0 %7180  ;;  %v5975_v13 = vmax.f32 %v5911_v31, 0.0 }
 0xd01   : > { %v7314_v22 = vadd.f32 %v14089_v6, %v7181_v27  ;;  %v9487_v61 = vpop.f32.mrf.mxu1 }
 0xd02   : > { %v5973_v4 = vmax.f32 %v5909_v50, 0.0  ;;  %v6015_v52 = vpack.c.bf16 %v5975_v13, %v5974_v49  ;;  %v5914_v6 = vadd.f32 %v9487_v61, %v12349_v34 }
 0xd03   : > { %v5801_v15 = vpop.f32.mrf.mxu1  ;;  %7500 = vrot.lane.b32.xlu0 %v7314_v22, %s9827_s29 }
 0xd04   : > { %v6014_v45 = vpack.c.bf16 %v5973_v4, %v5972_v28  ;;  %v12569_v63 = vpop.permute.xlu1 %7454  ;;  %v12571_v19 = vpop.permute.xlu0 %7448  ;;  %v5912_v38 = vadd.f32 %v5801_v15, %v12338_v36 }
 0xd05   : > { %14133 = vst [vmem:[#allocation31_spill] sm:$0xff] %v12569_v63  ;;  %14134 = vst [vmem:[#allocation32_spill] sm:$0xff] %v12571_v19  ;;  %v9488_v46 = vpop.f32.mrf.mxu1 }
 0xd06   : > { %v5915_v31 = vadd.f32 %v9488_v46, %v12340_v2  ;;  %9549 = vmatprep.mubr.msk.bf16.mxu0 %vm4893_vm3, %v6014_v45  ;;  %v5976_v4 = vmax.f32 %v5912_v38, 0.0  ;;  %v5978_v46 = vmax.f32 %v5914_v6, 0.0 }
 0xd07   : > { %v5804_v55 = vpop.f32.mrf.mxu1  ;;  %9550 = vmatmul.mubr.msk.bf16.gmra.mxu0 %vm4893_vm3, %v6015_v52 }
 0xd08   : > { %v5913_v43 = vadd.f32 %v5804_v55, %v12351_v9  ;;  %v7183_v50 = vpop.permute.xlu1 %7182  ;;  %v7177_v27 = vpop.permute.xlu0 %7176  ;;  %v5979_v22 = vmax.f32 %v5915_v31, 0.0  ;;  %v7310_v31 = vadd.f32 %v14088_v44, %v12398_v39 }
 0xd09   : > { %v7315_v28 = vadd.f32 %v11870_v32, %v7183_v50  ;;  %v7312_v49 = vadd.f32 %v7177_v27, %v11868_v21  ;;  %v9491_v13 = vpop.f32.mrf.mxu1 }
 0xd0a   : > { %v5977_v15 = vmax.f32 %v5913_v43, 0.0  ;;  %v6017_v55 = vpack.c.bf16 %v5979_v22, %v5978_v46  ;;  %v5918_v6 = vadd.f32 %v9491_v13, %v12374_v1  ;;  %v7311_v46 = vadd.f32 %v11859_v17, %v12416_v58 }
 0xd0b   : > { %v5817_v14 = vpop.f32.mrf.mxu1  ;;  %7502 = vrot.lane.b32.xlu1 %v7315_v28, %s9827_s29  ;;  %7496 = vrot.lane.b32.xlu0 %v7312_v49, %s9827_s29 }
 0xd0c   : > { %v6016_v61 = vpack.c.bf16 %v5977_v15, %v5976_v4  ;;  %v12583_v45 = vpop.permute.xlu1 %7450  ;;  %v7189_v52 = vpop.permute.xlu0 %7188  ;;  %v5916_v21 = vadd.f32 %v5817_v14, %v12368_v5  ;;  %v5982_v4 = vmax.f32 %v5918_v6, 0.0 }
 0xd0d   : > { %14135 = vst [vmem:[#allocation33_spill] sm:$0xff] %v12583_v45  ;;  %v9492_v32 = vpop.f32.mrf.mxu1 }
 0xd0e   : > { %v5919_v38 = vadd.f32 %v9492_v32, %v12370_v51  ;;  %9553 = vmatprep.mubr.msk.bf16.mxu0 %vm4893_vm3, %v6016_v61  ;;  %v5980_v22 = vmax.f32 %v5916_v21, 0.0 }
 0xd0f   : > { %v5820_v43 = vpop.f32.mrf.mxu1  ;;  %9554 = vmatmul.mubr.msk.bf16.gmra.mxu0 %vm4893_vm3, %v6017_v55  ;;  %7492 = vrot.lane.b32.xlu0 %v7310_v31, %s9827_s29  ;;  %v7318_v31 = vadd.f32 %v14090_v25, %v7189_v52 }
 0xd10   : > { %v5917_v50 = vadd.f32 %v5820_v43, %v12382_v23  ;;  %v7179_v27 = vpop.permute.xlu1 %7178  ;;  %v7185_v28 = vpop.permute.xlu0 %7184  ;;  %v5983_v44 = vmax.f32 %v5919_v38, 0.0 }
 0xd11   : > { %v7313_v39 = vadd.f32 %v7179_v27, %v11874_v57  ;;  %v7316_v14 = vadd.f32 %v7185_v28, %v11887_v11 }
 0xd12   : > { %v5981_v49 = vmax.f32 %v5917_v50, 0.0  ;;  %v6019_v61 = vpack.c.bf16 %v5983_v44, %v5982_v4 }
 0xd13   : > { %7498 = vrot.lane.b32.xlu1 %v7313_v39, %s9827_s29  ;;  %7504 = vrot.lane.b32.xlu0 %v7316_v14, %s9827_s29 }
 0xd14   : > { %v6018_v13 = vpack.c.bf16 %v5981_v49, %v5980_v22  ;;  %v7191_v15 = vpop.permute.xlu1 %7190 }
 0xd15   : > { %v7319_v55 = vadd.f32 %v11889_v41, %v7191_v15 }
 0xd16   : > { %9557 = vmatprep.mubr.msk.bf16.mxu0 %vm4893_vm3, %v6018_v13 }
 0xd17   : > { %9558 = vmatmul.mubr.msk.bf16.gmra.mxu0 %vm4893_vm3, %v6019_v61  ;;  %7494 = vrot.lane.b32.xlu1 %v7311_v46, %s9827_s29 }
 0xd18   : > { %7508 = vrot.lane.b32.xlu0 %v7318_v31, %s9827_s29  ;;  %v7187_v57 = vpop.permute.xlu1 %7186 }
 0xd19   : > { %v7317_v11 = vadd.f32 %v7187_v57, %v11892_v16 }
 0xd1b   : > { %7506 = vrot.lane.b32.xlu1 %v7317_v11, %s9827_s29 }
 0xd1f   : > { %7510 = vrot.lane.b32.xlu1 %v7319_v55, %s9827_s29  ;;  %s8493_s29 = sshll.u32 %s14273_s0, 9 }
 0xd20   : > { %s13252_s22 = scalar_lea.vmem %s13944_s19, %s8493_s29 }
 0xd57   : > { %v9495_v17 = vpop.f32.mrf.mxu1 }
 0xd58   : > { %v5922_v21 = vadd.f32 %v9495_v17, %v12349_v34 }
 0xd59   : > { %v5833_v58 = vpop.f32.mrf.mxu1 }
 0xd5a   : > { %v5920_v52 = vadd.f32 %v5833_v58, %v12338_v36  ;;  %v5986_v28 = vmax.f32 %v5922_v21, 0.0  ;;  %v9619_v36 = vld [vmem:[%s13941_s16 + $0x8] sm:$0xff]  }
 0xd5b   : > { %v9496_v25 = vpop.f32.mrf.mxu1  ;;  %9569 = vmatprep.subr.bf16.mxu1 %v9619_v36 }
 0xd5c   : > { %v5923_v32 = vadd.f32 %v9496_v25, %v12340_v2  ;;  %v5984_v50 = vmax.f32 %v5920_v52, 0.0  ;;  %9570 = vmatpush3.bf16.msra.mxu1 %v9619_v36 }
 0xd5d   : > { %v5836_v38 = vpop.f32.mrf.mxu1 }
 0xd5e   : > { %v5921_v6 = vadd.f32 %v5836_v38, %v12351_v9  ;;  %v5987_v43 = vmax.f32 %v5923_v32, 0.0 }
 0xd5f   : > { %v9499_v16 = vpop.f32.mrf.mxu1 }
 0xd60   : > { %v5985_v27 = vmax.f32 %v5921_v6, 0.0  ;;  %v6021_v39 = vpack.c.bf16 %v5987_v43, %v5986_v28  ;;  %v5926_v9 = vadd.f32 %v9499_v16, %v12374_v1 }
 0xd61   : > { %v5849_v41 = vpop.f32.mrf.mxu1 }
 0xd62   : > { %v6020_v44 = vpack.c.bf16 %v5985_v27, %v5984_v50  ;;  %v5924_v2 = vadd.f32 %v5849_v41, %v12368_v5  ;;  %v5990_v46 = vmax.f32 %v5926_v9, 0.0 }
 0xd63   : > { %v9500_v14 = vpop.f32.mrf.mxu1 }
 0xd64   : > { %v5927_v34 = vadd.f32 %v9500_v14, %v12370_v51  ;;  %9561 = vmatprep.mubr.msk.bf16.mxu0 %vm4893_vm3, %v6020_v44  ;;  %v5988_v13 = vmax.f32 %v5924_v2, 0.0 }
 0xd65   : > { %v5852_v22 = vpop.f32.mrf.mxu1  ;;  %9562 = vmatmul.mubr.msk.bf16.gmra.mxu0 %vm4893_vm3, %v6021_v39 }
 0xd66   : > { %v5925_v49 = vadd.f32 %v5852_v22, %v12382_v23  ;;  %v5991_v4 = vmax.f32 %v5927_v34, 0.0  ;;  %v12627_v23 = vld [vmem:[%s13940_s15] ss:$0 sm:$0xff] }
 0xd68   : > { %v5989_v15 = vmax.f32 %v5925_v49, 0.0  ;;  %v6023_v31 = vpack.c.bf16 %v5991_v4, %v5990_v46 }
 0xd6a   : > { %v6022_v61 = vpack.c.bf16 %v5989_v15, %v5988_v13 }
 0xd6c   : > { %9565 = vmatprep.mubr.msk.bf16.mxu0 %vm4893_vm3, %v6022_v61 }
 0xd6d   : > { %9566 = vmatmul.mubr.msk.bf16.gmra.mxu0 %vm4893_vm3, %v6023_v31 }
 0xd6f   : > { %v9507_v5 = vpop.f32.mrf.mxu0 }
 0xd70   : > { %v6186_v58 = vadd.f32 %v9507_v5, %v12627_v23 }
 0xd71   : > { %v6177_v51 = vpop.f32.mrf.mxu0 }
 0xd72   : > { %v6178_v52 = vadd.f32 %v12627_v23, %v6177_v51  ;;  %v12632_v38 = vmul.f32 0.17677669, %v6186_v58 }
 0xd73   : > { %v9508_v1 = vpop.f32.mrf.mxu0 }
 0xd74   : > { %v6189_v32 = vadd.f32 %v9508_v1, %v12627_v23  ;;  %v12636_v50 = vmul.f32 0.17677669, %v6178_v52  ;;  %v6526_v14 = vsel %vm4893_vm3, %v12632_v38, -inf }
 0xd75   : > { %v6180_v57 = vpop.f32.mrf.mxu0 }
 0xd76   : > { %v6181_v43 = vadd.f32 %v12627_v23, %v6180_v57  ;;  %v12641_v41 = vmul.f32 0.17677669, %v6189_v32  ;;  %v6496_v13 = vsel %vm4893_vm3, %v12636_v50, -inf }
 0xd77   : > { %v9511_v11 = vpop.f32.mrf.mxu0 }
 0xd78   : > { %v6202_v44 = vadd.f32 %v9511_v11, %v12627_v23  ;;  %v12651_v9 = vmul.f32 0.17677669, %v6181_v43  ;;  %v6541_v31 = vsel %vm4893_vm3, %v12641_v41, -inf }
 0xd79   : > { %v6193_v55 = vpop.f32.mrf.mxu0 }
 0xd7a   : > { %v6194_v22 = vadd.f32 %v12627_v23, %v6193_v55  ;;  %v12663_v5 = vmul.f32 0.17677669, %v6202_v44  ;;  %v6511_v52 = vsel %vm4893_vm3, %v12651_v9, -inf }
 0xd7b   : > { %v9512_v17 = vpop.f32.mrf.mxu0 }
 0xd7c   : > { %v6205_v57 = vadd.f32 %v9512_v17, %v12627_v23  ;;  %v12673_v32 = vmul.f32 0.17677669, %v6194_v22  ;;  %v6586_v44 = vsel %vm4893_vm3, %v12663_v5, -inf }
 0xd7d   : > { %v6196_v25 = vpop.f32.mrf.mxu0 }
 0xd7e   : > { %14136 = vst [vmem:[#allocation34_spill] sm:$0xff] %v12673_v32  ;;  %v6197_v43 = vadd.f32 %v12627_v23, %v6196_v25 }
 0xd7f   : > { %v9515_v21 = vpop.f32.mrf.mxu0 }
 0xd80   : > { %v6218_v6 = vadd.f32 %v9515_v21, %v12627_v23 }
 0xd81   : > { %v6209_v16 = vpop.f32.mrf.mxu0 }
 0xd82   : > { %v12638_v27 = vmul.f32 0.17677669, %v6218_v6  ;;  %v6210_v28 = vadd.f32 %v12627_v23, %v6209_v16 }
 0xd83   : > { %v9516_v39 = vpop.f32.mrf.mxu0 }
 0xd84   : > { %v6527_v36 = vsel %vm4893_vm3, %v12638_v27, -inf  ;;  %v12648_v2 = vmul.f32 0.17677669, %v6210_v28  ;;  %v6221_v34 = vadd.f32 %v9516_v39, %v12627_v23 }
 0xd85   : > { %v6528_v49 = vmax.f32 %v6526_v14, %v6527_v36  ;;  %v6212_v4 = vpop.f32.mrf.mxu0  ;;  %v12683_v36 = vmul.f32 0.17677669, %v6205_v57 }
 0xd86   : > { %v6497_v15 = vsel %vm4893_vm3, %v12648_v2, -inf  ;;  %v12658_v46 = vmul.f32 0.17677669, %v6221_v34  ;;  %v6213_v61 = vadd.f32 %v12627_v23, %v6212_v4  ;;  %v6556_v4 = vsel %vm4893_vm3, %v12673_v32, -inf }
 0xd87   : > { %v6498_v51 = vmax.f32 %v6496_v13, %v6497_v15  ;;  %v9519_v1 = vpop.f32.mrf.mxu0  ;;  %14137 = vst [vmem:[#allocation35_spill] sm:$0xff] %v12683_v36 }
 0xd88   : > { %v6542_v11 = vsel %vm4893_vm3, %v12658_v46, -inf  ;;  %v12668_v55 = vmul.f32 0.17677669, %v6213_v61  ;;  %v6234_v58 = vadd.f32 %v9519_v1, %v12627_v23  ;;  %v12692_v61 = vmul.f32 0.17677669, %v6197_v43 }
 0xd89   : > { %v6543_v21 = vmax.f32 %v6541_v31, %v6542_v11  ;;  %v6225_v6 = vpop.f32.mrf.mxu0 }
 0xd8a   : > { %v6512_v16 = vsel %vm4893_vm3, %v12668_v55, -inf  ;;  %v12678_v17 = vmul.f32 0.17677669, %v6234_v58  ;;  %v6226_v28 = vadd.f32 %v12627_v23, %v6225_v6  ;;  %14139 = vst [vmem:[#allocation37_spill] sm:$0xff] %v12692_v61 }
 0xd8b   : > { %v6513_v39 = vmax.f32 %v6511_v52, %v6512_v16  ;;  %v9520_v14 = vpop.f32.mrf.mxu0  ;;  %v6601_v52 = vsel %vm4893_vm3, %v12683_v36, -inf }
 0xd8c   : > { %v6587_v34 = vsel %vm4893_vm3, %v12678_v17, -inf  ;;  %v12687_v22 = vmul.f32 0.17677669, %v6226_v28  ;;  %v6237_v25 = vadd.f32 %v9520_v14, %v12627_v23  ;;  %v6571_v14 = vsel %vm4893_vm3, %v12692_v61, -inf }
 0xd8d   : > { %v6588_v13 = vmax.f32 %v6586_v44, %v6587_v34  ;;  %v6228_v15 = vpop.f32.mrf.mxu0 }
 0xd8e   : > { %14138 = vst [vmem:[#allocation36_spill] sm:$0xff] %v12687_v22  ;;  %v6557_v31 = vsel %vm4893_vm3, %v12687_v22, -inf  ;;  %v12696_v1 = vmul.f32 0.17677669, %v6237_v25  ;;  %v6229_v57 = vadd.f32 %v12627_v23, %v6228_v15 }
 0xd8f   : > { %v6558_v11 = vmax.f32 %v6556_v4, %v6557_v31  ;;  %v9523_v58 = vpop.f32.mrf.mxu0 }
 0xd90   : > { %14140 = vst [vmem:[#allocation38_spill] sm:$0xff] %v12696_v1  ;;  %v6602_v6 = vsel %vm4893_vm3, %v12696_v1, -inf  ;;  %v12703_v16 = vmul.f32 0.17677669, %v6229_v57  ;;  %v6250_v43 = vadd.f32 %v9523_v58, %v12627_v23 }
 0xd91   : > { %v6603_v28 = vmax.f32 %v6601_v52, %v6602_v6  ;;  %v6241_v44 = vpop.f32.mrf.mxu0 }
 0xd92   : > { %14141 = vst [vmem:[#allocation39_spill] sm:$0xff] %v12703_v16  ;;  %v6572_v34 = vsel %vm4893_vm3, %v12703_v16, -inf  ;;  %v12710_v25 = vmul.f32 0.17677669, %v6250_v43  ;;  %v6242_v4 = vadd.f32 %v12627_v23, %v6241_v44 }
 0xd93   : > { %v6573_v15 = vmax.f32 %v6571_v14, %v6572_v34  ;;  %v9524_v31 = vpop.f32.mrf.mxu0 }
 0xd94   : > { %v6529_v57 = vsel %vm4893_vm3, %v12710_v25, -inf  ;;  %v12715_v24 = vmul.f32 0.17677669, %v6242_v4  ;;  %v6253_v58 = vadd.f32 %v9524_v31, %v12627_v23 }
 0xd95   : > { %v12718_v52 = vmax.f32 %v6528_v49, %v6529_v57  ;;  %v6244_v6 = vpop.f32.mrf.mxu0 }
 0xd96   : > { %v6499_v26 = vsel %vm4893_vm3, %v12715_v24, -inf  ;;  %v12722_v7 = vmul.f32 0.17677669, %v6253_v58  ;;  %v6245_v43 = vadd.f32 %v12627_v23, %v6244_v6 }
 0xd97   : > { %v12725_v44 = vmax.f32 %v6498_v51, %v6499_v26  ;;  %v9527_v14 = vpop.f32.mrf.mxu0 }
 0xd98   : > { %v6544_v34 = vsel %vm4893_vm3, %v12722_v7, -inf  ;;  %v12729_v4 = vmul.f32 0.17677669, %v6245_v43  ;;  %v6266_v31 = vadd.f32 %v9527_v14, %v12627_v23 }
 0xd99   : > { %v12732_v49 = vmax.f32 %v6543_v21, %v6544_v34  ;;  %v6257_v57 = vpop.f32.mrf.mxu0 }
 0xd9a   : > { %v6514_v35 = vsel %vm4893_vm3, %v12729_v4, -inf  ;;  %v12736_v58 = vmul.f32 0.17677669, %v6266_v31  ;;  %v6258_v6 = vadd.f32 %v12627_v23, %v6257_v57 }
 0xd9b   : > { %v12739_v26 = vmax.f32 %v6513_v39, %v6514_v35  ;;  %v9528_v51 = vpop.f32.mrf.mxu0 }
 0xd9c   : > { %v6589_v40 = vsel %vm4893_vm3, %v12736_v58, -inf  ;;  %v12743_v43 = vmul.f32 0.17677669, %v6258_v6  ;;  %v6269_v14 = vadd.f32 %v9528_v51, %v12627_v23 }
 0xd9d   : > { %v12746_v21 = vmax.f32 %v6588_v13, %v6589_v40  ;;  %v6260_v34 = vpop.f32.mrf.mxu0 }
 0xd9e   : > { %14142 = vst [vmem:[#allocation40_spill] sm:$0xff] %v12743_v43  ;;  %v6559_v60 = vsel %vm4893_vm3, %v12743_v43, -inf  ;;  %v12750_v31 = vmul.f32 0.17677669, %v6269_v14  ;;  %v6261_v57 = vadd.f32 %v12627_v23, %v6260_v34 }
 0xd9f   : > { %v12753_v35 = vmax.f32 %v6558_v11, %v6559_v60  ;;  %v12755_v39 = vpop.f32.mrf.mxu0 }
 0xda0   : > { %14143 = vst [vmem:[#allocation41_spill] sm:$0xff] %v12750_v31  ;;  %v6604_v6 = vsel %vm4893_vm3, %v12750_v31, -inf  ;;  %v12759_v56 = vmul.f32 0.17677669, %v6261_v57 }
 0xda1   : > { %v12761_v51 = vmax.f32 %v6603_v28, %v6604_v6  ;;  %v6273_v40 = vpop.f32.mrf.mxu0 }
 0xda2   : > { %14144 = vst [vmem:[#allocation42_spill] sm:$0xff] %v12759_v56  ;;  %v6574_v13 = vsel %vm4893_vm3, %v12759_v56, -inf  ;;  %v6274_v14 = vadd.f32 %v12627_v23, %v6273_v40 }
 0xda3   : > { %v12766_v0 = vmax.f32 %v6573_v15, %v6574_v13  ;;  %v9532_v34 = vpop.f32.mrf.mxu0 }
 0xda4   : > { %v12768_v60 = vmul.f32 0.17677669, %v6274_v14  ;;  %v6285_v11 = vadd.f32 %v9532_v34, %v12627_v23 }
 0xda5   : > { %v6276_v45 = vpop.f32.mrf.mxu0 }
 0xda6   : > { %v12773_v57 = vsel %vm4893_vm3, %v12768_v60, -inf  ;;  %v12775_v28 = vmul.f32 0.17677669, %v6285_v11  ;;  %v6277_v6 = vadd.f32 %v12627_v23, %v6276_v45 }
 0xda7   : > { %v9535_v40 = vpop.f32.mrf.mxu0 }
 0xda8   : > { %v12782_v15 = vsel %vm4893_vm3, %v12775_v28, -inf  ;;  %v12784_v13 = vmul.f32 0.17677669, %v6277_v6  ;;  %v6298_v14 = vadd.f32 %v9535_v40, %v12627_v23 }
 0xda9   : > { %v6289_v62 = vpop.f32.mrf.mxu0 }
 0xdaa   : > { %v6516_v11 = vsel %vm4893_vm3, %v12784_v13, -inf  ;;  %v12791_v45 = vmul.f32 0.17677669, %v6298_v14  ;;  %v6290_v19 = vadd.f32 %v12627_v23, %v6289_v62 }
 0xdab   : > { %v6517_v54 = vmax.f32 %v12739_v26, %v6516_v11  ;;  %v9536_v48 = vpop.f32.mrf.mxu0 }
 0xdac   : > { %v6591_v6 = vsel %vm4893_vm3, %v12791_v45, -inf  ;;  %v12797_v8 = vmul.f32 0.17677669, %v6290_v19  ;;  %v6301_v40 = vadd.f32 %v9536_v48, %v12627_v23 }
 0xdad   : > { %v6592_v34 = vmax.f32 %v12746_v21, %v6591_v6  ;;  %v6292_v59 = vpop.f32.mrf.mxu0 }
 0xdae   : > { %14145 = vst [vmem:[#allocation43_spill] sm:$0xff] %v12797_v8  ;;  %v6561_v20 = vsel %vm4893_vm3, %v12797_v8, -inf  ;;  %v12803_v14 = vmul.f32 0.17677669, %v6301_v40  ;;  %v6293_v62 = vadd.f32 %v12627_v23, %v6292_v59 }
 0xdaf   : > { %v6562_v26 = vmax.f32 %v12753_v35, %v6561_v20  ;;  %v12807_v11 = vpop.f32.mrf.mxu0 }
 0xdb0   : > { %14146 = vst [vmem:[#allocation44_spill] sm:$0xff] %v12803_v14  ;;  %v6606_v19 = vsel %vm4893_vm3, %v12803_v14, -inf  ;;  %v12811_v37 = vmul.f32 0.17677669, %v6293_v62 }
 0xdb1   : > { %v6607_v48 = vmax.f32 %v12761_v51, %v6606_v19  ;;  %v12814_v21 = vpop.f32.mrf.mxu0 }
 0xdb2   : > { %14147 = vst [vmem:[#allocation45_spill] sm:$0xff] %v12811_v37  ;;  %v6576_v6 = vsel %vm4893_vm3, %v12811_v37, -inf }
 0xdb3   : > { %v6577_v40 = vmax.f32 %v12766_v0, %v6576_v6  ;;  %v12819_v10 = vpop.f32.mrf.mxu0 }
 0xdb5   : > { %v6308_v59 = vpop.f32.mrf.mxu0 }
 0xdb6   : > { %v6309_v20 = vadd.f32 %v12627_v23, %v6308_v59 }
 0xdb7   : > { %v9543_v35 = vpop.f32.mrf.mxu0 }
 0xdb8   : > { %v12822_v56 = vmul.f32 0.17677669, %v6309_v20  ;;  %v6330_v62 = vadd.f32 %v9543_v35, %v12627_v23 }
 0xdb9   : > { %v6321_v16 = vpop.f32.mrf.mxu0 }
 0xdba   : > { %v6518_v51 = vsel %vm4893_vm3, %v12822_v56, -inf  ;;  %v12827_v19 = vmul.f32 0.17677669, %v6330_v62  ;;  %v6322_v37 = vadd.f32 %v12627_v23, %v6321_v16 }
 0xdbb   : > { %v12830_v61 = vmax.f32 %v6517_v54, %v6518_v51  ;;  %v9544_v0 = vpop.f32.mrf.mxu0 }
 0xdbc   : > { %14148 = vst [vmem:[#allocation46_spill] sm:$0xff] %v12827_v19  ;;  %v6593_v6 = vsel %vm4893_vm3, %v12827_v19, -inf  ;;  %v12834_v59 = vmul.f32 0.17677669, %v6322_v37  ;;  %v6333_v20 = vadd.f32 %v9544_v0, %v12627_v23 }
 0xdbd   : > { %v12837_v63 = vmax.f32 %v6592_v34, %v6593_v6  ;;  %v6324_v35 = vpop.f32.mrf.mxu0 }
 0xdbe   : > { %14149 = vst [vmem:[#allocation47_spill] sm:$0xff] %v12834_v59  ;;  %v6563_v30 = vsel %vm4893_vm3, %v12834_v59, -inf  ;;  %v12841_v62 = vmul.f32 0.17677669, %v6333_v20  ;;  %v6325_v16 = vadd.f32 %v12627_v23, %v6324_v35 }
 0xdbf   : > { %v6564_v54 = vmax.f32 %v6562_v26, %v6563_v30  ;;  %v9547_v51 = vpop.f32.mrf.mxu0 }
 0xdc0   : > { %14150 = vst [vmem:[#allocation48_spill] sm:$0xff] %v12841_v62  ;;  %v6608_v18 = vsel %vm4893_vm3, %v12841_v62, -inf  ;;  %v12846_v47 = vmul.f32 0.17677669, %v6325_v16 }
 0xdc1   : > { %v6609_v37 = vmax.f32 %v6607_v48, %v6608_v18  ;;  %v6337_v3 = vpop.f32.mrf.mxu0 }
 0xdc2   : > { %14151 = vst [vmem:[#allocation49_spill] sm:$0xff] %v12846_v47  ;;  %v6578_v34 = vsel %vm4893_vm3, %v12846_v47, -inf }
 0xdc3   : > { %v12850_v0 = vmax.f32 %v6577_v40, %v6578_v34  ;;  %v9548_v6 = vpop.f32.mrf.mxu0 }
 0xdc5   : > { %v6340_v14 = vpop.f32.mrf.mxu0 }
 0xdc7   : > { %v9551_v20 = vpop.f32.mrf.mxu0 }
 0xdc8   : > { %v6362_v31 = vadd.f32 %v9551_v20, %v12627_v23 }
 0xdc9   : > { %v6353_v35 = vpop.f32.mrf.mxu0 }
 0xdca   : > { %v12853_v30 = vmul.f32 0.17677669, %v6362_v31  ;;  %v6354_v26 = vadd.f32 %v12627_v23, %v6353_v35 }
 0xdcb   : > { %v9552_v62 = vpop.f32.mrf.mxu0 }
 0xdcc   : > { %14152 = vst [vmem:[#allocation50_spill] sm:$0xff] %v12853_v30  ;;  %v12858_v18 = vsel %vm4893_vm3, %v12853_v30, -inf  ;;  %v12860_v48 = vmul.f32 0.17677669, %v6354_v26  ;;  %v6365_v40 = vadd.f32 %v9552_v62, %v12627_v23 }
 0xdcd   : > { %v6356_v34 = vpop.f32.mrf.mxu0 }
 0xdce   : > { %14153 = vst [vmem:[#allocation51_spill] sm:$0xff] %v12860_v48  ;;  %v6565_v20 = vsel %vm4893_vm3, %v12860_v48, -inf  ;;  %v12867_v31 = vmul.f32 0.17677669, %v6365_v40  ;;  %v6357_v35 = vadd.f32 %v12627_v23, %v6356_v34 }
 0xdcf   : > { %v6566_v47 = vmax.f32 %v6564_v54, %v6565_v20  ;;  %v9555_v1 = vpop.f32.mrf.mxu0 }
 0xdd0   : > { %14154 = vst [vmem:[#allocation52_spill] sm:$0xff] %v12867_v31  ;;  %v6610_v36 = vsel %vm4893_vm3, %v12867_v31, -inf  ;;  %v12872_v26 = vmul.f32 0.17677669, %v6357_v35 }
 0xdd1   : > { %v6611_v59 = vmax.f32 %v6609_v37, %v6610_v36  ;;  %v6369_v62 = vpop.f32.mrf.mxu0 }
 0xdd2   : > { %14155 = vst [vmem:[#allocation53_spill] sm:$0xff] %v12872_v26  ;;  %v12876_v16 = vsel %vm4893_vm3, %v12872_v26, -inf }
 0xdd3   : > { %v9556_v40 = vpop.f32.mrf.mxu0 }
 0xdd5   : > { %v6372_v8 = vpop.f32.mrf.mxu0 }
 0xdd7   : > { %v9559_v43 = vpop.f32.mrf.mxu0 }
 0xdd9   : > { %v6385_v34 = vpop.f32.mrf.mxu0 }
 0xdda   : > { %v6386_v54 = vadd.f32 %v12627_v23, %v6385_v34  ;;  %v6282_v34 = vadd.f32 %v12755_v39, %v12627_v23 }
 0xddb   : > { %v9560_v20 = vpop.f32.mrf.mxu0 }
 0xddc   : > { %v12881_v29 = vmul.f32 0.17677669, %v6386_v54  ;;  %v6397_v35 = vadd.f32 %v9560_v20, %v12627_v23  ;;  %v6314_v54 = vadd.f32 %v12807_v11, %v12627_v23  ;;  %v6306_v20 = vadd.f32 %v12627_v23, %v12814_v21 }
 0xddd   : > { %v6349_v11 = vadd.f32 %v9548_v6, %v12627_v23  ;;  %v6378_v21 = vadd.f32 %v9555_v1, %v12627_v23  ;;  %v6373_v6 = vadd.f32 %v12627_v23, %v6372_v8 }
 0xdde   : > { %14156 = vst [vmem:[#allocation54_spill] sm:$0xff] %v12881_v29  ;;  %v6567_v36 = vsel %vm4893_vm3, %v12881_v29, -inf  ;;  %v12886_v37 = vmul.f32 0.17677669, %v6397_v35  ;;  %v6317_v35 = vadd.f32 %v12819_v10, %v12627_v23  ;;  %v12902_v29 = vmul.f32 0.17677669, %v6282_v34  ;;  %v12915_v10 = vpop.permute.xlu0 %7440 }
 0xddf   : > { %v12888_v26 = vmax.f32 %v6566_v47, %v6567_v36  ;;  %v6346_v47 = vadd.f32 %v9547_v51, %v12627_v23  ;;  %v6338_v36 = vadd.f32 %v12627_v23, %v6337_v3  ;;  %14160 = vst [vmem:[#allocation58_spill] sm:$0xff] %v12915_v10  ;;  %v6370_v3 = vadd.f32 %v12627_v23, %v6369_v62 }
 0xde0   : > { %14157 = vst [vmem:[#allocation55_spill] sm:$0xff] %v12886_v37  ;;  %v6612_v48 = vsel %vm4893_vm3, %v12886_v37, -inf  ;;  %v12910_v39 = vmul.f32 0.17677669, %v6317_v35  ;;  %v6341_v37 = vadd.f32 %v12627_v23, %v6340_v14  ;;  %v6531_v51 = vsel %vm4893_vm3, %v12902_v29, -inf }
 0xde1   : > { %14158 = vst [vmem:[#allocation56_spill] sm:$0xff] %v12888_v26  ;;  %v12892_v31 = vmax.f32 %v6611_v59, %v6612_v48  ;;  %v12906_v59 = vmul.f32 0.17677669, %v6314_v54  ;;  %v12908_v48 = vmul.f32 0.17677669, %v6306_v20  ;;  %v6381_v34 = vadd.f32 %v9556_v40, %v12627_v23 }
 0xde2   : > { %v12921_v54 = vmul.f32 0.17677669, %v6346_v47  ;;  %v12923_v20 = vmul.f32 0.17677669, %v6338_v36  ;;  %v6394_v14 = vadd.f32 %v9559_v43, %v12627_v23  ;;  %v6548_v10 = vsel %vm4893_vm3, %v12910_v39, -inf }
 0xde3   : > { %14159 = vst [vmem:[#allocation57_spill] sm:$0xff] %v12892_v31  ;;  %v6388_v31 = vpop.f32.mrf.mxu0  ;;  %v6533_v1 = vsel %vm4893_vm3, %v12906_v59, -inf  ;;  %v6503_v35 = vsel %vm4893_vm3, %v12908_v48, -inf  ;;  %v12934_v40 = vmul.f32 0.17677669, %v6349_v11  ;;  %v6532_v8 = vmax.f32 %v12718_v52, %v6531_v51 }
 0xde4   : > { %v6389_v62 = vadd.f32 %v12627_v23, %v6388_v31  ;;  %v12936_v47 = vmul.f32 0.17677669, %v6341_v37  ;;  %v12938_v36 = vmul.f32 0.17677669, %v6378_v21  ;;  %v12941_v43 = vmul.f32 0.17677669, %v6370_v3  ;;  %v12953_v37 = vpop.permute.xlu0 %7444 }
 0xde5   : > { %v12943_v33 = vmul.f32 0.17677669, %v6381_v34  ;;  %v6535_v53 = vsel %vm4893_vm3, %v12921_v54, -inf  ;;  %v6505_v42 = vsel %vm4893_vm3, %v12923_v20, -inf  ;;  %v12949_v12 = vmul.f32 0.17677669, %v6373_v6 }
 0xde6   : > { %v12951_v31 = vmul.f32 0.17677669, %v6394_v14  ;;  %14162 = vst [vmem:[#allocation60_spill] sm:$0xff] %v12953_v37  ;;  %v6534_v11 = vmax.f32 %v6532_v8, %v6533_v1  ;;  %v14163_v52 = vmax.f32 %v12725_v44, %v12773_v57  ;;  %v14164_v51 = vmax.f32 %v12732_v49, %v12782_v15 }
 0xde7   : > { %v12961_v34 = vmul.f32 0.17677669, %v6389_v62  ;;  %v6550_v6 = vsel %vm4893_vm3, %v12934_v40, -inf  ;;  %v6520_v14 = vsel %vm4893_vm3, %v12936_v47, -inf  ;;  %v6537_v1 = vsel %vm4893_vm3, %v12938_v36, -inf }
 0xde8   : > { %14161 = vst [vmem:[#allocation59_spill] sm:$0xff] %v12951_v31  ;;  %v6504_v21 = vmax.f32 %v14163_v52, %v6503_v35  ;;  %v6549_v3 = vmax.f32 %v14164_v51, %v6548_v10  ;;  %v6536_v44 = vmax.f32 %v6534_v11, %v6535_v53  ;;  %v6507_v49 = vsel %vm4893_vm3, %v12941_v43, -inf  ;;  %v12984_v19 = vpop.permute.xlu0 %7456 }
 0xde9   : > { %v6552_v15 = vsel %vm4893_vm3, %v12943_v33, -inf  ;;  %v6522_v35 = vsel %vm4893_vm3, %v12949_v12, -inf  ;;  %v6597_v62 = vsel %vm4893_vm3, %v12951_v31, -inf  ;;  %v6521_v53 = vmax.f32 %v12830_v61, %v6520_v14  ;;  %14165 = vst [vmem:[#allocation61_spill] sm:$0xff] %v12984_v19 }
 0xdea   : > { %v6506_v57 = vmax.f32 %v6504_v21, %v6505_v42  ;;  %v6551_v37 = vmax.f32 %v6549_v3, %v6550_v6  ;;  %v6538_v42 = vmax.f32 %v6536_v44, %v6537_v1  ;;  %v14166_v61 = vmax.f32 %v12837_v63, %v12858_v18  ;;  %v9620_v1 = vld [vmem:[%s13941_s16] sm:$0xff]  }
 0xdeb   : > { %v14167_v44 = vmax.f32 %v12850_v0, %v12876_v16  ;;  %9571 = vmatprep.subr.bf16.mxu1 %v9620_v1 }
 0xdec   : > { %v6508_v21 = vmax.f32 %v6506_v57, %v6507_v49  ;;  %v12986_v31 = vmax.f32 %v6551_v37, %v6552_v15  ;;  %v12993_v3 = vmax.f32 %v14166_v61, %v6597_v62  ;;  %9572 = vmatpush3.bf16.msra.mxu1 %v9620_v1  ;;  %v13015_v61 = vpop.permute.xlu0 %7460 }
 0xded   : > { %14168 = vst [vmem:[#allocation62_spill] sm:$0xff] %v13015_v61 }
 0xe25   : > { %v9563_v22 = vpop.f32.mrf.mxu0 }
 0xe26   : > { %v6410_v8 = vadd.f32 %v9563_v22, %v12627_v23  ;;  %v6582_v22 = vsel %vm4893_vm3, %v12961_v34, -inf }
 0xe27   : > { %v6401_v10 = vpop.f32.mrf.mxu0  ;;  %v13001_v57 = vmax.f32 %v14167_v44, %v6582_v22 }
 0xe28   : > { %v6490_v52 = vmul.f32 0.17677669, %v6410_v8  ;;  %v6402_v51 = vadd.f32 %v12627_v23, %v6401_v10  ;;  %v12988_v8 = vmax.f32 %v6521_v53, %v6522_v35 }
 0xe29   : > { %v9564_v11 = vpop.f32.mrf.mxu0 }
 0xe2a   : > { %v6539_v32 = vsel %vm4893_vm3, %v6490_v52, -inf  ;;  %v6488_v26 = vmul.f32 0.17677669, %v6402_v51  ;;  %v6413_v30 = vadd.f32 %v9564_v11, %v12627_v23 }
 0xe2b   : > { %v6540_v6 = vmax.f32 %v6538_v42, %v6539_v32  ;;  %v6404_v14 = vpop.f32.mrf.mxu0 }
 0xe2c   : > { %v6509_v37 = vsel %vm4893_vm3, %v6488_v26, -inf  ;;  %v13004_v49 = vmul.f32 0.17677669, %v6413_v30  ;;  %v6405_v15 = vadd.f32 %v12627_v23, %v6404_v14 }
 0xe2d   : > { %v6618_v63 = vsub.f32 %v12632_v38, %v6540_v6  ;;  %v6626_v32 = vsub.f32 %v12638_v27, %v6540_v6  ;;  %v6634_v18 = vsub.f32 %v12710_v25, %v6540_v6  ;;  %v6642_v10 = vsub.f32 %v12902_v29, %v6540_v6  ;;  %v9567_v35 = vpop.f32.mrf.mxu0 }
 0xe2e   : > { %v6650_v0 = vsub.f32 %v12906_v59, %v6540_v6  ;;  %v6658_v16 = vsub.f32 %v12921_v54, %v6540_v6  ;;  %v6666_v62 = vsub.f32 %v12938_v36, %v6540_v6  ;;  %v6674_v30 = vsub.f32 %v6490_v52, %v6540_v6 }
 0xe2f   : > { %v6684_v51 = vmul.f32 1.442695, %v6618_v63  ;;  %v6700_v53 = vmul.f32 1.442695, %v6626_v32  ;;  %v6716_v42 = vmul.f32 1.442695, %v6634_v18  ;;  %v6510_v38 = vmax.f32 %v6508_v21, %v6509_v37  ;;  %v6417_v22 = vpop.f32.mrf.mxu0 }
 0xe30   : > { %v6732_v27 = vmul.f32 1.442695, %v6642_v10  ;;  %v6748_v11 = vmul.f32 1.442695, %v6650_v0  ;;  %v6764_v25 = vmul.f32 1.442695, %v6658_v16  ;;  %v6426_v29 = vadd.f32 %v9567_v35, %v12627_v23 }
 0xe31   : > { %9621 = vpow2.f32 %v6684_v51  ;;  %v6780_v59 = vmul.f32 1.442695, %v6666_v62  ;;  %v6796_v14 = vmul.f32 1.442695, %v6674_v30  ;;  %v6616_v54 = vsub.f32 %v12636_v50, %v6510_v38  ;;  %v9568_v6 = vpop.f32.mrf.mxu0  ;;  %v13024_v50 = vpop.permute.xlu1 %7442 }
 0xe32   : > { %9623 = vpow2.f32 %v6700_v53  ;;  %v6624_v36 = vsub.f32 %v12648_v2, %v6510_v38  ;;  %v6632_v52 = vsub.f32 %v12715_v24, %v6510_v38  ;;  %v6640_v21 = vsub.f32 %v12768_v60, %v6510_v38  ;;  %14169 = vst [vmem:[#allocation63_spill] sm:$0xff] %v13024_v50 }
 0xe33   : > { %9625 = vpow2.f32 %v6716_v42  ;;  %v6648_v1 = vsub.f32 %v12908_v48, %v6510_v38  ;;  %v6656_v44 = vsub.f32 %v12923_v20, %v6510_v38  ;;  %v6664_v37 = vsub.f32 %v12941_v43, %v6510_v38  ;;  %v6420_v16 = vpop.f32.mrf.mxu0  ;;  %v13026_v48 = vpop.permute.xlu0 %7468 }
 0xe34   : > { %9627 = vpow2.f32 %v6732_v27  ;;  %v6672_v63 = vsub.f32 %v6488_v26, %v6510_v38  ;;  %v6680_v32 = vmul.f32 1.442695, %v6616_v54  ;;  %v6696_v18 = vmul.f32 1.442695, %v6624_v36 }
 0xe35   : > { %9629 = vpow2.f32 %v6748_v11  ;;  %v6712_v2 = vmul.f32 1.442695, %v6632_v52  ;;  %v6728_v10 = vmul.f32 1.442695, %v6640_v21  ;;  %v6744_v24 = vmul.f32 1.442695, %v6648_v1  ;;  %v13049_v27 = vpop.permute.xlu1 %7446 }
 0xe36   : > { %9631 = vpow2.f32 %v6764_v25  ;;  %v6760_v60 = vmul.f32 1.442695, %v6656_v44  ;;  %v6776_v35 = vmul.f32 1.442695, %v6664_v37  ;;  %v6792_v0 = vmul.f32 1.442695, %v6672_v63 }
 0xe37   : > { %9633 = vpow2.f32 %v6780_v59  ;;  %v6554_v20 = vsel %vm4893_vm3, %v13004_v49, -inf  ;;  %v13030_v26 = vmul.f32 0.17677669, %v6405_v15  ;;  %v13032_v43 = vmul.f32 0.17677669, %v6426_v29  ;;  %14170 = vst [vmem:[#allocation64_spill] sm:$0xff] %v13049_v27 }
 0xe38   : > { %9635 = vpow2.f32 %v6796_v14  ;;  %v6555_v62 = vmax.f32 %v12986_v31, %v6554_v20  ;;  %v6418_v30 = vadd.f32 %v12627_v23, %v6417_v22  ;;  %v13037_v51 = vadd.f32 %v9568_v6, %v12627_v23 }
 0xe39   : > { %9637 = vpow2.f32 %v6680_v32  ;;  %v6524_v53 = vsel %vm4893_vm3, %v13030_v26, -inf  ;;  %v6599_v42 = vsel %vm4893_vm3, %v13032_v43, -inf  ;;  %v13044_v15 = vadd.f32 %v12627_v23, %v6420_v16  ;;  %v13078_v32 = vpop.permute.xlu1 %7458 }
 0xe3a   : > { %9639 = vpow2.f32 %v6696_v18  ;;  %v6619_v38 = vsub.f32 %v12641_v41, %v6555_v62  ;;  %v6627_v31 = vsub.f32 %v12658_v46, %v6555_v62  ;;  %v6635_v22 = vsub.f32 %v12722_v7, %v6555_v62  ;;  %v13056_v41 = vpop.permute.xlu0 %7464  ;;  %14172 = vst [vmem:[#allocation66_spill] sm:$0xff] %v13078_v32 }
 0xe3b   : > { %9641 = vpow2.f32 %v6712_v2  ;;  %v6643_v11 = vsub.f32 %v12775_v28, %v6555_v62  ;;  %v6651_v25 = vsub.f32 %v12910_v39, %v6555_v62  ;;  %v6659_v29 = vsub.f32 %v12934_v40, %v6555_v62  ;;  %14171 = vst [vmem:[#allocation65_spill] sm:$0xff] %v13056_v41 }
 0xe3c   : > { %9643 = vpow2.f32 %v6728_v10  ;;  %v6667_v23 = vsub.f32 %v12943_v33, %v6555_v62  ;;  %v6675_v59 = vsub.f32 %v13004_v49, %v6555_v62  ;;  %v6686_v14 = vmul.f32 1.442695, %v6619_v38 }
 0xe3d   : > { %9645 = vpow2.f32 %v6744_v24  ;;  %v6702_v46 = vmul.f32 1.442695, %v6627_v31  ;;  %v6718_v7 = vmul.f32 1.442695, %v6635_v22  ;;  %v6734_v54 = vmul.f32 1.442695, %v6643_v11 }
 0xe3e   : > { %v13058_v36 = vpop.eup %9621  ;;  %9647 = vpow2.f32 %v6760_v60  ;;  %v6750_v28 = vmul.f32 1.442695, %v6651_v25  ;;  %v6766_v52 = vmul.f32 1.442695, %v6659_v29  ;;  %v6782_v39 = vmul.f32 1.442695, %v6667_v23  ;;  %v13122_v25 = vpop.permute.xlu1 %7462 }
 0xe3f   : > { %v13060_v21 = vpop.eup %9623  ;;  %v6838_v33 = vsel %vm4893_vm3, %v13058_v36, 0.0  ;;  %9649 = vpow2.f32 %v6776_v35  ;;  %v6798_v40 = vmul.f32 1.442695, %v6675_v59  ;;  %v13065_v49 = vmax.f32 %v12988_v8, %v6524_v53  ;;  %14174 = vst [vmem:[#allocation68_spill] sm:$0xff] %v13122_v25 }
 0xe40   : > { %v13067_v6 = vpop.eup %9625  ;;  %v6839_v1 = vsel %vm4893_vm3, %v13060_v21, 0.0  ;;  %9651 = vpow2.f32 %v6792_v0  ;;  %v13072_v44 = vmax.f32 %v12993_v3, %v6599_v42  ;;  %v13074_v37 = vmul.f32 0.17677669, %v6418_v30  ;;  %v13094_v0 = vpop.permute.xlu0 %7476 }
 0xe41   : > { %v13076_v63 = vpop.eup %9627  ;;  %v6840_v18 = vadd.f32 %v6839_v1, %v6838_v33  ;;  %v6841_v8 = vsel %vm4893_vm3, %v13067_v6, 0.0  ;;  %9653 = vpow2.f32 %v6686_v14  ;;  %v6617_v2 = vsub.f32 %v12651_v9, %v13065_v49  ;;  %14173 = vst [vmem:[#allocation67_spill] sm:$0xff] %v13094_v0 }
 0xe42   : > { %v13084_v10 = vpop.eup %9629  ;;  %v6843_v3 = vsel %vm4893_vm3, %v13076_v63, 0.0  ;;  %9655 = vpow2.f32 %v6702_v46  ;;  %v6625_v24 = vsub.f32 %v12668_v55, %v13065_v49  ;;  %v6633_v60 = vsub.f32 %v12729_v4, %v13065_v49 }
 0xe43   : > { %v13092_v35 = vpop.eup %9631  ;;  %v6842_v16 = vadd.f32 %v6841_v8, %v6840_v18  ;;  %v6845_v9 = vsel %vm4893_vm3, %v13084_v10, 0.0  ;;  %9657 = vpow2.f32 %v6718_v7  ;;  %v6641_v20 = vsub.f32 %v12784_v13, %v13065_v49 }
 0xe44   : > { %v13100_v62 = vpop.eup %9633  ;;  %v6847_v55 = vsel %vm4893_vm3, %v13092_v35, 0.0  ;;  %9659 = vpow2.f32 %v6734_v54  ;;  %v6649_v4 = vsub.f32 %v12822_v56, %v13065_v49  ;;  %v6657_v30 = vsub.f32 %v12936_v47, %v13065_v49  ;;  %v13132_v54 = vpop.permute.xlu0 %7472 }
 0xe45   : > { %v13108_v53 = vpop.eup %9635  ;;  %v6844_v42 = vadd.f32 %v6843_v3, %v6842_v16  ;;  %v6849_v38 = vsel %vm4893_vm3, %v13100_v62, 0.0  ;;  %9661 = vpow2.f32 %v6750_v28  ;;  %v6665_v13 = vsub.f32 %v12949_v12, %v13065_v49  ;;  %14175 = vst [vmem:[#allocation69_spill] sm:$0xff] %v13132_v54 }
 0xe46   : > { %v13114_v31 = vpop.eup %9637  ;;  %v6851_v22 = vsel %vm4893_vm3, %v13108_v53, 0.0  ;;  %9663 = vpow2.f32 %v6766_v52  ;;  %v6673_v56 = vsub.f32 %v13030_v26, %v13065_v49  ;;  %v6682_v47 = vmul.f32 1.442695, %v6617_v2 }
 0xe47   : > { %v13120_v11 = vpop.eup %9639  ;;  %v6846_v29 = vadd.f32 %v6845_v9, %v6844_v42  ;;  %v6808_v23 = vsel %vm4893_vm3, %v13114_v31, 0.0  ;;  %9665 = vpow2.f32 %v6782_v39  ;;  %v6698_v12 = vmul.f32 1.442695, %v6625_v24 }
 0xe48   : > { %v13126_v59 = vpop.eup %9641  ;;  %v6809_v14 = vsel %vm4893_vm3, %v13120_v11, 0.0  ;;  %9667 = vpow2.f32 %v6798_v40  ;;  %v6714_v46 = vmul.f32 1.442695, %v6633_v60  ;;  %v6730_v7 = vmul.f32 1.442695, %v6641_v20 }
 0xe49   : > { %v13130_v26 = vpop.eup %9643  ;;  %v6848_v28 = vadd.f32 %v6847_v55, %v6846_v29  ;;  %v6810_v52 = vadd.f32 %v6809_v14, %v6808_v23  ;;  %v6811_v33 = vsel %vm4893_vm3, %v13126_v59, 0.0  ;;  %9669 = vpow2.f32 %v6682_v47  ;;  %v13150_v55 = vpop.permute.xlu1 %7470 }
 0xe4a   : > { %v13136_v39 = vpop.eup %9645  ;;  %v6813_v49 = vsel %vm4893_vm3, %v13130_v26, 0.0  ;;  %9671 = vpow2.f32 %v6698_v12  ;;  %v6746_v1 = vmul.f32 1.442695, %v6649_v4  ;;  %v6762_v40 = vmul.f32 1.442695, %v6657_v30 }
 0xe4b   : > { %v13140_v18 = vpop.eup %9647  ;;  %v6850_v8 = vadd.f32 %v6849_v38, %v6848_v28  ;;  %v6812_v2 = vadd.f32 %v6811_v33, %v6810_v52  ;;  %v6815_v3 = vsel %vm4893_vm3, %v13136_v39, 0.0  ;;  %9673 = vpow2.f32 %v6714_v46 }
 0xe4c   : > { %v13144_v24 = vpop.eup %9649  ;;  %v6817_v60 = vsel %vm4893_vm3, %v13140_v18, 0.0  ;;  %9675 = vpow2.f32 %v6730_v7  ;;  %v6778_v16 = vmul.f32 1.442695, %v6665_v13  ;;  %v6794_v9 = vmul.f32 1.442695, %v6673_v56  ;;  %v14176_v7 = vld [vmem:[#allocation46_spill] sm:$0xff] }
 0xe4d   : > { %v13148_v20 = vpop.eup %9651  ;;  %v6852_v4 = vadd.f32 %v6851_v22, %v6850_v8  ;;  %v6814_v30 = vadd.f32 %v6813_v49, %v6812_v2  ;;  %v6819_v42 = vsel %vm4893_vm3, %v13144_v24, 0.0  ;;  %9677 = vpow2.f32 %v6746_v1  ;;  %v13164_v22 = vpop.permute.xlu0 %7484  ;;  %v14177_v8 = vld [vmem:[#allocation50_spill] sm:$0xff] }
 0xe4e   : > { %v13154_v38 = vpop.eup %9653  ;;  %v6821_v47 = vsel %vm4893_vm3, %v13148_v20, 0.0  ;;  %9679 = vpow2.f32 %v6762_v40  ;;  %v6622_v13 = vsub.f32 %v12663_v5, %v13072_v44  ;;  %v6630_v56 = vsub.f32 %v12678_v17, %v13072_v44 }
 0xe4f   : > { %v13162_v29 = vpop.eup %9655  ;;  %9681 = vrcp.f32 %v6852_v4  ;;  %v6816_v23 = vadd.f32 %v6815_v3, %v6814_v30  ;;  %v6853_v12 = vsel %vm4893_vm3, %v13154_v38, 0.0  ;;  %v6638_v14 = vsub.f32 %v12736_v58, %v13072_v44  ;;  %v13194_v4 = vpop.permute.xlu1 %7466 }
 0xe50   : > { %v13170_v46 = vpop.eup %9657  ;;  %v6854_v5 = vsel %vm4893_vm3, %v13162_v29, 0.0  ;;  %9683 = vpow2.f32 %v6778_v16  ;;  %v6646_v17 = vsub.f32 %v12791_v45, %v13072_v44  ;;  %v6654_v28 = vsub.f32 %v14176_v7, %v13072_v44  ;;  %v14178_v45 = vld [vmem:[#allocation59_spill] sm:$0xff]  ;;  %14179 = vst [vmem:[#allocation46_spill] sm:$0xff] %v13194_v4 }
 0xe51   : > { %v13178_v52 = vpop.eup %9659  ;;  %v6818_v33 = vadd.f32 %v6817_v60, %v6816_v23  ;;  %v6855_v49 = vadd.f32 %v6854_v5, %v6853_v12  ;;  %v6856_v1 = vsel %vm4893_vm3, %v13170_v46, 0.0  ;;  %9685 = vpow2.f32 %v6794_v9  ;;  %v13206_v0 = vpop.permute.xlu0 %7480 }
 0xe52   : > { %v13182_v58 = vpop.eup %9661  ;;  %v6858_v40 = vsel %vm4893_vm3, %v13178_v52, 0.0  ;;  %v6662_v2 = vsub.f32 %v14177_v8, %v13072_v44  ;;  %v6670_v3 = vsub.f32 %v14178_v45, %v13072_v44  ;;  %v6678_v16 = vsub.f32 %v13032_v43, %v13072_v44  ;;  %14180 = vst [vmem:[#allocation50_spill] sm:$0xff] %v13206_v0  ;;  %v14189_v0 = vld [vmem:[#allocation8_spill] sm:$0xff] }
 0xe53   : > { %v13192_v60 = vpop.eup %9663  ;;  %v6820_v30 = vadd.f32 %v6819_v42, %v6818_v33  ;;  %v6857_v9 = vadd.f32 %v6856_v1, %v6855_v49  ;;  %v6860_v23 = vsel %vm4893_vm3, %v13182_v58, 0.0  ;;  %v6692_v12 = vmul.f32 1.442695, %v6622_v13 }
 0xe54   : > { %v13198_v5 = vpop.eup %9665  ;;  %v6862_v7 = vsel %vm4893_vm3, %v13192_v60, 0.0  ;;  %v6708_v8 = vmul.f32 1.442695, %v6630_v56  ;;  %v6724_v45 = vmul.f32 1.442695, %v6638_v14  ;;  %v6569_v43 = vsel %vm4893_vm3, %v13074_v37, -inf }
 0xe55   : > { %v13204_v44 = vpop.eup %9667  ;;  %v6822_v42 = vadd.f32 %v6821_v47, %v6820_v30  ;;  %v6859_v33 = vadd.f32 %v6858_v40, %v6857_v9  ;;  %v6864_v49 = vsel %vm4893_vm3, %v13198_v5, 0.0  ;;  %9687 = vpow2.f32 %v6692_v12 }
 0xe56   : > { %v13210_v13 = vpop.eup %9669  ;;  %v13214_v56 = vsel %vm4893_vm3, %v13204_v44, 0.0  ;;  %9689 = vpow2.f32 %v6708_v8  ;;  %v6740_v14 = vmul.f32 1.442695, %v6646_v17  ;;  %v6756_v1 = vmul.f32 1.442695, %v6654_v28  ;;  %v13229_v17 = vpop.permute.xlu1 %7478 }
 0xe57   : > { %v13216_v25 = vpop.eup %9671  ;;  %9691 = vrcp.f32 %v6822_v42  ;;  %v6861_v50 = vadd.f32 %v6860_v23, %v6859_v33  ;;  %v6823_v47 = vsel %vm4893_vm3, %v13210_v13, 0.0  ;;  %v6772_v40 = vmul.f32 1.442695, %v6662_v2  ;;  %14181 = vst [vmem:[#allocation59_spill] sm:$0xff] %v13229_v17 }
 0xe58   : > { %v13220_v30 = vpop.eup %9673  ;;  %v6824_v9 = vsel %vm4893_vm3, %v13216_v25, 0.0  ;;  %9693 = vpow2.f32 %v6724_v45  ;;  %v6788_v12 = vmul.f32 1.442695, %v6670_v3  ;;  %v13224_v61 = vmul.f32 1.442695, %v6678_v16  ;;  %v14182_v3 = vld [vmem:[#allocation56_spill] sm:$0xff] }
 0xe59   : > { %v13226_v8 = vpop.eup %9675  ;;  %v6863_v28 = vadd.f32 %v6862_v7, %v6861_v50  ;;  %v6825_v23 = vadd.f32 %v6824_v9, %v6823_v47  ;;  %v6826_v42 = vsel %vm4893_vm3, %v13220_v30, 0.0  ;;  %9695 = vpow2.f32 %v6740_v14  ;;  %v13245_v50 = vpop.permute.xlu0 %7488 }
 0xe5a   : > { %v13233_v2 = vpop.eup %9677  ;;  %v6828_v33 = vsel %vm4893_vm3, %v13226_v8, 0.0  ;;  %9697 = vpow2.f32 %v6756_v1  ;;  %v13238_v16 = vmax.f32 %v14182_v3, %v6569_v43  ;;  %v13241_v45 = vmul.f32 0.17677669, %v13037_v51  ;;  %14183 = vst [vmem:[#allocation56_spill] sm:$0xff] %v13245_v50  ;;  %v14184_v43 = vld [vmem:[#allocation34_spill] sm:$0xff]  ;;  %v13274_v50 = vpop.permute.xlu1 %7474 }
 0xe5b   : > { %v13243_v27 = vpop.eup %9679  ;;  %v6865_v7 = vadd.f32 %v6864_v49, %v6863_v28  ;;  %v6827_v47 = vadd.f32 %v6826_v42, %v6825_v23  ;;  %v6830_v14 = vsel %vm4893_vm3, %v13233_v2, 0.0  ;;  %9699 = vpow2.f32 %v6772_v40  ;;  %v14185_v49 = vld [vmem:[#allocation36_spill] sm:$0xff]  ;;  %14186 = vst [vmem:[#allocation34_spill] sm:$0xff] %v13274_v50  ;;  %v14202_v50 = vld [vmem:[#allocation54_spill] sm:$0xff] }
 0xe5c   : > { %v9682_v9 = vpop.eup %9681  ;;  %v13256_v51 = vsel %vm4893_vm3, %v13243_v27, 0.0  ;;  %9701 = vpow2.f32 %v6788_v12 }
 0xe5d   : > { %v13262_v23 = vpop.eup %9683  ;;  %v6933_v40 = vmul.f32 %v9682_v9, %v13058_v36  ;;  %v6946_v42 = vmul.f32 %v9682_v9, %v13060_v21  ;;  %v6954_v3 = vmul.f32 %v9682_v9, %v13067_v6  ;;  %v6962_v12 = vmul.f32 %v9682_v9, %v13076_v63  ;;  %v7501_v21 = vpop.permute.xlu0 %7500  ;;  %v14187_v6 = vld [vmem:[#allocation4_spill] sm:$0xff]  ;;  %v14188_v63 = vld [vmem:[#allocation23_spill] sm:$0xff] }
 0xe5e   : > { %v13268_v17 = vpop.eup %9685  ;;  %v6970_v1 = vmul.f32 %v9682_v9, %v13084_v10  ;;  %v6978_v28 = vmul.f32 %v9682_v9, %v13092_v35  ;;  %v6986_v32 = vmul.f32 %v9682_v9, %v13100_v62  ;;  %v6994_v36 = vmul.f32 %v9682_v9, %v13108_v53  ;;  %v14190_v10 = vld [vmem:[#allocation20_spill] sm:$0xff]  ;;  %v14191_v35 = vld [vmem:[#allocation29_spill] sm:$0xff] }
 0xe5f   : > { %v7578_v54 = vmul.f32 %v14187_v6, %v6933_v40  ;;  %v7586_v19 = vmul.f32 %v14188_v63, %v6946_v42  ;;  %v7594_v4 = vmul.f32 %v14189_v0, %v6954_v3  ;;  %v7602_v41 = vmul.f32 %v14190_v10, %v6962_v12  ;;  %7882 = vst.msk [vmem:[%s13252_s22 + $0x10] sm:$0xff] %vm4893_vm3, %v6933_v40 }
 0xe60   : > { %7890 = vst.msk [vmem:[%s13252_s22 + $0x50] sm:$0xff] %vm4893_vm3, %v6946_v42  ;;  %7898 = vst.msk [vmem:[%s13252_s22 + $0x90] sm:$0xff] %vm4893_vm3, %v6954_v3  ;;  %v7610_v62 = vmul.f32 %v14191_v35, %v6970_v1  ;;  %v7618_v53 = vmul.f32 %v13026_v48, %v6978_v28  ;;  %v7626_v9 = vmul.f32 %v13164_v22, %v6986_v32  ;;  %v6836_v63 = vsel %vm4893_vm3, %v13268_v17, 0.0 }
 0xe61   : > { %7906 = vst.msk [vmem:[%s13252_s22 + $0xd0] sm:$0xff] %vm4893_vm3, %v6962_v12  ;;  %v7634_v6 = vmul.f32 %v7501_v21, %v6994_v36  ;;  %7914 = vst.msk [vmem:[%s13252_s22 + $0x110] sm:$0xff] %vm4893_vm3, %v6970_v1  ;;  %v7670_v0 = vsel %vm4893_vm3, %v7578_v54, 0.0  ;;  %v7671_v40 = vsel %vm4893_vm3, %v7586_v19, 0.0  ;;  %v7673_v42 = vsel %vm4893_vm3, %v7594_v4, 0.0 }
 0xe62   : > { %7922 = vst.msk [vmem:[%s13252_s22 + $0x150] sm:$0xff] %vm4893_vm3, %v6978_v28  ;;  %7930 = vst.msk [vmem:[%s13252_s22 + $0x190] sm:$0xff] %vm4893_vm3, %v6986_v32  ;;  %v7675_v3 = vsel %vm4893_vm3, %v7602_v41, 0.0  ;;  %v13303_v48 = vpop.eup %9687  ;;  %v7672_v22 = vadd.f32 %v7671_v40, %v7670_v0  ;;  %v7677_v12 = vsel %vm4893_vm3, %v7610_v62, 0.0  ;;  %v7679_v1 = vsel %vm4893_vm3, %v7618_v53, 0.0  ;;  %v13323_v62 = vpop.permute.xlu1 %7486  ;;  %v14197_v0 = vld [vmem:[#allocation43_spill] sm:$0xff] }
 0xe63   : > { %7938 = vst.msk [vmem:[%s13252_s22 + $0x1d0] sm:$0xff] %vm4893_vm3, %v6994_v36  ;;  %14192 = vst [vmem:[#allocation36_spill] sm:$0xff] %v13303_v48  ;;  %v7681_v28 = vsel %vm4893_vm3, %v7626_v9, 0.0  ;;  %v13308_v32 = vpop.eup %9689  ;;  %v7683_v36 = vsel %vm4893_vm3, %v7634_v6, 0.0  ;;  %v6867_v54 = vadd.f32 %v13214_v56, %v6865_v7  ;;  %v6829_v19 = vadd.f32 %v6828_v33, %v6827_v47  ;;  %v14195_v7 = vld [vmem:[#allocation40_spill] sm:$0xff] }
 0xe64   : > { %14193 = vst [vmem:[#allocation4_spill] sm:$0xff] %v13308_v32  ;;  %v6834_v4 = vsel %vm4893_vm3, %v13262_v23, 0.0  ;;  %v13314_v41 = vpop.eup %9691  ;;  %v7674_v21 = vadd.f32 %v7673_v42, %v7672_v22  ;;  %9703 = vpow2.f32 %v13224_v61  ;;  %v6898_v10 = vsel %vm4893_vm3, %v13303_v48, 0.0 }
 0xe65   : > { %v13321_v35 = vpop.eup %9693  ;;  %9705 = vrcp.f32 %v6867_v54  ;;  %v6831_v56 = vadd.f32 %v6830_v14, %v6829_v19  ;;  %v6899_v33 = vsel %vm4893_vm3, %v13308_v32, 0.0  ;;  %v6636_v47 = vsub.f32 %v14195_v7, %v13238_v16  ;;  %v14199_v54 = vld [vmem:[#allocation47_spill] sm:$0xff] }
 0xe66   : > { %14194 = vst [vmem:[#allocation23_spill] sm:$0xff] %v13321_v35  ;;  %v13329_v53 = vpop.eup %9695  ;;  %v7676_v9 = vadd.f32 %v7675_v3, %v7674_v21  ;;  %v6900_v6 = vadd.f32 %v6899_v33, %v6898_v10  ;;  %v6901_v61 = vsel %vm4893_vm3, %v13321_v35, 0.0  ;;  %v6644_v40 = vsub.f32 %v14197_v0, %v13238_v16  ;;  %v14200_v7 = vld [vmem:[#allocation51_spill] sm:$0xff] }
 0xe67   : > { %14196 = vst [vmem:[#allocation8_spill] sm:$0xff] %v13329_v53  ;;  %v13335_v42 = vpop.eup %9697  ;;  %v6833_v14 = vadd.f32 %v13256_v51, %v6831_v56  ;;  %v6903_v22 = vsel %vm4893_vm3, %v13329_v53, 0.0  ;;  %v6652_v19 = vsub.f32 %v14199_v54, %v13238_v16  ;;  %v6660_v3 = vsub.f32 %v14200_v7, %v13238_v16 }
 0xe68   : > { %14198 = vst [vmem:[#allocation20_spill] sm:$0xff] %v13335_v42  ;;  %v13344_v21 = vpop.eup %9699  ;;  %v7678_v10 = vadd.f32 %v7677_v12, %v7676_v9  ;;  %v6902_v33 = vadd.f32 %v6901_v61, %v6900_v6  ;;  %v6905_v0 = vsel %vm4893_vm3, %v13335_v42, 0.0  ;;  %v6668_v35 = vsub.f32 %v14202_v50, %v13238_v16 }
 0xe69   : > { %14201 = vst [vmem:[#allocation29_spill] sm:$0xff] %v13344_v21  ;;  %v13350_v51 = vpop.eup %9701  ;;  %v6835_v56 = vadd.f32 %v6834_v4, %v6833_v14  ;;  %v6907_v53 = vsel %vm4893_vm3, %v13344_v21, 0.0  ;;  %v6676_v54 = vsub.f32 %v13074_v37, %v13238_v16  ;;  %v14203_v7 = vsub.f32 %v14184_v43, %v13238_v16  ;;  %v13364_v4 = vpop.permute.xlu1 %7482 }
 0xe6a   : > { %v7680_v9 = vadd.f32 %v7679_v1, %v7678_v10  ;;  %v6904_v6 = vadd.f32 %v6903_v22, %v6902_v33  ;;  %v6909_v61 = vsel %vm4893_vm3, %v13350_v51, 0.0  ;;  %v14204_v50 = vsub.f32 %v14185_v49, %v13238_v16  ;;  %v14205_v49 = vld [vmem:[#allocation57_spill] sm:$0xff] }
 0xe6b   : > { %v6688_v12 = vmul.f32 1.442695, %v14203_v7  ;;  %v6837_v14 = vadd.f32 %v6836_v63, %v6835_v56  ;;  %v6720_v21 = vmul.f32 1.442695, %v6636_v47  ;;  %v6736_v32 = vmul.f32 1.442695, %v6644_v40 }
 0xe6c   : > { %v6704_v42 = vmul.f32 1.442695, %v14204_v50  ;;  %v7682_v37 = vadd.f32 %v7681_v28, %v7680_v9  ;;  %v6906_v48 = vadd.f32 %v6905_v0, %v6904_v6  ;;  %v6752_v43 = vmul.f32 1.442695, %v6652_v19  ;;  %v14207_v40 = vld [vmem:[#allocation38_spill] sm:$0xff]  ;;  %v14208_v19 = vld [vmem:[#allocation41_spill] sm:$0xff] }
 0xe6d   : > { %9707 = vpow2.f32 %v6688_v12  ;;  %v6768_v1 = vmul.f32 1.442695, %v6660_v3  ;;  %v6784_v22 = vmul.f32 1.442695, %v6668_v35  ;;  %v13366_v10 = vmul.f32 1.442695, %v6676_v54 }
 0xe6e   : > { %9709 = vpow2.f32 %v6704_v42  ;;  %v13368_v33 = vadd.f32 %v7683_v36, %v7682_v37  ;;  %v6908_v7 = vadd.f32 %v6907_v53, %v6906_v48  ;;  %v6614_v16 = vsel %vm4893_vm3, %v13241_v45, -inf  ;;  %v14210_v56 = vld [vmem:[#allocation48_spill] sm:$0xff] }
 0xe6f   : > { %9711 = vrcp.f32 %v6837_v14  ;;  %v13373_v63 = vmax.f32 %v14205_v49, %v6614_v16  ;;  %v13376_v28 = vmul.f32 0.17677669, %v13044_v15  ;;  %v13380_v35 = vmul.f32 %v13314_v41, %v13114_v31  ;;  %v13392_v15 = vpop.permute.xlu1 %7490  ;;  %v14206_v31 = vld [vmem:[#allocation35_spill] sm:$0xff] }
 0xe70   : > { %9713 = vpow2.f32 %v6720_v21  ;;  %v6910_v47 = vadd.f32 %v6909_v61, %v6908_v7  ;;  %v13384_v48 = vmul.f32 %v13314_v41, %v13120_v11  ;;  %v14209_v21 = vld [vmem:[#allocation44_spill] sm:$0xff] }
 0xe71   : > { %9715 = vpow2.f32 %v6736_v32  ;;  %v13388_v32 = vmul.f32 %v13314_v41, %v13126_v59  ;;  %v13390_v36 = vpop.eup %9703  ;;  %v6623_v53 = vsub.f32 %v14206_v31, %v13373_v63  ;;  %v6631_v42 = vsub.f32 %v14207_v40, %v13373_v63  ;;  %7880 = vst.msk [vmem:[%s13252_s22] sm:$0xff] %vm4893_vm3, %v13380_v35 }
 0xe72   : > { %9717 = vpow2.f32 %v6752_v43  ;;  %v6639_v3 = vsub.f32 %v14208_v19, %v13373_v63  ;;  %v9706_v11 = vpop.eup %9705  ;;  %v6911_v59 = vsel %vm4893_vm3, %v13390_v36, 0.0  ;;  %v6647_v0 = vsub.f32 %v14209_v21, %v13373_v63  ;;  %7888 = vst.msk [vmem:[%s13252_s22 + $0x40] sm:$0xff] %vm4893_vm3, %v13384_v48 }
 0xe73   : > { %9719 = vpow2.f32 %v6768_v1  ;;  %v6655_v54 = vsub.f32 %v14210_v56, %v13373_v63  ;;  %7896 = vst.msk [vmem:[%s13252_s22 + $0x80] sm:$0xff] %vm4893_vm3, %v13388_v32  ;;  %v6935_v12 = vmul.f32 %v9706_v11, %v13154_v38  ;;  %v6947_v9 = vmul.f32 %v9706_v11, %v13162_v29  ;;  %v7503_v1 = vpop.permute.xlu1 %7502  ;;  %v14211_v38 = vld [vmem:[#allocation3_spill] sm:$0xff]  ;;  %v14212_v29 = vld [vmem:[#allocation25_spill] sm:$0xff] }
 0xe74   : > { %9721 = vpow2.f32 %v6784_v22  ;;  %v6955_v6 = vmul.f32 %v9706_v11, %v13170_v46  ;;  %v6963_v61 = vmul.f32 %v9706_v11, %v13178_v52  ;;  %v6971_v50 = vmul.f32 %v9706_v11, %v13182_v58  ;;  %v14213_v46 = vld [vmem:[#allocation14_spill] sm:$0xff]  ;;  %v14214_v52 = vld [vmem:[#allocation28_spill] sm:$0xff]  ;;  %v14215_v58 = vld [vmem:[#allocation31_spill] sm:$0xff] }
 0xe75   : > { %v6979_v14 = vmul.f32 %v9706_v11, %v13192_v60  ;;  %v6987_v37 = vmul.f32 %v9706_v11, %v13198_v5  ;;  %v6995_v43 = vmul.f32 %v9706_v11, %v13204_v44  ;;  %v7579_v22 = vmul.f32 %v14211_v38, %v6935_v12  ;;  %7883 = vst.msk [vmem:[%s13252_s22 + $0x18] sm:$0xff] %vm4893_vm3, %v6935_v12 }
 0xe76   : > { %v7587_v7 = vmul.f32 %v14212_v29, %v6947_v9  ;;  %v7595_v16 = vmul.f32 %v14213_v46, %v6955_v6  ;;  %v7603_v49 = vmul.f32 %v14214_v52, %v6963_v61  ;;  %7891 = vst.msk [vmem:[%s13252_s22 + $0x58] sm:$0xff] %vm4893_vm3, %v6947_v9  ;;  %7899 = vst.msk [vmem:[%s13252_s22 + $0x98] sm:$0xff] %vm4893_vm3, %v6955_v6  ;;  %9723 = vpow2.f32 %v13366_v10 }
 0xe77   : > { %7907 = vst.msk [vmem:[%s13252_s22 + $0xd8] sm:$0xff] %vm4893_vm3, %v6963_v61  ;;  %v7611_v60 = vmul.f32 %v14215_v58, %v6971_v50  ;;  %v7619_v5 = vmul.f32 %v13150_v55, %v6979_v14  ;;  %v7627_v44 = vmul.f32 %v13323_v62, %v6987_v37  ;;  %v7635_v31 = vmul.f32 %v7503_v1, %v6995_v43 }
 0xe78   : > { %7915 = vst.msk [vmem:[%s13252_s22 + $0x118] sm:$0xff] %vm4893_vm3, %v6971_v50  ;;  %7923 = vst.msk [vmem:[%s13252_s22 + $0x158] sm:$0xff] %vm4893_vm3, %v6979_v14  ;;  %v7685_v40 = vsel %vm4893_vm3, %v7579_v22, 0.0  ;;  %v7686_v19 = vsel %vm4893_vm3, %v7587_v7, 0.0  ;;  %v7688_v11 = vsel %vm4893_vm3, %v7595_v16, 0.0  ;;  %v7690_v21 = vsel %vm4893_vm3, %v7603_v49, 0.0 }
 0xe79   : > { %7931 = vst.msk [vmem:[%s13252_s22 + $0x198] sm:$0xff] %vm4893_vm3, %v6987_v37  ;;  %7939 = vst.msk [vmem:[%s13252_s22 + $0x1d8] sm:$0xff] %vm4893_vm3, %v6995_v43  ;;  %v7687_v62 = vadd.f32 %v7686_v19, %v7685_v40  ;;  %v7692_v12 = vsel %vm4893_vm3, %v7611_v60, 0.0  ;;  %v7694_v9 = vsel %vm4893_vm3, %v7619_v5, 0.0  ;;  %v7696_v6 = vsel %vm4893_vm3, %v7627_v44, 0.0  ;;  %v14216_v22 = vld [vmem:[#allocation52_spill] sm:$0xff] }
 0xe7a   : > { %v13450_v55 = vpop.eup %9707  ;;  %v7698_v50 = vsel %vm4893_vm3, %v7635_v31, 0.0  ;;  %v6912_v14 = vadd.f32 %v6911_v59, %v6910_v47  ;;  %v6663_v29 = vsub.f32 %v14216_v22, %v13373_v63  ;;  %v14217_v7 = vld [vmem:[#allocation55_spill] sm:$0xff]  ;;  %v6679_v10 = vsub.f32 %v13241_v45, %v13373_v63 }
 0xe7b   : > { %v13455_v61 = vpop.eup %9709  ;;  %v6868_v37 = vsel %vm4893_vm3, %v13450_v55, 0.0  ;;  %v7689_v1 = vadd.f32 %v7688_v11, %v7687_v62  ;;  %v6671_v46 = vsub.f32 %v14217_v7, %v13373_v63  ;;  %v6694_v59 = vmul.f32 1.442695, %v6623_v53 }
 0xe7c   : > { %v13461_v43 = vpop.eup %9711  ;;  %v6869_v38 = vsel %vm4893_vm3, %v13455_v61, 0.0  ;;  %9725 = vrcp.f32 %v6912_v14  ;;  %v6710_v60 = vmul.f32 1.442695, %v6631_v42  ;;  %v6726_v5 = vmul.f32 1.442695, %v6639_v3 }
 0xe7d   : > { %v13469_v16 = vpop.eup %9713  ;;  %v6870_v47 = vadd.f32 %v6869_v38, %v6868_v37  ;;  %v7691_v49 = vadd.f32 %v7690_v21, %v7689_v1  ;;  %9727 = vpow2.f32 %v6694_v59  ;;  %v6742_v19 = vmul.f32 1.442695, %v6647_v0  ;;  %v14220_v59 = vld [vmem:[#allocation42_spill] sm:$0xff] }
 0xe7e   : > { %v13473_v52 = vpop.eup %9715  ;;  %v6871_v58 = vsel %vm4893_vm3, %v13469_v16, 0.0  ;;  %9729 = vpow2.f32 %v6710_v60  ;;  %v6758_v42 = vmul.f32 1.442695, %v6655_v54  ;;  %v6774_v14 = vmul.f32 1.442695, %v6663_v29  ;;  %v14222_v60 = vld [vmem:[#allocation49_spill] sm:$0xff] }
 0xe7f   : > { %v13477_v44 = vpop.eup %9717  ;;  %v6872_v31 = vadd.f32 %v6871_v58, %v6870_v47  ;;  %v6873_v40 = vsel %vm4893_vm3, %v13473_v52, 0.0  ;;  %v7693_v45 = vadd.f32 %v7692_v12, %v7691_v49  ;;  %9731 = vpow2.f32 %v6726_v5  ;;  %v14219_v47 = vld [vmem:[#allocation39_spill] sm:$0xff]  ;;  %v14221_v58 = vld [vmem:[#allocation45_spill] sm:$0xff] }
 0xe80   : > { %v13481_v11 = vpop.eup %9719  ;;  %v6875_v53 = vsel %vm4893_vm3, %v13477_v44, 0.0  ;;  %9733 = vpow2.f32 %v6742_v19  ;;  %v6790_v37 = vmul.f32 1.442695, %v6671_v46  ;;  %v6806_v38 = vmul.f32 1.442695, %v6679_v10  ;;  %v14218_v46 = vld [vmem:[#allocation37_spill] sm:$0xff] }
 0xe81   : > { %v13488_v3 = vpop.eup %9721  ;;  %v6874_v21 = vadd.f32 %v6873_v40, %v6872_v31  ;;  %v6877_v62 = vsel %vm4893_vm3, %v13481_v11, 0.0  ;;  %v7695_v0 = vadd.f32 %v7694_v9, %v7693_v45  ;;  %9735 = vpow2.f32 %v6758_v42 }
 0xe82   : > { %v6879_v12 = vsel %vm4893_vm3, %v13488_v3, 0.0  ;;  %v6584_v63 = vsel %vm4893_vm3, %v13376_v28, -inf  ;;  %9737 = vpow2.f32 %v6774_v14  ;;  %v13499_v9 = vmul.f32 %v13461_v43, %v13210_v13 }
 0xe83   : > { %v6876_v1 = vadd.f32 %v6875_v53, %v6874_v21  ;;  %v7697_v56 = vadd.f32 %v7696_v6, %v7695_v0  ;;  %v6585_v54 = vmax.f32 %v13001_v57, %v6584_v63  ;;  %9739 = vpow2.f32 %v6790_v37 }
 0xe84   : > { %v13503_v29 = vmul.f32 %v13461_v43, %v13216_v25  ;;  %v13507_v7 = vmul.f32 %v13461_v43, %v13220_v30  ;;  %9741 = vpow2.f32 %v6806_v38  ;;  %7881 = vst.msk [vmem:[%s13252_s22 + $0x8] sm:$0xff] %vm4893_vm3, %v13499_v9  ;;  %v13525_v30 = vpop.eup %9723  ;;  %v6961_v63 = vmul.f32 %v13461_v43, %v13226_v8 }
 0xe85   : > { %v6878_v22 = vadd.f32 %v6877_v62, %v6876_v1  ;;  %v13509_v6 = vadd.f32 %v7698_v50, %v7697_v56  ;;  %v6621_v57 = vsub.f32 %v14218_v46, %v6585_v54  ;;  %v6629_v10 = vsub.f32 %v14219_v47, %v6585_v54  ;;  %v14223_v50 = vld [vmem:[#allocation53_spill] sm:$0xff] }
 0xe86   : > { %v6637_v49 = vsub.f32 %v14220_v59, %v6585_v54  ;;  %v6645_v25 = vsub.f32 %v14221_v58, %v6585_v54  ;;  %v6653_v5 = vsub.f32 %v14222_v60, %v6585_v54  ;;  %7889 = vst.msk [vmem:[%s13252_s22 + $0x48] sm:$0xff] %vm4893_vm3, %v13503_v29  ;;  %7897 = vst.msk [vmem:[%s13252_s22 + $0x88] sm:$0xff] %vm4893_vm3, %v13507_v7  ;;  %v6881_v53 = vsel %vm4893_vm3, %v13525_v30, 0.0  ;;  %v14225_v60 = vld [vmem:[#allocation2_spill] sm:$0xff] }
 0xe87   : > { %v6880_v13 = vadd.f32 %v6879_v12, %v6878_v22  ;;  %v6661_v31 = vsub.f32 %v14223_v50, %v6585_v54  ;;  %v6669_v40 = vsub.f32 %v12961_v34, %v6585_v54  ;;  %v6677_v19 = vsub.f32 %v13376_v28, %v6585_v54  ;;  %7905 = vst.msk [vmem:[%s13252_s22 + $0xc8] sm:$0xff] %vm4893_vm3, %v6961_v63 }
 0xe88   : > { %v6690_v45 = vmul.f32 1.442695, %v6621_v57  ;;  %v6706_v42 = vmul.f32 1.442695, %v6629_v10  ;;  %v6722_v21 = vmul.f32 1.442695, %v6637_v49  ;;  %v13534_v62 = vmul.f32 %v13314_v41, %v13130_v26 }
 0xe89   : > { %v13536_v14 = vpop.eup %9725  ;;  %v6882_v0 = vadd.f32 %v6881_v53, %v6880_v13  ;;  %v6738_v12 = vmul.f32 1.442695, %v6645_v25  ;;  %v6754_v34 = vmul.f32 1.442695, %v6653_v5  ;;  %v6770_v37 = vmul.f32 1.442695, %v6661_v31 }
 0xe8a   : > { %9743 = vpow2.f32 %v6690_v45  ;;  %v13540_v28 = vmul.f32 %v13536_v14, %v13390_v36  ;;  %v6786_v1 = vmul.f32 1.442695, %v6669_v40  ;;  %7904 = vst.msk [vmem:[%s13252_s22 + $0xc0] sm:$0xff] %vm4893_vm3, %v13534_v62  ;;  %v13545_v38 = vpop.eup %9727  ;;  %v6802_v26 = vmul.f32 1.442695, %v6677_v19  ;;  %v14226_v19 = vld [vmem:[#allocation22_spill] sm:$0xff] }
 0xe8b   : > { %9745 = vpow2.f32 %v6706_v42  ;;  %v6968_v56 = vmul.f32 %v13314_v41, %v13136_v39  ;;  %v13551_v36 = vpop.eup %9729  ;;  %v6913_v54 = vsel %vm4893_vm3, %v13545_v38, 0.0  ;;  %v6969_v22 = vmul.f32 %v13461_v43, %v13233_v2  ;;  %v14227_v53 = vld [vmem:[#allocation6_spill] sm:$0xff] }
 0xe8c   : > { %9747 = vrcp.f32 %v6882_v0  ;;  %7942 = vst.msk [vmem:[%s13252_s22 + $0x1f0] sm:$0xff] %vm4893_vm3, %v13540_v28  ;;  %v6976_v8 = vmul.f32 %v13314_v41, %v13140_v18  ;;  %v13562_v46 = vpop.eup %9731  ;;  %v6914_v39 = vsel %vm4893_vm3, %v13551_v36, 0.0  ;;  %v6977_v57 = vmul.f32 %v13461_v43, %v13243_v27  ;;  %v14229_v0 = vld [vmem:[#allocation15_spill] sm:$0xff] }
 0xe8d   : > { %9749 = vpow2.f32 %v6722_v21  ;;  %v6984_v47 = vmul.f32 %v13314_v41, %v13144_v24  ;;  %7912 = vst.msk [vmem:[%s13252_s22 + $0x100] sm:$0xff] %vm4893_vm3, %v6968_v56  ;;  %v13574_v2 = vpop.eup %9733  ;;  %v6915_v18 = vadd.f32 %v6914_v39, %v6913_v54  ;;  %v6985_v10 = vmul.f32 %v13461_v43, %v13262_v23  ;;  %7913 = vst.msk [vmem:[%s13252_s22 + $0x108] sm:$0xff] %vm4893_vm3, %v6969_v22  ;;  %v14232_v39 = vld [vmem:[#allocation32_spill] sm:$0xff] }
 0xe8e   : > { %9751 = vpow2.f32 %v6738_v12  ;;  %7920 = vst.msk [vmem:[%s13252_s22 + $0x140] sm:$0xff] %vm4893_vm3, %v6976_v8  ;;  %v13582_v27 = vpop.eup %9735  ;;  %v6916_v24 = vsel %vm4893_vm3, %v13562_v46, 0.0  ;;  %v6992_v13 = vmul.f32 %v13314_v41, %v13148_v20  ;;  %v6993_v59 = vmul.f32 %v13461_v43, %v13268_v17  ;;  %7921 = vst.msk [vmem:[%s13252_s22 + $0x148] sm:$0xff] %vm4893_vm3, %v6977_v57  ;;  %v14224_v41 = vld [vmem:[#allocation5_spill] sm:$0xff] }
 0xe8f   : > { %9753 = vpow2.f32 %v6754_v34  ;;  %7928 = vst.msk [vmem:[%s13252_s22 + $0x180] sm:$0xff] %vm4893_vm3, %v6984_v47  ;;  %v13594_v23 = vpop.eup %9737  ;;  %v6917_v49 = vadd.f32 %v6916_v24, %v6915_v18  ;;  %v6918_v58 = vsel %vm4893_vm3, %v13574_v2, 0.0  ;;  %v6920_v25 = vsel %vm4893_vm3, %v13582_v27, 0.0  ;;  %7929 = vst.msk [vmem:[%s13252_s22 + $0x188] sm:$0xff] %vm4893_vm3, %v6985_v10  ;;  %v14230_v34 = vld [vmem:[#allocation27_spill] sm:$0xff]  ;;  %v14233_v18 = vld [vmem:[#allocation33_spill] sm:$0xff] }
 0xe90   : > { %9755 = vpow2.f32 %v6770_v37  ;;  %v13602_v20 = vpop.eup %9739  ;;  %v6922_v17 = vsel %vm4893_vm3, %v13594_v23, 0.0  ;;  %v7576_v43 = vmul.f32 %v14224_v41, %v13380_v35  ;;  %v7577_v5 = vmul.f32 %v14225_v60, %v13499_v9  ;;  %7936 = vst.msk [vmem:[%s13252_s22 + $0x1c0] sm:$0xff] %vm4893_vm3, %v6992_v13  ;;  %7937 = vst.msk [vmem:[%s13252_s22 + $0x1c8] sm:$0xff] %vm4893_vm3, %v6993_v59  ;;  %v14228_v9 = vld [vmem:[#allocation12_spill] sm:$0xff]  ;;  %v14235_v41 = vld [vmem:[#allocation46_spill] sm:$0xff] }
 0xe91   : > { %9757 = vpow2.f32 %v6786_v1  ;;  %v13614_v50 = vpop.eup %9741  ;;  %v6919_v31 = vadd.f32 %v6918_v58, %v6917_v49  ;;  %v6924_v40 = vsel %vm4893_vm3, %v13602_v20, 0.0  ;;  %v7584_v45 = vmul.f32 %v14226_v19, %v13384_v48  ;;  %v14234_v49 = vld [vmem:[#allocation65_spill] sm:$0xff]  ;;  %v14236_v19 = vld [vmem:[#allocation50_spill] sm:$0xff] }
 0xe92   : > { %9759 = vpow2.f32 %v6802_v26  ;;  %v7585_v42 = vmul.f32 %v14227_v53, %v13503_v29  ;;  %v6926_v35 = vsel %vm4893_vm3, %v13614_v50, 0.0  ;;  %v7592_v21 = vmul.f32 %v14228_v9, %v13388_v32  ;;  %v14231_v26 = vld [vmem:[#allocation30_spill] sm:$0xff]  ;;  %v7497_v29 = vpop.permute.xlu0 %7496  ;;  %v7499_v9 = vpop.permute.xlu1 %7498 }
 0xe93   : > { %v7593_v12 = vmul.f32 %v14229_v0, %v13507_v7  ;;  %v7600_v37 = vmul.f32 %v14230_v34, %v13534_v62  ;;  %v6921_v1 = vadd.f32 %v6920_v25, %v6919_v31  ;;  %v7601_v54 = vmul.f32 %v14231_v26, %v6961_v63 }
 0xe94   : > { %v7608_v48 = vmul.f32 %v14232_v39, %v6968_v56  ;;  %v7609_v24 = vmul.f32 %v14233_v18, %v6969_v22  ;;  %v7616_v58 = vmul.f32 %v14234_v49, %v6976_v8  ;;  %v7617_v60 = vmul.f32 %v14235_v41, %v6977_v57 }
 0xe95   : > { %v7624_v32 = vmul.f32 %v14236_v19, %v6984_v47  ;;  %v7625_v53 = vmul.f32 %v13364_v4, %v6985_v10  ;;  %v6923_v62 = vadd.f32 %v6922_v17, %v6921_v1  ;;  %v7632_v25 = vmul.f32 %v7497_v29, %v6992_v13 }
 0xe96   : > { %v7640_v63 = vsel %vm4893_vm3, %v7576_v43, 0.0  ;;  %v7641_v56 = vsel %vm4893_vm3, %v7584_v45, 0.0  ;;  %v13645_v8 = vmul.f32 %v7499_v9, %v6993_v59  ;;  %v7643_v47 = vsel %vm4893_vm3, %v7592_v21, 0.0 }
 0xe97   : > { %v13637_v7 = vpop.eup %9743  ;;  %v7642_v57 = vadd.f32 %v7641_v56, %v7640_v63  ;;  %v6925_v10 = vadd.f32 %v6924_v40, %v6923_v62  ;;  %v7645_v13 = vsel %vm4893_vm3, %v7600_v37, 0.0  ;;  %v7647_v43 = vsel %vm4893_vm3, %v7608_v48, 0.0 }
 0xe98   : > { %v13641_v31 = vpop.eup %9745  ;;  %v6883_v22 = vsel %vm4893_vm3, %v13637_v7, 0.0  ;;  %v7649_v1 = vsel %vm4893_vm3, %v7616_v58, 0.0  ;;  %v7651_v59 = vsel %vm4893_vm3, %v7624_v32, 0.0  ;;  %v7655_v39 = vsel %vm4893_vm3, %v7577_v5, 0.0 }
 0xe99   : > { %v9748_v4 = vpop.eup %9747  ;;  %v6884_v17 = vsel %vm4893_vm3, %v13641_v31, 0.0  ;;  %v7644_v34 = vadd.f32 %v7643_v47, %v7642_v57  ;;  %v6927_v21 = vadd.f32 %v6926_v35, %v6925_v10  ;;  %v7656_v37 = vsel %vm4893_vm3, %v7585_v42, 0.0 }
 0xe9a   : > { %v13652_v45 = vpop.eup %9749  ;;  %v6885_v0 = vadd.f32 %v6884_v17, %v6883_v22  ;;  %v7653_v49 = vsel %vm4893_vm3, %v7632_v25, 0.0  ;;  %v7657_v41 = vadd.f32 %v7656_v37, %v7655_v39  ;;  %v7658_v5 = vsel %vm4893_vm3, %v7593_v12, 0.0 }
 0xe9b   : > { %v13656_v26 = vpop.eup %9751  ;;  %v6886_v40 = vsel %vm4893_vm3, %v13652_v45, 0.0  ;;  %v7646_v29 = vadd.f32 %v7645_v13, %v7644_v34  ;;  %9761 = vrcp.f32 %v6927_v21  ;;  %v7660_v63 = vsel %vm4893_vm3, %v7601_v54, 0.0 }
 0xe9c   : > { %v13662_v18 = vpop.eup %9753  ;;  %v6887_v48 = vadd.f32 %v6886_v40, %v6885_v0  ;;  %v6888_v35 = vsel %vm4893_vm3, %v13656_v26, 0.0  ;;  %v7659_v62 = vadd.f32 %v7658_v5, %v7657_v41  ;;  %v7662_v57 = vsel %vm4893_vm3, %v7609_v24, 0.0 }
 0xe9d   : > { %v13665_v58 = vpop.eup %9755  ;;  %v6890_v19 = vsel %vm4893_vm3, %v13662_v18, 0.0  ;;  %v7648_v9 = vadd.f32 %v7647_v43, %v7646_v29  ;;  %v7664_v47 = vsel %vm4893_vm3, %v7617_v60, 0.0  ;;  %v7666_v13 = vsel %vm4893_vm3, %v7625_v53, 0.0  ;;  %v14240_v29 = vld [vmem:[#allocation58_spill] sm:$0xff] }
 0xe9e   : > { %v13672_v32 = vpop.eup %9757  ;;  %v6889_v42 = vadd.f32 %v6888_v35, %v6887_v48  ;;  %v6892_v56 = vsel %vm4893_vm3, %v13665_v58, 0.0  ;;  %v7661_v17 = vadd.f32 %v7660_v63, %v7659_v62  ;;  %v7761_v43 = vpack.c.bf16 %v13509_v6, %v13368_v33  ;;  %v14242_v63 = vld [vmem:[#allocation69_spill] sm:$0xff] }
 0xe9f   : > { %v13675_v25 = vpop.eup %9759  ;;  %v6894_v22 = vsel %vm4893_vm3, %v13672_v32, 0.0  ;;  %v7650_v10 = vadd.f32 %v7649_v1, %v7648_v9  ;;  %v6937_v0 = vmul.f32 %v9748_v4, %v13450_v55  ;;  %v6948_v24 = vmul.f32 %v9748_v4, %v13455_v61 }
 0xea0   : > { %v6891_v12 = vadd.f32 %v6890_v19, %v6889_v42  ;;  %v6896_v54 = vsel %vm4893_vm3, %v13675_v25, 0.0  ;;  %v7663_v21 = vadd.f32 %v7662_v57, %v7661_v17  ;;  %v6956_v1 = vmul.f32 %v9748_v4, %v13469_v16  ;;  %v13721_v42 = vpop.permute.xlu0 %7492 }
 0xea1   : > { %v7652_v60 = vadd.f32 %v7651_v59, %v7650_v10  ;;  %v6964_v40 = vmul.f32 %v9748_v4, %v13473_v52  ;;  %v6972_v53 = vmul.f32 %v9748_v4, %v13477_v44  ;;  %v6980_v39 = vmul.f32 %v9748_v4, %v13481_v11  ;;  %7884 = vst.msk [vmem:[%s13252_s22 + $0x20] sm:$0xff] %vm4893_vm3, %v6937_v0  ;;  %v14237_v52 = vld [vmem:[#allocation19_spill] sm:$0xff]  ;;  %v14238_v59 = vld [vmem:[#allocation10_spill] sm:$0xff]  ;;  %v14239_v11 = vld [vmem:[#allocation16_spill] sm:$0xff] }
 0xea2   : > { %v6893_v34 = vadd.f32 %v6892_v56, %v6891_v12  ;;  %v6988_v33 = vmul.f32 %v9748_v4, %v13488_v3  ;;  %7892 = vst.msk [vmem:[%s13252_s22 + $0x60] sm:$0xff] %vm4893_vm3, %v6948_v24  ;;  %v7665_v16 = vadd.f32 %v7664_v47, %v7663_v21  ;;  %v6996_v6 = vmul.f32 %v9748_v4, %v13525_v30  ;;  %v14241_v4 = vld [vmem:[#allocation61_spill] sm:$0xff] }
 0xea3   : > { %v7654_v61 = vadd.f32 %v7653_v49, %v7652_v60  ;;  %7900 = vst.msk [vmem:[%s13252_s22 + $0xa0] sm:$0xff] %vm4893_vm3, %v6956_v1  ;;  %v7580_v44 = vmul.f32 %v14237_v52, %v6937_v0  ;;  %v7588_v37 = vmul.f32 %v14238_v59, %v6948_v24  ;;  %v7596_v48 = vmul.f32 %v14239_v11, %v6956_v1  ;;  %v14245_v60 = vld [vmem:[#allocation4_spill] sm:$0xff] }
 0xea4   : > { %v6895_v55 = vadd.f32 %v6894_v22, %v6893_v34  ;;  %v7604_v3 = vmul.f32 %v14240_v29, %v6964_v40  ;;  %7908 = vst.msk [vmem:[%s13252_s22 + $0xe0] sm:$0xff] %vm4893_vm3, %v6964_v40  ;;  %7916 = vst.msk [vmem:[%s13252_s22 + $0x120] sm:$0xff] %vm4893_vm3, %v6972_v53  ;;  %v7667_v30 = vadd.f32 %v7666_v13, %v7665_v16  ;;  %v7668_v35 = vsel %vm4893_vm3, %v13645_v8, 0.0  ;;  %v14243_v22 = vld [vmem:[#allocation56_spill] sm:$0xff]  ;;  %v14249_v16 = vld [vmem:[#allocation29_spill] sm:$0xff] }
 0xea5   : > { %7924 = vst.msk [vmem:[%s13252_s22 + $0x160] sm:$0xff] %vm4893_vm3, %v6980_v39  ;;  %7932 = vst.msk [vmem:[%s13252_s22 + $0x1a0] sm:$0xff] %vm4893_vm3, %v6988_v33  ;;  %v7612_v41 = vmul.f32 %v14241_v4, %v6972_v53  ;;  %v7700_v19 = vsel %vm4893_vm3, %v7580_v44, 0.0  ;;  %v7701_v5 = vsel %vm4893_vm3, %v7588_v37, 0.0  ;;  %v7620_v56 = vmul.f32 %v14242_v63, %v6980_v39  ;;  %v14246_v53 = vld [vmem:[#allocation23_spill] sm:$0xff]  ;;  %v14251_v29 = vld [vmem:[#allocation26_spill] sm:$0xff] }
 0xea6   : > { %v6897_v49 = vadd.f32 %v6896_v54, %v6895_v55  ;;  %7940 = vst.msk [vmem:[%s13252_s22 + $0x1e0] sm:$0xff] %vm4893_vm3, %v6996_v6  ;;  %v7669_v9 = vadd.f32 %v7668_v35, %v7667_v30  ;;  %v7702_v62 = vadd.f32 %v7701_v5, %v7700_v19  ;;  %v7628_v57 = vmul.f32 %v14243_v22, %v6988_v33  ;;  %v14244_v54 = vld [vmem:[#allocation36_spill] sm:$0xff]  ;;  %v14252_v19 = vld [vmem:[#allocation18_spill] sm:$0xff]  ;;  %v14254_v63 = vld [vmem:[#allocation13_spill] sm:$0xff] }
 0xea7   : > { %v7703_v47 = vsel %vm4893_vm3, %v7596_v48, 0.0  ;;  %v7705_v12 = vsel %vm4893_vm3, %v7604_v3, 0.0  ;;  %v7707_v13 = vsel %vm4893_vm3, %v7612_v41, 0.0  ;;  %v6941_v0 = vmul.f32 %v13536_v14, %v14244_v54 }
 0xea8   : > { %9763 = vrcp.f32 %v6897_v49  ;;  %v9762_v8 = vpop.eup %9761  ;;  %v7760_v10 = vpack.c.bf16 %v7669_v9, %v7654_v61  ;;  %v7704_v17 = vadd.f32 %v7703_v47, %v7702_v62  ;;  %v6950_v21 = vmul.f32 %v13536_v14, %v14245_v60  ;;  %v14253_v9 = vld [vmem:[#allocation9_spill] sm:$0xff] }
 0xea9   : > { %v13731_v24 = vmul.f32 %v9762_v8, %v13614_v50  ;;  %v6943_v34 = vmul.f32 %v9762_v8, %v13545_v38  ;;  %v6951_v1 = vmul.f32 %v9762_v8, %v13551_v36  ;;  %v6958_v39 = vmul.f32 %v13536_v14, %v14246_v53  ;;  %v14247_v50 = vld [vmem:[#allocation8_spill] sm:$0xff]  ;;  %7886 = vst.msk [vmem:[%s13252_s22 + $0x30] sm:$0xff] %vm4893_vm3, %v6941_v0  ;;  %v14262_v53 = vld [vmem:[#allocation62_spill] sm:$0xff] }
 0xeaa   : > { %9573 = vmatprep.mubr.msk.bf16.mxu1 %vm4893_vm3, %v7760_v10  ;;  %v7706_v40 = vadd.f32 %v7705_v12, %v7704_v17  ;;  %v6959_v33 = vmul.f32 %v9762_v8, %v13562_v46  ;;  %v13743_v55 = vmul.f32 %v13536_v14, %v14247_v50  ;;  %v6967_v38 = vmul.f32 %v9762_v8, %v13574_v2  ;;  %v14248_v36 = vld [vmem:[#allocation20_spill] sm:$0xff]  ;;  %v7505_v2 = vpop.permute.xlu0 %7504  ;;  %v14263_v50 = vld [vmem:[#allocation63_spill] sm:$0xff] }
 0xeab   : > { %7943 = vst.msk [vmem:[%s13252_s22 + $0x1f8] sm:$0xff] %vm4893_vm3, %v13731_v24  ;;  %9574 = vmatmul.mubr.msk.bf16.vlgmr.msra.gmra.mxu1 %vm4893_vm3, %v7761_v43  ;;  %v6974_v61 = vmul.f32 %v13536_v14, %v14248_v36  ;;  %v13755_v46 = vmul.f32 %v9762_v8, %v13582_v27  ;;  %v13759_v52 = vmul.f32 %v13536_v14, %v14249_v16  ;;  %7887 = vst.msk [vmem:[%s13252_s22 + $0x38] sm:$0xff] %vm4893_vm3, %v6943_v34 }
 0xeac   : > { %7894 = vst.msk [vmem:[%s13252_s22 + $0x70] sm:$0xff] %vm4893_vm3, %v6950_v21  ;;  %7895 = vst.msk [vmem:[%s13252_s22 + $0x78] sm:$0xff] %vm4893_vm3, %v6951_v1  ;;  %v7708_v43 = vadd.f32 %v7707_v13, %v7706_v40  ;;  %v6983_v27 = vmul.f32 %v9762_v8, %v13594_v23  ;;  %v13770_v44 = vmul.f32 %v13536_v14, %v13350_v51  ;;  %v7709_v11 = vsel %vm4893_vm3, %v7620_v56, 0.0  ;;  %v14250_v23 = vld [vmem:[#allocation7_spill] sm:$0xff] }
 0xead   : > { %v13773_v59 = vmul.f32 %v9762_v8, %v13602_v20  ;;  %7902 = vst.msk [vmem:[%s13252_s22 + $0xb0] sm:$0xff] %vm4893_vm3, %v6958_v39  ;;  %7903 = vst.msk [vmem:[%s13252_s22 + $0xb8] sm:$0xff] %vm4893_vm3, %v6959_v33  ;;  %v7636_v37 = vmul.f32 %v7505_v2, %v6996_v6  ;;  %v7582_v48 = vmul.f32 %v14250_v23, %v6941_v0  ;;  %v7711_v14 = vsel %vm4893_vm3, %v7628_v57, 0.0  ;;  %v7495_v8 = vpop.permute.xlu1 %7494  ;;  %v14264_v2 = vld [vmem:[#allocation68_spill] sm:$0xff] }
 0xeae   : > { %7910 = vst.msk [vmem:[%s13252_s22 + $0xf0] sm:$0xff] %vm4893_vm3, %v13743_v55  ;;  %v7590_v3 = vmul.f32 %v14251_v29, %v6950_v21  ;;  %7911 = vst.msk [vmem:[%s13252_s22 + $0xf8] sm:$0xff] %vm4893_vm3, %v6967_v38  ;;  %v7710_v51 = vadd.f32 %v7709_v11, %v7708_v43  ;;  %v7583_v5 = vmul.f32 %v14252_v19, %v6943_v34  ;;  %v14265_v11 = vld [vmem:[#allocation67_spill] sm:$0xff] }
 0xeaf   : > { %7918 = vst.msk [vmem:[%s13252_s22 + $0x130] sm:$0xff] %vm4893_vm3, %v6974_v61  ;;  %7919 = vst.msk [vmem:[%s13252_s22 + $0x138] sm:$0xff] %vm4893_vm3, %v13755_v46  ;;  %v7713_v6 = vsel %vm4893_vm3, %v7636_v37, 0.0  ;;  %v7730_v49 = vsel %vm4893_vm3, %v7582_v48, 0.0  ;;  %v7591_v62 = vmul.f32 %v14253_v9, %v6951_v1  ;;  %v7598_v56 = vmul.f32 %v14254_v63, %v6958_v39  ;;  %v14261_v1 = vld [vmem:[#allocation64_spill] sm:$0xff]  ;;  %v14266_v48 = vld [vmem:[#allocation59_spill] sm:$0xff]  ;;  %v7509_v63 = vpop.permute.xlu0 %7508 }
 0xeb0   : > { %7926 = vst.msk [vmem:[%s13252_s22 + $0x170] sm:$0xff] %vm4893_vm3, %v13759_v52  ;;  %7927 = vst.msk [vmem:[%s13252_s22 + $0x178] sm:$0xff] %vm4893_vm3, %v6983_v27  ;;  %v7712_v20 = vadd.f32 %v7711_v14, %v7710_v51  ;;  %v7731_v30 = vsel %vm4893_vm3, %v7590_v3, 0.0  ;;  %v7607_v40 = vmul.f32 %v14261_v1, %v6967_v38  ;;  %v7614_v39 = vmul.f32 %v14262_v53, %v6974_v61 }
 0xeb1   : > { %7934 = vst.msk [vmem:[%s13252_s22 + $0x1b0] sm:$0xff] %vm4893_vm3, %v13770_v44  ;;  %7935 = vst.msk [vmem:[%s13252_s22 + $0x1b8] sm:$0xff] %vm4893_vm3, %v13773_v59  ;;  %v7732_v41 = vadd.f32 %v7731_v30, %v7730_v49  ;;  %v7615_v43 = vmul.f32 %v14264_v2, %v13755_v46  ;;  %v7622_v23 = vmul.f32 %v14265_v11, %v13759_v52  ;;  %v7745_v3 = vsel %vm4893_vm3, %v7583_v5, 0.0  ;;  %v7507_v14 = vpop.permute.xlu1 %7506  ;;  %v14267_v52 = vld [vmem:[#allocation34_spill] sm:$0xff] }
 0xeb2   : > { %v13807_v4 = vadd.f32 %v7713_v6, %v7712_v20  ;;  %v7623_v29 = vmul.f32 %v14266_v48, %v6983_v27  ;;  %v7746_v51 = vsel %vm4893_vm3, %v7591_v62, 0.0  ;;  %v7630_v46 = vmul.f32 %v13721_v42, %v13770_v44  ;;  %v9791_v11 = vld [vmem:[%s9974_s3] sm:$0xff] }
 0xeb3   : > { %v7747_v49 = vadd.f32 %v7746_v51, %v7745_v3  ;;  %v7631_v5 = vmul.f32 %v7495_v8, %v13773_v59  ;;  %v7737_v9 = vsel %vm4893_vm3, %v7614_v39, 0.0  ;;  %v9793_v3 = vld [vmem:[%s9974_s3 + $0x8] sm:$0xff] }
 0xeb5   : > { %v9764_v35 = vpop.eup %9763 }
 0xeb6   : > { %v6939_v22 = vmul.f32 %v9764_v35, %v13637_v7  ;;  %v6949_v57 = vmul.f32 %v9764_v35, %v13641_v31  ;;  %v6957_v47 = vmul.f32 %v9764_v35, %v13652_v45  ;;  %v6965_v12 = vmul.f32 %v9764_v35, %v13656_v26  ;;  %v14255_v7 = vld [vmem:[#allocation24_spill] sm:$0xff]  ;;  %v14256_v31 = vld [vmem:[#allocation11_spill] sm:$0xff]  ;;  %v14257_v45 = vld [vmem:[#allocation21_spill] sm:$0xff] }
 0xeb7   : > { %v6973_v10 = vmul.f32 %v9764_v35, %v13662_v18  ;;  %v6981_v17 = vmul.f32 %v9764_v35, %v13665_v58  ;;  %v6989_v13 = vmul.f32 %v9764_v35, %v13672_v32  ;;  %v6997_v54 = vmul.f32 %v9764_v35, %v13675_v25  ;;  %v14258_v26 = vld [vmem:[#allocation17_spill] sm:$0xff]  ;;  %v14259_v58 = vld [vmem:[#allocation66_spill] sm:$0xff]  ;;  %v14260_v25 = vld [vmem:[#allocation60_spill] sm:$0xff] }
 0xeb8   : > { %v7581_v0 = vmul.f32 %v14255_v7, %v6939_v22  ;;  %v7589_v34 = vmul.f32 %v14256_v31, %v6949_v57  ;;  %v7597_v60 = vmul.f32 %v14257_v45, %v6957_v47  ;;  %7885 = vst.msk [vmem:[%s13252_s22 + $0x28] sm:$0xff] %vm4893_vm3, %v6939_v22  ;;  %7893 = vst.msk [vmem:[%s13252_s22 + $0x68] sm:$0xff] %vm4893_vm3, %v6949_v57  ;;  %v7750_v22 = vsel %vm4893_vm3, %v7607_v40, 0.0 }
 0xeb9   : > { %7901 = vst.msk [vmem:[%s13252_s22 + $0xa8] sm:$0xff] %vm4893_vm3, %v6957_v47  ;;  %7909 = vst.msk [vmem:[%s13252_s22 + $0xe8] sm:$0xff] %vm4893_vm3, %v6965_v12  ;;  %v7599_v18 = vmul.f32 %v14258_v26, %v6959_v33  ;;  %v7613_v32 = vmul.f32 %v14259_v58, %v6973_v10  ;;  %v7606_v21 = vmul.f32 %v14260_v25, %v13743_v55  ;;  %v7733_v55 = vsel %vm4893_vm3, %v7598_v56, 0.0 }
 0xeba   : > { %7917 = vst.msk [vmem:[%s13252_s22 + $0x128] sm:$0xff] %vm4893_vm3, %v6973_v10  ;;  %7925 = vst.msk [vmem:[%s13252_s22 + $0x168] sm:$0xff] %vm4893_vm3, %v6981_v17  ;;  %v7605_v36 = vmul.f32 %v14263_v50, %v6965_v12  ;;  %v7715_v33 = vsel %vm4893_vm3, %v7581_v0, 0.0  ;;  %v7716_v16 = vsel %vm4893_vm3, %v7589_v34, 0.0  ;;  %v7718_v38 = vsel %vm4893_vm3, %v7597_v60, 0.0  ;;  %v7511_v0 = vpop.permute.xlu1 %7510 }
 0xebb   : > { %7933 = vst.msk [vmem:[%s13252_s22 + $0x1a8] sm:$0xff] %vm4893_vm3, %v6989_v13  ;;  %7941 = vst.msk [vmem:[%s13252_s22 + $0x1e8] sm:$0xff] %vm4893_vm3, %v6997_v54  ;;  %v7717_v37 = vadd.f32 %v7716_v16, %v7715_v33  ;;  %v7734_v61 = vadd.f32 %v7733_v55, %v7732_v41  ;;  %v7735_v6 = vsel %vm4893_vm3, %v7606_v21, 0.0  ;;  %v7621_v30 = vmul.f32 %v14267_v52, %v6981_v17  ;;  %v8479_v50 = vld [vmem:[%s13942_s17] ss:$0 sm:$0xff]  ;;  %v9790_v16 = vld [vmem:[%s9974_s3 + $0x10] sm:$0xff] }
 0xebc   : > { %v7720_v27 = vsel %vm4893_vm3, %v7605_v36, 0.0  ;;  %v7748_v19 = vsel %vm4893_vm3, %v7599_v18, 0.0  ;;  %v7629_v56 = vmul.f32 %v13392_v15, %v6989_v13  ;;  %v7722_v42 = vsel %vm4893_vm3, %v7613_v32, 0.0  ;;  %v9792_v55 = vld [vmem:[%s9974_s3 + $0x18] sm:$0xff] }
 0xebd   : > { %v7719_v20 = vadd.f32 %v7718_v38, %v7717_v37  ;;  %v7736_v35 = vadd.f32 %v7735_v6, %v7734_v61  ;;  %v7749_v62 = vadd.f32 %v7748_v19, %v7747_v49  ;;  %v7638_v47 = vmul.f32 %v7509_v63, %v13540_v28  ;;  %v9794_v6 = vld [vmem:[%s9974_s3 + $0x30] sm:$0xff]  ;;  %v9797_v63 = vld [vmem:[%s9974_s3 + $0x28] sm:$0xff] }
 0xebe   : > { %v7739_v12 = vsel %vm4893_vm3, %v7622_v23, 0.0  ;;  %v7637_v17 = vmul.f32 %v7507_v14, %v6997_v54  ;;  %v7724_v59 = vsel %vm4893_vm3, %v7621_v30, 0.0  ;;  %v7752_v7 = vsel %vm4893_vm3, %v7615_v43, 0.0 }
 0xebf   : > { %v7721_v41 = vadd.f32 %v7720_v27, %v7719_v20  ;;  %v7738_v44 = vadd.f32 %v7737_v9, %v7736_v35  ;;  %v7751_v10 = vadd.f32 %v7750_v22, %v7749_v62  ;;  %v7741_v15 = vsel %vm4893_vm3, %v7630_v46, 0.0  ;;  %v9795_v27 = vld [vmem:[%s9974_s3 + $0x20] sm:$0xff] }
 0xec0   : > { %v7726_v34 = vsel %vm4893_vm3, %v7629_v56, 0.0  ;;  %v7639_v45 = vmul.f32 %v7511_v0, %v13731_v24  ;;  %v7754_v28 = vsel %vm4893_vm3, %v7623_v29, 0.0  ;;  %v7743_v54 = vsel %vm4893_vm3, %v7638_v47, 0.0 }
 0xec1   : > { %v7723_v57 = vadd.f32 %v7722_v42, %v7721_v41  ;;  %v7740_v8 = vadd.f32 %v7739_v12, %v7738_v44  ;;  %v7753_v13 = vadd.f32 %v7752_v7, %v7751_v10  ;;  %v7728_v58 = vsel %vm4893_vm3, %v7637_v17, 0.0 }
 0xec2   : > { %v7756_v25 = vsel %vm4893_vm3, %v7631_v5, 0.0  ;;  %v7758_v40 = vsel %vm4893_vm3, %v7639_v45, 0.0  ;;  %v9796_v5 = vld [vmem:[%s9974_s3 + $0x38] sm:$0xff] }
 0xec3   : > { %v7725_v31 = vadd.f32 %v7724_v59, %v7723_v57  ;;  %v7742_v60 = vadd.f32 %v7741_v15, %v7740_v8  ;;  %v7755_v18 = vadd.f32 %v7754_v28, %v7753_v13 }
 0xec5   : > { %v7727_v26 = vadd.f32 %v7726_v34, %v7725_v31  ;;  %v7744_v32 = vadd.f32 %v7743_v54, %v7742_v60  ;;  %v7757_v1 = vadd.f32 %v7756_v25, %v7755_v18 }
 0xec7   : > { %v7729_v21 = vadd.f32 %v7728_v58, %v7727_v26  ;;  %v7759_v53 = vadd.f32 %v7758_v40, %v7757_v1 }
 0xec9   : > { %v7762_v24 = vpack.c.bf16 %v7729_v21, %v13807_v4  ;;  %v7763_v39 = vpack.c.bf16 %v7759_v53, %v7744_v32 }
 0xecb   : > { %9577 = vmatprep.mubr.msk.bf16.mxu1 %vm4893_vm3, %v7762_v24 }
 0xecc   : > { %9578 = vmatmul.mubr.msk.bf16.gmra.mxu1 %vm4893_vm3, %v7763_v39 }
 0xf6b   : > { %v9575_v36 = vpop.f32.mrf.mxu1 }
 0xf6c   : > { %v7842_v33 = vadd.f32 %v9575_v36, %v8479_v50 }
 0xf6d   : > { %v7833_v4 = vpop.f32.mrf.mxu1 }
 0xf6e   : > { %v7866_v2 = vadd.f32 %v9790_v16, %v7842_v33  ;;  %v7834_v43 = vadd.f32 %v8479_v50, %v7833_v4 }
 0xf6f   : > { %v9576_v37 = vpop.f32.mrf.mxu1 }
 0xf70   : > { %7874 = vst.msk [vmem:[%s13890_s26 + $0x10] sm:$0xff] %vm794_vm1, %v7866_v2  ;;  %v7864_v23 = vadd.f32 %v9791_v11, %v7834_v43  ;;  %v7845_v48 = vadd.f32 %v9576_v37, %v8479_v50 }
 0xf71   : > { %v7836_v29 = vpop.f32.mrf.mxu1 }
 0xf72   : > { %7872 = vst.msk [vmem:[%s13890_s26] sm:$0xff] %vm794_vm1, %v7864_v23  ;;  %v7867_v38 = vadd.f32 %v9792_v55, %v7845_v48  ;;  %v7837_v61 = vadd.f32 %v8479_v50, %v7836_v29 }
 0xf74   : > { %7875 = vst.msk [vmem:[%s13890_s26 + $0x18] sm:$0xff] %vm794_vm1, %v7867_v38  ;;  %v7865_v51 = vadd.f32 %v9793_v3, %v7837_v61 }
 0xf76   : > { %7873 = vst.msk [vmem:[%s13890_s26 + $0x8] sm:$0xff] %vm794_vm1, %v7865_v51 }
 0xf8c   : > { %v9579_v14 = vpop.f32.mrf.mxu1 }
 0xf8d   : > { %v7858_v20 = vadd.f32 %v9579_v14, %v8479_v50 }
 0xf8e   : > { %v7849_v46 = vpop.f32.mrf.mxu1 }
 0xf8f   : > { %v7870_v49 = vadd.f32 %v9794_v6, %v7858_v20  ;;  %v7850_v52 = vadd.f32 %v8479_v50, %v7849_v46 }
 0xf90   : > { %v9580_v30 = vpop.f32.mrf.mxu1 }
 0xf91   : > { %7878 = vst.msk [vmem:[%s13890_s26 + $0x30] sm:$0xff] %vm794_vm1, %v7870_v49  ;;  %v7868_v35 = vadd.f32 %v9795_v27, %v7850_v52  ;;  %v7861_v19 = vadd.f32 %v9580_v30, %v8479_v50 }
 0xf92   : > { %v7852_v41 = vpop.f32.mrf.mxu1 }
 0xf93   : > { %7876 = vst.msk [vmem:[%s13890_s26 + $0x20] sm:$0xff] %vm794_vm1, %v7868_v35  ;;  %v7871_v9 = vadd.f32 %v9796_v5, %v7861_v19  ;;  %v7853_v62 = vadd.f32 %v8479_v50, %v7852_v41 }
 0xf95   : > { %7879 = vst.msk [vmem:[%s13890_s26 + $0x38] sm:$0xff] %vm794_vm1, %v7871_v9  ;;  %v7869_v56 = vadd.f32 %v9797_v63, %v7853_v62 }
 0xf97   : > { %7877 = vst.msk [vmem:[%s13890_s26 + $0x28] sm:$0xff] %vm794_vm1, %v7869_v56 }
 0xf98 PF: > { %s30_s20 = sadd.s32 1, %s9820_s20   ;;  %s14268_s0 = smov %s9816_s30 }
 0xf99   : > { %p27_p5 = scmp.ge.s32.totalorder %s30_s20, 4   ;;  %s14269_s30 = smov %s14271_s21 }
 0xf9b   :  { %29 = sbr.rel (!%p27_p5) target bundleno = 5 (0x5), region = 143 }

</bundles_post_ra>
